<compile_context>
chip_gen: v6e
topology: v6e:2x2x1
jax: 0.10.0
libtpu: 0.0.40
codegen_flags: <defaults>
</compile_context>

<pallas_src>
import functools

import numpy as np
import jax
import jax.numpy as jnp
from jax.experimental import pallas as pl
from jax.experimental.pallas import tpu as pltpu


_VMEM_LIMIT = 32 * 1024 * 1024


def _round_up(x, m):
    return (x + m - 1) // m * m


def _cdiv(a, b):
    return (a + b - 1) // b


@functools.lru_cache(maxsize=None)
def _multi_tc():
    """Best-effort detection of a multi-TensorCore chip (v7x).  On single-TC
    v5e/v6e a forced 2-way grid split is pure per-step overhead."""
    try:
        d = jax.devices()[0]
        if int(getattr(d, "num_cores", 1) or 1) > 1:
            return True
        kind = (getattr(d, "device_kind", "") or "").lower()
        return "v7" in kind
    except Exception:
        return False


# --------------------------- fused matmul + bias + ReLU (conv1) ---------------

def _matmul_bias_relu_kernel(a_ref, w_ref, b_ref, o_ref):
    # One (tm, tn) output tile, full K resident in VMEM: o = relu(a @ w + b).
    acc = jnp.dot(a_ref[...], w_ref[...], preferred_element_type=jnp.float32)
    o_ref[...] = jnp.maximum(acc + b_ref[...], 0.0).astype(o_ref.dtype)


def _pick_tiles(M, N):
    """N is always lane-dense (multiple of 128) after weight repacking.  M is
    tiled to <=512 rows; a 2-way split of an otherwise single-block grid is
    only forced on multi-TensorCore chips (v7x)."""
    tn = 256 if N % 256 == 0 else 128
    nbn = N // tn
    nbm = max(1, _cdiv(M, 512))
    if _multi_tc() and nbm * nbn < 2 and M >= 32:
        nbm = 2
    if nbm == 1:
        tm = M                               # full-dim block, no M padding
    else:
        tm = _round_up(_cdiv(M, nbm), 16)    # bf16 sublane tile (16, 128)
        nbm = _cdiv(M, tm)                   # last block may be ragged (masked)
    return tm, nbm, tn, nbn


def matmul_bias_relu(a, w, b_row):
    """relu(a @ w + b).  a:(M,K) bf16, w:(K,N) bf16, b:(1,N) f32.
    No M/K padding copies: the ragged edge M block is masked by Pallas and K is
    a full-dim block (so no garbage can enter the contraction)."""
    M, K = a.shape
    _, N = w.shape
    tm, nbm, tn, nbn = _pick_tiles(M, N)
    return pl.pallas_call(
        _matmul_bias_relu_kernel,
        out_shape=jax.ShapeDtypeStruct((M, N), jnp.bfloat16),
        grid=(nbm, nbn),
        in_specs=[
            pl.BlockSpec((tm, K), lambda i, j: (i, 0)),
            pl.BlockSpec((K, tn), lambda i, j: (0, j)),
            pl.BlockSpec((1, tn), lambda i, j: (0, j)),
        ],
        out_specs=pl.BlockSpec((tm, tn), lambda i, j: (i, j)),
        compiler_params=pltpu.CompilerParams(
            dimension_semantics=("parallel", "parallel"),
            vmem_limit_bytes=_VMEM_LIMIT),
    )(a, w, b_row)


# --------------------------- implicit-GEMM conv (stride 1) --------------------

def _conv_s1_kernel(x_ref, w_ref, b_ref, o_ref, *, k, ho, wo, off):
    """Stride-1 conv + bias + ReLU for one batch element, taps gathered
    in-kernel (no im2col HBM materialization).

    x_ref: (1, Hp, Wp, Cin)  bf16 input with its zero padding halo included
    w_ref: (k*k*Cin, N)      bf16 weights, K ordered (kh, kw, Cin)
    b_ref: (1, N)            f32 bias
    o_ref: (1, Hop, Wop, N)  bf16; the valid (ho, wo) block is written at
                             offset (off, off); the rest of the block is
                             zero-filled so it doubles as the next conv's
                             padding halo / the pool's even-size spatial pad.
    """
    cin = x_ref.shape[3]
    n = o_ref.shape[3]
    bias = b_ref[...]                                     # (1, N) f32
    o_ref[...] = jnp.zeros(o_ref.shape, o_ref.dtype)      # halo / pad = 0

    def row_body(r, carry):
        acc = jnp.zeros((wo, n), jnp.float32)
        for i in range(k):                                # k*k taps, unrolled
            for j in range(k):
                tap = x_ref[0, r + i, j:j + wo, :]        # (wo, Cin)
                wsl = w_ref[(i * k + j) * cin:(i * k + j + 1) * cin, :]
                acc = acc + jnp.dot(tap, wsl,
                                    preferred_element_type=jnp.float32)
        o_ref[0, off + r, pl.ds(off, wo), :] = (
            jnp.maximum(acc + bias, 0.0).astype(o_ref.dtype))
        return carry

    jax.lax.fori_loop(0, ho, row_body, 0)


def conv2d_s1_relu(x, w_mat, b_row, *, k, out_hw, off):
    """x: (B, Hp, Wp, Cin) bf16 with the conv's zero padding already included.
    Returns (B, out_hw[0], out_hw[1], N) bf16; valid (Hp-k+1, Wp-k+1) block at
    (off, off), zeros elsewhere (next layer's halo / pool's even-size pad)."""
    B, Hp, Wp, Cin = x.shape
    ho, wo = Hp - k + 1, Wp - k + 1
    Hop, Wop = out_hw
    N = w_mat.shape[1]
    return pl.pallas_call(
        functools.partial(_conv_s1_kernel, k=k, ho=ho, wo=wo, off=off),
        out_shape=jax.ShapeDtypeStruct((B, Hop, Wop, N), jnp.bfloat16),
        grid=(B,),
        in_specs=[
            pl.BlockSpec((1, Hp, Wp, Cin), lambda b: (b, 0, 0, 0)),
            pl.BlockSpec((k * k * Cin, N), lambda b: (0, 0)),
            pl.BlockSpec((1, N), lambda b: (0, 0)),
        ],
        out_specs=pl.BlockSpec((1, Hop, Wop, N), lambda b: (b, 0, 0, 0)),
        compiler_params=pltpu.CompilerParams(
            dimension_semantics=("parallel",),
            vmem_limit_bytes=_VMEM_LIMIT),
    )(x, w_mat, b_row)


# --------------------------- max-pool 3x3 / stride 2 --------------------------

def _maxpool_kernel(x_ref, o_ref, *, ho, wo, c, halo):
    # x_ref block: (1, ho+1, 2, wo+1, 2c) pair-folded, even-size-padded input.
    # The padded row/col is provably never read by any of the 9 taps.
    # o_ref block: (1, ho+2*halo, wo+2*halo, c); pooled values land at
    # (halo, halo) and the halo is written as zeros (next conv's padding).
    x = x_ref[0]
    # Column taps (j = 0, 1, 2) via the folded W/channel axis, then column max.
    cm = jnp.maximum(jnp.maximum(x[:, :, :wo, :c], x[:, :, :wo, c:]),
                     x[:, :, 1:, :c])                     # (ho+1, 2, wo, c)
    # Row taps (i = 0, 1, 2) via the folded H axis, then row max.
    pooled = jnp.maximum(jnp.maximum(cm[:ho, 0], cm[:ho, 1]), cm[1:, 0])
    if halo:
        o_ref[...] = jnp.zeros(o_ref.shape, o_ref.dtype)
        o_ref[0, halo:halo + ho, halo:halo + wo, :] = pooled
    else:
        o_ref[0] = pooled


def maxpool_3x3_s2(x_even, out_halo):
    """MaxPool2d(3, stride=2) on an NHWC input whose spatial dims have been
    padded to the even sizes 2*(Ho+1).  The 9 taps come from a pair-folded
    metadata-only view (no 9x HBM expansion, channels are multiples of 128 so
    the half-lane splits are clean vreg boundaries).  The output carries a
    zero halo of `out_halo` so the following conv needs no separate jnp.pad."""
    B, He, We, C = x_even.shape
    ho, wo = He // 2 - 1, We // 2 - 1
    xf = x_even.reshape(B, He // 2, 2, We // 2, 2 * C)    # metadata-only fold
    Hop, Wop = ho + 2 * out_halo, wo + 2 * out_halo
    # TODO(synk): grid additionally over output-row tiles for deeper
    # pipelining when batch <= 2 at large spatial sizes.
    return pl.pallas_call(
        functools.partial(_maxpool_kernel, ho=ho, wo=wo, c=C, halo=out_halo),
        out_shape=jax.ShapeDtypeStruct((B, Hop, Wop, C), x_even.dtype),
        grid=(B,),
        in_specs=[pl.BlockSpec((1, He // 2, 2, We // 2, 2 * C),
                               lambda b: (b, 0, 0, 0, 0))],
        out_specs=pl.BlockSpec((1, Hop, Wop, C), lambda b: (b, 0, 0, 0)),
        compiler_params=pltpu.CompilerParams(
            dimension_semantics=("parallel",),
            vmem_limit_bytes=_VMEM_LIMIT),
    )(xf)


# --------------------------- conv1 glue (im2col, plain JAX) -------------------

def _im2col(xp, k, stride):
    """xp: spatially pre-padded (B, Hp, Wp, C).  Returns (B*Ho*Wo, k*k*C)
    patches with K ordered (kh, kw, C) — matching the repacked weights, so no
    post-hoc transpose of the large patch matrix is needed (all reshapes after
    the stack are metadata-only)."""
    B, Hp, Wp, C = xp.shape
    ho = (Hp - k) // stride + 1
    wo = (Wp - k) // stride + 1
    taps = [xp[:, i:i + stride * (ho - 1) + 1:stride,
               j:j + stride * (wo - 1) + 1:stride, :]
            for i in range(k) for j in range(k)]
    cols = jnp.stack(taps, axis=3)                        # (B, Ho, Wo, k*k, C)
    return cols.reshape(B * ho * wo, k * k * C), ho, wo


# --------------------------- weight repack (one-time) -------------------------

# Lane-dense channel padding: conv1's 64 and conv2's 192 output channels are
# zero-padded to 128 / 256 at repack time; the consumer conv expects the wider
# input with zero weight rows, so results are bit-identical on the real
# channels while every activation / store stays a multiple of 128 lanes.
_CIN_PAD = (3, 128, 256, 384, 256)
_COUT_PAD = (128, 256, 384, 256, 256)


def _repack(w, b, cin_pad, cout_pad):
    c_out, c_in, kh, kw = w.shape
    wt = jnp.transpose(w, (0, 2, 3, 1))                   # (Cout, kh, kw, Cin)
    wt = jnp.pad(wt, ((0, cout_pad - c_out), (0, 0), (0, 0),
                      (0, cin_pad - c_in)))
    w_mat = wt.reshape(cout_pad, kh * kw * cin_pad).T.astype(jnp.bfloat16)
    b_row = jnp.pad(b.astype(jnp.float32),
                    (0, cout_pad - c_out)).reshape(1, cout_pad)
    return w_mat, b_row


def prepare_params(params):
    """One-time weight repack (outside the per-forward path): OIHW f32 ->
    (kh*kw*Cin_pad, Cout_pad) bf16 matmul operand in (kh, kw, C) K-order, plus
    a (1, Cout_pad) f32 bias row."""
    return [_repack(w, b, ci, co)
            for (w, b), ci, co in zip(params, _CIN_PAD, _COUT_PAD)]


# --------------------------- forward ------------------------------------------

def _pool_geom(h):
    ho = (h - 3) // 2 + 1
    return ho, 2 * (ho + 1) - h            # (pool output size, even-size pad)


def features_forward(x_nchw, prepped):
    # PyTorch-facing NCHW f32 in/out; NHWC bf16 internally (f32 accumulation).
    x = jnp.transpose(x_nchw, (0, 2, 3, 1)).astype(jnp.bfloat16)
    B = x.shape[0]

    # conv1 (11x11 / s4 / p2): with only 3 input channels an implicit GEMM
    # would run 121 K=3 matmuls, so this first conv stays on a (cheap, 3-wide)
    # im2col feeding the fused GEMM + bias + ReLU kernel.
    w_mat, b_row = prepped[0]
    xp = jnp.pad(x, ((0, 0), (2, 2), (2, 2), (0, 0)))
    a, h1, w1 = _im2col(xp, 11, 4)
    y = matmul_bias_relu(a, w_mat, b_row).reshape(B, h1, w1, w_mat.shape[1])

    # pool1: even-size spatial pad (padded cells are never read by the taps);
    # the pool emits conv2's zero halo (pad=2) directly.
    # TODO(synk): fold this pad into the conv1 GEMM epilogue as well.
    p1h, padh = _pool_geom(h1)
    p1w, padw = _pool_geom(w1)
    y = jnp.pad(y, ((0, 0), (0, padh), (0, padw), (0, 0)))
    y = maxpool_3x3_s2(y, out_halo=2)

    # conv2 (5x5 / p2): implicit GEMM; output comes out already even-size
    # padded (zeros) for pool2 -> zero XLA glue between conv2 and pool2.
    w_mat, b_row = prepped[1]
    p2h, pad2h = _pool_geom(p1h)
    p2w, pad2w = _pool_geom(p1w)
    y = conv2d_s1_relu(y, w_mat, b_row, k=5,
                       out_hw=(p1h + pad2h, p1w + pad2w), off=0)

    # pool2: emits conv3's zero halo (pad=1).
    y = maxpool_3x3_s2(y, out_halo=1)

    # conv3 / conv4 emit the next conv's zero halo; conv5 emits the final map.
    w_mat, b_row = prepped[2]
    y = conv2d_s1_relu(y, w_mat, b_row, k=3, out_hw=(p2h + 2, p2w + 2), off=1)
    w_mat, b_row = prepped[3]
    y = conv2d_s1_relu(y, w_mat, b_row, k=3, out_hw=(p2h + 2, p2w + 2), off=1)
    w_mat, b_row = prepped[4]
    y = conv2d_s1_relu(y, w_mat, b_row, k=3, out_hw=(p2h, p2w), off=0)

    return jnp.transpose(y, (0, 3, 1, 2)).astype(jnp.float32)


# --------------------------- pure-JAX reference -------------------------------

def ref_forward(x_nchw, params):
    def conv(x, w, b, stride, pad):
        y = jax.lax.conv_general_dilated(
            x, w, window_strides=(stride, stride),
            padding=((pad, pad), (pad, pad)),
            dimension_numbers=("NCHW", "OIHW", "NCHW"),
            precision=jax.lax.Precision.HIGHEST)
        return jax.nn.relu(y + b[None, :, None, None])

    def pool(x):
        return jax.lax.reduce_window(x, -jnp.inf, jax.lax.max,
                                     (1, 1, 3, 3), (1, 1, 2, 2), "VALID")

    (w1, b1), (w2, b2), (w3, b3), (w4, b4), (w5, b5) = params
    x = conv(x_nchw, w1, b1, 4, 2)
    x = pool(x)
    x = conv(x, w2, b2, 1, 2)
    x = pool(x)
    x = conv(x, w3, b3, 1, 1)
    x = conv(x, w4, b4, 1, 1)
    x = conv(x, w5, b5, 1, 1)
    return x


# --------------------------- main ---------------------------------------------

if __name__ == "__main__":
    key = jax.random.PRNGKey(0)
    keys = jax.random.split(key, 11)

    B, H, W = 2, 63, 63
    x = jax.random.normal(keys[0], (B, 3, H, W), jnp.float32)

    # (C_out, C_in, k) for the 5 convs of the AlexNet `features` stack.
    cfgs = [(64, 3, 11), (192, 64, 5), (384, 192, 3), (256, 384, 3), (256, 256, 3)]
    params = []
    for idx, (co, ci, k) in enumerate(cfgs):
        wk, bk = keys[1 + 2 * idx], keys[2 + 2 * idx]
        fan_in = ci * k * k
        wgt = jax.random.normal(wk, (co, ci, k, k), jnp.float32) / np.sqrt(fan_in)
        bias = 0.1 * jax.random.normal(bk, (co,), jnp.float32)
        params.append((wgt, bias))

    prepped = prepare_params(params)          # hoisted weight repack (once)
    fwd = jax.jit(features_forward)
    out = jax.block_until_ready(fwd(x, prepped))

    ref = jax.block_until_ready(ref_forward(x, params))
    assert out.shape == ref.shape == (B, 256, 3, 3), (out.shape, ref.shape)
    # bf16 inputs / f32 accumulation vs an f32 HIGHEST-precision reference.
    np.testing.assert_allclose(np.asarray(out), np.asarray(ref),
                               rtol=3e-2, atol=3e-2)
    print("KERNEL_OK")
</pallas_src>

<mosaic_0001>
module attributes {stable_mosaic.version = 11 : i64} {
  func.func @_matmul_bias_relu_kernel(%arg0: i32, %arg1: i32, %arg2: memref<450x363xbf16, #tpu.memory_space<vmem>>, %arg3: memref<363x128xbf16, #tpu.memory_space<vmem>>, %arg4: memref<1x128xf32, #tpu.memory_space<vmem>>, %arg5: memref<450x128xbf16, #tpu.memory_space<vmem>>) attributes {dimension_semantics = [#tpu.dimension_semantics<parallel>, #tpu.dimension_semantics<parallel>], iteration_bounds = array<i64: 1, 1>, scalar_prefetch = 0 : i64, scratch_operands = 0 : i64, tpu.core_type = #tpu.core_type<tc>, window_params = [{transform_indices = @transform_0, window_bounds = array<i64: 450, 363>}, {transform_indices = @transform_1, window_bounds = array<i64: 363, 128>}, {transform_indices = @transform_2, window_bounds = array<i64: 1, 128>}, {transform_indices = @transform_3, window_bounds = array<i64: 450, 128>}]} {
    %c0 = arith.constant 0 : index
    %c0_0 = arith.constant 0 : index
    %0 = vector.load %arg2[%c0, %c0_0] : memref<450x363xbf16, #tpu.memory_space<vmem>>, vector<450x363xbf16>
    %c0_1 = arith.constant 0 : index
    %c0_2 = arith.constant 0 : index
    %1 = vector.load %arg3[%c0_1, %c0_2] : memref<363x128xbf16, #tpu.memory_space<vmem>>, vector<363x128xbf16>
    %cst = arith.constant dense<0.000000e+00> : vector<450x128xf32>
    %2 = tpu.matmul %0, %1, %cst {dimension_numbers = #tpu.dot_dimension_numbers<[1], [0], [0], [1], [0, 0, 1, 1], [], []>} : vector<450x363xbf16>, vector<363x128xbf16>, vector<450x128xf32> -> vector<450x128xf32>
    %c0_3 = arith.constant 0 : index
    %c0_4 = arith.constant 0 : index
    %3 = vector.load %arg4[%c0_3, %c0_4] : memref<1x128xf32, #tpu.memory_space<vmem>>, vector<1x128xf32>
    %4 = vector.broadcast %3 : vector<1x128xf32> to vector<450x128xf32>
    %5 = arith.addf %2, %4 : vector<450x128xf32>
    %cst_5 = arith.constant 0.000000e+00 : f32
    %6 = vector.broadcast %cst_5 : f32 to vector<450x128xf32>
    %7 = arith.maximumf %5, %6 : vector<450x128xf32>
    %8 = arith.truncf %7 : vector<450x128xf32> to vector<450x128xbf16>
    %c0_6 = arith.constant 0 : index
    %c0_7 = arith.constant 0 : index
    %9 = vector.load %arg5[%c0_6, %c0_7] : memref<450x128xbf16, #tpu.memory_space<vmem>>, vector<450x128xbf16>
    tpu.vector_store %arg5[%c0_6, %c0_7], %8 {strides = array<i32>} : memref<450x128xbf16, #tpu.memory_space<vmem>>, vector<450x128xbf16>,
    return
  }
  func.func @transform_0(%arg0: i32, %arg1: i32) -> (i32, i32) {
    %c0_i32 = arith.constant 0 : i32
    %c0_i32_0 = arith.constant 0 : i32
    return %arg0, %c0_i32 : i32, i32
  }
  func.func @transform_1(%arg0: i32, %arg1: i32) -> (i32, i32) {
    %c0_i32 = arith.constant 0 : i32
    %c0_i32_0 = arith.constant 0 : i32
    return %c0_i32, %arg1 : i32, i32
  }
  func.func @transform_2(%arg0: i32, %arg1: i32) -> (i32, i32) {
    %c0_i32 = arith.constant 0 : i32
    %c0_i32_0 = arith.constant 0 : i32
    return %c0_i32, %arg1 : i32, i32
  }
  func.func @transform_3(%arg0: i32, %arg1: i32) -> (i32, i32) {
    %c0_i32 = arith.constant 0 : i32
    return %arg0, %arg1 : i32, i32
  }
}

module attributes {stable_mosaic.version = 11 : i64} {
  func.func @_maxpool_kernel(%arg0: i32, %arg1: memref<1x8x2x8x256xbf16, #tpu.memory_space<vmem>>, %arg2: memref<1x11x11x128xbf16, #tpu.memory_space<vmem>>) attributes {dimension_semantics = [#tpu.dimension_semantics<parallel>], iteration_bounds = array<i64: 2>, scalar_prefetch = 0 : i64, scratch_operands = 0 : i64, tpu.core_type = #tpu.core_type<tc>, window_params = [{transform_indices = @transform_0, window_bounds = array<i64: 1, 8, 2, 8, 256>}, {transform_indices = @transform_1, window_bounds = array<i64: 1, 11, 11, 128>}]} {
    %c0 = arith.constant 0 : index
    %c0_0 = arith.constant 0 : index
    %c0_1 = arith.constant 0 : index
    %c0_2 = arith.constant 0 : index
    %c0_3 = arith.constant 0 : index
    %0 = vector.load %arg1[%c0, %c0_0, %c0_1, %c0_2, %c0_3] : memref<1x8x2x8x256xbf16, #tpu.memory_space<vmem>>, vector<1x8x2x8x256xbf16>
    %1 = vector.shape_cast %0 : vector<1x8x2x8x256xbf16> to vector<8x2x8x256xbf16>
    %2 = vector.extract_strided_slice %1 {offsets = [0, 0, 0, 0], sizes = [8, 2, 7, 128], strides = [1, 1, 1, 1]} : vector<8x2x8x256xbf16> to vector<8x2x7x128xbf16>
    %3 = vector.extract_strided_slice %1 {offsets = [0, 0, 0, 128], sizes = [8, 2, 7, 128], strides = [1, 1, 1, 1]} : vector<8x2x8x256xbf16> to vector<8x2x7x128xbf16>
    %4 = arith.maximumf %2, %3 : vector<8x2x7x128xbf16>
    %5 = vector.extract_strided_slice %1 {offsets = [0, 0, 1, 0], sizes = [8, 2, 7, 128], strides = [1, 1, 1, 1]} : vector<8x2x8x256xbf16> to vector<8x2x7x128xbf16>
    %6 = arith.maximumf %4, %5 : vector<8x2x7x128xbf16>
    %7 = vector.extract_strided_slice %6 {offsets = [0, 0, 0, 0], sizes = [7, 1, 7, 128], strides = [1, 1, 1, 1]} : vector<8x2x7x128xbf16> to vector<7x1x7x128xbf16>
    %8 = vector.shape_cast %7 : vector<7x1x7x128xbf16> to vector<7x7x128xbf16>
    %9 = vector.extract_strided_slice %6 {offsets = [0, 1, 0, 0], sizes = [7, 1, 7, 128], strides = [1, 1, 1, 1]} : vector<8x2x7x128xbf16> to vector<7x1x7x128xbf16>
    %10 = vector.shape_cast %9 : vector<7x1x7x128xbf16> to vector<7x7x128xbf16>
    %11 = arith.maximumf %8, %10 : vector<7x7x128xbf16>
    %12 = vector.extract_strided_slice %6 {offsets = [1, 0, 0, 0], sizes = [7, 1, 7, 128], strides = [1, 1, 1, 1]} : vector<8x2x7x128xbf16> to vector<7x1x7x128xbf16>
    %13 = vector.shape_cast %12 : vector<7x1x7x128xbf16> to vector<7x7x128xbf16>
    %14 = arith.maximumf %11, %13 : vector<7x7x128xbf16>
    %cst = arith.constant 0.000000e+00 : bf16
    %15 = vector.broadcast %cst : bf16 to vector<1x11x11x128xbf16>
    %c0_4 = arith.constant 0 : index
    %c0_5 = arith.constant 0 : index
    %c0_6 = arith.constant 0 : index
    %c0_7 = arith.constant 0 : index
    %16 = vector.load %arg2[%c0_4, %c0_5, %c0_6, %c0_7] : memref<1x11x11x128xbf16, #tpu.memory_space<vmem>>, vector<1x11x11x128xbf16>
    tpu.vector_store %arg2[%c0_4, %c0_5, %c0_6, %c0_7], %15 {strides = array<i32>} : memref<1x11x11x128xbf16, #tpu.memory_space<vmem>>, vector<1x11x11x128xbf16>,
    %c0_8 = arith.constant 0 : index
    %c2 = arith.constant 2 : index
    %c2_9 = arith.constant 2 : index
    %c0_10 = arith.constant 0 : index
    %17 = vector.load %arg2[%c0_8, %c2, %c2_9, %c0_10] : memref<1x11x11x128xbf16, #tpu.memory_space<vmem>>, vector<1x7x7x128xbf16>
    %18 = vector.shape_cast %17 : vector<1x7x7x128xbf16> to vector<7x7x128xbf16>
    %19 = vector.shape_cast %14 : vector<7x7x128xbf16> to vector<1x7x7x128xbf16>
    tpu.vector_store %arg2[%c0_8, %c2, %c2_9, %c0_10], %19 {strides = array<i32>} : memref<1x11x11x128xbf16, #tpu.memory_space<vmem>>, vector<1x7x7x128xbf16>,
    return
  }
  func.func @transform_0(%arg0: i32) -> (i32, i32, i32, i32, i32) {
    %c0_i32 = arith.constant 0 : i32
    %c0_i32_0 = arith.constant 0 : i32
    %c0_i32_1 = arith.constant 0 : i32
    %c0_i32_2 = arith.constant 0 : i32
    %c0_i32_3 = arith.constant 0 : i32
    return %arg0, %c0_i32, %c0_i32_0, %c0_i32_1, %c0_i32_2 : i32, i32, i32, i32, i32
  }
  func.func @transform_1(%arg0: i32) -> (i32, i32, i32, i32) {
    %c0_i32 = arith.constant 0 : i32
    %c0_i32_0 = arith.constant 0 : i32
    %c0_i32_1 = arith.constant 0 : i32
    %c0_i32_2 = arith.constant 0 : i32
    return %arg0, %c0_i32, %c0_i32_0, %c0_i32_1 : i32, i32, i32, i32
  }
}

module attributes {stable_mosaic.version = 11 : i64} {
  func.func @_conv_s1_kernel(%arg0: i32, %arg1: memref<1x11x11x128xbf16, #tpu.memory_space<vmem>>, %arg2: memref<3200x256xbf16, #tpu.memory_space<vmem>>, %arg3: memref<1x256xf32, #tpu.memory_space<vmem>>, %arg4: memref<1x8x8x256xbf16, #tpu.memory_space<vmem>>) attributes {dimension_semantics = [#tpu.dimension_semantics<parallel>], iteration_bounds = array<i64: 2>, scalar_prefetch = 0 : i64, scratch_operands = 0 : i64, tpu.core_type = #tpu.core_type<tc>, window_params = [{transform_indices = @transform_0, window_bounds = array<i64: 1, 11, 11, 128>}, {pipeline_mode = #tpu.pipeline_mode<synchronous>, transform_indices = @transform_1, window_bounds = array<i64: 3200, 256>}, {pipeline_mode = #tpu.pipeline_mode<synchronous>, transform_indices = @transform_2, window_bounds = array<i64: 1, 256>}, {transform_indices = @transform_3, window_bounds = array<i64: 1, 8, 8, 256>}]} {
    %c0 = arith.constant 0 : index
    %c0_0 = arith.constant 0 : index
    %0 = vector.load %arg3[%c0, %c0_0] : memref<1x256xf32, #tpu.memory_space<vmem>>, vector<1x256xf32>
    %cst = arith.constant 0.000000e+00 : bf16
    %1 = vector.broadcast %cst : bf16 to vector<1x8x8x256xbf16>
    %c0_1 = arith.constant 0 : index
    %c0_2 = arith.constant 0 : index
    %c0_3 = arith.constant 0 : index
    %c0_4 = arith.constant 0 : index
    %2 = vector.load %arg4[%c0_1, %c0_2, %c0_3, %c0_4] : memref<1x8x8x256xbf16, #tpu.memory_space<vmem>>, vector<1x8x8x256xbf16>
    tpu.vector_store %arg4[%c0_1, %c0_2, %c0_3, %c0_4], %1 {strides = array<i32>} : memref<1x8x8x256xbf16, #tpu.memory_space<vmem>>, vector<1x8x8x256xbf16>,
    %c0_i32 = arith.constant 0 : i32
    %c7_i32 = arith.constant 7 : i32
    %3 = arith.addi %c0_i32, %c7_i32 : i32
    %c1_i32 = arith.constant 1 : i32
    scf.for %arg5 = %c0_i32 to %3 step %c1_i32  : i32 {
      %cst_6 = arith.constant 0.000000e+00 : f32
      %4 = vector.broadcast %cst_6 : f32 to vector<7x256xf32>
      %c0_i32_7 = arith.constant 0 : i32
      %5 = arith.addi %arg5, %c0_i32_7 : i32
      %c0_8 = arith.constant 0 : index
      %6 = arith.index_cast %5 : i32 to index
      %c0_9 = arith.constant 0 : index
      %c0_10 = arith.constant 0 : index
      %7 = vector.load %arg1[%c0_8, %6, %c0_9, %c0_10] : memref<1x11x11x128xbf16, #tpu.memory_space<vmem>>, vector<1x1x7x128xbf16>
      %8 = vector.shape_cast %7 : vector<1x1x7x128xbf16> to vector<7x128xbf16>
      %c0_11 = arith.constant 0 : index
      %c0_12 = arith.constant 0 : index
      %9 = vector.load %arg2[%c0_11, %c0_12] : memref<3200x256xbf16, #tpu.memory_space<vmem>>, vector<128x256xbf16>
      %cst_13 = arith.constant dense<0.000000e+00> : vector<7x256xf32>
      %10 = tpu.matmul %8, %9, %cst_13 {dimension_numbers = #tpu.dot_dimension_numbers<[1], [0], [0], [1], [0, 0, 1, 1], [], []>} : vector<7x128xbf16>, vector<128x256xbf16>, vector<7x256xf32> -> vector<7x256xf32>
      %11 = arith.addf %4, %10 : vector<7x256xf32>
      %c0_i32_14 = arith.constant 0 : i32
      %12 = arith.addi %arg5, %c0_i32_14 : i32
      %c0_15 = arith.constant 0 : index
      %13 = arith.index_cast %12 : i32 to index
      %c1 = arith.constant 1 : index
      %c0_16 = arith.constant 0 : index
      %14 = vector.load %arg1[%c0_15, %13, %c1, %c0_16] : memref<1x11x11x128xbf16, #tpu.memory_space<vmem>>, vector<1x1x7x128xbf16>
      %15 = vector.shape_cast %14 : vector<1x1x7x128xbf16> to vector<7x128xbf16>
      %c128 = arith.constant 128 : index
      %c0_17 = arith.constant 0 : index
      %16 = vector.load %arg2[%c128, %c0_17] : memref<3200x256xbf16, #tpu.memory_space<vmem>>, vector<128x256xbf16>
      %cst_18 = arith.constant dense<0.000000e+00> : vector<7x256xf32>
      %17 = tpu.matmul %15, %16, %cst_18 {dimension_numbers = #tpu.dot_dimension_numbers<[1], [0], [0], [1], [0, 0, 1, 1], [], []>} : vector<7x128xbf16>, vector<128x256xbf16>, vector<7x256xf32> -> vector<7x256xf32>
      %18 = arith.addf %11, %17 : vector<7x256xf32>
      %c0_i32_19 = arith.constant 0 : i32
      %19 = arith.addi %arg5, %c0_i32_19 : i32
      %c0_20 = arith.constant 0 : index
      %20 = arith.index_cast %19 : i32 to index
      %c2 = arith.constant 2 : index
      %c0_21 = arith.constant 0 : index
      %21 = vector.load %arg1[%c0_20, %20, %c2, %c0_21] : memref<1x11x11x128xbf16, #tpu.memory_space<vmem>>, vector<1x1x7x128xbf16>
      %22 = vector.shape_cast %21 : vector<1x1x7x128xbf16> to vector<7x128xbf16>
      %c256 = arith.constant 256 : index
      %c0_22 = arith.constant 0 : index
      %23 = vector.load %arg2[%c256, %c0_22] : memref<3200x256xbf16, #tpu.memory_space<vmem>>, vector<128x256xbf16>
      %cst_23 = arith.constant dense<0.000000e+00> : vector<7x256xf32>
      %24 = tpu.matmul %22, %23, %cst_23 {dimension_numbers = #tpu.dot_dimension_numbers<[1], [0], [0], [1], [0, 0, 1, 1], [], []>} : vector<7x128xbf16>, vector<128x256xbf16>, vector<7x256xf32> -> vector<7x256xf32>
      %25 = arith.addf %18, %24 : vector<7x256xf32>
      %c0_i32_24 = arith.constant 0 : i32
      %26 = arith.addi %arg5, %c0_i32_24 : i32
      %c0_25 = arith.constant 0 : index
      %27 = arith.index_cast %26 : i32 to index
      %c3 = arith.constant 3 : index
      %c0_26 = arith.constant 0 : index
      %28 = vector.load %arg1[%c0_25, %27, %c3, %c0_26] : memref<1x11x11x128xbf16, #tpu.memory_space<vmem>>, vector<1x1x7x128xbf16>
      %29 = vector.shape_cast %28 : vector<1x1x7x128xbf16> to vector<7x128xbf16>
      %c384 = arith.constant 384 : index
      %c0_27 = arith.constant 0 : index
      %30 = vector.load %arg2[%c384, %c0_27] : memref<3200x256xbf16, #tpu.memory_space<vmem>>, vector<128x256xbf16>
      %cst_28 = arith.constant dense<0.000000e+00> : vector<7x256xf32>
      %31 = tpu.matmul %29, %30, %cst_28 {dimension_numbers = #tpu.dot_dimension_numbers<[1], [0], [0], [1], [0, 0, 1, 1], [], []>} : vector<7x128xbf16>, vector<128x256xbf16>, vector<7x256xf32> -> vector<7x256xf32>
      %32 = arith.addf %25, %31 : vector<7x256xf32>
      %c0_i32_29 = arith.constant 0 : i32
      %33 = arith.addi %arg5, %c0_i32_29 : i32
      %c0_30 = arith.constant 0 : index
      %34 = arith.index_cast %33 : i32 to index
      %c4 = arith.constant 4 : index
      %c0_31 = arith.constant 0 : index
      %35 = vector.load %arg1[%c0_30, %34, %c4, %c0_31] : memref<1x11x11x128xbf16, #tpu.memory_space<vmem>>, vector<1x1x7x128xbf16>
      %36 = vector.shape_cast %35 : vector<1x1x7x128xbf16> to vector<7x128xbf16>
      %c512 = arith.constant 512 : index
      %c0_32 = arith.constant 0 : index
      %37 = vector.load %arg2[%c512, %c0_32] : memref<3200x256xbf16, #tpu.memory_space<vmem>>, vector<128x256xbf16>
      %cst_33 = arith.constant dense<0.000000e+00> : vector<7x256xf32>
      %38 = tpu.matmul %36, %37, %cst_33 {dimension_numbers = #tpu.dot_dimension_numbers<[1], [0], [0], [1], [0, 0, 1, 1], [], []>} : vector<7x128xbf16>, vector<128x256xbf16>, vector<7x256xf32> -> vector<7x256xf32>
      %39 = arith.addf %32, %38 : vector<7x256xf32>
      %c1_i32_34 = arith.constant 1 : i32
      %40 = arith.addi %arg5, %c1_i32_34 : i32
      %c0_35 = arith.constant 0 : index
      %41 = arith.index_cast %40 : i32 to index
      %c0_36 = arith.constant 0 : index
      %c0_37 = arith.constant 0 : index
      %42 = vector.load %arg1[%c0_35, %41, %c0_36, %c0_37] : memref<1x11x11x128xbf16, #tpu.memory_space<vmem>>, vector<1x1x7x128xbf16>
      %43 = vector.shape_cast %42 : vector<1x1x7x128xbf16> to vector<7x128xbf16>
      %c640 = arith.constant 640 : index
      %c0_38 = arith.constant 0 : index
      %44 = vector.load %arg2[%c640, %c0_38] : memref<3200x256xbf16, #tpu.memory_space<vmem>>, vector<128x256xbf16>
      %cst_39 = arith.constant dense<0.000000e+00> : vector<7x256xf32>
      %45 = tpu.matmul %43, %44, %cst_39 {dimension_numbers = #tpu.dot_dimension_numbers<[1], [0], [0], [1], [0, 0, 1, 1], [], []>} : vector<7x128xbf16>, vector<128x256xbf16>, vector<7x256xf32> -> vector<7x256xf32>
      %46 = arith.addf %39, %45 : vector<7x256xf32>
      %c1_i32_40 = arith.constant 1 : i32
      %47 = arith.addi %arg5, %c1_i32_40 : i32
      %c0_41 = arith.constant 0 : index
      %48 = arith.index_cast %47 : i32 to index
      %c1_42 = arith.constant 1 : index
      %c0_43 = arith.constant 0 : index
      %49 = vector.load %arg1[%c0_41, %48, %c1_42, %c0_43] : memref<1x11x11x128xbf16, #tpu.memory_space<vmem>>, vector<1x1x7x128xbf16>
      %50 = vector.shape_cast %49 : vector<1x1x7x128xbf16> to vector<7x128xbf16>
      %c768 = arith.constant 768 : index
      %c0_44 = arith.constant 0 : index
      %51 = vector.load %arg2[%c768, %c0_44] : memref<3200x256xbf16, #tpu.memory_space<vmem>>, vector<128x256xbf16>
      %cst_45 = arith.constant dense<0.000000e+00> : vector<7x256xf32>
      %52 = tpu.matmul %50, %51, %cst_45 {dimension_numbers = #tpu.dot_dimension_numbers<[1], [0], [0], [1], [0, 0, 1, 1], [], []>} : vector<7x128xbf16>, vector<128x256xbf16>, vector<7x256xf32> -> vector<7x256xf32>
      %53 = arith.addf %46, %52 : vector<7x256xf32>
      %c1_i32_46 = arith.constant 1 : i32
      %54 = arith.addi %arg5, %c1_i32_46 : i32
      %c0_47 = arith.constant 0 : index
      %55 = arith.index_cast %54 : i32 to index
      %c2_48 = arith.constant 2 : index
      %c0_49 = arith.constant 0 : index
      %56 = vector.load %arg1[%c0_47, %55, %c2_48, %c0_49] : memref<1x11x11x128xbf16, #tpu.memory_space<vmem>>, vector<1x1x7x128xbf16>
      %57 = vector.shape_cast %56 : vector<1x1x7x128xbf16> to vector<7x128xbf16>
      %c896 = arith.constant 896 : index
      %c0_50 = arith.constant 0 : index
      %58 = vector.load %arg2[%c896, %c0_50] : memref<3200x256xbf16, #tpu.memory_space<vmem>>, vector<128x256xbf16>
      %cst_51 = arith.constant dense<0.000000e+00> : vector<7x256xf32>
      %59 = tpu.matmul %57, %58, %cst_51 {dimension_numbers = #tpu.dot_dimension_numbers<[1], [0], [0], [1], [0, 0, 1, 1], [], []>} : vector<7x128xbf16>, vector<128x256xbf16>, vector<7x256xf32> -> vector<7x256xf32>
      %60 = arith.addf %53, %59 : vector<7x256xf32>
      %c1_i32_52 = arith.constant 1 : i32
      %61 = arith.addi %arg5, %c1_i32_52 : i32
      %c0_53 = arith.constant 0 : index
      %62 = arith.index_cast %61 : i32 to index
      %c3_54 = arith.constant 3 : index
      %c0_55 = arith.constant 0 : index
      %63 = vector.load %arg1[%c0_53, %62, %c3_54, %c0_55] : memref<1x11x11x128xbf16, #tpu.memory_space<vmem>>, vector<1x1x7x128xbf16>
      %64 = vector.shape_cast %63 : vector<1x1x7x128xbf16> to vector<7x128xbf16>
      %c1024 = arith.constant 1024 : index
      %c0_56 = arith.constant 0 : index
      %65 = vector.load %arg2[%c1024, %c0_56] : memref<3200x256xbf16, #tpu.memory_space<vmem>>, vector<128x256xbf16>
      %cst_57 = arith.constant dense<0.000000e+00> : vector<7x256xf32>
      %66 = tpu.matmul %64, %65, %cst_57 {dimension_numbers = #tpu.dot_dimension_numbers<[1], [0], [0], [1], [0, 0, 1, 1], [], []>} : vector<7x128xbf16>, vector<128x256xbf16>, vector<7x256xf32> -> vector<7x256xf32>
      %67 = arith.addf %60, %66 : vector<7x256xf32>
      %c1_i32_58 = arith.constant 1 : i32
      %68 = arith.addi %arg5, %c1_i32_58 : i32
      %c0_59 = arith.constant 0 : index
      %69 = arith.index_cast %68 : i32 to index
      %c4_60 = arith.constant 4 : index
      %c0_61 = arith.constant 0 : index
      %70 = vector.load %arg1[%c0_59, %69, %c4_60, %c0_61] : memref<1x11x11x128xbf16, #tpu.memory_space<vmem>>, vector<1x1x7x128xbf16>
      %71 = vector.shape_cast %70 : vector<1x1x7x128xbf16> to vector<7x128xbf16>
      %c1152 = arith.constant 1152 : index
      %c0_62 = arith.constant 0 : index
      %72 = vector.load %arg2[%c1152, %c0_62] : memref<3200x256xbf16, #tpu.memory_space<vmem>>, vector<128x256xbf16>
      %cst_63 = arith.constant dense<0.000000e+00> : vector<7x256xf32>
      %73 = tpu.matmul %71, %72, %cst_63 {dimension_numbers = #tpu.dot_dimension_numbers<[1], [0], [0], [1], [0, 0, 1, 1], [], []>} : vector<7x128xbf16>, vector<128x256xbf16>, vector<7x256xf32> -> vector<7x256xf32>
      %74 = arith.addf %67, %73 : vector<7x256xf32>
      %c2_i32 = arith.constant 2 : i32
      %75 = arith.addi %arg5, %c2_i32 : i32
      %c0_64 = arith.constant 0 : index
      %76 = arith.index_cast %75 : i32 to index
      %c0_65 = arith.constant 0 : index
      %c0_66 = arith.constant 0 : index
      %77 = vector.load %arg1[%c0_64, %76, %c0_65, %c0_66] : memref<1x11x11x128xbf16, #tpu.memory_space<vmem>>, vector<1x1x7x128xbf16>
      %78 = vector.shape_cast %77 : vector<1x1x7x128xbf16> to vector<7x128xbf16>
      %c1280 = arith.constant 1280 : index
      %c0_67 = arith.constant 0 : index
      %79 = vector.load %arg2[%c1280, %c0_67] : memref<3200x256xbf16, #tpu.memory_space<vmem>>, vector<128x256xbf16>
      %cst_68 = arith.constant dense<0.000000e+00> : vector<7x256xf32>
      %80 = tpu.matmul %78, %79, %cst_68 {dimension_numbers = #tpu.dot_dimension_numbers<[1], [0], [0], [1], [0, 0, 1, 1], [], []>} : vector<7x128xbf16>, vector<128x256xbf16>, vector<7x256xf32> -> vector<7x256xf32>
      %81 = arith.addf %74, %80 : vector<7x256xf32>
      %c2_i32_69 = arith.constant 2 : i32
      %82 = arith.addi %arg5, %c2_i32_69 : i32
      %c0_70 = arith.constant 0 : index
      %83 = arith.index_cast %82 : i32 to index
      %c1_71 = arith.constant 1 : index
      %c0_72 = arith.constant 0 : index
      %84 = vector.load %arg1[%c0_70, %83, %c1_71, %c0_72] : memref<1x11x11x128xbf16, #tpu.memory_space<vmem>>, vector<1x1x7x128xbf16>
      %85 = vector.shape_cast %84 : vector<1x1x7x128xbf16> to vector<7x128xbf16>
      %c1408 = arith.constant 1408 : index
      %c0_73 = arith.constant 0 : index
      %86 = vector.load %arg2[%c1408, %c0_73] : memref<3200x256xbf16, #tpu.memory_space<vmem>>, vector<128x256xbf16>
      %cst_74 = arith.constant dense<0.000000e+00> : vector<7x256xf32>
      %87 = tpu.matmul %85, %86, %cst_74 {dimension_numbers = #tpu.dot_dimension_numbers<[1], [0], [0], [1], [0, 0, 1, 1], [], []>} : vector<7x128xbf16>, vector<128x256xbf16>, vector<7x256xf32> -> vector<7x256xf32>
      %88 = arith.addf %81, %87 : vector<7x256xf32>
      %c2_i32_75 = arith.constant 2 : i32
      %89 = arith.addi %arg5, %c2_i32_75 : i32
      %c0_76 = arith.constant 0 : index
      %90 = arith.index_cast %89 : i32 to index
      %c2_77 = arith.constant 2 : index
      %c0_78 = arith.constant 0 : index
      %91 = vector.load %arg1[%c0_76, %90, %c2_77, %c0_78] : memref<1x11x11x128xbf16, #tpu.memory_space<vmem>>, vector<1x1x7x128xbf16>
      %92 = vector.shape_cast %91 : vector<1x1x7x128xbf16> to vector<7x128xbf16>
      %c1536 = arith.constant 1536 : index
      %c0_79 = arith.constant 0 : index
      %93 = vector.load %arg2[%c1536, %c0_79] : memref<3200x256xbf16, #tpu.memory_space<vmem>>, vector<128x256xbf16>
      %cst_80 = arith.constant dense<0.000000e+00> : vector<7x256xf32>
      %94 = tpu.matmul %92, %93, %cst_80 {dimension_numbers = #tpu.dot_dimension_numbers<[1], [0], [0], [1], [0, 0, 1, 1], [], []>} : vector<7x128xbf16>, vector<128x256xbf16>, vector<7x256xf32> -> vector<7x256xf32>
      %95 = arith.addf %88, %94 : vector<7x256xf32>
      %c2_i32_81 = arith.constant 2 : i32
      %96 = arith.addi %arg5, %c2_i32_81 : i32
      %c0_82 = arith.constant 0 : index
      %97 = arith.index_cast %96 : i32 to index
      %c3_83 = arith.constant 3 : index
      %c0_84 = arith.constant 0 : index
      %98 = vector.load %arg1[%c0_82, %97, %c3_83, %c0_84] : memref<1x11x11x128xbf16, #tpu.memory_space<vmem>>, vector<1x1x7x128xbf16>
      %99 = vector.shape_cast %98 : vector<1x1x7x128xbf16> to vector<7x128xbf16>
      %c1664 = arith.constant 1664 : index
      %c0_85 = arith.constant 0 : index
      %100 = vector.load %arg2[%c1664, %c0_85] : memref<3200x256xbf16, #tpu.memory_space<vmem>>, vector<128x256xbf16>
      %cst_86 = arith.constant dense<0.000000e+00> : vector<7x256xf32>
      %101 = tpu.matmul %99, %100, %cst_86 {dimension_numbers = #tpu.dot_dimension_numbers<[1], [0], [0], [1], [0, 0, 1, 1], [], []>} : vector<7x128xbf16>, vector<128x256xbf16>, vector<7x256xf32> -> vector<7x256xf32>
      %102 = arith.addf %95, %101 : vector<7x256xf32>
      %c2_i32_87 = arith.constant 2 : i32
      %103 = arith.addi %arg5, %c2_i32_87 : i32
      %c0_88 = arith.constant 0 : index
      %104 = arith.index_cast %103 : i32 to index
      %c4_89 = arith.constant 4 : index
      %c0_90 = arith.constant 0 : index
      %105 = vector.load %arg1[%c0_88, %104, %c4_89, %c0_90] : memref<1x11x11x128xbf16, #tpu.memory_space<vmem>>, vector<1x1x7x128xbf16>
      %106 = vector.shape_cast %105 : vector<1x1x7x128xbf16> to vector<7x128xbf16>
      %c1792 = arith.constant 1792 : index
      %c0_91 = arith.constant 0 : index
      %107 = vector.load %arg2[%c1792, %c0_91] : memref<3200x256xbf16, #tpu.memory_space<vmem>>, vector<128x256xbf16>
      %cst_92 = arith.constant dense<0.000000e+00> : vector<7x256xf32>
      %108 = tpu.matmul %106, %107, %cst_92 {dimension_numbers = #tpu.dot_dimension_numbers<[1], [0], [0], [1], [0, 0, 1, 1], [], []>} : vector<7x128xbf16>, vector<128x256xbf16>, vector<7x256xf32> -> vector<7x256xf32>
      %109 = arith.addf %102, %108 : vector<7x256xf32>
      %c3_i32 = arith.constant 3 : i32
      %110 = arith.addi %arg5, %c3_i32 : i32
      %c0_93 = arith.constant 0 : index
      %111 = arith.index_cast %110 : i32 to index
      %c0_94 = arith.constant 0 : index
      %c0_95 = arith.constant 0 : index
      %112 = vector.load %arg1[%c0_93, %111, %c0_94, %c0_95] : memref<1x11x11x128xbf16, #tpu.memory_space<vmem>>, vector<1x1x7x128xbf16>
      %113 = vector.shape_cast %112 : vector<1x1x7x128xbf16> to vector<7x128xbf16>
      %c1920 = arith.constant 1920 : index
      %c0_96 = arith.constant 0 : index
      %114 = vector.load %arg2[%c1920, %c0_96] : memref<3200x256xbf16, #tpu.memory_space<vmem>>, vector<128x256xbf16>
      %cst_97 = arith.constant dense<0.000000e+00> : vector<7x256xf32>
      %115 = tpu.matmul %113, %114, %cst_97 {dimension_numbers = #tpu.dot_dimension_numbers<[1], [0], [0], [1], [0, 0, 1, 1], [], []>} : vector<7x128xbf16>, vector<128x256xbf16>, vector<7x256xf32> -> vector<7x256xf32>
      %116 = arith.addf %109, %115 : vector<7x256xf32>
      %c3_i32_98 = arith.constant 3 : i32
      %117 = arith.addi %arg5, %c3_i32_98 : i32
      %c0_99 = arith.constant 0 : index
      %118 = arith.index_cast %117 : i32 to index
      %c1_100 = arith.constant 1 : index
      %c0_101 = arith.constant 0 : index
      %119 = vector.load %arg1[%c0_99, %118, %c1_100, %c0_101] : memref<1x11x11x128xbf16, #tpu.memory_space<vmem>>, vector<1x1x7x128xbf16>
      %120 = vector.shape_cast %119 : vector<1x1x7x128xbf16> to vector<7x128xbf16>
      %c2048 = arith.constant 2048 : index
      %c0_102 = arith.constant 0 : index
      %121 = vector.load %arg2[%c2048, %c0_102] : memref<3200x256xbf16, #tpu.memory_space<vmem>>, vector<128x256xbf16>
      %cst_103 = arith.constant dense<0.000000e+00> : vector<7x256xf32>
      %122 = tpu.matmul %120, %121, %cst_103 {dimension_numbers = #tpu.dot_dimension_numbers<[1], [0], [0], [1], [0, 0, 1, 1], [], []>} : vector<7x128xbf16>, vector<128x256xbf16>, vector<7x256xf32> -> vector<7x256xf32>
      %123 = arith.addf %116, %122 : vector<7x256xf32>
      %c3_i32_104 = arith.constant 3 : i32
      %124 = arith.addi %arg5, %c3_i32_104 : i32
      %c0_105 = arith.constant 0 : index
      %125 = arith.index_cast %124 : i32 to index
      %c2_106 = arith.constant 2 : index
      %c0_107 = arith.constant 0 : index
      %126 = vector.load %arg1[%c0_105, %125, %c2_106, %c0_107] : memref<1x11x11x128xbf16, #tpu.memory_space<vmem>>, vector<1x1x7x128xbf16>
      %127 = vector.shape_cast %126 : vector<1x1x7x128xbf16> to vector<7x128xbf16>
      %c2176 = arith.constant 2176 : index
      %c0_108 = arith.constant 0 : index
      %128 = vector.load %arg2[%c2176, %c0_108] : memref<3200x256xbf16, #tpu.memory_space<vmem>>, vector<128x256xbf16>
      %cst_109 = arith.constant dense<0.000000e+00> : vector<7x256xf32>
      %129 = tpu.matmul %127, %128, %cst_109 {dimension_numbers = #tpu.dot_dimension_numbers<[1], [0], [0], [1], [0, 0, 1, 1], [], []>} : vector<7x128xbf16>, vector<128x256xbf16>, vector<7x256xf32> -> vector<7x256xf32>
      %130 = arith.addf %123, %129 : vector<7x256xf32>
      %c3_i32_110 = arith.constant 3 : i32
      %131 = arith.addi %arg5, %c3_i32_110 : i32
      %c0_111 = arith.constant 0 : index
      %132 = arith.index_cast %131 : i32 to index
      %c3_112 = arith.constant 3 : index
      %c0_113 = arith.constant 0 : index
      %133 = vector.load %arg1[%c0_111, %132, %c3_112, %c0_113] : memref<1x11x11x128xbf16, #tpu.memory_space<vmem>>, vector<1x1x7x128xbf16>
      %134 = vector.shape_cast %133 : vector<1x1x7x128xbf16> to vector<7x128xbf16>
      %c2304 = arith.constant 2304 : index
      %c0_114 = arith.constant 0 : index
      %135 = vector.load %arg2[%c2304, %c0_114] : memref<3200x256xbf16, #tpu.memory_space<vmem>>, vector<128x256xbf16>
      %cst_115 = arith.constant dense<0.000000e+00> : vector<7x256xf32>
      %136 = tpu.matmul %134, %135, %cst_115 {dimension_numbers = #tpu.dot_dimension_numbers<[1], [0], [0], [1], [0, 0, 1, 1], [], []>} : vector<7x128xbf16>, vector<128x256xbf16>, vector<7x256xf32> -> vector<7x256xf32>
      %137 = arith.addf %130, %136 : vector<7x256xf32>
      %c3_i32_116 = arith.constant 3 : i32
      %138 = arith.addi %arg5, %c3_i32_116 : i32
      %c0_117 = arith.constant 0 : index
      %139 = arith.index_cast %138 : i32 to index
      %c4_118 = arith.constant 4 : index
      %c0_119 = arith.constant 0 : index
      %140 = vector.load %arg1[%c0_117, %139, %c4_118, %c0_119] : memref<1x11x11x128xbf16, #tpu.memory_space<vmem>>, vector<1x1x7x128xbf16>
      %141 = vector.shape_cast %140 : vector<1x1x7x128xbf16> to vector<7x128xbf16>
      %c2432 = arith.constant 2432 : index
      %c0_120 = arith.constant 0 : index
      %142 = vector.load %arg2[%c2432, %c0_120] : memref<3200x256xbf16, #tpu.memory_space<vmem>>, vector<128x256xbf16>
      %cst_121 = arith.constant dense<0.000000e+00> : vector<7x256xf32>
      %143 = tpu.matmul %141, %142, %cst_121 {dimension_numbers = #tpu.dot_dimension_numbers<[1], [0], [0], [1], [0, 0, 1, 1], [], []>} : vector<7x128xbf16>, vector<128x256xbf16>, vector<7x256xf32> -> vector<7x256xf32>
      %144 = arith.addf %137, %143 : vector<7x256xf32>
      %c4_i32 = arith.constant 4 : i32
      %145 = arith.addi %arg5, %c4_i32 : i32
      %c0_122 = arith.constant 0 : index
      %146 = arith.index_cast %145 : i32 to index
      %c0_123 = arith.constant 0 : index
      %c0_124 = arith.constant 0 : index
      %147 = vector.load %arg1[%c0_122, %146, %c0_123, %c0_124] : memref<1x11x11x128xbf16, #tpu.memory_space<vmem>>, vector<1x1x7x128xbf16>
      %148 = vector.shape_cast %147 : vector<1x1x7x128xbf16> to vector<7x128xbf16>
      %c2560 = arith.constant 2560 : index
      %c0_125 = arith.constant 0 : index
      %149 = vector.load %arg2[%c2560, %c0_125] : memref<3200x256xbf16, #tpu.memory_space<vmem>>, vector<128x256xbf16>
      %cst_126 = arith.constant dense<0.000000e+00> : vector<7x256xf32>
      %150 = tpu.matmul %148, %149, %cst_126 {dimension_numbers = #tpu.dot_dimension_numbers<[1], [0], [0], [1], [0, 0, 1, 1], [], []>} : vector<7x128xbf16>, vector<128x256xbf16>, vector<7x256xf32> -> vector<7x256xf32>
      %151 = arith.addf %144, %150 : vector<7x256xf32>
      %c4_i32_127 = arith.constant 4 : i32
      %152 = arith.addi %arg5, %c4_i32_127 : i32
      %c0_128 = arith.constant 0 : index
      %153 = arith.index_cast %152 : i32 to index
      %c1_129 = arith.constant 1 : index
      %c0_130 = arith.constant 0 : index
      %154 = vector.load %arg1[%c0_128, %153, %c1_129, %c0_130] : memref<1x11x11x128xbf16, #tpu.memory_space<vmem>>, vector<1x1x7x128xbf16>
      %155 = vector.shape_cast %154 : vector<1x1x7x128xbf16> to vector<7x128xbf16>
      %c2688 = arith.constant 2688 : index
      %c0_131 = arith.constant 0 : index
      %156 = vector.load %arg2[%c2688, %c0_131] : memref<3200x256xbf16, #tpu.memory_space<vmem>>, vector<128x256xbf16>
      %cst_132 = arith.constant dense<0.000000e+00> : vector<7x256xf32>
      %157 = tpu.matmul %155, %156, %cst_132 {dimension_numbers = #tpu.dot_dimension_numbers<[1], [0], [0], [1], [0, 0, 1, 1], [], []>} : vector<7x128xbf16>, vector<128x256xbf16>, vector<7x256xf32> -> vector<7x256xf32>
      %158 = arith.addf %151, %157 : vector<7x256xf32>
      %c4_i32_133 = arith.constant 4 : i32
      %159 = arith.addi %arg5, %c4_i32_133 : i32
      %c0_134 = arith.constant 0 : index
      %160 = arith.index_cast %159 : i32 to index
      %c2_135 = arith.constant 2 : index
      %c0_136 = arith.constant 0 : index
      %161 = vector.load %arg1[%c0_134, %160, %c2_135, %c0_136] : memref<1x11x11x128xbf16, #tpu.memory_space<vmem>>, vector<1x1x7x128xbf16>
      %162 = vector.shape_cast %161 : vector<1x1x7x128xbf16> to vector<7x128xbf16>
      %c2816 = arith.constant 2816 : index
      %c0_137 = arith.constant 0 : index
      %163 = vector.load %arg2[%c2816, %c0_137] : memref<3200x256xbf16, #tpu.memory_space<vmem>>, vector<128x256xbf16>
      %cst_138 = arith.constant dense<0.000000e+00> : vector<7x256xf32>
      %164 = tpu.matmul %162, %163, %cst_138 {dimension_numbers = #tpu.dot_dimension_numbers<[1], [0], [0], [1], [0, 0, 1, 1], [], []>} : vector<7x128xbf16>, vector<128x256xbf16>, vector<7x256xf32> -> vector<7x256xf32>
      %165 = arith.addf %158, %164 : vector<7x256xf32>
      %c4_i32_139 = arith.constant 4 : i32
      %166 = arith.addi %arg5, %c4_i32_139 : i32
      %c0_140 = arith.constant 0 : index
      %167 = arith.index_cast %166 : i32 to index
      %c3_141 = arith.constant 3 : index
      %c0_142 = arith.constant 0 : index
      %168 = vector.load %arg1[%c0_140, %167, %c3_141, %c0_142] : memref<1x11x11x128xbf16, #tpu.memory_space<vmem>>, vector<1x1x7x128xbf16>
      %169 = vector.shape_cast %168 : vector<1x1x7x128xbf16> to vector<7x128xbf16>
      %c2944 = arith.constant 2944 : index
      %c0_143 = arith.constant 0 : index
      %170 = vector.load %arg2[%c2944, %c0_143] : memref<3200x256xbf16, #tpu.memory_space<vmem>>, vector<128x256xbf16>
      %cst_144 = arith.constant dense<0.000000e+00> : vector<7x256xf32>
      %171 = tpu.matmul %169, %170, %cst_144 {dimension_numbers = #tpu.dot_dimension_numbers<[1], [0], [0], [1], [0, 0, 1, 1], [], []>} : vector<7x128xbf16>, vector<128x256xbf16>, vector<7x256xf32> -> vector<7x256xf32>
      %172 = arith.addf %165, %171 : vector<7x256xf32>
      %c4_i32_145 = arith.constant 4 : i32
      %173 = arith.addi %arg5, %c4_i32_145 : i32
      %c0_146 = arith.constant 0 : index
      %174 = arith.index_cast %173 : i32 to index
      %c4_147 = arith.constant 4 : index
      %c0_148 = arith.constant 0 : index
      %175 = vector.load %arg1[%c0_146, %174, %c4_147, %c0_148] : memref<1x11x11x128xbf16, #tpu.memory_space<vmem>>, vector<1x1x7x128xbf16>
      %176 = vector.shape_cast %175 : vector<1x1x7x128xbf16> to vector<7x128xbf16>
      %c3072 = arith.constant 3072 : index
      %c0_149 = arith.constant 0 : index
      %177 = vector.load %arg2[%c3072, %c0_149] : memref<3200x256xbf16, #tpu.memory_space<vmem>>, vector<128x256xbf16>
      %cst_150 = arith.constant dense<0.000000e+00> : vector<7x256xf32>
      %178 = tpu.matmul %176, %177, %cst_150 {dimension_numbers = #tpu.dot_dimension_numbers<[1], [0], [0], [1], [0, 0, 1, 1], [], []>} : vector<7x128xbf16>, vector<128x256xbf16>, vector<7x256xf32> -> vector<7x256xf32>
      %179 = arith.addf %172, %178 : vector<7x256xf32>
      %180 = vector.broadcast %0 : vector<1x256xf32> to vector<7x256xf32>
      %181 = arith.addf %179, %180 : vector<7x256xf32>
      %cst_151 = arith.constant 0.000000e+00 : f32
      %182 = vector.broadcast %cst_151 : f32 to vector<7x256xf32>
      %183 = arith.maximumf %181, %182 : vector<7x256xf32>
      %184 = arith.truncf %183 : vector<7x256xf32> to vector<7x256xbf16>
      %c0_i32_152 = arith.constant 0 : i32
      %185 = arith.addi %c0_i32_152, %arg5 : i32
      %c0_153 = arith.constant 0 : index
      %186 = arith.index_cast %185 : i32 to index
      %c0_154 = arith.constant 0 : index
      %c0_155 = arith.constant 0 : index
      %187 = vector.load %arg4[%c0_153, %186, %c0_154, %c0_155] : memref<1x8x8x256xbf16, #tpu.memory_space<vmem>>, vector<1x1x7x256xbf16>
      %188 = vector.shape_cast %187 : vector<1x1x7x256xbf16> to vector<7x256xbf16>
      %189 = vector.shape_cast %184 : vector<7x256xbf16> to vector<1x1x7x256xbf16>
      tpu.vector_store %arg4[%c0_153, %186, %c0_154, %c0_155], %189 {strides = array<i32>} : memref<1x8x8x256xbf16, #tpu.memory_space<vmem>>, vector<1x1x7x256xbf16>,
    }
    %c7_i32_5 = arith.constant 7 : i32
    return
  }
  func.func @transform_0(%arg0: i32) -> (i32, i32, i32, i32) {
    %c0_i32 = arith.constant 0 : i32
    %c0_i32_0 = arith.constant 0 : i32
    %c0_i32_1 = arith.constant 0 : i32
    %c0_i32_2 = arith.constant 0 : i32
    return %arg0, %c0_i32, %c0_i32_0, %c0_i32_1 : i32, i32, i32, i32
  }
  func.func @transform_1(%arg0: i32) -> (i32, i32) {
    %c0_i32 = arith.constant 0 : i32
    %c0_i32_0 = arith.constant 0 : i32
    %c0_i32_1 = arith.constant 0 : i32
    return %c0_i32, %c0_i32_0 : i32, i32
  }
  func.func @transform_2(%arg0: i32) -> (i32, i32) {
    %c0_i32 = arith.constant 0 : i32
    %c0_i32_0 = arith.constant 0 : i32
    %c0_i32_1 = arith.constant 0 : i32
    return %c0_i32, %c0_i32_0 : i32, i32
  }
  func.func @transform_3(%arg0: i32) -> (i32, i32, i32, i32) {
    %c0_i32 = arith.constant 0 : i32
    %c0_i32_0 = arith.constant 0 : i32
    %c0_i32_1 = arith.constant 0 : i32
    %c0_i32_2 = arith.constant 0 : i32
    return %arg0, %c0_i32, %c0_i32_0, %c0_i32_1 : i32, i32, i32, i32
  }
}

module attributes {stable_mosaic.version = 11 : i64} {
  func.func @_maxpool_kernel(%arg0: i32, %arg1: memref<1x4x2x4x512xbf16, #tpu.memory_space<vmem>>, %arg2: memref<1x5x5x256xbf16, #tpu.memory_space<vmem>>) attributes {dimension_semantics = [#tpu.dimension_semantics<parallel>], iteration_bounds = array<i64: 2>, scalar_prefetch = 0 : i64, scratch_operands = 0 : i64, tpu.core_type = #tpu.core_type<tc>, window_params = [{transform_indices = @transform_0, window_bounds = array<i64: 1, 4, 2, 4, 512>}, {transform_indices = @transform_1, window_bounds = array<i64: 1, 5, 5, 256>}]} {
    %c0 = arith.constant 0 : index
    %c0_0 = arith.constant 0 : index
    %c0_1 = arith.constant 0 : index
    %c0_2 = arith.constant 0 : index
    %c0_3 = arith.constant 0 : index
    %0 = vector.load %arg1[%c0, %c0_0, %c0_1, %c0_2, %c0_3] : memref<1x4x2x4x512xbf16, #tpu.memory_space<vmem>>, vector<1x4x2x4x512xbf16>
    %1 = vector.shape_cast %0 : vector<1x4x2x4x512xbf16> to vector<4x2x4x512xbf16>
    %2 = vector.extract_strided_slice %1 {offsets = [0, 0, 0, 0], sizes = [4, 2, 3, 256], strides = [1, 1, 1, 1]} : vector<4x2x4x512xbf16> to vector<4x2x3x256xbf16>
    %3 = vector.extract_strided_slice %1 {offsets = [0, 0, 0, 256], sizes = [4, 2, 3, 256], strides = [1, 1, 1, 1]} : vector<4x2x4x512xbf16> to vector<4x2x3x256xbf16>
    %4 = arith.maximumf %2, %3 : vector<4x2x3x256xbf16>
    %5 = vector.extract_strided_slice %1 {offsets = [0, 0, 1, 0], sizes = [4, 2, 3, 256], strides = [1, 1, 1, 1]} : vector<4x2x4x512xbf16> to vector<4x2x3x256xbf16>
    %6 = arith.maximumf %4, %5 : vector<4x2x3x256xbf16>
    %7 = vector.extract_strided_slice %6 {offsets = [0, 0, 0, 0], sizes = [3, 1, 3, 256], strides = [1, 1, 1, 1]} : vector<4x2x3x256xbf16> to vector<3x1x3x256xbf16>
    %8 = vector.shape_cast %7 : vector<3x1x3x256xbf16> to vector<3x3x256xbf16>
    %9 = vector.extract_strided_slice %6 {offsets = [0, 1, 0, 0], sizes = [3, 1, 3, 256], strides = [1, 1, 1, 1]} : vector<4x2x3x256xbf16> to vector<3x1x3x256xbf16>
    %10 = vector.shape_cast %9 : vector<3x1x3x256xbf16> to vector<3x3x256xbf16>
    %11 = arith.maximumf %8, %10 : vector<3x3x256xbf16>
    %12 = vector.extract_strided_slice %6 {offsets = [1, 0, 0, 0], sizes = [3, 1, 3, 256], strides = [1, 1, 1, 1]} : vector<4x2x3x256xbf16> to vector<3x1x3x256xbf16>
    %13 = vector.shape_cast %12 : vector<3x1x3x256xbf16> to vector<3x3x256xbf16>
    %14 = arith.maximumf %11, %13 : vector<3x3x256xbf16>
    %cst = arith.constant 0.000000e+00 : bf16
    %15 = vector.broadcast %cst : bf16 to vector<1x5x5x256xbf16>
    %c0_4 = arith.constant 0 : index
    %c0_5 = arith.constant 0 : index
    %c0_6 = arith.constant 0 : index
    %c0_7 = arith.constant 0 : index
    %16 = vector.load %arg2[%c0_4, %c0_5, %c0_6, %c0_7] : memref<1x5x5x256xbf16, #tpu.memory_space<vmem>>, vector<1x5x5x256xbf16>
    tpu.vector_store %arg2[%c0_4, %c0_5, %c0_6, %c0_7], %15 {strides = array<i32>} : memref<1x5x5x256xbf16, #tpu.memory_space<vmem>>, vector<1x5x5x256xbf16>,
    %c0_8 = arith.constant 0 : index
    %c1 = arith.constant 1 : index
    %c1_9 = arith.constant 1 : index
    %c0_10 = arith.constant 0 : index
    %17 = vector.load %arg2[%c0_8, %c1, %c1_9, %c0_10] : memref<1x5x5x256xbf16, #tpu.memory_space<vmem>>, vector<1x3x3x256xbf16>
    %18 = vector.shape_cast %17 : vector<1x3x3x256xbf16> to vector<3x3x256xbf16>
    %19 = vector.shape_cast %14 : vector<3x3x256xbf16> to vector<1x3x3x256xbf16>
    tpu.vector_store %arg2[%c0_8, %c1, %c1_9, %c0_10], %19 {strides = array<i32>} : memref<1x5x5x256xbf16, #tpu.memory_space<vmem>>, vector<1x3x3x256xbf16>,
    return
  }
  func.func @transform_0(%arg0: i32) -> (i32, i32, i32, i32, i32) {
    %c0_i32 = arith.constant 0 : i32
    %c0_i32_0 = arith.constant 0 : i32
    %c0_i32_1 = arith.constant 0 : i32
    %c0_i32_2 = arith.constant 0 : i32
    %c0_i32_3 = arith.constant 0 : i32
    return %arg0, %c0_i32, %c0_i32_0, %c0_i32_1, %c0_i32_2 : i32, i32, i32, i32, i32
  }
  func.func @transform_1(%arg0: i32) -> (i32, i32, i32, i32) {
    %c0_i32 = arith.constant 0 : i32
    %c0_i32_0 = arith.constant 0 : i32
    %c0_i32_1 = arith.constant 0 : i32
    %c0_i32_2 = arith.constant 0 : i32
    return %arg0, %c0_i32, %c0_i32_0, %c0_i32_1 : i32, i32, i32, i32
  }
}

module attributes {stable_mosaic.version = 11 : i64} {
  func.func @_conv_s1_kernel(%arg0: i32, %arg1: memref<1x5x5x384xbf16, #tpu.memory_space<vmem>>, %arg2: memref<3456x256xbf16, #tpu.memory_space<vmem>>, %arg3: memref<1x256xf32, #tpu.memory_space<vmem>>, %arg4: memref<1x5x5x256xbf16, #tpu.memory_space<vmem>>) attributes {dimension_semantics = [#tpu.dimension_semantics<parallel>], iteration_bounds = array<i64: 2>, scalar_prefetch = 0 : i64, scratch_operands = 0 : i64, tpu.core_type = #tpu.core_type<tc>, window_params = [{transform_indices = @transform_0, window_bounds = array<i64: 1, 5, 5, 384>}, {pipeline_mode = #tpu.pipeline_mode<synchronous>, transform_indices = @transform_1, window_bounds = array<i64: 3456, 256>}, {pipeline_mode = #tpu.pipeline_mode<synchronous>, transform_indices = @transform_2, window_bounds = array<i64: 1, 256>}, {transform_indices = @transform_3, window_bounds = array<i64: 1, 5, 5, 256>}]} {
    %c0 = arith.constant 0 : index
    %c0_0 = arith.constant 0 : index
    %0 = vector.load %arg3[%c0, %c0_0] : memref<1x256xf32, #tpu.memory_space<vmem>>, vector<1x256xf32>
    %cst = arith.constant 0.000000e+00 : bf16
    %1 = vector.broadcast %cst : bf16 to vector<1x5x5x256xbf16>
    %c0_1 = arith.constant 0 : index
    %c0_2 = arith.constant 0 : index
    %c0_3 = arith.constant 0 : index
    %c0_4 = arith.constant 0 : index
    %2 = vector.load %arg4[%c0_1, %c0_2, %c0_3, %c0_4] : memref<1x5x5x256xbf16, #tpu.memory_space<vmem>>, vector<1x5x5x256xbf16>
    tpu.vector_store %arg4[%c0_1, %c0_2, %c0_3, %c0_4], %1 {strides = array<i32>} : memref<1x5x5x256xbf16, #tpu.memory_space<vmem>>, vector<1x5x5x256xbf16>,
    %c0_i32 = arith.constant 0 : i32
    %c3_i32 = arith.constant 3 : i32
    %3 = arith.addi %c0_i32, %c3_i32 : i32
    %c1_i32 = arith.constant 1 : i32
    scf.for %arg5 = %c0_i32 to %3 step %c1_i32  : i32 {
      %cst_6 = arith.constant 0.000000e+00 : f32
      %4 = vector.broadcast %cst_6 : f32 to vector<3x256xf32>
      %c0_i32_7 = arith.constant 0 : i32
      %5 = arith.addi %arg5, %c0_i32_7 : i32
      %c0_8 = arith.constant 0 : index
      %6 = arith.index_cast %5 : i32 to index
      %c0_9 = arith.constant 0 : index
      %c0_10 = arith.constant 0 : index
      %7 = vector.load %arg1[%c0_8, %6, %c0_9, %c0_10] : memref<1x5x5x384xbf16, #tpu.memory_space<vmem>>, vector<1x1x3x384xbf16>
      %8 = vector.shape_cast %7 : vector<1x1x3x384xbf16> to vector<3x384xbf16>
      %c0_11 = arith.constant 0 : index
      %c0_12 = arith.constant 0 : index
      %9 = vector.load %arg2[%c0_11, %c0_12] : memref<3456x256xbf16, #tpu.memory_space<vmem>>, vector<384x256xbf16>
      %cst_13 = arith.constant dense<0.000000e+00> : vector<3x256xf32>
      %10 = tpu.matmul %8, %9, %cst_13 {dimension_numbers = #tpu.dot_dimension_numbers<[1], [0], [0], [1], [0, 0, 1, 1], [], []>} : vector<3x384xbf16>, vector<384x256xbf16>, vector<3x256xf32> -> vector<3x256xf32>
      %11 = arith.addf %4, %10 : vector<3x256xf32>
      %c0_i32_14 = arith.constant 0 : i32
      %12 = arith.addi %arg5, %c0_i32_14 : i32
      %c0_15 = arith.constant 0 : index
      %13 = arith.index_cast %12 : i32 to index
      %c1 = arith.constant 1 : index
      %c0_16 = arith.constant 0 : index
      %14 = vector.load %arg1[%c0_15, %13, %c1, %c0_16] : memref<1x5x5x384xbf16, #tpu.memory_space<vmem>>, vector<1x1x3x384xbf16>
      %15 = vector.shape_cast %14 : vector<1x1x3x384xbf16> to vector<3x384xbf16>
      %c384 = arith.constant 384 : index
      %c0_17 = arith.constant 0 : index
      %16 = vector.load %arg2[%c384, %c0_17] : memref<3456x256xbf16, #tpu.memory_space<vmem>>, vector<384x256xbf16>
      %cst_18 = arith.constant dense<0.000000e+00> : vector<3x256xf32>
      %17 = tpu.matmul %15, %16, %cst_18 {dimension_numbers = #tpu.dot_dimension_numbers<[1], [0], [0], [1], [0, 0, 1, 1], [], []>} : vector<3x384xbf16>, vector<384x256xbf16>, vector<3x256xf32> -> vector<3x256xf32>
      %18 = arith.addf %11, %17 : vector<3x256xf32>
      %c0_i32_19 = arith.constant 0 : i32
      %19 = arith.addi %arg5, %c0_i32_19 : i32
      %c0_20 = arith.constant 0 : index
      %20 = arith.index_cast %19 : i32 to index
      %c2 = arith.constant 2 : index
      %c0_21 = arith.constant 0 : index
      %21 = vector.load %arg1[%c0_20, %20, %c2, %c0_21] : memref<1x5x5x384xbf16, #tpu.memory_space<vmem>>, vector<1x1x3x384xbf16>
      %22 = vector.shape_cast %21 : vector<1x1x3x384xbf16> to vector<3x384xbf16>
      %c768 = arith.constant 768 : index
      %c0_22 = arith.constant 0 : index
      %23 = vector.load %arg2[%c768, %c0_22] : memref<3456x256xbf16, #tpu.memory_space<vmem>>, vector<384x256xbf16>
      %cst_23 = arith.constant dense<0.000000e+00> : vector<3x256xf32>
      %24 = tpu.matmul %22, %23, %cst_23 {dimension_numbers = #tpu.dot_dimension_numbers<[1], [0], [0], [1], [0, 0, 1, 1], [], []>} : vector<3x384xbf16>, vector<384x256xbf16>, vector<3x256xf32> -> vector<3x256xf32>
      %25 = arith.addf %18, %24 : vector<3x256xf32>
      %c1_i32_24 = arith.constant 1 : i32
      %26 = arith.addi %arg5, %c1_i32_24 : i32
      %c0_25 = arith.constant 0 : index
      %27 = arith.index_cast %26 : i32 to index
      %c0_26 = arith.constant 0 : index
      %c0_27 = arith.constant 0 : index
      %28 = vector.load %arg1[%c0_25, %27, %c0_26, %c0_27] : memref<1x5x5x384xbf16, #tpu.memory_space<vmem>>, vector<1x1x3x384xbf16>
      %29 = vector.shape_cast %28 : vector<1x1x3x384xbf16> to vector<3x384xbf16>
      %c1152 = arith.constant 1152 : index
      %c0_28 = arith.constant 0 : index
      %30 = vector.load %arg2[%c1152, %c0_28] : memref<3456x256xbf16, #tpu.memory_space<vmem>>, vector<384x256xbf16>
      %cst_29 = arith.constant dense<0.000000e+00> : vector<3x256xf32>
      %31 = tpu.matmul %29, %30, %cst_29 {dimension_numbers = #tpu.dot_dimension_numbers<[1], [0], [0], [1], [0, 0, 1, 1], [], []>} : vector<3x384xbf16>, vector<384x256xbf16>, vector<3x256xf32> -> vector<3x256xf32>
      %32 = arith.addf %25, %31 : vector<3x256xf32>
      %c1_i32_30 = arith.constant 1 : i32
      %33 = arith.addi %arg5, %c1_i32_30 : i32
      %c0_31 = arith.constant 0 : index
      %34 = arith.index_cast %33 : i32 to index
      %c1_32 = arith.constant 1 : index
      %c0_33 = arith.constant 0 : index
      %35 = vector.load %arg1[%c0_31, %34, %c1_32, %c0_33] : memref<1x5x5x384xbf16, #tpu.memory_space<vmem>>, vector<1x1x3x384xbf16>
      %36 = vector.shape_cast %35 : vector<1x1x3x384xbf16> to vector<3x384xbf16>
      %c1536 = arith.constant 1536 : index
      %c0_34 = arith.constant 0 : index
      %37 = vector.load %arg2[%c1536, %c0_34] : memref<3456x256xbf16, #tpu.memory_space<vmem>>, vector<384x256xbf16>
      %cst_35 = arith.constant dense<0.000000e+00> : vector<3x256xf32>
      %38 = tpu.matmul %36, %37, %cst_35 {dimension_numbers = #tpu.dot_dimension_numbers<[1], [0], [0], [1], [0, 0, 1, 1], [], []>} : vector<3x384xbf16>, vector<384x256xbf16>, vector<3x256xf32> -> vector<3x256xf32>
      %39 = arith.addf %32, %38 : vector<3x256xf32>
      %c1_i32_36 = arith.constant 1 : i32
      %40 = arith.addi %arg5, %c1_i32_36 : i32
      %c0_37 = arith.constant 0 : index
      %41 = arith.index_cast %40 : i32 to index
      %c2_38 = arith.constant 2 : index
      %c0_39 = arith.constant 0 : index
      %42 = vector.load %arg1[%c0_37, %41, %c2_38, %c0_39] : memref<1x5x5x384xbf16, #tpu.memory_space<vmem>>, vector<1x1x3x384xbf16>
      %43 = vector.shape_cast %42 : vector<1x1x3x384xbf16> to vector<3x384xbf16>
      %c1920 = arith.constant 1920 : index
      %c0_40 = arith.constant 0 : index
      %44 = vector.load %arg2[%c1920, %c0_40] : memref<3456x256xbf16, #tpu.memory_space<vmem>>, vector<384x256xbf16>
      %cst_41 = arith.constant dense<0.000000e+00> : vector<3x256xf32>
      %45 = tpu.matmul %43, %44, %cst_41 {dimension_numbers = #tpu.dot_dimension_numbers<[1], [0], [0], [1], [0, 0, 1, 1], [], []>} : vector<3x384xbf16>, vector<384x256xbf16>, vector<3x256xf32> -> vector<3x256xf32>
      %46 = arith.addf %39, %45 : vector<3x256xf32>
      %c2_i32 = arith.constant 2 : i32
      %47 = arith.addi %arg5, %c2_i32 : i32
      %c0_42 = arith.constant 0 : index
      %48 = arith.index_cast %47 : i32 to index
      %c0_43 = arith.constant 0 : index
      %c0_44 = arith.constant 0 : index
      %49 = vector.load %arg1[%c0_42, %48, %c0_43, %c0_44] : memref<1x5x5x384xbf16, #tpu.memory_space<vmem>>, vector<1x1x3x384xbf16>
      %50 = vector.shape_cast %49 : vector<1x1x3x384xbf16> to vector<3x384xbf16>
      %c2304 = arith.constant 2304 : index
      %c0_45 = arith.constant 0 : index
      %51 = vector.load %arg2[%c2304, %c0_45] : memref<3456x256xbf16, #tpu.memory_space<vmem>>, vector<384x256xbf16>
      %cst_46 = arith.constant dense<0.000000e+00> : vector<3x256xf32>
      %52 = tpu.matmul %50, %51, %cst_46 {dimension_numbers = #tpu.dot_dimension_numbers<[1], [0], [0], [1], [0, 0, 1, 1], [], []>} : vector<3x384xbf16>, vector<384x256xbf16>, vector<3x256xf32> -> vector<3x256xf32>
      %53 = arith.addf %46, %52 : vector<3x256xf32>
      %c2_i32_47 = arith.constant 2 : i32
      %54 = arith.addi %arg5, %c2_i32_47 : i32
      %c0_48 = arith.constant 0 : index
      %55 = arith.index_cast %54 : i32 to index
      %c1_49 = arith.constant 1 : index
      %c0_50 = arith.constant 0 : index
      %56 = vector.load %arg1[%c0_48, %55, %c1_49, %c0_50] : memref<1x5x5x384xbf16, #tpu.memory_space<vmem>>, vector<1x1x3x384xbf16>
      %57 = vector.shape_cast %56 : vector<1x1x3x384xbf16> to vector<3x384xbf16>
      %c2688 = arith.constant 2688 : index
      %c0_51 = arith.constant 0 : index
      %58 = vector.load %arg2[%c2688, %c0_51] : memref<3456x256xbf16, #tpu.memory_space<vmem>>, vector<384x256xbf16>
      %cst_52 = arith.constant dense<0.000000e+00> : vector<3x256xf32>
      %59 = tpu.matmul %57, %58, %cst_52 {dimension_numbers = #tpu.dot_dimension_numbers<[1], [0], [0], [1], [0, 0, 1, 1], [], []>} : vector<3x384xbf16>, vector<384x256xbf16>, vector<3x256xf32> -> vector<3x256xf32>
      %60 = arith.addf %53, %59 : vector<3x256xf32>
      %c2_i32_53 = arith.constant 2 : i32
      %61 = arith.addi %arg5, %c2_i32_53 : i32
      %c0_54 = arith.constant 0 : index
      %62 = arith.index_cast %61 : i32 to index
      %c2_55 = arith.constant 2 : index
      %c0_56 = arith.constant 0 : index
      %63 = vector.load %arg1[%c0_54, %62, %c2_55, %c0_56] : memref<1x5x5x384xbf16, #tpu.memory_space<vmem>>, vector<1x1x3x384xbf16>
      %64 = vector.shape_cast %63 : vector<1x1x3x384xbf16> to vector<3x384xbf16>
      %c3072 = arith.constant 3072 : index
      %c0_57 = arith.constant 0 : index
      %65 = vector.load %arg2[%c3072, %c0_57] : memref<3456x256xbf16, #tpu.memory_space<vmem>>, vector<384x256xbf16>
      %cst_58 = arith.constant dense<0.000000e+00> : vector<3x256xf32>
      %66 = tpu.matmul %64, %65, %cst_58 {dimension_numbers = #tpu.dot_dimension_numbers<[1], [0], [0], [1], [0, 0, 1, 1], [], []>} : vector<3x384xbf16>, vector<384x256xbf16>, vector<3x256xf32> -> vector<3x256xf32>
      %67 = arith.addf %60, %66 : vector<3x256xf32>
      %68 = vector.broadcast %0 : vector<1x256xf32> to vector<3x256xf32>
      %69 = arith.addf %67, %68 : vector<3x256xf32>
      %cst_59 = arith.constant 0.000000e+00 : f32
      %70 = vector.broadcast %cst_59 : f32 to vector<3x256xf32>
      %71 = arith.maximumf %69, %70 : vector<3x256xf32>
      %72 = arith.truncf %71 : vector<3x256xf32> to vector<3x256xbf16>
      %c1_i32_60 = arith.constant 1 : i32
      %73 = arith.addi %c1_i32_60, %arg5 : i32
      %c0_61 = arith.constant 0 : index
      %74 = arith.index_cast %73 : i32 to index
      %c1_62 = arith.constant 1 : index
      %c0_63 = arith.constant 0 : index
      %75 = vector.load %arg4[%c0_61, %74, %c1_62, %c0_63] : memref<1x5x5x256xbf16, #tpu.memory_space<vmem>>, vector<1x1x3x256xbf16>
      %76 = vector.shape_cast %75 : vector<1x1x3x256xbf16> to vector<3x256xbf16>
      %77 = vector.shape_cast %72 : vector<3x256xbf16> to vector<1x1x3x256xbf16>
      tpu.vector_store %arg4[%c0_61, %74, %c1_62, %c0_63], %77 {strides = array<i32>} : memref<1x5x5x256xbf16, #tpu.memory_space<vmem>>, vector<1x1x3x256xbf16>,
    }
    %c3_i32_5 = arith.constant 3 : i32
    return
  }
  func.func @transform_0(%arg0: i32) -> (i32, i32, i32, i32) {
    %c0_i32 = arith.constant 0 : i32
    %c0_i32_0 = arith.constant 0 : i32
    %c0_i32_1 = arith.constant 0 : i32
    %c0_i32_2 = arith.constant 0 : i32
    return %arg0, %c0_i32, %c0_i32_0, %c0_i32_1 : i32, i32, i32, i32
  }
  func.func @transform_1(%arg0: i32) -> (i32, i32) {
    %c0_i32 = arith.constant 0 : i32
    %c0_i32_0 = arith.constant 0 : i32
    %c0_i32_1 = arith.constant 0 : i32
    return %c0_i32, %c0_i32_0 : i32, i32
  }
  func.func @transform_2(%arg0: i32) -> (i32, i32) {
    %c0_i32 = arith.constant 0 : i32
    %c0_i32_0 = arith.constant 0 : i32
    %c0_i32_1 = arith.constant 0 : i32
    return %c0_i32, %c0_i32_0 : i32, i32
  }
  func.func @transform_3(%arg0: i32) -> (i32, i32, i32, i32) {
    %c0_i32 = arith.constant 0 : i32
    %c0_i32_0 = arith.constant 0 : i32
    %c0_i32_1 = arith.constant 0 : i32
    %c0_i32_2 = arith.constant 0 : i32
    return %arg0, %c0_i32, %c0_i32_0, %c0_i32_1 : i32, i32, i32, i32
  }
}

module attributes {stable_mosaic.version = 11 : i64} {
  func.func @_conv_s1_kernel(%arg0: i32, %arg1: memref<1x5x5x256xbf16, #tpu.memory_space<vmem>>, %arg2: memref<2304x384xbf16, #tpu.memory_space<vmem>>, %arg3: memref<1x384xf32, #tpu.memory_space<vmem>>, %arg4: memref<1x5x5x384xbf16, #tpu.memory_space<vmem>>) attributes {dimension_semantics = [#tpu.dimension_semantics<parallel>], iteration_bounds = array<i64: 2>, scalar_prefetch = 0 : i64, scratch_operands = 0 : i64, tpu.core_type = #tpu.core_type<tc>, window_params = [{transform_indices = @transform_0, window_bounds = array<i64: 1, 5, 5, 256>}, {pipeline_mode = #tpu.pipeline_mode<synchronous>, transform_indices = @transform_1, window_bounds = array<i64: 2304, 384>}, {pipeline_mode = #tpu.pipeline_mode<synchronous>, transform_indices = @transform_2, window_bounds = array<i64: 1, 384>}, {transform_indices = @transform_3, window_bounds = array<i64: 1, 5, 5, 384>}]} {
    %c0 = arith.constant 0 : index
    %c0_0 = arith.constant 0 : index
    %0 = vector.load %arg3[%c0, %c0_0] : memref<1x384xf32, #tpu.memory_space<vmem>>, vector<1x384xf32>
    %cst = arith.constant 0.000000e+00 : bf16
    %1 = vector.broadcast %cst : bf16 to vector<1x5x5x384xbf16>
    %c0_1 = arith.constant 0 : index
    %c0_2 = arith.constant 0 : index
    %c0_3 = arith.constant 0 : index
    %c0_4 = arith.constant 0 : index
    %2 = vector.load %arg4[%c0_1, %c0_2, %c0_3, %c0_4] : memref<1x5x5x384xbf16, #tpu.memory_space<vmem>>, vector<1x5x5x384xbf16>
    tpu.vector_store %arg4[%c0_1, %c0_2, %c0_3, %c0_4], %1 {strides = array<i32>} : memref<1x5x5x384xbf16, #tpu.memory_space<vmem>>, vector<1x5x5x384xbf16>,
    %c0_i32 = arith.constant 0 : i32
    %c3_i32 = arith.constant 3 : i32
    %3 = arith.addi %c0_i32, %c3_i32 : i32
    %c1_i32 = arith.constant 1 : i32
    scf.for %arg5 = %c0_i32 to %3 step %c1_i32  : i32 {
      %cst_6 = arith.constant 0.000000e+00 : f32
      %4 = vector.broadcast %cst_6 : f32 to vector<3x384xf32>
      %c0_i32_7 = arith.constant 0 : i32
      %5 = arith.addi %arg5, %c0_i32_7 : i32
      %c0_8 = arith.constant 0 : index
      %6 = arith.index_cast %5 : i32 to index
      %c0_9 = arith.constant 0 : index
      %c0_10 = arith.constant 0 : index
      %7 = vector.load %arg1[%c0_8, %6, %c0_9, %c0_10] : memref<1x5x5x256xbf16, #tpu.memory_space<vmem>>, vector<1x1x3x256xbf16>
      %8 = vector.shape_cast %7 : vector<1x1x3x256xbf16> to vector<3x256xbf16>
      %c0_11 = arith.constant 0 : index
      %c0_12 = arith.constant 0 : index
      %9 = vector.load %arg2[%c0_11, %c0_12] : memref<2304x384xbf16, #tpu.memory_space<vmem>>, vector<256x384xbf16>
      %cst_13 = arith.constant dense<0.000000e+00> : vector<3x384xf32>
      %10 = tpu.matmul %8, %9, %cst_13 {dimension_numbers = #tpu.dot_dimension_numbers<[1], [0], [0], [1], [0, 0, 1, 1], [], []>} : vector<3x256xbf16>, vector<256x384xbf16>, vector<3x384xf32> -> vector<3x384xf32>
      %11 = arith.addf %4, %10 : vector<3x384xf32>
      %c0_i32_14 = arith.constant 0 : i32
      %12 = arith.addi %arg5, %c0_i32_14 : i32
      %c0_15 = arith.constant 0 : index
      %13 = arith.index_cast %12 : i32 to index
      %c1 = arith.constant 1 : index
      %c0_16 = arith.constant 0 : index
      %14 = vector.load %arg1[%c0_15, %13, %c1, %c0_16] : memref<1x5x5x256xbf16, #tpu.memory_space<vmem>>, vector<1x1x3x256xbf16>
      %15 = vector.shape_cast %14 : vector<1x1x3x256xbf16> to vector<3x256xbf16>
      %c256 = arith.constant 256 : index
      %c0_17 = arith.constant 0 : index
      %16 = vector.load %arg2[%c256, %c0_17] : memref<2304x384xbf16, #tpu.memory_space<vmem>>, vector<256x384xbf16>
      %cst_18 = arith.constant dense<0.000000e+00> : vector<3x384xf32>
      %17 = tpu.matmul %15, %16, %cst_18 {dimension_numbers = #tpu.dot_dimension_numbers<[1], [0], [0], [1], [0, 0, 1, 1], [], []>} : vector<3x256xbf16>, vector<256x384xbf16>, vector<3x384xf32> -> vector<3x384xf32>
      %18 = arith.addf %11, %17 : vector<3x384xf32>
      %c0_i32_19 = arith.constant 0 : i32
      %19 = arith.addi %arg5, %c0_i32_19 : i32
      %c0_20 = arith.constant 0 : index
      %20 = arith.index_cast %19 : i32 to index
      %c2 = arith.constant 2 : index
      %c0_21 = arith.constant 0 : index
      %21 = vector.load %arg1[%c0_20, %20, %c2, %c0_21] : memref<1x5x5x256xbf16, #tpu.memory_space<vmem>>, vector<1x1x3x256xbf16>
      %22 = vector.shape_cast %21 : vector<1x1x3x256xbf16> to vector<3x256xbf16>
      %c512 = arith.constant 512 : index
      %c0_22 = arith.constant 0 : index
      %23 = vector.load %arg2[%c512, %c0_22] : memref<2304x384xbf16, #tpu.memory_space<vmem>>, vector<256x384xbf16>
      %cst_23 = arith.constant dense<0.000000e+00> : vector<3x384xf32>
      %24 = tpu.matmul %22, %23, %cst_23 {dimension_numbers = #tpu.dot_dimension_numbers<[1], [0], [0], [1], [0, 0, 1, 1], [], []>} : vector<3x256xbf16>, vector<256x384xbf16>, vector<3x384xf32> -> vector<3x384xf32>
      %25 = arith.addf %18, %24 : vector<3x384xf32>
      %c1_i32_24 = arith.constant 1 : i32
      %26 = arith.addi %arg5, %c1_i32_24 : i32
      %c0_25 = arith.constant 0 : index
      %27 = arith.index_cast %26 : i32 to index
      %c0_26 = arith.constant 0 : index
      %c0_27 = arith.constant 0 : index
      %28 = vector.load %arg1[%c0_25, %27, %c0_26, %c0_27] : memref<1x5x5x256xbf16, #tpu.memory_space<vmem>>, vector<1x1x3x256xbf16>
      %29 = vector.shape_cast %28 : vector<1x1x3x256xbf16> to vector<3x256xbf16>
      %c768 = arith.constant 768 : index
      %c0_28 = arith.constant 0 : index
      %30 = vector.load %arg2[%c768, %c0_28] : memref<2304x384xbf16, #tpu.memory_space<vmem>>, vector<256x384xbf16>
      %cst_29 = arith.constant dense<0.000000e+00> : vector<3x384xf32>
      %31 = tpu.matmul %29, %30, %cst_29 {dimension_numbers = #tpu.dot_dimension_numbers<[1], [0], [0], [1], [0, 0, 1, 1], [], []>} : vector<3x256xbf16>, vector<256x384xbf16>, vector<3x384xf32> -> vector<3x384xf32>
      %32 = arith.addf %25, %31 : vector<3x384xf32>
      %c1_i32_30 = arith.constant 1 : i32
      %33 = arith.addi %arg5, %c1_i32_30 : i32
      %c0_31 = arith.constant 0 : index
      %34 = arith.index_cast %33 : i32 to index
      %c1_32 = arith.constant 1 : index
      %c0_33 = arith.constant 0 : index
      %35 = vector.load %arg1[%c0_31, %34, %c1_32, %c0_33] : memref<1x5x5x256xbf16, #tpu.memory_space<vmem>>, vector<1x1x3x256xbf16>
      %36 = vector.shape_cast %35 : vector<1x1x3x256xbf16> to vector<3x256xbf16>
      %c1024 = arith.constant 1024 : index
      %c0_34 = arith.constant 0 : index
      %37 = vector.load %arg2[%c1024, %c0_34] : memref<2304x384xbf16, #tpu.memory_space<vmem>>, vector<256x384xbf16>
      %cst_35 = arith.constant dense<0.000000e+00> : vector<3x384xf32>
      %38 = tpu.matmul %36, %37, %cst_35 {dimension_numbers = #tpu.dot_dimension_numbers<[1], [0], [0], [1], [0, 0, 1, 1], [], []>} : vector<3x256xbf16>, vector<256x384xbf16>, vector<3x384xf32> -> vector<3x384xf32>
      %39 = arith.addf %32, %38 : vector<3x384xf32>
      %c1_i32_36 = arith.constant 1 : i32
      %40 = arith.addi %arg5, %c1_i32_36 : i32
      %c0_37 = arith.constant 0 : index
      %41 = arith.index_cast %40 : i32 to index
      %c2_38 = arith.constant 2 : index
      %c0_39 = arith.constant 0 : index
      %42 = vector.load %arg1[%c0_37, %41, %c2_38, %c0_39] : memref<1x5x5x256xbf16, #tpu.memory_space<vmem>>, vector<1x1x3x256xbf16>
      %43 = vector.shape_cast %42 : vector<1x1x3x256xbf16> to vector<3x256xbf16>
      %c1280 = arith.constant 1280 : index
      %c0_40 = arith.constant 0 : index
      %44 = vector.load %arg2[%c1280, %c0_40] : memref<2304x384xbf16, #tpu.memory_space<vmem>>, vector<256x384xbf16>
      %cst_41 = arith.constant dense<0.000000e+00> : vector<3x384xf32>
      %45 = tpu.matmul %43, %44, %cst_41 {dimension_numbers = #tpu.dot_dimension_numbers<[1], [0], [0], [1], [0, 0, 1, 1], [], []>} : vector<3x256xbf16>, vector<256x384xbf16>, vector<3x384xf32> -> vector<3x384xf32>
      %46 = arith.addf %39, %45 : vector<3x384xf32>
      %c2_i32 = arith.constant 2 : i32
      %47 = arith.addi %arg5, %c2_i32 : i32
      %c0_42 = arith.constant 0 : index
      %48 = arith.index_cast %47 : i32 to index
      %c0_43 = arith.constant 0 : index
      %c0_44 = arith.constant 0 : index
      %49 = vector.load %arg1[%c0_42, %48, %c0_43, %c0_44] : memref<1x5x5x256xbf16, #tpu.memory_space<vmem>>, vector<1x1x3x256xbf16>
      %50 = vector.shape_cast %49 : vector<1x1x3x256xbf16> to vector<3x256xbf16>
      %c1536 = arith.constant 1536 : index
      %c0_45 = arith.constant 0 : index
      %51 = vector.load %arg2[%c1536, %c0_45] : memref<2304x384xbf16, #tpu.memory_space<vmem>>, vector<256x384xbf16>
      %cst_46 = arith.constant dense<0.000000e+00> : vector<3x384xf32>
      %52 = tpu.matmul %50, %51, %cst_46 {dimension_numbers = #tpu.dot_dimension_numbers<[1], [0], [0], [1], [0, 0, 1, 1], [], []>} : vector<3x256xbf16>, vector<256x384xbf16>, vector<3x384xf32> -> vector<3x384xf32>
      %53 = arith.addf %46, %52 : vector<3x384xf32>
      %c2_i32_47 = arith.constant 2 : i32
      %54 = arith.addi %arg5, %c2_i32_47 : i32
      %c0_48 = arith.constant 0 : index
      %55 = arith.index_cast %54 : i32 to index
      %c1_49 = arith.constant 1 : index
      %c0_50 = arith.constant 0 : index
      %56 = vector.load %arg1[%c0_48, %55, %c1_49, %c0_50] : memref<1x5x5x256xbf16, #tpu.memory_space<vmem>>, vector<1x1x3x256xbf16>
      %57 = vector.shape_cast %56 : vector<1x1x3x256xbf16> to vector<3x256xbf16>
      %c1792 = arith.constant 1792 : index
      %c0_51 = arith.constant 0 : index
      %58 = vector.load %arg2[%c1792, %c0_51] : memref<2304x384xbf16, #tpu.memory_space<vmem>>, vector<256x384xbf16>
      %cst_52 = arith.constant dense<0.000000e+00> : vector<3x384xf32>
      %59 = tpu.matmul %57, %58, %cst_52 {dimension_numbers = #tpu.dot_dimension_numbers<[1], [0], [0], [1], [0, 0, 1, 1], [], []>} : vector<3x256xbf16>, vector<256x384xbf16>, vector<3x384xf32> -> vector<3x384xf32>
      %60 = arith.addf %53, %59 : vector<3x384xf32>
      %c2_i32_53 = arith.constant 2 : i32
      %61 = arith.addi %arg5, %c2_i32_53 : i32
      %c0_54 = arith.constant 0 : index
      %62 = arith.index_cast %61 : i32 to index
      %c2_55 = arith.constant 2 : index
      %c0_56 = arith.constant 0 : index
      %63 = vector.load %arg1[%c0_54, %62, %c2_55, %c0_56] : memref<1x5x5x256xbf16, #tpu.memory_space<vmem>>, vector<1x1x3x256xbf16>
      %64 = vector.shape_cast %63 : vector<1x1x3x256xbf16> to vector<3x256xbf16>
      %c2048 = arith.constant 2048 : index
      %c0_57 = arith.constant 0 : index
      %65 = vector.load %arg2[%c2048, %c0_57] : memref<2304x384xbf16, #tpu.memory_space<vmem>>, vector<256x384xbf16>
      %cst_58 = arith.constant dense<0.000000e+00> : vector<3x384xf32>
      %66 = tpu.matmul %64, %65, %cst_58 {dimension_numbers = #tpu.dot_dimension_numbers<[1], [0], [0], [1], [0, 0, 1, 1], [], []>} : vector<3x256xbf16>, vector<256x384xbf16>, vector<3x384xf32> -> vector<3x384xf32>
      %67 = arith.addf %60, %66 : vector<3x384xf32>
      %68 = vector.broadcast %0 : vector<1x384xf32> to vector<3x384xf32>
      %69 = arith.addf %67, %68 : vector<3x384xf32>
      %cst_59 = arith.constant 0.000000e+00 : f32
      %70 = vector.broadcast %cst_59 : f32 to vector<3x384xf32>
      %71 = arith.maximumf %69, %70 : vector<3x384xf32>
      %72 = arith.truncf %71 : vector<3x384xf32> to vector<3x384xbf16>
      %c1_i32_60 = arith.constant 1 : i32
      %73 = arith.addi %c1_i32_60, %arg5 : i32
      %c0_61 = arith.constant 0 : index
      %74 = arith.index_cast %73 : i32 to index
      %c1_62 = arith.constant 1 : index
      %c0_63 = arith.constant 0 : index
      %75 = vector.load %arg4[%c0_61, %74, %c1_62, %c0_63] : memref<1x5x5x384xbf16, #tpu.memory_space<vmem>>, vector<1x1x3x384xbf16>
      %76 = vector.shape_cast %75 : vector<1x1x3x384xbf16> to vector<3x384xbf16>
      %77 = vector.shape_cast %72 : vector<3x384xbf16> to vector<1x1x3x384xbf16>
      tpu.vector_store %arg4[%c0_61, %74, %c1_62, %c0_63], %77 {strides = array<i32>} : memref<1x5x5x384xbf16, #tpu.memory_space<vmem>>, vector<1x1x3x384xbf16>,
    }
    %c3_i32_5 = arith.constant 3 : i32
    return
  }
  func.func @transform_0(%arg0: i32) -> (i32, i32, i32, i32) {
    %c0_i32 = arith.constant 0 : i32
    %c0_i32_0 = arith.constant 0 : i32
    %c0_i32_1 = arith.constant 0 : i32
    %c0_i32_2 = arith.constant 0 : i32
    return %arg0, %c0_i32, %c0_i32_0, %c0_i32_1 : i32, i32, i32, i32
  }
  func.func @transform_1(%arg0: i32) -> (i32, i32) {
    %c0_i32 = arith.constant 0 : i32
    %c0_i32_0 = arith.constant 0 : i32
    %c0_i32_1 = arith.constant 0 : i32
    return %c0_i32, %c0_i32_0 : i32, i32
  }
  func.func @transform_2(%arg0: i32) -> (i32, i32) {
    %c0_i32 = arith.constant 0 : i32
    %c0_i32_0 = arith.constant 0 : i32
    %c0_i32_1 = arith.constant 0 : i32
    return %c0_i32, %c0_i32_0 : i32, i32
  }
  func.func @transform_3(%arg0: i32) -> (i32, i32, i32, i32) {
    %c0_i32 = arith.constant 0 : i32
    %c0_i32_0 = arith.constant 0 : i32
    %c0_i32_1 = arith.constant 0 : i32
    %c0_i32_2 = arith.constant 0 : i32
    return %arg0, %c0_i32, %c0_i32_0, %c0_i32_1 : i32, i32, i32, i32
  }
}

module attributes {stable_mosaic.version = 11 : i64} {
  func.func @_conv_s1_kernel(%arg0: i32, %arg1: memref<1x5x5x256xbf16, #tpu.memory_space<vmem>>, %arg2: memref<2304x256xbf16, #tpu.memory_space<vmem>>, %arg3: memref<1x256xf32, #tpu.memory_space<vmem>>, %arg4: memref<1x3x3x256xbf16, #tpu.memory_space<vmem>>) attributes {dimension_semantics = [#tpu.dimension_semantics<parallel>], iteration_bounds = array<i64: 2>, scalar_prefetch = 0 : i64, scratch_operands = 0 : i64, tpu.core_type = #tpu.core_type<tc>, window_params = [{transform_indices = @transform_0, window_bounds = array<i64: 1, 5, 5, 256>}, {pipeline_mode = #tpu.pipeline_mode<synchronous>, transform_indices = @transform_1, window_bounds = array<i64: 2304, 256>}, {pipeline_mode = #tpu.pipeline_mode<synchronous>, transform_indices = @transform_2, window_bounds = array<i64: 1, 256>}, {transform_indices = @transform_3, window_bounds = array<i64: 1, 3, 3, 256>}]} {
    %c0 = arith.constant 0 : index
    %c0_0 = arith.constant 0 : index
    %0 = vector.load %arg3[%c0, %c0_0] : memref<1x256xf32, #tpu.memory_space<vmem>>, vector<1x256xf32>
    %cst = arith.constant 0.000000e+00 : bf16
    %1 = vector.broadcast %cst : bf16 to vector<1x3x3x256xbf16>
    %c0_1 = arith.constant 0 : index
    %c0_2 = arith.constant 0 : index
    %c0_3 = arith.constant 0 : index
    %c0_4 = arith.constant 0 : index
    %2 = vector.load %arg4[%c0_1, %c0_2, %c0_3, %c0_4] : memref<1x3x3x256xbf16, #tpu.memory_space<vmem>>, vector<1x3x3x256xbf16>
    tpu.vector_store %arg4[%c0_1, %c0_2, %c0_3, %c0_4], %1 {strides = array<i32>} : memref<1x3x3x256xbf16, #tpu.memory_space<vmem>>, vector<1x3x3x256xbf16>,
    %c0_i32 = arith.constant 0 : i32
    %c3_i32 = arith.constant 3 : i32
    %3 = arith.addi %c0_i32, %c3_i32 : i32
    %c1_i32 = arith.constant 1 : i32
    scf.for %arg5 = %c0_i32 to %3 step %c1_i32  : i32 {
      %cst_6 = arith.constant 0.000000e+00 : f32
      %4 = vector.broadcast %cst_6 : f32 to vector<3x256xf32>
      %c0_i32_7 = arith.constant 0 : i32
      %5 = arith.addi %arg5, %c0_i32_7 : i32
      %c0_8 = arith.constant 0 : index
      %6 = arith.index_cast %5 : i32 to index
      %c0_9 = arith.constant 0 : index
      %c0_10 = arith.constant 0 : index
      %7 = vector.load %arg1[%c0_8, %6, %c0_9, %c0_10] : memref<1x5x5x256xbf16, #tpu.memory_space<vmem>>, vector<1x1x3x256xbf16>
      %8 = vector.shape_cast %7 : vector<1x1x3x256xbf16> to vector<3x256xbf16>
      %c0_11 = arith.constant 0 : index
      %c0_12 = arith.constant 0 : index
      %9 = vector.load %arg2[%c0_11, %c0_12] : memref<2304x256xbf16, #tpu.memory_space<vmem>>, vector<256x256xbf16>
      %cst_13 = arith.constant dense<0.000000e+00> : vector<3x256xf32>
      %10 = tpu.matmul %8, %9, %cst_13 {dimension_numbers = #tpu.dot_dimension_numbers<[1], [0], [0], [1], [0, 0, 1, 1], [], []>} : vector<3x256xbf16>, vector<256x256xbf16>, vector<3x256xf32> -> vector<3x256xf32>
      %11 = arith.addf %4, %10 : vector<3x256xf32>
      %c0_i32_14 = arith.constant 0 : i32
      %12 = arith.addi %arg5, %c0_i32_14 : i32
      %c0_15 = arith.constant 0 : index
      %13 = arith.index_cast %12 : i32 to index
      %c1 = arith.constant 1 : index
      %c0_16 = arith.constant 0 : index
      %14 = vector.load %arg1[%c0_15, %13, %c1, %c0_16] : memref<1x5x5x256xbf16, #tpu.memory_space<vmem>>, vector<1x1x3x256xbf16>
      %15 = vector.shape_cast %14 : vector<1x1x3x256xbf16> to vector<3x256xbf16>
      %c256 = arith.constant 256 : index
      %c0_17 = arith.constant 0 : index
      %16 = vector.load %arg2[%c256, %c0_17] : memref<2304x256xbf16, #tpu.memory_space<vmem>>, vector<256x256xbf16>
      %cst_18 = arith.constant dense<0.000000e+00> : vector<3x256xf32>
      %17 = tpu.matmul %15, %16, %cst_18 {dimension_numbers = #tpu.dot_dimension_numbers<[1], [0], [0], [1], [0, 0, 1, 1], [], []>} : vector<3x256xbf16>, vector<256x256xbf16>, vector<3x256xf32> -> vector<3x256xf32>
      %18 = arith.addf %11, %17 : vector<3x256xf32>
      %c0_i32_19 = arith.constant 0 : i32
      %19 = arith.addi %arg5, %c0_i32_19 : i32
      %c0_20 = arith.constant 0 : index
      %20 = arith.index_cast %19 : i32 to index
      %c2 = arith.constant 2 : index
      %c0_21 = arith.constant 0 : index
      %21 = vector.load %arg1[%c0_20, %20, %c2, %c0_21] : memref<1x5x5x256xbf16, #tpu.memory_space<vmem>>, vector<1x1x3x256xbf16>
      %22 = vector.shape_cast %21 : vector<1x1x3x256xbf16> to vector<3x256xbf16>
      %c512 = arith.constant 512 : index
      %c0_22 = arith.constant 0 : index
      %23 = vector.load %arg2[%c512, %c0_22] : memref<2304x256xbf16, #tpu.memory_space<vmem>>, vector<256x256xbf16>
      %cst_23 = arith.constant dense<0.000000e+00> : vector<3x256xf32>
      %24 = tpu.matmul %22, %23, %cst_23 {dimension_numbers = #tpu.dot_dimension_numbers<[1], [0], [0], [1], [0, 0, 1, 1], [], []>} : vector<3x256xbf16>, vector<256x256xbf16>, vector<3x256xf32> -> vector<3x256xf32>
      %25 = arith.addf %18, %24 : vector<3x256xf32>
      %c1_i32_24 = arith.constant 1 : i32
      %26 = arith.addi %arg5, %c1_i32_24 : i32
      %c0_25 = arith.constant 0 : index
      %27 = arith.index_cast %26 : i32 to index
      %c0_26 = arith.constant 0 : index
      %c0_27 = arith.constant 0 : index
      %28 = vector.load %arg1[%c0_25, %27, %c0_26, %c0_27] : memref<1x5x5x256xbf16, #tpu.memory_space<vmem>>, vector<1x1x3x256xbf16>
      %29 = vector.shape_cast %28 : vector<1x1x3x256xbf16> to vector<3x256xbf16>
      %c768 = arith.constant 768 : index
      %c0_28 = arith.constant 0 : index
      %30 = vector.load %arg2[%c768, %c0_28] : memref<2304x256xbf16, #tpu.memory_space<vmem>>, vector<256x256xbf16>
      %cst_29 = arith.constant dense<0.000000e+00> : vector<3x256xf32>
      %31 = tpu.matmul %29, %30, %cst_29 {dimension_numbers = #tpu.dot_dimension_numbers<[1], [0], [0], [1], [0, 0, 1, 1], [], []>} : vector<3x256xbf16>, vector<256x256xbf16>, vector<3x256xf32> -> vector<3x256xf32>
      %32 = arith.addf %25, %31 : vector<3x256xf32>
      %c1_i32_30 = arith.constant 1 : i32
      %33 = arith.addi %arg5, %c1_i32_30 : i32
      %c0_31 = arith.constant 0 : index
      %34 = arith.index_cast %33 : i32 to index
      %c1_32 = arith.constant 1 : index
      %c0_33 = arith.constant 0 : index
      %35 = vector.load %arg1[%c0_31, %34, %c1_32, %c0_33] : memref<1x5x5x256xbf16, #tpu.memory_space<vmem>>, vector<1x1x3x256xbf16>
      %36 = vector.shape_cast %35 : vector<1x1x3x256xbf16> to vector<3x256xbf16>
      %c1024 = arith.constant 1024 : index
      %c0_34 = arith.constant 0 : index
      %37 = vector.load %arg2[%c1024, %c0_34] : memref<2304x256xbf16, #tpu.memory_space<vmem>>, vector<256x256xbf16>
      %cst_35 = arith.constant dense<0.000000e+00> : vector<3x256xf32>
      %38 = tpu.matmul %36, %37, %cst_35 {dimension_numbers = #tpu.dot_dimension_numbers<[1], [0], [0], [1], [0, 0, 1, 1], [], []>} : vector<3x256xbf16>, vector<256x256xbf16>, vector<3x256xf32> -> vector<3x256xf32>
      %39 = arith.addf %32, %38 : vector<3x256xf32>
      %c1_i32_36 = arith.constant 1 : i32
      %40 = arith.addi %arg5, %c1_i32_36 : i32
      %c0_37 = arith.constant 0 : index
      %41 = arith.index_cast %40 : i32 to index
      %c2_38 = arith.constant 2 : index
      %c0_39 = arith.constant 0 : index
      %42 = vector.load %arg1[%c0_37, %41, %c2_38, %c0_39] : memref<1x5x5x256xbf16, #tpu.memory_space<vmem>>, vector<1x1x3x256xbf16>
      %43 = vector.shape_cast %42 : vector<1x1x3x256xbf16> to vector<3x256xbf16>
      %c1280 = arith.constant 1280 : index
      %c0_40 = arith.constant 0 : index
      %44 = vector.load %arg2[%c1280, %c0_40] : memref<2304x256xbf16, #tpu.memory_space<vmem>>, vector<256x256xbf16>
      %cst_41 = arith.constant dense<0.000000e+00> : vector<3x256xf32>
      %45 = tpu.matmul %43, %44, %cst_41 {dimension_numbers = #tpu.dot_dimension_numbers<[1], [0], [0], [1], [0, 0, 1, 1], [], []>} : vector<3x256xbf16>, vector<256x256xbf16>, vector<3x256xf32> -> vector<3x256xf32>
      %46 = arith.addf %39, %45 : vector<3x256xf32>
      %c2_i32 = arith.constant 2 : i32
      %47 = arith.addi %arg5, %c2_i32 : i32
      %c0_42 = arith.constant 0 : index
      %48 = arith.index_cast %47 : i32 to index
      %c0_43 = arith.constant 0 : index
      %c0_44 = arith.constant 0 : index
      %49 = vector.load %arg1[%c0_42, %48, %c0_43, %c0_44] : memref<1x5x5x256xbf16, #tpu.memory_space<vmem>>, vector<1x1x3x256xbf16>
      %50 = vector.shape_cast %49 : vector<1x1x3x256xbf16> to vector<3x256xbf16>
      %c1536 = arith.constant 1536 : index
      %c0_45 = arith.constant 0 : index
      %51 = vector.load %arg2[%c1536, %c0_45] : memref<2304x256xbf16, #tpu.memory_space<vmem>>, vector<256x256xbf16>
      %cst_46 = arith.constant dense<0.000000e+00> : vector<3x256xf32>
      %52 = tpu.matmul %50, %51, %cst_46 {dimension_numbers = #tpu.dot_dimension_numbers<[1], [0], [0], [1], [0, 0, 1, 1], [], []>} : vector<3x256xbf16>, vector<256x256xbf16>, vector<3x256xf32> -> vector<3x256xf32>
      %53 = arith.addf %46, %52 : vector<3x256xf32>
      %c2_i32_47 = arith.constant 2 : i32
      %54 = arith.addi %arg5, %c2_i32_47 : i32
      %c0_48 = arith.constant 0 : index
      %55 = arith.index_cast %54 : i32 to index
      %c1_49 = arith.constant 1 : index
      %c0_50 = arith.constant 0 : index
      %56 = vector.load %arg1[%c0_48, %55, %c1_49, %c0_50] : memref<1x5x5x256xbf16, #tpu.memory_space<vmem>>, vector<1x1x3x256xbf16>
      %57 = vector.shape_cast %56 : vector<1x1x3x256xbf16> to vector<3x256xbf16>
      %c1792 = arith.constant 1792 : index
      %c0_51 = arith.constant 0 : index
      %58 = vector.load %arg2[%c1792, %c0_51] : memref<2304x256xbf16, #tpu.memory_space<vmem>>, vector<256x256xbf16>
      %cst_52 = arith.constant dense<0.000000e+00> : vector<3x256xf32>
      %59 = tpu.matmul %57, %58, %cst_52 {dimension_numbers = #tpu.dot_dimension_numbers<[1], [0], [0], [1], [0, 0, 1, 1], [], []>} : vector<3x256xbf16>, vector<256x256xbf16>, vector<3x256xf32> -> vector<3x256xf32>
      %60 = arith.addf %53, %59 : vector<3x256xf32>
      %c2_i32_53 = arith.constant 2 : i32
      %61 = arith.addi %arg5, %c2_i32_53 : i32
      %c0_54 = arith.constant 0 : index
      %62 = arith.index_cast %61 : i32 to index
      %c2_55 = arith.constant 2 : index
      %c0_56 = arith.constant 0 : index
      %63 = vector.load %arg1[%c0_54, %62, %c2_55, %c0_56] : memref<1x5x5x256xbf16, #tpu.memory_space<vmem>>, vector<1x1x3x256xbf16>
      %64 = vector.shape_cast %63 : vector<1x1x3x256xbf16> to vector<3x256xbf16>
      %c2048 = arith.constant 2048 : index
      %c0_57 = arith.constant 0 : index
      %65 = vector.load %arg2[%c2048, %c0_57] : memref<2304x256xbf16, #tpu.memory_space<vmem>>, vector<256x256xbf16>
      %cst_58 = arith.constant dense<0.000000e+00> : vector<3x256xf32>
      %66 = tpu.matmul %64, %65, %cst_58 {dimension_numbers = #tpu.dot_dimension_numbers<[1], [0], [0], [1], [0, 0, 1, 1], [], []>} : vector<3x256xbf16>, vector<256x256xbf16>, vector<3x256xf32> -> vector<3x256xf32>
      %67 = arith.addf %60, %66 : vector<3x256xf32>
      %68 = vector.broadcast %0 : vector<1x256xf32> to vector<3x256xf32>
      %69 = arith.addf %67, %68 : vector<3x256xf32>
      %cst_59 = arith.constant 0.000000e+00 : f32
      %70 = vector.broadcast %cst_59 : f32 to vector<3x256xf32>
      %71 = arith.maximumf %69, %70 : vector<3x256xf32>
      %72 = arith.truncf %71 : vector<3x256xf32> to vector<3x256xbf16>
      %c0_i32_60 = arith.constant 0 : i32
      %73 = arith.addi %c0_i32_60, %arg5 : i32
      %c0_61 = arith.constant 0 : index
      %74 = arith.index_cast %73 : i32 to index
      %c0_62 = arith.constant 0 : index
      %c0_63 = arith.constant 0 : index
      %75 = vector.load %arg4[%c0_61, %74, %c0_62, %c0_63] : memref<1x3x3x256xbf16, #tpu.memory_space<vmem>>, vector<1x1x3x256xbf16>
      %76 = vector.shape_cast %75 : vector<1x1x3x256xbf16> to vector<3x256xbf16>
      %77 = vector.shape_cast %72 : vector<3x256xbf16> to vector<1x1x3x256xbf16>
      tpu.vector_store %arg4[%c0_61, %74, %c0_62, %c0_63], %77 {strides = array<i32>} : memref<1x3x3x256xbf16, #tpu.memory_space<vmem>>, vector<1x1x3x256xbf16>,
    }
    %c3_i32_5 = arith.constant 3 : i32
    return
  }
  func.func @transform_0(%arg0: i32) -> (i32, i32, i32, i32) {
    %c0_i32 = arith.constant 0 : i32
    %c0_i32_0 = arith.constant 0 : i32
    %c0_i32_1 = arith.constant 0 : i32
    %c0_i32_2 = arith.constant 0 : i32
    return %arg0, %c0_i32, %c0_i32_0, %c0_i32_1 : i32, i32, i32, i32
  }
  func.func @transform_1(%arg0: i32) -> (i32, i32) {
    %c0_i32 = arith.constant 0 : i32
    %c0_i32_0 = arith.constant 0 : i32
    %c0_i32_1 = arith.constant 0 : i32
    return %c0_i32, %c0_i32_0 : i32, i32
  }
  func.func @transform_2(%arg0: i32) -> (i32, i32) {
    %c0_i32 = arith.constant 0 : i32
    %c0_i32_0 = arith.constant 0 : i32
    %c0_i32_1 = arith.constant 0 : i32
    return %c0_i32, %c0_i32_0 : i32, i32
  }
  func.func @transform_3(%arg0: i32) -> (i32, i32, i32, i32) {
    %c0_i32 = arith.constant 0 : i32
    %c0_i32_0 = arith.constant 0 : i32
    %c0_i32_1 = arith.constant 0 : i32
    %c0_i32_2 = arith.constant 0 : i32
    return %arg0, %c0_i32, %c0_i32_0, %c0_i32_1 : i32, i32, i32, i32
  }
}

</mosaic_0001>

<bundles_post_ra>
// kernel: features_forward.7
= control target key start
LH: loop header
LB: loop body
LE: loop exit
PB: predicated region body
PF: predicated region fallthrough
CT: control target
= control target key end

     0   :  { %v2448_v0 = vmov 0   ;;  %v2449_v2 = vmov 0.0   ;;  %vm837_vm0 = vcmask 1044480   ;;  %vm2450_vm1 = vmmov 0   ;;  %s3082_s1 = inlined_call_operand.vmem [shape: bf16[363,128], index: 1, kind: input, shape index: {}]   ;;  %s3083_s0 = inlined_call_operand.vmem [shape: bf16[450,363], index: 0, kind: input, shape index: {}]   ;;  %s3084_s2 = inlined_call_operand.vmem [shape: f32[1,128], index: 2, kind: input, shape index: {}]   ;;  %s3085_s3 = inlined_call_operand.vmem [shape: bf16[450,128], index: 3, kind: output, shape index: {}]  }
   0x1   :  { %844 = vmatprep.subr.bf16.mxu0 %v2448_v0  ;;  %v2310_v1 = vld [vmem:[%s3082_s1 + $0x38] sm:$0xff]   ;;  %2176 = vmatprep.subr.bf16.mxu1 %v2449_v2  ;;  %v2311_v3 = vld [vmem:[%s3082_s1 + $0x30] sm:$0xff]   ;;  %vm838_vm2 = vcmask 1045504   ;;  %v2451_v4 = vmov 65535   ;;  %v2312_v6 = vld [vmem:[%s3082_s1 + $0x28] sm:$0xff]   ;;  %vm749_vm3 = vcmask 875520  }
   0x2   :  { %845 = vmatpush1.bf16.msra.mxu0 %v2310_v1  ;;  %2190 = vmatprep.mubr.msk.bf16.mxu1 %vm2450_vm1, %v2449_v2  ;;  %v839_v5 = vsel %vm837_vm0, 4294967295, %v2451_v4  ;;  %v2319_v8 = vld [vmem:[%s3082_s1 + $0xb0] sm:$0x3f]   ;;  %v2313_v9 = vld [vmem:[%s3082_s1 + $0x20] sm:$0xff]   ;;  %v2321_v11 = vld [vmem:[%s3082_s1 + $0xa8] sm:$0xff]  }
   0x3   :  { %846 = vmatprep.subr.bf16.mxu0 %v2448_v0  ;;  %v840_v7 = vsel %vm838_vm2, %v839_v5, 0  ;;  %v2314_v12 = vld [vmem:[%s3082_s1 + $0x18] sm:$0xff]   ;;  %v2323_v13 = vld [vmem:[%s3082_s1 + $0xa0] sm:$0xff]   ;;  %v2315_v14 = vld [vmem:[%s3082_s1 + $0x10] sm:$0xff]  }
   0x4   :  { %v842_v10 = vand.u32 %v2319_v8, %v840_v7  ;;  %v2325_v15 = vld [vmem:[%s3082_s1 + $0x98] sm:$0xff]   ;;  %v2316_v16 = vld [vmem:[%s3082_s1 + $0x8] sm:$0xff]   ;;  %v2327_v17 = vld [vmem:[%s3082_s1 + $0x90] sm:$0xff]  }
   0x5   :  { %v2336_v18 = vld [vmem:[%s3083_s0 + $0x4] ss:$12 sps:$4 sm:$0xff]   ;;  %v2329_v20 = vld [vmem:[%s3082_s1 + $0x88] sm:$0xff]   ;;  %v2318_v21 = vld [vmem:[%s3082_s1 + $0x78] sm:$0xff]  }
   0x6   :  { %847 = vmatpush1.bf16.msra.mxu0 %v2311_v3  ;;  %2177 = vmatpush3.bf16.msra.mxu1 %v842_v10  ;;  %v2317_v19 = vld [vmem:[%s3082_s1] sm:$0xff]   ;;  %v2320_v23 = vld [vmem:[%s3082_s1 + $0x70] sm:$0xff]   ;;  %v2322_v25 = vld [vmem:[%s3082_s1 + $0x68] sm:$0xff]  }
   0x7   :  { %848 = vmatprep.subr.bf16.mxu0 %v2448_v0  ;;  %2178 = vmatprep.subr.bf16.mxu1 %v2449_v2  ;;  %v2331_v22 = vld [vmem:[%s3082_s1 + $0x80] sm:$0xff]   ;;  %v2332_v24 = vld [vmem:[%s3083_s0 + $0x8] ss:$12 sps:$4 sm:$0xff]   ;;  %v2326_v28 = vld [vmem:[%s3082_s1 + $0x58] sm:$0xff]  }
   0x8   :  { %876 = vmatprep.mubr.bf16.mxu0 %v2336_v18  ;;  %v2324_v26 = vld [vmem:[%s3082_s1 + $0x60] sm:$0xff]   ;;  %v2328_v29 = vld [vmem:[%s3082_s1 + $0x50] sm:$0xff]   ;;  %v2330_v31 = vld [vmem:[%s3082_s1 + $0x48] sm:$0xff]  }
   0x9   :  { %v2337_v27 = vld [vmem:[%s3083_s0 + $0x20] ss:$12 sps:$4 sm:$0xff]   ;;  %v2341_v30 = vld [vmem:[%s3083_s0 + $0x38] ss:$12 sps:$4 sm:$0xff]   ;;  %v2345_v33 = vld [vmem:[%s3083_s0 + $0x50] ss:$12 sps:$4 sm:$0xff]  }
   0xa   :  { %849 = vmatpush1.bf16.msra.mxu0 %v2312_v6  ;;  %2179 = vmatpush3.bf16.msra.mxu1 %v2321_v11  ;;  %v2333_v32 = vld [vmem:[%s3082_s1 + $0x40] sm:$0xff]   ;;  %v2338_v35 = vld [vmem:[%s3083_s0 + $0x1c] ss:$12 sps:$4 sm:$0xff]   ;;  %v2346_v41 = vld [vmem:[%s3083_s0 + $0x4c] ss:$12 sps:$4 sm:$0xff]  }
   0xb   :  { %850 = vmatprep.subr.bf16.mxu0 %v2448_v0  ;;  %2180 = vmatprep.subr.bf16.mxu1 %v2449_v2  ;;  %v2334_v34 = vld [vmem:[%s3083_s0] ss:$12 sps:$4 sm:$0xff]   ;;  %v2349_v36 = vld [vmem:[%s3083_s0 + $0x68] ss:$12 sps:$4 sm:$0xff]   ;;  %v2340_v37 = vld [vmem:[%s3083_s0 + $0x18] ss:$12 sps:$4 sm:$0xff]  }
   0xc   :  { %v2342_v38 = vld [vmem:[%s3083_s0 + $0x34] ss:$12 sps:$4 sm:$0xff]   ;;  %v2344_v40 = vld [vmem:[%s3083_s0 + $0x30] ss:$12 sps:$4 sm:$0xff]   ;;  %v2357_v42 = vld [vmem:[%s3083_s0 + $0x98] ss:$12 sps:$4 sm:$0xff]  }
   0xd   :  { %v2353_v39 = vld [vmem:[%s3083_s0 + $0x80] ss:$12 sps:$4 sm:$0xff]   ;;  %v2348_v43 = vld [vmem:[%s3083_s0 + $0x48] ss:$12 sps:$4 sm:$0xff]   ;;  %v2350_v44 = vld [vmem:[%s3083_s0 + $0x64] ss:$12 sps:$4 sm:$0xff]  }
   0xe   :  { %851 = vmatpush1.bf16.msra.mxu0 %v2313_v9  ;;  %2181 = vmatpush3.bf16.msra.mxu1 %v2323_v13  ;;  %v2361_v45 = vld [vmem:[%s3083_s0 + $0xb0] ss:$12 sps:$4 sm:$0xff]   ;;  %v2352_v46 = vld [vmem:[%s3083_s0 + $0x60] ss:$12 sps:$4 sm:$0xff]   ;;  %v2365_v48 = vld [vmem:[%s3083_s0 + $0xc8] ss:$12 sps:$4 sm:$0xff]  }
   0xf   :  { %852 = vmatprep.subr.bf16.mxu0 %v2448_v0  ;;  %2182 = vmatprep.subr.bf16.mxu1 %v2449_v2  ;;  %v2354_v47 = vld [vmem:[%s3083_s0 + $0x7c] ss:$12 sps:$4 sm:$0xff]   ;;  %v2356_v49 = vld [vmem:[%s3083_s0 + $0x78] ss:$12 sps:$4 sm:$0xff]   ;;  %v2358_v50 = vld [vmem:[%s3083_s0 + $0x94] ss:$12 sps:$4 sm:$0xff]  }
  0x10   :  { %v2369_v51 = vld [vmem:[%s3083_s0 + $0xe0] ss:$12 sps:$4 sm:$0xff]   ;;  %v2360_v52 = vld [vmem:[%s3083_s0 + $0x90] ss:$12 sps:$4 sm:$0xff]   ;;  %v2373_v54 = vld [vmem:[%s3083_s0 + $0xf8] ss:$12 sps:$4 sm:$0xff]  }
  0x11   :  { %v2362_v53 = vld [vmem:[%s3083_s0 + $0xac] ss:$12 sps:$4 sm:$0xff]   ;;  %v2364_v55 = vld [vmem:[%s3083_s0 + $0xa8] ss:$12 sps:$4 sm:$0xff]   ;;  %v2366_v56 = vld [vmem:[%s3083_s0 + $0xc4] ss:$12 sps:$4 sm:$0xff]  }
  0x12   :  { %853 = vmatpush1.bf16.msra.mxu0 %v2314_v12  ;;  %2183 = vmatpush3.bf16.msra.mxu1 %v2325_v15  ;;  %v2377_v57 = vld [vmem:[%s3083_s0 + $0x110] ss:$12 sps:$4 sm:$0xff]   ;;  %v2368_v58 = vld [vmem:[%s3083_s0 + $0xc0] ss:$12 sps:$4 sm:$0xff]   ;;  %v2381_v60 = vld [vmem:[%s3083_s0 + $0x128] ss:$12 sps:$4 sm:$0xff]  }
  0x13   :  { %854 = vmatprep.subr.bf16.mxu0 %v2448_v0  ;;  %2184 = vmatprep.subr.bf16.mxu1 %v2449_v2  ;;  %v2370_v59 = vld [vmem:[%s3083_s0 + $0xdc] ss:$12 sps:$4 sm:$0xff]   ;;  %v2372_v61 = vld [vmem:[%s3083_s0 + $0xd8] ss:$12 sps:$4 sm:$0xff]   ;;  %v2374_v62 = vld [vmem:[%s3083_s0 + $0xf4] ss:$12 sps:$4 sm:$0xff]  }
  0x14   :  { %v2385_v63 = vld [vmem:[%s3083_s0 + $0x140] ss:$12 sps:$4 sm:$0xff]   ;;  %v2389_v3 = vld [vmem:[%s3083_s0 + $0x158] ss:$12 sps:$4 sm:$0xff]   ;;  %v2380_v4 = vld [vmem:[%s3083_s0 + $0x108] ss:$12 sps:$4 sm:$0xff]  }
  0x15   :  { %v2378_v1 = vld [vmem:[%s3083_s0 + $0x10c] ss:$12 sps:$4 sm:$0xff]   ;;  %v2382_v5 = vld [vmem:[%s3083_s0 + $0x124] ss:$12 sps:$4 sm:$0xff]   ;;  %v2386_v8 = vld [vmem:[%s3083_s0 + $0x13c] ss:$12 sps:$4 sm:$0xff]  }
  0x16   :  { %855 = vmatpush1.bf16.msra.mxu0 %v2315_v14  ;;  %2185 = vmatpush3.bf16.msra.mxu1 %v2327_v17  ;;  %v2393_v6 = vld [vmem:[%s3083_s0 + $0x170] ss:$12 sps:$4 sm:$0xff]   ;;  %v2384_v7 = vld [vmem:[%s3083_s0 + $0x120] ss:$12 sps:$4 sm:$0xff]   ;;  %v2397_v9 = vld [vmem:[%s3083_s0 + $0x188] ss:$12 sps:$4 sm:$0xff]  }
  0x17   :  { %856 = vmatprep.subr.bf16.mxu0 %v2448_v0  ;;  %2186 = vmatprep.subr.bf16.mxu1 %v2449_v2  ;;  %v2388_v10 = vld [vmem:[%s3083_s0 + $0x138] ss:$12 sps:$4 sm:$0xff]   ;;  %v2390_v11 = vld [vmem:[%s3083_s0 + $0x154] ss:$12 sps:$4 sm:$0xff]   ;;  %v2392_v13 = vld [vmem:[%s3083_s0 + $0x150] ss:$12 sps:$4 sm:$0xff]  }
  0x18   :  { %v2401_v12 = vld [vmem:[%s3083_s0 + $0x1a0] ss:$12 sps:$4 sm:$0xff]   ;;  %v2405_v15 = vld [vmem:[%s3083_s0 + $0x1b8] ss:$12 sps:$4 sm:$0xff]   ;;  %v2409_v18 = vld [vmem:[%s3083_s0 + $0x1d0] ss:$12 sps:$4 sm:$0xff]  }
  0x19   :  { %v2394_v14 = vld [vmem:[%s3083_s0 + $0x16c] ss:$12 sps:$4 sm:$0xff]   ;;  %v2398_v17 = vld [vmem:[%s3083_s0 + $0x184] ss:$12 sps:$4 sm:$0xff]  }
  0x1a   :  { %857 = vmatpush1.bf16.msra.mxu0 %v2316_v16  ;;  %2187 = vmatpush3.bf16.msra.mxu1 %v2329_v20  ;;  %v2396_v16 = vld [vmem:[%s3083_s0 + $0x168] ss:$12 sps:$4 sm:$0xff]  }
  0x1b   :  { %858 = vmatprep.subr.bf16.mxu0 %v2448_v0  ;;  %2188 = vmatprep.subr.bf16.mxu1 %v2449_v2  ;;  %v2402_v20 = vld [vmem:[%s3083_s0 + $0x19c] ss:$12 sps:$4 sm:$0xff]  }
  0x1e   :  { %859 = vmatpush1.bf16.msra.mxu0 %v2317_v19  ;;  %2189 = vmatpush3.bf16.msra.mxu1 %v2331_v22  ;;  %v2400_v19 = vld [vmem:[%s3083_s0 + $0x180] ss:$12 sps:$4 sm:$0xff]   ;;  %v2404_v22 = vld [vmem:[%s3083_s0 + $0x198] ss:$12 sps:$4 sm:$0xff]  }
  0x1f   :  { %860 = vmatprep.subr.bf16.mxu0 %v2448_v0 }
  0x21   :  { %2191 = vmatmul.mubr.msk.bf16.vlgmr.msra.gmra.mxu1 %vm749_vm3, %v2332_v24  ;;  %v2417_v24 = vld [vmem:[%s3083_s0 + $0x200] ss:$12 sps:$4 sm:$0xff]  }
  0x22   :  { %861 = vmatpush2.bf16.msra.mxu0 %v2318_v21  ;;  %2194 = vmatprep.mubr.msk.bf16.mxu1 %vm2450_vm1, %v2449_v2  ;;  %v2413_v21 = vld [vmem:[%s3083_s0 + $0x1e8] ss:$12 sps:$4 sm:$0xff]  }
  0x23   :  { %862 = vmatprep.subr.bf16.mxu0 %v2448_v0 }
  0x26   :  { %863 = vmatpush2.bf16.msra.mxu0 %v2320_v23  ;;  %v2406_v23 = vld [vmem:[%s3083_s0 + $0x1b4] ss:$12 sps:$4 sm:$0xff]  }
  0x27   :  { %864 = vmatprep.subr.bf16.mxu0 %v2448_v0 }
  0x29   :  { %2195 = vmatmul.mubr.msk.bf16.gmra.mxu1 %vm749_vm3, %v2337_v27  ;;  %v2421_v27 = vld [vmem:[%s3083_s0 + $0x218] ss:$12 sps:$4 sm:$0xff]  }
  0x2a   :  { %865 = vmatpush2.bf16.msra.mxu0 %v2322_v25  ;;  %2198 = vmatprep.mubr.msk.bf16.mxu1 %vm2450_vm1, %v2449_v2  ;;  %v2408_v25 = vld [vmem:[%s3083_s0 + $0x1b0] ss:$12 sps:$4 sm:$0xff]  }
  0x2b   :  { %866 = vmatprep.subr.bf16.mxu0 %v2448_v0 }
  0x2e   :  { %867 = vmatpush2.bf16.msra.mxu0 %v2324_v26  ;;  %v2410_v26 = vld [vmem:[%s3083_s0 + $0x1cc] ss:$12 sps:$4 sm:$0xff]  }
  0x2f   :  { %868 = vmatprep.subr.bf16.mxu0 %v2448_v0 }
  0x31   :  { %2199 = vmatmul.mubr.msk.bf16.gmra.mxu1 %vm749_vm3, %v2341_v30  ;;  %v2425_v30 = vld [vmem:[%s3083_s0 + $0x230] ss:$12 sps:$4 sm:$0xff]  }
  0x32   :  { %869 = vmatpush2.bf16.msra.mxu0 %v2326_v28  ;;  %2202 = vmatprep.mubr.msk.bf16.mxu1 %vm2450_vm1, %v2449_v2  ;;  %v2412_v28 = vld [vmem:[%s3083_s0 + $0x1c8] ss:$12 sps:$4 sm:$0xff]  }
  0x33   :  { %870 = vmatprep.subr.bf16.mxu0 %v2448_v0 }
  0x36   :  { %871 = vmatpush2.bf16.msra.mxu0 %v2328_v29  ;;  %v2414_v29 = vld [vmem:[%s3083_s0 + $0x1e4] ss:$12 sps:$4 sm:$0xff]  }
  0x37   :  { %872 = vmatprep.subr.bf16.mxu0 %v2448_v0 }
  0x39   :  { %2203 = vmatmul.mubr.msk.bf16.gmra.mxu1 %vm749_vm3, %v2345_v33  ;;  %v2429_v33 = vld [vmem:[%s3083_s0 + $0x248] ss:$12 sps:$4 sm:$0xff]  }
  0x3a   :  { %873 = vmatpush2.bf16.msra.mxu0 %v2330_v31  ;;  %2206 = vmatprep.mubr.msk.bf16.mxu1 %vm2450_vm1, %v2449_v2  ;;  %v2416_v31 = vld [vmem:[%s3083_s0 + $0x1e0] ss:$12 sps:$4 sm:$0xff]  }
  0x3b   :  { %874 = vmatprep.subr.bf16.mxu0 %v2448_v0  ;;  %v2376_v0 = vld [vmem:[%s3083_s0 + $0xf0] ss:$12 sps:$4 sm:$0xff]  }
  0x3e   :  { %875 = vmatpush2.bf16.msra.mxu0 %v2333_v32  ;;  %v2418_v32 = vld [vmem:[%s3083_s0 + $0x1fc] ss:$12 sps:$4 sm:$0xff]  }
  0x41   :  { %877 = vmatmul.mubr.bf16.vlgmr.msra.gmra.mxu0 %v2334_v34  ;;  %2207 = vmatmul.mubr.msk.bf16.gmra.mxu1 %vm749_vm3, %v2349_v36  ;;  %v2420_v34 = vld [vmem:[%s3083_s0 + $0x1f8] ss:$12 sps:$4 sm:$0xff]  }
  0x42   :  { %884 = vmatprep.mubr.bf16.mxu0 %v2338_v35  ;;  %2210 = vmatprep.mubr.msk.bf16.mxu1 %vm2450_vm1, %v2449_v2  ;;  %v2422_v35 = vld [vmem:[%s3083_s0 + $0x214] ss:$12 sps:$4 sm:$0xff]  }
  0x49   :  { %885 = vmatmul.mubr.bf16.gmra.mxu0 %v2340_v37  ;;  %2211 = vmatmul.mubr.msk.bf16.gmra.mxu1 %vm749_vm3, %v2353_v39  ;;  %v2433_v39 = vld [vmem:[%s3083_s0 + $0x260] ss:$12 sps:$4 sm:$0xff]  }
  0x4a   :  { %892 = vmatprep.mubr.bf16.mxu0 %v2342_v38  ;;  %2214 = vmatprep.mubr.msk.bf16.mxu1 %vm2450_vm1, %v2449_v2 }
  0x51   :  { %893 = vmatmul.mubr.bf16.gmra.mxu0 %v2344_v40  ;;  %2215 = vmatmul.mubr.msk.bf16.gmra.mxu1 %vm749_vm3, %v2357_v42  ;;  %v2424_v40 = vld [vmem:[%s3083_s0 + $0x210] ss:$12 sps:$4 sm:$0xff]  }
  0x52   :  { %900 = vmatprep.mubr.bf16.mxu0 %v2346_v41  ;;  %2218 = vmatprep.mubr.msk.bf16.mxu1 %vm2450_vm1, %v2449_v2  ;;  %v2426_v41 = vld [vmem:[%s3083_s0 + $0x22c] ss:$12 sps:$4 sm:$0xff]  }
  0x59   :  { %901 = vmatmul.mubr.bf16.gmra.mxu0 %v2348_v43  ;;  %2219 = vmatmul.mubr.msk.bf16.gmra.mxu1 %vm749_vm3, %v2361_v45 }
  0x5a   :  { %908 = vmatprep.mubr.bf16.mxu0 %v2350_v44  ;;  %2222 = vmatprep.mubr.msk.bf16.mxu1 %vm2450_vm1, %v2449_v2 }
  0x61   :  { %909 = vmatmul.mubr.bf16.gmra.mxu0 %v2352_v46  ;;  %2223 = vmatmul.mubr.msk.bf16.gmra.mxu1 %vm749_vm3, %v2365_v48  ;;  %v2437_v46 = vld [vmem:[%s3083_s0 + $0x278] ss:$12 sps:$4 sm:$0xff]  }
  0x62   :  { %916 = vmatprep.mubr.bf16.mxu0 %v2354_v47  ;;  %2226 = vmatprep.mubr.msk.bf16.mxu1 %vm2450_vm1, %v2449_v2  ;;  %v2428_v47 = vld [vmem:[%s3083_s0 + $0x228] ss:$12 sps:$4 sm:$0xff]   ;;  %v2430_v48 = vld [vmem:[%s3083_s0 + $0x244] ss:$12 sps:$4 sm:$0xff]  }
  0x69   :  { %917 = vmatmul.mubr.bf16.gmra.mxu0 %v2356_v49  ;;  %2227 = vmatmul.mubr.msk.bf16.gmra.mxu1 %vm749_vm3, %v2369_v51 }
  0x6a   :  { %924 = vmatprep.mubr.bf16.mxu0 %v2358_v50  ;;  %2230 = vmatprep.mubr.msk.bf16.mxu1 %vm2450_vm1, %v2449_v2 }
  0x71   :  { %925 = vmatmul.mubr.bf16.gmra.mxu0 %v2360_v52  ;;  %2231 = vmatmul.mubr.msk.bf16.gmra.mxu1 %vm749_vm3, %v2373_v54  ;;  %v2432_v54 = vld [vmem:[%s3083_s0 + $0x240] ss:$12 sps:$4 sm:$0xff]  }
  0x72   :  { %932 = vmatprep.mubr.bf16.mxu0 %v2362_v53  ;;  %2234 = vmatprep.mubr.msk.bf16.mxu1 %vm2450_vm1, %v2449_v2  ;;  %v2441_v53 = vld [vmem:[%s3083_s0 + $0x290] ss:$12 sps:$4 sm:$0xff]  }
  0x79   :  { %933 = vmatmul.mubr.bf16.gmra.mxu0 %v2364_v55  ;;  %2235 = vmatmul.mubr.msk.bf16.gmra.mxu1 %vm749_vm3, %v2377_v57  ;;  %v2434_v55 = vld [vmem:[%s3083_s0 + $0x25c] ss:$12 sps:$4 sm:$0xff]   ;;  %v2891_v57 = vld [vmem:[%s3084_s2] ss:$0 sm:$0xff] }
  0x7a   :  { %940 = vmatprep.mubr.bf16.mxu0 %v2366_v56  ;;  %2238 = vmatprep.mubr.msk.bf16.mxu1 %vm2450_vm1, %v2449_v2 }
  0x81   :  { %941 = vmatmul.mubr.bf16.gmra.mxu0 %v2368_v58  ;;  %2239 = vmatmul.mubr.msk.bf16.gmra.mxu1 %vm749_vm3, %v2381_v60 }
  0x82   :  { %948 = vmatprep.mubr.bf16.mxu0 %v2370_v59  ;;  %2242 = vmatprep.mubr.msk.bf16.mxu1 %vm2450_vm1, %v2449_v2 }
  0x89   :  { %949 = vmatmul.mubr.bf16.gmra.mxu0 %v2372_v61  ;;  %2243 = vmatmul.mubr.msk.bf16.gmra.mxu1 %vm749_vm3, %v2385_v63 }
  0x8a   :  { %956 = vmatprep.mubr.bf16.mxu0 %v2374_v62  ;;  %2246 = vmatprep.mubr.msk.bf16.mxu1 %vm2450_vm1, %v2449_v2 }
  0x91   :  { %957 = vmatmul.mubr.bf16.gmra.mxu0 %v2376_v0  ;;  %2247 = vmatmul.mubr.msk.bf16.gmra.mxu1 %vm749_vm3, %v2389_v3  ;;  %v2445_v0 = vld [vmem:[%s3083_s0 + $0x2a8] ss:$0 sps:$4 sm:$0x11]   ;;  %v2436_v3 = vld [vmem:[%s3083_s0 + $0x258] ss:$12 sps:$4 sm:$0xff]  }
  0x92   :  { %964 = vmatprep.mubr.bf16.mxu0 %v2378_v1  ;;  %2250 = vmatprep.mubr.msk.bf16.mxu1 %vm2450_vm1, %v2449_v2 }
  0x99   :  { %965 = vmatmul.mubr.bf16.gmra.mxu0 %v2380_v4  ;;  %2251 = vmatmul.mubr.msk.bf16.gmra.mxu1 %vm749_vm3, %v2393_v6 }
  0x9a   :  { %972 = vmatprep.mubr.bf16.mxu0 %v2382_v5  ;;  %2254 = vmatprep.mubr.msk.bf16.mxu1 %vm2450_vm1, %v2449_v2 }
  0xa1   :  { %973 = vmatmul.mubr.bf16.gmra.mxu0 %v2384_v7  ;;  %2255 = vmatmul.mubr.msk.bf16.gmra.mxu1 %vm749_vm3, %v2397_v9 }
  0xa2   :  { %980 = vmatprep.mubr.bf16.mxu0 %v2386_v8  ;;  %2258 = vmatprep.mubr.msk.bf16.mxu1 %vm2450_vm1, %v2449_v2 }
  0xa9   :  { %981 = vmatmul.mubr.bf16.gmra.mxu0 %v2388_v10  ;;  %2259 = vmatmul.mubr.msk.bf16.gmra.mxu1 %vm749_vm3, %v2401_v12 }
  0xaa   :  { %988 = vmatprep.mubr.bf16.mxu0 %v2390_v11  ;;  %2262 = vmatprep.mubr.msk.bf16.mxu1 %vm2450_vm1, %v2449_v2 }
  0xb1   :  { %989 = vmatmul.mubr.bf16.gmra.mxu0 %v2392_v13  ;;  %2263 = vmatmul.mubr.msk.bf16.gmra.mxu1 %vm749_vm3, %v2405_v15 }
  0xb2   :  { %996 = vmatprep.mubr.bf16.mxu0 %v2394_v14  ;;  %2266 = vmatprep.mubr.msk.bf16.mxu1 %vm2450_vm1, %v2449_v2 }
  0xb9   :  { %997 = vmatmul.mubr.bf16.gmra.mxu0 %v2396_v16  ;;  %2267 = vmatmul.mubr.msk.bf16.gmra.mxu1 %vm749_vm3, %v2409_v18 }
  0xba   :  { %1004 = vmatprep.mubr.bf16.mxu0 %v2398_v17  ;;  %2270 = vmatprep.mubr.msk.bf16.mxu1 %vm2450_vm1, %v2449_v2 }
  0xc1   :  { %1005 = vmatmul.mubr.bf16.gmra.mxu0 %v2400_v19  ;;  %2271 = vmatmul.mubr.msk.bf16.gmra.mxu1 %vm749_vm3, %v2413_v21  ;;  %v2440_v19 = vld [vmem:[%s3083_s0 + $0x270] ss:$12 sps:$4 sm:$0xff]  }
  0xc2   :  { %1012 = vmatprep.mubr.bf16.mxu0 %v2402_v20  ;;  %2274 = vmatprep.mubr.msk.bf16.mxu1 %vm2450_vm1, %v2449_v2 }
  0xc9   :  { %1013 = vmatmul.mubr.bf16.gmra.mxu0 %v2404_v22  ;;  %2275 = vmatmul.mubr.msk.bf16.gmra.mxu1 %vm749_vm3, %v2417_v24  ;;  %v2442_v22 = vld [vmem:[%s3083_s0 + $0x28c] ss:$12 sps:$4 sm:$0xff]  }
  0xca   :  { %1020 = vmatprep.mubr.bf16.mxu0 %v2406_v23  ;;  %2278 = vmatprep.mubr.msk.bf16.mxu1 %vm2450_vm1, %v2449_v2 }
  0xd1   :  { %1021 = vmatmul.mubr.bf16.gmra.mxu0 %v2408_v25  ;;  %2279 = vmatmul.mubr.msk.bf16.gmra.mxu1 %vm749_vm3, %v2421_v27 }
  0xd2   :  { %1028 = vmatprep.mubr.bf16.mxu0 %v2410_v26  ;;  %2282 = vmatprep.mubr.msk.bf16.mxu1 %vm2450_vm1, %v2449_v2 }
  0xd9   :  { %1029 = vmatmul.mubr.bf16.gmra.mxu0 %v2412_v28  ;;  %2283 = vmatmul.mubr.msk.bf16.gmra.mxu1 %vm749_vm3, %v2425_v30 }
  0xda   :  { %1036 = vmatprep.mubr.bf16.mxu0 %v2414_v29  ;;  %2286 = vmatprep.mubr.msk.bf16.mxu1 %vm2450_vm1, %v2449_v2 }
  0xe1   :  { %1037 = vmatmul.mubr.bf16.gmra.mxu0 %v2416_v31  ;;  %v1142_v36 = vpop.f32.mrf.mxu1  ;;  %2287 = vmatmul.mubr.msk.bf16.gmra.mxu1 %vm749_vm3, %v2429_v33  ;;  %v127_v33 = vld [vmem:[%s3083_s0 + $0x2a0] sm:$0x11] }
  0xe2   :  { %1044 = vmatprep.mubr.bf16.mxu0 %v2418_v32  ;;  %2290 = vmatprep.mubr.msk.bf16.mxu1 %vm2450_vm1, %v2449_v2 }
  0xe3   :  { %v2192_v37 = vpop.f32.mrf.mxu1 }
  0xe4   :  { %v2444_v37 = vld [vmem:[%s3083_s0 + $0x288] ss:$12 sps:$4 sm:$0xff]  }
  0xe5   :  { %v1145_v38 = vpop.f32.mrf.mxu1 }
  0xe7   :  { %v2193_v42 = vpop.f32.mrf.mxu1 }
  0xe9   :  { %1045 = vmatmul.mubr.bf16.gmra.mxu0 %v2420_v34  ;;  %v1150_v43 = vpop.f32.mrf.mxu1  ;;  %2291 = vmatmul.mubr.msk.bf16.gmra.mxu1 %vm749_vm3, %v2433_v39 }
  0xea   :  { %1052 = vmatprep.mubr.bf16.mxu0 %v2422_v35  ;;  %2294 = vmatprep.mubr.msk.bf16.mxu1 %vm2450_vm1, %v2449_v2 }
  0xeb   :  { %v2196_v44 = vpop.f32.mrf.mxu1 }
  0xed   :  { %v1153_v45 = vpop.f32.mrf.mxu1 }
  0xef   :  { %v2197_v49 = vpop.f32.mrf.mxu1 }
  0xf1   :  { %1053 = vmatmul.mubr.bf16.gmra.mxu0 %v2424_v40  ;;  %v2872_v50 = vpop.f32.mrf.mxu1  ;;  %2295 = vmatmul.mubr.msk.bf16.gmra.mxu1 %vm749_vm3, %v2437_v46  ;;  %v1805_v40 = vcombine.high %v127_v33, %v127_v33 }
  0xf2   :  { %1060 = vmatprep.mubr.bf16.mxu0 %v2426_v41  ;;  %2298 = vmatprep.mubr.msk.bf16.mxu1 %vm2450_vm1, %v2449_v2 }
  0xf3   :  { %v2200_v51 = vpop.f32.mrf.mxu1 }
  0xf5   :  { %v2877_v52 = vpop.f32.mrf.mxu1 }
  0xf7   :  { %v2201_v56 = vpop.f32.mrf.mxu1 }
  0xf9   :  { %1061 = vmatmul.mubr.bf16.gmra.mxu0 %v2428_v47  ;;  %v2893_v58 = vpop.f32.mrf.mxu1  ;;  %2299 = vmatmul.mubr.msk.bf16.gmra.mxu1 %vm749_vm3, %v2441_v53 }
  0xfa   :  { %1068 = vmatprep.mubr.bf16.mxu0 %v2430_v48  ;;  %2302 = vmatprep.mubr.msk.bf16.mxu1 %vm2450_vm1, %v2449_v2  ;;  %v2438_v2 = vld [vmem:[%s3083_s0 + $0x274] ss:$12 sps:$4 sm:$0xff]  }
  0xfb   :  { %v2204_v61 = vpop.f32.mrf.mxu1 }
  0xfd   :  { %v2899_v63 = vpop.f32.mrf.mxu1 }
  0xff   :  { %v2205_v6 = vpop.f32.mrf.mxu1 }
 0x101   :  { %v878_v59 = vpop.f32.mrf.mxu0  ;;  %1069 = vmatmul.mubr.bf16.gmra.mxu0 %v2432_v54  ;;  %v2911_v9 = vpop.f32.mrf.mxu1  ;;  %2303 = vmatmul.mubr.msk.bf16.gmra.mxu1 %vm749_vm3, %v2445_v0 }
 0x102   :  { %v879_v60 = vadd.f32 %v2891_v57, %v878_v59  ;;  %1076 = vmatprep.mubr.bf16.mxu0 %v2434_v55  ;;  %v1804_v55 = vcombine.low %v127_v33, %v127_v33 }
 0x103   :  { %v880_v62 = vpop.f32.mrf.mxu0  ;;  %v2208_v14 = vpop.f32.mrf.mxu1 }
 0x104   :  { %v1143_v4 = vadd.f32 %v1142_v36, %v879_v60 }
 0x105   :  { %v881_v1 = vpop.f32.mrf.mxu0  ;;  %v2915_v17 = vpop.f32.mrf.mxu1 }
 0x106   :  { %v882_v5 = vadd.f32 %v2891_v57, %v881_v1  ;;  %v1372_v11 = vmax.f32 %v1143_v4, 0.0 }
 0x107   :  { %v883_v7 = vpop.f32.mrf.mxu0  ;;  %v2209_v23 = vpop.f32.mrf.mxu1 }
 0x108   :  { %v1146_v8 = vadd.f32 %v1145_v38, %v882_v5 }
 0x109   :  { %v886_v10 = vpop.f32.mrf.mxu0  ;;  %1077 = vmatmul.mubr.bf16.gmra.mxu0 %v2436_v3  ;;  %v2927_v26 = vpop.f32.mrf.mxu1 }
 0x10a   :  { %v1373_v12 = vmax.f32 %v1146_v8, 0.0  ;;  %v887_v13 = vadd.f32 %v2891_v57, %v886_v10  ;;  %1084 = vmatprep.mubr.bf16.mxu0 %v2438_v2 }
 0x10b   :  { %v888_v15 = vpop.f32.mrf.mxu0  ;;  %v2212_v31 = vpop.f32.mrf.mxu1 }
 0x10c   :  { %v1976_v16 = vpack.c.bf16 %v1373_v12, %v1372_v11  ;;  %v1151_v20 = vadd.f32 %v1150_v43, %v887_v13 }
 0x10d   :  { %v889_v18 = vpop.f32.mrf.mxu0  ;;  %v1185_v35 = vpop.f32.mrf.mxu1 }
 0x10e   :  { %1977 = vst [vmem:[%s3085_s3] sm:$0xff] %v1976_v16   ;;  %v890_v21 = vadd.f32 %v2891_v57, %v889_v18  ;;  %v1374_v28 = vmax.f32 %v1151_v20, 0.0 }
 0x10f   :  { %v891_v24 = vpop.f32.mrf.mxu0  ;;  %v2213_v41 = vpop.f32.mrf.mxu1 }
 0x110   :  { %v1154_v25 = vadd.f32 %v1153_v45, %v890_v21 }
 0x111   :  { %v894_v27 = vpop.f32.mrf.mxu0  ;;  %1085 = vmatmul.mubr.bf16.gmra.mxu0 %v2440_v19  ;;  %v2942_v44 = vpop.f32.mrf.mxu1 }
 0x112   :  { %v1375_v29 = vmax.f32 %v1154_v25, 0.0  ;;  %v895_v30 = vadd.f32 %v2891_v57, %v894_v27  ;;  %1092 = vmatprep.mubr.bf16.mxu0 %v2442_v22 }
 0x113   :  { %v896_v32 = vpop.f32.mrf.mxu0  ;;  %v2216_v49 = vpop.f32.mrf.mxu1 }
 0x114   :  { %v1981_v34 = vpack.c.bf16 %v1375_v29, %v1374_v28  ;;  %v1159_v38 = vadd.f32 %v2872_v50, %v895_v30 }
 0x115   :  { %v897_v36 = vpop.f32.mrf.mxu0  ;;  %v1193_v50 = vpop.f32.mrf.mxu1 }
 0x116   :  { %2113 = vst [vmem:[%s3085_s3 + $0x8] sm:$0xff] %v1981_v34   ;;  %v898_v39 = vadd.f32 %v2891_v57, %v897_v36  ;;  %v1376_v46 = vmax.f32 %v1159_v38, 0.0 }
 0x117   :  { %v899_v42 = vpop.f32.mrf.mxu0  ;;  %v2217_v59 = vpop.f32.mrf.mxu1 }
 0x118   :  { %v1162_v43 = vadd.f32 %v2877_v52, %v898_v39 }
 0x119   :  { %v902_v45 = vpop.f32.mrf.mxu0  ;;  %1093 = vmatmul.mubr.bf16.gmra.mxu0 %v2444_v37  ;;  %v1198_v62 = vpop.f32.mrf.mxu1 }
 0x11a   :  { %v1377_v47 = vmax.f32 %v1162_v43, 0.0  ;;  %v903_v48 = vadd.f32 %v2891_v57, %v902_v45  ;;  %1100 = vmatprep.mubr.bf16.mxu0 %v1805_v40 }
 0x11b   :  { %v904_v51 = vpop.f32.mrf.mxu0  ;;  %v2220_v5 = vpop.f32.mrf.mxu1 }
 0x11c   :  { %v1986_v53 = vpack.c.bf16 %v1377_v47, %v1376_v46  ;;  %v1167_v52 = vadd.f32 %v2893_v58, %v903_v48 }
 0x11d   :  { %v905_v54 = vpop.f32.mrf.mxu0  ;;  %v1201_v7 = vpop.f32.mrf.mxu1 }
 0x11e   :  { %2114 = vst [vmem:[%s3085_s3 + $0x10] sm:$0xff] %v1986_v53   ;;  %v906_v56 = vadd.f32 %v2891_v57, %v905_v54  ;;  %v1378_v1 = vmax.f32 %v1167_v52, 0.0 }
 0x11f   :  { %v907_v60 = vpop.f32.mrf.mxu0  ;;  %v2221_v10 = vpop.f32.mrf.mxu1 }
 0x120   :  { %v1170_v61 = vadd.f32 %v2899_v63, %v906_v56 }
 0x121   :  { %v910_v0 = vpop.f32.mrf.mxu0  ;;  %1101 = vmatmul.mubr.bf16.gmra.mxu0 %v1804_v55  ;;  %v1206_v13 = vpop.f32.mrf.mxu1 }
 0x122   :  { %v1379_v3 = vmax.f32 %v1170_v61, 0.0  ;;  %v911_v4 = vadd.f32 %v2891_v57, %v910_v0 }
 0x123   :  { %v912_v2 = vpop.f32.mrf.mxu0  ;;  %v2224_v19 = vpop.f32.mrf.mxu1 }
 0x124   :  { %v1991_v6 = vpack.c.bf16 %v1379_v3, %v1378_v1  ;;  %v1175_v58 = vadd.f32 %v2911_v9, %v911_v4 }
 0x125   :  { %v913_v8 = vpop.f32.mrf.mxu0  ;;  %v1209_v22 = vpop.f32.mrf.mxu1 }
 0x126   :  { %2115 = vst [vmem:[%s3085_s3 + $0x18] sm:$0xff] %v1991_v6   ;;  %v914_v63 = vadd.f32 %v2891_v57, %v913_v8  ;;  %v1380_v15 = vmax.f32 %v1175_v58, 0.0 }
 0x127   :  { %v915_v11 = vpop.f32.mrf.mxu0 }
 0x128   :  { %v1178_v12 = vadd.f32 %v2915_v17, %v914_v63  ;;  %v2225_v17 = vpop.f32.mrf.mxu1 }
 0x129   :  { %v918_v14 = vpop.f32.mrf.mxu0 }
 0x12a   :  { %v1381_v16 = vmax.f32 %v1178_v12, 0.0  ;;  %v919_v18 = vadd.f32 %v2891_v57, %v918_v14  ;;  %v1214_v28 = vpop.f32.mrf.mxu1 }
 0x12b   :  { %v920_v20 = vpop.f32.mrf.mxu0 }
 0x12c   :  { %v1996_v21 = vpack.c.bf16 %v1381_v16, %v1380_v15  ;;  %v1183_v9 = vadd.f32 %v2927_v26, %v919_v18  ;;  %v2228_v33 = vpop.f32.mrf.mxu1 }
 0x12d   :  { %v921_v23 = vpop.f32.mrf.mxu0 }
 0x12e   :  { %2116 = vst [vmem:[%s3085_s3 + $0x20] sm:$0xff] %v1996_v21   ;;  %v922_v24 = vadd.f32 %v2891_v57, %v921_v23  ;;  %v1382_v30 = vmax.f32 %v1183_v9, 0.0  ;;  %v1217_v37 = vpop.f32.mrf.mxu1 }
 0x12f   :  { %v923_v25 = vpop.f32.mrf.mxu0 }
 0x130   :  { %v1186_v27 = vadd.f32 %v1185_v35, %v922_v24  ;;  %v2229_v35 = vpop.f32.mrf.mxu1 }
 0x131   :  { %v926_v29 = vpop.f32.mrf.mxu0 }
 0x132   :  { %v1383_v31 = vmax.f32 %v1186_v27, 0.0  ;;  %v927_v32 = vadd.f32 %v2891_v57, %v926_v29  ;;  %v1222_v42 = vpop.f32.mrf.mxu1 }
 0x133   :  { %v928_v34 = vpop.f32.mrf.mxu0 }
 0x134   :  { %v2001_v36 = vpack.c.bf16 %v1383_v31, %v1382_v30  ;;  %v1191_v26 = vadd.f32 %v2942_v44, %v927_v32  ;;  %v2232_v48 = vpop.f32.mrf.mxu1 }
 0x135   :  { %v929_v38 = vpop.f32.mrf.mxu0 }
 0x136   :  { %2117 = vst [vmem:[%s3085_s3 + $0x28] sm:$0xff] %v2001_v36   ;;  %v930_v39 = vadd.f32 %v2891_v57, %v929_v38  ;;  %v1384_v45 = vmax.f32 %v1191_v26, 0.0  ;;  %v1225_v53 = vpop.f32.mrf.mxu1 }
 0x137   :  { %v931_v40 = vpop.f32.mrf.mxu0 }
 0x138   :  { %v1194_v41 = vadd.f32 %v1193_v50, %v930_v39  ;;  %v2233_v52 = vpop.f32.mrf.mxu1 }
 0x139   :  { %v934_v43 = vpop.f32.mrf.mxu0 }
 0x13a   :  { %v1385_v46 = vmax.f32 %v1194_v41, 0.0  ;;  %v935_v47 = vadd.f32 %v2891_v57, %v934_v43  ;;  %v1230_v59 = vpop.f32.mrf.mxu1 }
 0x13b   :  { %v936_v49 = vpop.f32.mrf.mxu0 }
 0x13c   :  { %v2006_v51 = vpack.c.bf16 %v1385_v46, %v1384_v45  ;;  %v1199_v44 = vadd.f32 %v1198_v62, %v935_v47  ;;  %v2236_v3 = vpop.f32.mrf.mxu1 }
 0x13d   :  { %v937_v54 = vpop.f32.mrf.mxu0 }
 0x13e   :  { %2118 = vst [vmem:[%s3085_s3 + $0x30] sm:$0xff] %v2006_v51   ;;  %v938_v55 = vadd.f32 %v2891_v57, %v937_v54  ;;  %v1386_v61 = vmax.f32 %v1199_v44, 0.0  ;;  %v1233_v2 = vpop.f32.mrf.mxu1 }
 0x13f   :  { %v939_v50 = vpop.f32.mrf.mxu0 }
 0x140   :  { %v1202_v56 = vadd.f32 %v1201_v7, %v938_v55  ;;  %v2237_v58 = vpop.f32.mrf.mxu1 }
 0x141   :  { %v942_v60 = vpop.f32.mrf.mxu0 }
 0x142   :  { %v1387_v0 = vmax.f32 %v1202_v56, 0.0  ;;  %v943_v1 = vadd.f32 %v2891_v57, %v942_v60  ;;  %v1238_v10 = vpop.f32.mrf.mxu1 }
 0x143   :  { %v944_v4 = vpop.f32.mrf.mxu0 }
 0x144   :  { %v2011_v5 = vpack.c.bf16 %v1387_v0, %v1386_v61  ;;  %v1207_v62 = vadd.f32 %v1206_v13, %v943_v1  ;;  %v2240_v16 = vpop.f32.mrf.mxu1 }
 0x145   :  { %v945_v6 = vpop.f32.mrf.mxu0 }
 0x146   :  { %2119 = vst [vmem:[%s3085_s3 + $0x38] sm:$0xff] %v2011_v5   ;;  %v946_v8 = vadd.f32 %v2891_v57, %v945_v6  ;;  %v1388_v12 = vmax.f32 %v1207_v62, 0.0  ;;  %v1241_v20 = vpop.f32.mrf.mxu1 }
 0x147   :  { %v947_v7 = vpop.f32.mrf.mxu0 }
 0x148   :  { %v1210_v63 = vadd.f32 %v1209_v22, %v946_v8  ;;  %v2241_v9 = vpop.f32.mrf.mxu1 }
 0x149   :  { %v950_v11 = vpop.f32.mrf.mxu0 }
 0x14a   :  { %v1389_v14 = vmax.f32 %v1210_v63, 0.0  ;;  %v951_v15 = vadd.f32 %v2891_v57, %v950_v11  ;;  %v1246_v17 = vpop.f32.mrf.mxu1 }
 0x14b   :  { %v952_v18 = vpop.f32.mrf.mxu0 }
 0x14c   :  { %v2016_v19 = vpack.c.bf16 %v1389_v14, %v1388_v12  ;;  %v1215_v13 = vadd.f32 %v1214_v28, %v951_v15  ;;  %v2244_v31 = vpop.f32.mrf.mxu1 }
 0x14d   :  { %v953_v21 = vpop.f32.mrf.mxu0 }
 0x14e   :  { %2120 = vst [vmem:[%s3085_s3 + $0x40] sm:$0xff] %v2016_v19   ;;  %v954_v23 = vadd.f32 %v2891_v57, %v953_v21  ;;  %v1390_v27 = vmax.f32 %v1215_v13, 0.0  ;;  %v1249_v34 = vpop.f32.mrf.mxu1 }
 0x14f   :  { %v955_v22 = vpop.f32.mrf.mxu0 }
 0x150   :  { %v1218_v24 = vadd.f32 %v1217_v37, %v954_v23  ;;  %v2245_v26 = vpop.f32.mrf.mxu1 }
 0x151   :  { %v958_v25 = vpop.f32.mrf.mxu0 }
 0x152   :  { %v1391_v29 = vmax.f32 %v1218_v24, 0.0  ;;  %v959_v30 = vadd.f32 %v2891_v57, %v958_v25  ;;  %v1254_v35 = vpop.f32.mrf.mxu1 }
 0x153   :  { %v960_v32 = vpop.f32.mrf.mxu0 }
 0x154   :  { %v2021_v33 = vpack.c.bf16 %v1391_v29, %v1390_v27  ;;  %v1223_v28 = vadd.f32 %v1222_v42, %v959_v30  ;;  %v2248_v46 = vpop.f32.mrf.mxu1 }
 0x155   :  { %v961_v36 = vpop.f32.mrf.mxu0 }
 0x156   :  { %2121 = vst [vmem:[%s3085_s3 + $0x48] sm:$0xff] %v2021_v33   ;;  %v962_v38 = vadd.f32 %v2891_v57, %v961_v36  ;;  %v1392_v41 = vmax.f32 %v1223_v28, 0.0  ;;  %v1257_v49 = vpop.f32.mrf.mxu1 }
 0x157   :  { %v963_v37 = vpop.f32.mrf.mxu0 }
 0x158   :  { %v1226_v39 = vadd.f32 %v1225_v53, %v962_v38  ;;  %v2249_v44 = vpop.f32.mrf.mxu1 }
 0x159   :  { %v966_v40 = vpop.f32.mrf.mxu0 }
 0x15a   :  { %v1393_v43 = vmax.f32 %v1226_v39, 0.0  ;;  %v967_v45 = vadd.f32 %v2891_v57, %v966_v40  ;;  %v1262_v52 = vpop.f32.mrf.mxu1 }
 0x15b   :  { %v968_v47 = vpop.f32.mrf.mxu0 }
 0x15c   :  { %v2026_v48 = vpack.c.bf16 %v1393_v43, %v1392_v41  ;;  %v1231_v42 = vadd.f32 %v1230_v59, %v967_v45  ;;  %v2252_v0 = vpop.f32.mrf.mxu1 }
 0x15d   :  { %v969_v51 = vpop.f32.mrf.mxu0 }
 0x15e   :  { %2122 = vst [vmem:[%s3085_s3 + $0x50] sm:$0xff] %v2026_v48   ;;  %v970_v54 = vadd.f32 %v2891_v57, %v969_v51  ;;  %v1394_v56 = vmax.f32 %v1231_v42, 0.0  ;;  %v1265_v4 = vpop.f32.mrf.mxu1 }
 0x15f   :  { %v971_v53 = vpop.f32.mrf.mxu0 }
 0x160   :  { %v1234_v55 = vadd.f32 %v1233_v2, %v970_v54  ;;  %v2253_v62 = vpop.f32.mrf.mxu1 }
 0x161   :  { %v974_v50 = vpop.f32.mrf.mxu0 }
 0x162   :  { %v1395_v60 = vmax.f32 %v1234_v55, 0.0  ;;  %v975_v61 = vadd.f32 %v2891_v57, %v974_v50  ;;  %v1270_v58 = vpop.f32.mrf.mxu1 }
 0x163   :  { %v976_v1 = vpop.f32.mrf.mxu0 }
 0x164   :  { %v2031_v3 = vpack.c.bf16 %v1395_v60, %v1394_v56  ;;  %v1239_v59 = vadd.f32 %v1238_v10, %v975_v61  ;;  %v2256_v14 = vpop.f32.mrf.mxu1 }
 0x165   :  { %v977_v5 = vpop.f32.mrf.mxu0 }
 0x166   :  { %2123 = vst [vmem:[%s3085_s3 + $0x58] sm:$0xff] %v2031_v3   ;;  %v978_v6 = vadd.f32 %v2891_v57, %v977_v5  ;;  %v1396_v63 = vmax.f32 %v1239_v59, 0.0  ;;  %v1273_v18 = vpop.f32.mrf.mxu1 }
 0x167   :  { %v979_v2 = vpop.f32.mrf.mxu0 }
 0x168   :  { %v1242_v8 = vadd.f32 %v1241_v20, %v978_v6  ;;  %v2257_v13 = vpop.f32.mrf.mxu1 }
 0x169   :  { %v982_v7 = vpop.f32.mrf.mxu0 }
 0x16a   :  { %v1397_v11 = vmax.f32 %v1242_v8, 0.0  ;;  %v983_v12 = vadd.f32 %v2891_v57, %v982_v7  ;;  %v1278_v9 = vpop.f32.mrf.mxu1 }
 0x16b   :  { %v984_v15 = vpop.f32.mrf.mxu0 }
 0x16c   :  { %v2036_v16 = vpack.c.bf16 %v1397_v11, %v1396_v63  ;;  %v1247_v10 = vadd.f32 %v1246_v17, %v983_v12  ;;  %v2260_v29 = vpop.f32.mrf.mxu1 }
 0x16d   :  { %v985_v19 = vpop.f32.mrf.mxu0 }
 0x16e   :  { %2124 = vst [vmem:[%s3085_s3 + $0x60] sm:$0xff] %v2036_v16   ;;  %v986_v21 = vadd.f32 %v2891_v57, %v985_v19  ;;  %v1398_v24 = vmax.f32 %v1247_v10, 0.0  ;;  %v1281_v32 = vpop.f32.mrf.mxu1 }
 0x16f   :  { %v987_v20 = vpop.f32.mrf.mxu0 }
 0x170   :  { %v1250_v23 = vadd.f32 %v1249_v34, %v986_v21  ;;  %v2261_v28 = vpop.f32.mrf.mxu1 }
 0x171   :  { %v990_v22 = vpop.f32.mrf.mxu0 }
 0x172   :  { %v1399_v25 = vmax.f32 %v1250_v23, 0.0  ;;  %v991_v27 = vadd.f32 %v2891_v57, %v990_v22  ;;  %v1286_v26 = vpop.f32.mrf.mxu1 }
 0x173   :  { %v992_v30 = vpop.f32.mrf.mxu0 }
 0x174   :  { %v2041_v31 = vpack.c.bf16 %v1399_v25, %v1398_v24  ;;  %v1255_v17 = vadd.f32 %v1254_v35, %v991_v27  ;;  %v2264_v43 = vpop.f32.mrf.mxu1 }
 0x175   :  { %v993_v33 = vpop.f32.mrf.mxu0 }
 0x176   :  { %2125 = vst [vmem:[%s3085_s3 + $0x68] sm:$0xff] %v2041_v31   ;;  %v994_v36 = vadd.f32 %v2891_v57, %v993_v33  ;;  %v1400_v39 = vmax.f32 %v1255_v17, 0.0  ;;  %v1289_v47 = vpop.f32.mrf.mxu1 }
 0x177   :  { %v995_v34 = vpop.f32.mrf.mxu0 }
 0x178   :  { %v1258_v38 = vadd.f32 %v1257_v49, %v994_v36  ;;  %v2265_v42 = vpop.f32.mrf.mxu1 }
 0x179   :  { %v998_v37 = vpop.f32.mrf.mxu0 }
 0x17a   :  { %v1401_v40 = vmax.f32 %v1258_v38, 0.0  ;;  %v999_v41 = vadd.f32 %v2891_v57, %v998_v37  ;;  %v1294_v44 = vpop.f32.mrf.mxu1 }
 0x17b   :  { %v1000_v45 = vpop.f32.mrf.mxu0 }
 0x17c   :  { %v2046_v46 = vpack.c.bf16 %v1401_v40, %v1400_v39  ;;  %v1263_v35 = vadd.f32 %v1262_v52, %v999_v41  ;;  %v2268_v60 = vpop.f32.mrf.mxu1 }
 0x17d   :  { %v1001_v48 = vpop.f32.mrf.mxu0 }
 0x17e   :  { %2126 = vst [vmem:[%s3085_s3 + $0x70] sm:$0xff] %v2046_v46   ;;  %v1002_v51 = vadd.f32 %v2891_v57, %v1001_v48  ;;  %v1402_v55 = vmax.f32 %v1263_v35, 0.0  ;;  %v1297_v1 = vpop.f32.mrf.mxu1 }
 0x17f   :  { %v1003_v49 = vpop.f32.mrf.mxu0 }
 0x180   :  { %v1266_v54 = vadd.f32 %v1265_v4, %v1002_v51  ;;  %v2269_v59 = vpop.f32.mrf.mxu1 }
 0x181   :  { %v1006_v53 = vpop.f32.mrf.mxu0 }
 0x182   :  { %v1403_v50 = vmax.f32 %v1266_v54, 0.0  ;;  %v1007_v56 = vadd.f32 %v2891_v57, %v1006_v53  ;;  %v1302_v62 = vpop.f32.mrf.mxu1 }
 0x183   :  { %v1008_v61 = vpop.f32.mrf.mxu0 }
 0x184   :  { %v2051_v0 = vpack.c.bf16 %v1403_v50, %v1402_v55  ;;  %v1271_v52 = vadd.f32 %v1270_v58, %v1007_v56  ;;  %v2272_v11 = vpop.f32.mrf.mxu1 }
 0x185   :  { %v1009_v3 = vpop.f32.mrf.mxu0 }
 0x186   :  { %2127 = vst [vmem:[%s3085_s3 + $0x78] sm:$0xff] %v2051_v0   ;;  %v1010_v5 = vadd.f32 %v2891_v57, %v1009_v3  ;;  %v1404_v8 = vmax.f32 %v1271_v52, 0.0  ;;  %v1305_v15 = vpop.f32.mrf.mxu1 }
 0x187   :  { %v1011_v4 = vpop.f32.mrf.mxu0 }
 0x188   :  { %v1274_v6 = vadd.f32 %v1273_v18, %v1010_v5  ;;  %v2273_v10 = vpop.f32.mrf.mxu1 }
 0x189   :  { %v1014_v2 = vpop.f32.mrf.mxu0 }
 0x18a   :  { %v1405_v7 = vmax.f32 %v1274_v6, 0.0  ;;  %v1015_v63 = vadd.f32 %v2891_v57, %v1014_v2  ;;  %v1310_v13 = vpop.f32.mrf.mxu1 }
 0x18b   :  { %v1016_v12 = vpop.f32.mrf.mxu0 }
 0x18c   :  { %v2056_v14 = vpack.c.bf16 %v1405_v7, %v1404_v8  ;;  %v1279_v58 = vadd.f32 %v1278_v9, %v1015_v63  ;;  %v2276_v25 = vpop.f32.mrf.mxu1 }
 0x18d   :  { %v1017_v16 = vpop.f32.mrf.mxu0 }
 0x18e   :  { %2128 = vst [vmem:[%s3085_s3 + $0x80] sm:$0xff] %v2056_v14   ;;  %v1018_v19 = vadd.f32 %v2891_v57, %v1017_v16  ;;  %v1406_v23 = vmax.f32 %v1279_v58, 0.0  ;;  %v1313_v30 = vpop.f32.mrf.mxu1 }
 0x18f   :  { %v1019_v18 = vpop.f32.mrf.mxu0 }
 0x190   :  { %v1282_v21 = vadd.f32 %v1281_v32, %v1018_v19  ;;  %v2277_v17 = vpop.f32.mrf.mxu1 }
 0x191   :  { %v1022_v20 = vpop.f32.mrf.mxu0 }
 0x192   :  { %v1407_v22 = vmax.f32 %v1282_v21, 0.0  ;;  %v1023_v24 = vadd.f32 %v2891_v57, %v1022_v20  ;;  %v1318_v28 = vpop.f32.mrf.mxu1 }
 0x193   :  { %v1024_v27 = vpop.f32.mrf.mxu0 }
 0x194   :  { %v2061_v29 = vpack.c.bf16 %v1407_v22, %v1406_v23  ;;  %v1287_v9 = vadd.f32 %v1286_v26, %v1023_v24  ;;  %v2280_v40 = vpop.f32.mrf.mxu1 }
 0x195   :  { %v1025_v31 = vpop.f32.mrf.mxu0 }
 0x196   :  { %2129 = vst [vmem:[%s3085_s3 + $0x88] sm:$0xff] %v2061_v29   ;;  %v1026_v33 = vadd.f32 %v2891_v57, %v1025_v31  ;;  %v1408_v38 = vmax.f32 %v1287_v9, 0.0  ;;  %v1321_v45 = vpop.f32.mrf.mxu1 }
 0x197   :  { %v1027_v32 = vpop.f32.mrf.mxu0 }
 0x198   :  { %v1290_v36 = vadd.f32 %v1289_v47, %v1026_v33  ;;  %v2281_v35 = vpop.f32.mrf.mxu1 }
 0x199   :  { %v1030_v34 = vpop.f32.mrf.mxu0 }
 0x19a   :  { %v1409_v37 = vmax.f32 %v1290_v36, 0.0  ;;  %v1031_v39 = vadd.f32 %v2891_v57, %v1030_v34  ;;  %v1326_v42 = vpop.f32.mrf.mxu1 }
 0x19b   :  { %v1032_v41 = vpop.f32.mrf.mxu0 }
 0x19c   :  { %v2066_v43 = vpack.c.bf16 %v1409_v37, %v1408_v38  ;;  %v1295_v26 = vadd.f32 %v1294_v44, %v1031_v39  ;;  %v2284_v50 = vpop.f32.mrf.mxu1 }
 0x19d   :  { %v1033_v46 = vpop.f32.mrf.mxu0 }
 0x19e   :  { %2130 = vst [vmem:[%s3085_s3 + $0x90] sm:$0xff] %v2066_v43   ;;  %v1034_v48 = vadd.f32 %v2891_v57, %v1033_v46  ;;  %v1410_v54 = vmax.f32 %v1295_v26, 0.0  ;;  %v1329_v61 = vpop.f32.mrf.mxu1 }
 0x19f   :  { %v1035_v47 = vpop.f32.mrf.mxu0 }
 0x1a0   :  { %v1298_v51 = vadd.f32 %v1297_v1, %v1034_v48  ;;  %v2285_v52 = vpop.f32.mrf.mxu1 }
 0x1a1   :  { %v1038_v49 = vpop.f32.mrf.mxu0 }
 0x1a2   :  { %v1411_v53 = vmax.f32 %v1298_v51, 0.0  ;;  %v1039_v55 = vadd.f32 %v2891_v57, %v1038_v49  ;;  %v1334_v59 = vpop.f32.mrf.mxu1 }
 0x1a3   :  { %v1040_v56 = vpop.f32.mrf.mxu0 }
 0x1a4   :  { %v2071_v60 = vpack.c.bf16 %v1411_v53, %v1410_v54  ;;  %v1303_v44 = vadd.f32 %v1302_v62, %v1039_v55  ;;  %v2288_v7 = vpop.f32.mrf.mxu1 }
 0x1a5   :  { %v1041_v0 = vpop.f32.mrf.mxu0 }
 0x1a6   :  { %2131 = vst [vmem:[%s3085_s3 + $0x98] sm:$0xff] %v2071_v60   ;;  %v1042_v3 = vadd.f32 %v2891_v57, %v1041_v0  ;;  %v1412_v6 = vmax.f32 %v1303_v44, 0.0  ;;  %v1337_v12 = vpop.f32.mrf.mxu1 }
 0x1a7   :  { %v1043_v1 = vpop.f32.mrf.mxu0 }
 0x1a8   :  { %v1306_v5 = vadd.f32 %v1305_v15, %v1042_v3  ;;  %v2289_v58 = vpop.f32.mrf.mxu1 }
 0x1a9   :  { %v1046_v4 = vpop.f32.mrf.mxu0 }
 0x1aa   :  { %v1413_v2 = vmax.f32 %v1306_v5, 0.0  ;;  %v1047_v8 = vadd.f32 %v2891_v57, %v1046_v4  ;;  %v1342_v10 = vpop.f32.mrf.mxu1 }
 0x1ab   :  { %v1048_v63 = vpop.f32.mrf.mxu0 }
 0x1ac   :  { %v2076_v11 = vpack.c.bf16 %v1413_v2, %v1412_v6  ;;  %v1311_v62 = vadd.f32 %v1310_v13, %v1047_v8  ;;  %v2292_v22 = vpop.f32.mrf.mxu1 }
 0x1ad   :  { %v1049_v14 = vpop.f32.mrf.mxu0 }
 0x1ae   :  { %2132 = vst [vmem:[%s3085_s3 + $0xa0] sm:$0xff] %v2076_v11   ;;  %v1050_v16 = vadd.f32 %v2891_v57, %v1049_v14  ;;  %v1414_v21 = vmax.f32 %v1311_v62, 0.0  ;;  %v1345_v27 = vpop.f32.mrf.mxu1 }
 0x1af   :  { %v1051_v15 = vpop.f32.mrf.mxu0 }
 0x1b0   :  { %v1314_v19 = vadd.f32 %v1313_v30, %v1050_v16  ;;  %v2293_v9 = vpop.f32.mrf.mxu1 }
 0x1b1   :  { %v1054_v18 = vpop.f32.mrf.mxu0 }
 0x1b2   :  { %v1415_v20 = vmax.f32 %v1314_v19, 0.0  ;;  %v1055_v23 = vadd.f32 %v2891_v57, %v1054_v18  ;;  %v1350_v17 = vpop.f32.mrf.mxu1 }
 0x1b3   :  { %v1056_v24 = vpop.f32.mrf.mxu0 }
 0x1b4   :  { %v2081_v25 = vpack.c.bf16 %v1415_v20, %v1414_v21  ;;  %v1319_v13 = vadd.f32 %v1318_v28, %v1055_v23  ;;  %v2296_v37 = vpop.f32.mrf.mxu1 }
 0x1b5   :  { %v1057_v29 = vpop.f32.mrf.mxu0 }
 0x1b6   :  { %2133 = vst [vmem:[%s3085_s3 + $0xa8] sm:$0xff] %v2081_v25   ;;  %v1058_v31 = vadd.f32 %v2891_v57, %v1057_v29  ;;  %v1416_v36 = vmax.f32 %v1319_v13, 0.0  ;;  %v1353_v41 = vpop.f32.mrf.mxu1 }
 0x1b7   :  { %v1059_v30 = vpop.f32.mrf.mxu0 }
 0x1b8   :  { %v1322_v33 = vadd.f32 %v1321_v45, %v1058_v31  ;;  %v2297_v26 = vpop.f32.mrf.mxu1 }
 0x1b9   :  { %v1062_v32 = vpop.f32.mrf.mxu0 }
 0x1ba   :  { %v1417_v34 = vmax.f32 %v1322_v33, 0.0  ;;  %v1063_v38 = vadd.f32 %v2891_v57, %v1062_v32  ;;  %v1358_v35 = vpop.f32.mrf.mxu1 }
 0x1bb   :  { %v1064_v39 = vpop.f32.mrf.mxu0 }
 0x1bc   :  { %v2086_v40 = vpack.c.bf16 %v1417_v34, %v1416_v36  ;;  %v1327_v28 = vadd.f32 %v1326_v42, %v1063_v38  ;;  %v2300_v53 = vpop.f32.mrf.mxu1 }
 0x1bd   :  { %v1065_v43 = vpop.f32.mrf.mxu0 }
 0x1be   :  { %2134 = vst [vmem:[%s3085_s3 + $0xb0] sm:$0xff] %v2086_v40   ;;  %v1066_v46 = vadd.f32 %v2891_v57, %v1065_v43  ;;  %v1418_v51 = vmax.f32 %v1327_v28, 0.0  ;;  %v1361_v56 = vpop.f32.mrf.mxu1 }
 0x1bf   :  { %v1067_v45 = vpop.f32.mrf.mxu0 }
 0x1c0   :  { %v1330_v48 = vadd.f32 %v1329_v61, %v1066_v46  ;;  %v2301_v44 = vpop.f32.mrf.mxu1 }
 0x1c1   :  { %v1070_v47 = vpop.f32.mrf.mxu0 }
 0x1c2   :  { %v1419_v49 = vmax.f32 %v1330_v48, 0.0  ;;  %v1071_v54 = vadd.f32 %v2891_v57, %v1070_v47  ;;  %v1366_v52 = vpop.f32.mrf.mxu1 }
 0x1c3   :  { %v1072_v55 = vpop.f32.mrf.mxu0 }
 0x1c4   :  { %v2091_v50 = vpack.c.bf16 %v1419_v49, %v1418_v51  ;;  %v1335_v42 = vadd.f32 %v1334_v59, %v1071_v54  ;;  %v2304_v2 = vpop.f32.mrf.mxu1 }
 0x1c5   :  { %v1073_v60 = vpop.f32.mrf.mxu0 }
 0x1c6   :  { %2135 = vst [vmem:[%s3085_s3 + $0xb8] sm:$0xff] %v2091_v50   ;;  %v1074_v0 = vadd.f32 %v2891_v57, %v1073_v60  ;;  %v1420_v5 = vmax.f32 %v1335_v42, 0.0  ;;  %v1369_v63 = vpop.f32.mrf.mxu1 }
 0x1c7   :  { %v1075_v61 = vpop.f32.mrf.mxu0 }
 0x1c8   :  { %v1338_v3 = vadd.f32 %v1337_v12, %v1074_v0  ;;  %v2305_v62 = vpop.f32.mrf.mxu1 }
 0x1c9   :  { %v1078_v1 = vpop.f32.mrf.mxu0 }
 0x1ca   :  { %v1421_v4 = vmax.f32 %v1338_v3, 0.0  ;;  %v1079_v6 = vadd.f32 %v2891_v57, %v1078_v1 }
 0x1cb   :  { %v1080_v8 = vpop.f32.mrf.mxu0 }
 0x1cc   :  { %v2096_v7 = vpack.c.bf16 %v1421_v4, %v1420_v5  ;;  %v1343_v59 = vadd.f32 %v1342_v10, %v1079_v6 }
 0x1cd   :  { %v1081_v11 = vpop.f32.mrf.mxu0 }
 0x1ce   :  { %2136 = vst [vmem:[%s3085_s3 + $0xc0] sm:$0xff] %v2096_v7   ;;  %v1082_v14 = vadd.f32 %v2891_v57, %v1081_v11  ;;  %v1422_v15 = vmax.f32 %v1343_v59, 0.0 }
 0x1cf   :  { %v1083_v12 = vpop.f32.mrf.mxu0 }
 0x1d0   :  { %v1346_v16 = vadd.f32 %v1345_v27, %v1082_v14 }
 0x1d1   :  { %v1086_v58 = vpop.f32.mrf.mxu0 }
 0x1d2   :  { %v1423_v19 = vmax.f32 %v1346_v16, 0.0  ;;  %v1087_v18 = vadd.f32 %v2891_v57, %v1086_v58 }
 0x1d3   :  { %v1088_v21 = vpop.f32.mrf.mxu0 }
 0x1d4   :  { %v2101_v20 = vpack.c.bf16 %v1423_v19, %v1422_v15  ;;  %v1351_v22 = vadd.f32 %v1350_v17, %v1087_v18 }
 0x1d5   :  { %v1089_v23 = vpop.f32.mrf.mxu0 }
 0x1d6   :  { %2137 = vst [vmem:[%s3085_s3 + $0xc8] sm:$0xff] %v2101_v20   ;;  %v1090_v10 = vadd.f32 %v2891_v57, %v1089_v23  ;;  %v1424_v13 = vmax.f32 %v1351_v22, 0.0 }
 0x1d7   :  { %v1091_v24 = vpop.f32.mrf.mxu0 }
 0x1d8   :  { %v1354_v25 = vadd.f32 %v1353_v41, %v1090_v10 }
 0x1d9   :  { %v1094_v29 = vpop.f32.mrf.mxu0 }
 0x1da   :  { %v1425_v27 = vmax.f32 %v1354_v25, 0.0  ;;  %v1095_v31 = vadd.f32 %v2891_v57, %v1094_v29 }
 0x1db   :  { %v1096_v9 = vpop.f32.mrf.mxu0 }
 0x1dc   :  { %v2106_v30 = vpack.c.bf16 %v1425_v27, %v1424_v13  ;;  %v1359_v32 = vadd.f32 %v1358_v35, %v1095_v31 }
 0x1dd   :  { %v1097_v33 = vpop.f32.mrf.mxu0 }
 0x1de   :  { %2138 = vst [vmem:[%s3085_s3 + $0xd0] sm:$0xff] %v2106_v30   ;;  %v1098_v36 = vadd.f32 %v2891_v57, %v1097_v33  ;;  %v1426_v37 = vmax.f32 %v1359_v32, 0.0 }
 0x1df   :  { %v1099_v17 = vpop.f32.mrf.mxu0 }
 0x1e0   :  { %v1362_v34 = vadd.f32 %v1361_v56, %v1098_v36 }
 0x1e1   :  { %v1102_v38 = vpop.f32.mrf.mxu0 }
 0x1e2   :  { %v1427_v39 = vmax.f32 %v1362_v34, 0.0  ;;  %v1103_v40 = vadd.f32 %v2891_v57, %v1102_v38 }
 0x1e3   :  { %v1104_v41 = vpop.f32.mrf.mxu0 }
 0x1e4   :  { %v2111_v43 = vpack.c.bf16 %v1427_v39, %v1426_v37  ;;  %v1367_v28 = vadd.f32 %v1366_v52, %v1103_v40 }
 0x1e5   :  { %v1105_v46 = vpop.f32.mrf.mxu0 }
 0x1e6   :  { %2139 = vst [vmem:[%s3085_s3 + $0xd8] sm:$0xff] %v2111_v43   ;;  %v1428_v26 = vmax.f32 %v1367_v28, 0.0 }
 0x1e7   :  { %v1106_v45 = vpop.f32.mrf.mxu0 }
 0x1e8   :  { %v1972_v48 = vpack.c.bf16 %v1428_v26, %v1428_v26 }
 0x1ea   :  { %1714 = vst [vmem:[%s3085_s3 + $0xe0] sm:$0x1] %v1972_v48 }

// kernel: features_forward.8
= control target key start
LH: loop header
LB: loop body
LE: loop exit
PB: predicated region body
PF: predicated region fallthrough
CT: control target
= control target key end

     0   :  { %s602_s6 = smov 0   ;;  %s738_s0 = inlined_call_operand.vmem [shape: bf16[2,8,2,8,256], index: 0, kind: input, shape index: {}]   ;;  %s739_s1 = inlined_call_operand.vmem [shape: bf16[2,11,11,128], index: 1, kind: output, shape index: {}]  }
   0x1 LB: > { %s541_s7 = sadd.s32 4294967295, %s589_s6   ;;  %p545_p0 = scmp.ge.s32.totalorder %s589_s6, 1  ;;  %s589_s6 = sphi %s602_s6, %s11_s6  }
   0x2   : > { %p87_p1 = scmp.lt.s32.totalorder %s589_s6, 3 }
   0x4   : > { %p88_p2 = pnand %p545_p0, %p87_p1 }
   0x5   : > { %p107_p3 = scmp.lt.s32.totalorder (!%p88_p2), %s541_s7, 1 }
   0x6   : > { %91 = sbr.rel (%p88_p2) target bundleno = 80 (0x50), region = 24 }
   0xb   : > { %s745_s7 = smov (!%p107_p3, %s541_s7), 1  ;;  %vm373_vm0 = vcmask 1041408   ;;  %vm374_vm1 = vsmask.f32 1280  ;;  %v591_v6 = vmov 0   ;;  %vm456_vm3 = vcmask 1040384  }
   0xc   : > { %s573_s8 = smul.u32 88, %s745_s7  ;;  %s572_s9 = sshll.u32 %s745_s7, 7  ;;  %vm610_vm2 = vmand %vm373_vm0, %vm374_vm1  ;;  %vm457_vm4 = vsmask.f32 256 }
   0xd   : > { %s617_s12 = scalar_lea.vmem %s738_s0, %s572_s9  ;;  %vm690_vm5 = vmand %vm456_vm3, %vm457_vm4 }
   0xe   : > { %s622_s15 = scalar_lea.vmem %s739_s1, %s573_s8  ;;  %v118_v1 = vld [vmem:[%s617_s12] sm:$0xff]  ;;  %v119_v2 = vld [vmem:[%s617_s12 + $0x8] sm:$0xff]  ;;  %v120_v15 = vld [vmem:[%s617_s12 + $0x10] sm:$0xff] }
   0xf   : > { %v384_v3 = vld [vmem:[%s622_s15 + $0x14] sm:$0x3]  ;;  %v388_v4 = vld [vmem:[%s622_s15 + $0x1c] sm:$0x3]  ;;  %v392_v5 = vld [vmem:[%s622_s15 + $0x24] sm:$0x3] }
  0x10   : > { %383 = vst [vmem:[%s622_s15 + $0x10] sm:$0xf] %v591_v6  ;;  %372 = vst [vmem:[%s622_s15] sm:$0xf] %v591_v6  ;;  %v385_v7 = vsel %vm610_vm2, 0, %v384_v3  ;;  %v389_v8 = vsel %vm610_vm2, 0, %v388_v4  ;;  %v393_v9 = vsel %vm610_vm2, 0, %v392_v5 }
  0x11   : > { %379 = vst [vmem:[%s622_s15 + $0x8] sm:$0xf] %v591_v6  ;;  %387 = vst [vmem:[%s622_s15 + $0x18] sm:$0xf] %v591_v6  ;;  %v396_v10 = vld [vmem:[%s622_s15 + $0x2c] sm:$0x3] }
  0x12   : > { %391 = vst [vmem:[%s622_s15 + $0x20] sm:$0xf] %v591_v6  ;;  %395 = vst [vmem:[%s622_s15 + $0x28] sm:$0xf] %v591_v6  ;;  %v148_v11 = vrot.slane %v118_v1, 4  ;;  %v397_v12 = vsel %vm610_vm2, 0, %v396_v10 }
  0x13   : > { %399 = vst [vmem:[%s622_s15 + $0x30] sm:$0xf] %v591_v6  ;;  %403 = vst [vmem:[%s622_s15 + $0x38] sm:$0xf] %v591_v6  ;;  %v400_v13 = vld [vmem:[%s622_s15 + $0x34] sm:$0x3] }
  0x14   : > { %407 = vst [vmem:[%s622_s15 + $0x40] sm:$0xf] %v591_v6  ;;  %411 = vst [vmem:[%s622_s15 + $0x48] sm:$0xf] %v591_v6  ;;  %v404_v14 = vld [vmem:[%s622_s15 + $0x3c] sm:$0x3]  ;;  %v178_v25 = vmax.bf16 %v148_v11, %v118_v1 }
  0x15   : > { %415 = vst [vmem:[%s622_s15 + $0x50] sm:$0xf] %v591_v6  ;;  %386 = vst [vmem:[%s622_s15 + $0x14] sm:$0x3] %v385_v7  ;;  %v149_v16 = vrot.slane %v119_v2, 4  ;;  %v401_v17 = vsel %vm610_vm2, 0, %v400_v13 }
  0x16   : > { %390 = vst [vmem:[%s622_s15 + $0x1c] sm:$0x3] %v389_v8  ;;  %394 = vst [vmem:[%s622_s15 + $0x24] sm:$0x3] %v393_v9  ;;  %v405_v18 = vsel %vm610_vm2, 0, %v404_v14  ;;  %v150_v29 = vrot.slane %v120_v15, 4 }
  0x17   : > { %398 = vst [vmem:[%s622_s15 + $0x2c] sm:$0x3] %v397_v12  ;;  %v408_v19 = vld [vmem:[%s622_s15 + $0x44] sm:$0x3]  ;;  %402 = vst [vmem:[%s622_s15 + $0x34] sm:$0x3] %v401_v17  ;;  %v179_v36 = vmax.bf16 %v149_v16, %v119_v2 }
  0x18   : > { %v376_v20 = vld [vmem:[%s622_s15 + $0x4] sm:$0x3]  ;;  %406 = vst [vmem:[%s622_s15 + $0x3c] sm:$0x3] %v405_v18  ;;  %v409_v21 = vsel %vm610_vm2, 0, %v408_v19  ;;  %v194_v30 = vshrl.u32 %v118_v1, 16  ;;  %v180_v49 = vmax.bf16 %v150_v29, %v120_v15 }
  0x19   : > { %v377_v22 = vsel %vm610_vm2, 0, %v376_v20  ;;  %v380_v23 = vld [vmem:[%s622_s15 + $0xc] sm:$0x3]  ;;  %410 = vst [vmem:[%s622_s15 + $0x44] sm:$0x3] %v409_v21  ;;  %v197_v32 = vshll.u32 %v118_v1, 16 }
  0x1a   : > { %v412_v24 = vld [vmem:[%s622_s15 + $0x4c] sm:$0x3]  ;;  %378 = vst [vmem:[%s622_s15 + $0x4] sm:$0x3] %v377_v22  ;;  %v381_v26 = vsel %vm610_vm2, 0, %v380_v23  ;;  %v203_v33 = vshrl.u32 %v119_v2, 16 }
  0x1b   : > { %v413_v27 = vsel %vm610_vm2, 0, %v412_v24  ;;  %v416_v28 = vld [vmem:[%s622_s15 + $0x54] sm:$0x3]  ;;  %382 = vst [vmem:[%s622_s15 + $0xc] sm:$0x3] %v381_v26  ;;  %v206_v34 = vshll.u32 %v119_v2, 16 }
  0x1c   : > { %414 = vst [vmem:[%s622_s15 + $0x4c] sm:$0x3] %v413_v27  ;;  %v417_v31 = vsel %vm610_vm2, 0, %v416_v28  ;;  %v121_v35 = vld [vmem:[%s617_s12 + $0x18] sm:$0xff]  ;;  %v196_v37 = vrot.slane %v194_v30, 4  ;;  %v212_v38 = vshrl.u32 %v120_v15, 16 }
  0x1d   : > { %418 = vst [vmem:[%s622_s15 + $0x54] sm:$0x3] %v417_v31  ;;  %v215_v39 = vshll.u32 %v120_v15, 16  ;;  %v199_v40 = vrot.slane %v197_v32, 5  ;;  %v205_v41 = vrot.slane %v203_v33, 4  ;;  %v208_v42 = vrot.slane %v206_v34, 5 }
  0x1e   : > { %v122_v43 = vld [vmem:[%s617_s12 + $0x20] sm:$0xff]  ;;  %v151_v44 = vrot.slane %v121_v35, 4  ;;  %v214_v45 = vrot.slane %v212_v38, 4  ;;  %v221_v48 = vshrl.u32 %v121_v35, 16  ;;  %v224_v52 = vshll.u32 %v121_v35, 16  ;;  %v123_v61 = vld [vmem:[%s617_s12 + $0x28] sm:$0xff] }
  0x1f   : > { %v217_v46 = vrot.slane %v215_v39, 5  ;;  %v152_v47 = vrot.slane %v122_v43, 4  ;;  %v200_v50 = vor.u32 %v199_v40, %v196_v37  ;;  %v209_v51 = vor.u32 %v208_v42, %v205_v41  ;;  %v124_v6 = vld [vmem:[%s617_s12 + $0x30] sm:$0xff]  ;;  %v125_v15 = vld [vmem:[%s617_s12 + $0x38] sm:$0xff]  ;;  %v126_v24 = vld [vmem:[%s617_s12 + $0x40] sm:$0xff] }
  0x20   : > { %v181_v54 = vmax.bf16 %v151_v44, %v121_v35  ;;  %v223_v55 = vrot.slane %v221_v48, 4  ;;  %v230_v56 = vshrl.u32 %v122_v43, 16  ;;  %v226_v59 = vrot.slane %v224_v52, 5  ;;  %v550_v34 = vld [vmem:[%s622_s15 + $0x14] sm:$0x1] }
  0x21   : > { %v218_v53 = vor.u32 %v217_v46, %v214_v45  ;;  %v201_v57 = vrot.slane %v200_v50, 4  ;;  %v210_v58 = vrot.slane %v209_v51, 4  ;;  %v233_v60 = vshll.u32 %v122_v43, 16  ;;  %v553_v52 = vld [vmem:[%s622_s15 + $0x1c] sm:$0x1] }
  0x22   : > { %v182_v63 = vmax.bf16 %v152_v47, %v122_v43  ;;  %v232_v0 = vrot.slane %v230_v56, 4  ;;  %v153_v1 = vrot.slane %v123_v61, 4  ;;  %v227_v4 = vor.u32 %v226_v59, %v223_v55  ;;  %v127_v47 = vld [vmem:[%s617_s12 + $0x48] sm:$0xff]  ;;  %v128_v56 = vld [vmem:[%s617_s12 + $0x50] sm:$0xff] }
  0x23   : > { %v219_v62 = vrot.slane %v218_v53, 4  ;;  %v343_v2 = vmax.bf16 %v201_v57, %v178_v25  ;;  %v344_v3 = vmax.bf16 %v210_v58, %v179_v36  ;;  %v235_v5 = vrot.slane %v233_v60, 5 }
  0x24   : > { %v154_v8 = vrot.slane %v124_v6, 4  ;;  %v183_v9 = vmax.bf16 %v153_v1, %v123_v61  ;;  %v239_v10 = vshrl.u32 %v123_v61, 16  ;;  %v228_v12 = vrot.slane %v227_v4, 4 }
  0x25   : > { %v345_v7 = vmax.bf16 %v219_v62, %v180_v49  ;;  %v358_v11 = vmax.bf16 %v344_v3, %v343_v2  ;;  %v236_v13 = vor.u32 %v235_v5, %v232_v0  ;;  %v242_v14 = vshll.u32 %v123_v61, 16 }
  0x26   : > { %v241_v16 = vrot.slane %v239_v10, 4  ;;  %v248_v17 = vshrl.u32 %v124_v6, 16  ;;  %v251_v18 = vshll.u32 %v124_v6, 16  ;;  %v155_v19 = vrot.slane %v125_v15, 4 }
  0x27   : > { %v365_v20 = vmax.bf16 %v358_v11, %v345_v7  ;;  %v237_v21 = vrot.slane %v236_v13, 4  ;;  %v346_v22 = vmax.bf16 %v228_v12, %v181_v54  ;;  %v244_v23 = vrot.slane %v242_v14, 5  ;;  %v129_v13 = vld [vmem:[%s617_s12 + $0x58] sm:$0xff]  ;;  %v556_v14 = vld [vmem:[%s622_s15 + $0x24] sm:$0x1] }
  0x28   : > { %v184_v25 = vmax.bf16 %v154_v8, %v124_v6  ;;  %v250_v26 = vrot.slane %v248_v17, 4  ;;  %v253_v27 = vrot.slane %v251_v18, 5  ;;  %v156_v28 = vrot.slane %v126_v24, 4 }
  0x29   : > { %v426_v29 = vrot.slane %v365_v20, 7  ;;  %v347_v30 = vmax.bf16 %v237_v21, %v182_v63  ;;  %v359_v31 = vmax.bf16 %v346_v22, %v345_v7  ;;  %v245_v32 = vor.u32 %v244_v23, %v241_v16 }
  0x2a   : > { %v254_v35 = vor.u32 %v253_v27, %v250_v26  ;;  %v185_v36 = vmax.bf16 %v155_v19, %v125_v15  ;;  %v257_v37 = vshrl.u32 %v125_v15, 16  ;;  %v260_v38 = vshll.u32 %v125_v15, 16  ;;  %v130_v19 = vld [vmem:[%s617_s12 + $0x60] sm:$0xff] }
  0x2b   : > { %v427_v39 = vrot.slane %v426_v29, 4  ;;  %549 = vst [vmem:[%s622_s15 + $0x10] sm:$0xe] %v426_v29  ;;  %v366_v40 = vmax.bf16 %v359_v31, %v347_v30  ;;  %v246_v41 = vrot.slane %v245_v32, 4  ;;  %v266_v42 = vshrl.u32 %v126_v24, 16 }
  0x2c   : > { %v255_v43 = vrot.slane %v254_v35, 4  ;;  %v259_v44 = vrot.slane %v257_v37, 4  ;;  %v262_v45 = vrot.slane %v260_v38, 5  ;;  %v269_v46 = vshll.u32 %v126_v24, 16  ;;  %v131_v37 = vld [vmem:[%s617_s12 + $0x68] sm:$0xff] }
  0x2d   : > { %v460_v48 = vsel %vm690_vm5, %v427_v39, %v550_v34  ;;  %v428_v49 = vrot.slane %v366_v40, 7  ;;  %v348_v50 = vmax.bf16 %v246_v41, %v183_v9  ;;  %v268_v51 = vrot.slane %v266_v42, 4  ;;  %v559_v38 = vld [vmem:[%s622_s15 + $0x2c] sm:$0x1] }
  0x2e   : > { %551 = vst [vmem:[%s622_s15 + $0x14] sm:$0x1] %v460_v48  ;;  %v349_v53 = vmax.bf16 %v255_v43, %v184_v25  ;;  %v263_v54 = vor.u32 %v262_v45, %v259_v44  ;;  %v271_v55 = vrot.slane %v269_v46, 5  ;;  %v157_v57 = vrot.slane %v127_v47, 4  ;;  %v132_v46 = vld [vmem:[%s617_s12 + $0x70] sm:$0xff] }
  0x2f   : > { %v429_v58 = vrot.slane %v428_v49, 4  ;;  %552 = vst [vmem:[%s622_s15 + $0x18] sm:$0xe] %v428_v49  ;;  %v360_v59 = vmax.bf16 %v348_v50, %v347_v30  ;;  %v158_v60 = vrot.slane %v128_v56, 4  ;;  %v275_v61 = vshrl.u32 %v127_v47, 16 }
  0x30   : > { %v186_v62 = vmax.bf16 %v156_v28, %v126_v24  ;;  %v264_v63 = vrot.slane %v263_v54, 4  ;;  %v272_v0 = vor.u32 %v271_v55, %v268_v51  ;;  %v278_v1 = vshll.u32 %v127_v47, 16 }
  0x31   : > { %v464_v2 = vsel %vm690_vm5, %v429_v58, %v553_v52  ;;  %v367_v3 = vmax.bf16 %v360_v59, %v349_v53  ;;  %v277_v4 = vrot.slane %v275_v61, 4  ;;  %v284_v8 = vshrl.u32 %v128_v56, 16 }
  0x32   : > { %554 = vst [vmem:[%s622_s15 + $0x1c] sm:$0x1] %v464_v2  ;;  %v273_v5 = vrot.slane %v272_v0, 4  ;;  %v350_v6 = vmax.bf16 %v264_v63, %v185_v36  ;;  %v280_v7 = vrot.slane %v278_v1, 5  ;;  %v187_v10 = vmax.bf16 %v157_v57, %v127_v47  ;;  %v562_v2 = vld [vmem:[%s622_s15 + $0x34] sm:$0x1] }
  0x33   : > { %v430_v9 = vrot.slane %v367_v3, 7  ;;  %v188_v11 = vmax.bf16 %v158_v60, %v128_v56  ;;  %v287_v12 = vshll.u32 %v128_v56, 16  ;;  %v286_v18 = vrot.slane %v284_v8, 4 }
  0x34   : > { %v351_v15 = vmax.bf16 %v273_v5, %v186_v62  ;;  %v361_v16 = vmax.bf16 %v350_v6, %v349_v53  ;;  %v281_v17 = vor.u32 %v280_v7, %v277_v4  ;;  %v159_v22 = vrot.slane %v129_v13, 4 }
  0x35   : > { %v431_v20 = vrot.slane %v430_v9, 4  ;;  %555 = vst [vmem:[%s622_s15 + $0x20] sm:$0xe] %v430_v9  ;;  %v289_v21 = vrot.slane %v287_v12, 5  ;;  %v160_v23 = vrot.slane %v130_v19, 4  ;;  %v293_v26 = vshrl.u32 %v129_v13, 16 }
  0x36   : > { %v368_v24 = vmax.bf16 %v361_v16, %v351_v15  ;;  %v282_v25 = vrot.slane %v281_v17, 4  ;;  %v296_v27 = vshll.u32 %v129_v13, 16  ;;  %v302_v30 = vshrl.u32 %v130_v19, 16  ;;  %v565_v16 = vld [vmem:[%s622_s15 + $0x3c] sm:$0x1] }
  0x37   : > { %v468_v28 = vsel %vm690_vm5, %v431_v20, %v556_v14  ;;  %v290_v29 = vor.u32 %v289_v21, %v286_v18  ;;  %v305_v31 = vshll.u32 %v130_v19, 16  ;;  %v295_v35 = vrot.slane %v293_v26, 4 }
  0x38   : > { %557 = vst [vmem:[%s622_s15 + $0x24] sm:$0x1] %v468_v28  ;;  %v432_v32 = vrot.slane %v368_v24, 7  ;;  %v352_v34 = vmax.bf16 %v282_v25, %v187_v10  ;;  %v298_v36 = vrot.slane %v296_v27, 5  ;;  %v304_v40 = vrot.slane %v302_v30, 4 }
  0x39   : > { %v291_v39 = vrot.slane %v290_v29, 4  ;;  %v307_v41 = vrot.slane %v305_v31, 5  ;;  %v189_v44 = vmax.bf16 %v159_v22, %v129_v13  ;;  %v161_v49 = vrot.slane %v131_v37, 4 }
  0x3a   : > { %v433_v42 = vrot.slane %v432_v32, 4  ;;  %558 = vst [vmem:[%s622_s15 + $0x28] sm:$0xe] %v432_v32  ;;  %v362_v43 = vmax.bf16 %v352_v34, %v351_v15  ;;  %v299_v45 = vor.u32 %v298_v36, %v295_v35  ;;  %v311_v50 = vshrl.u32 %v131_v37, 16 }
  0x3b   : > { %v353_v47 = vmax.bf16 %v291_v39, %v188_v11  ;;  %v308_v48 = vor.u32 %v307_v41, %v304_v40  ;;  %v190_v52 = vmax.bf16 %v160_v23, %v130_v19  ;;  %v314_v54 = vshll.u32 %v131_v37, 16  ;;  %v568_v23 = vld [vmem:[%s622_s15 + $0x44] sm:$0x1] }
  0x3c   : > { %v472_v51 = vsel %vm690_vm5, %v433_v42, %v559_v38  ;;  %v300_v53 = vrot.slane %v299_v45, 4  ;;  %v313_v57 = vrot.slane %v311_v50, 4  ;;  %v320_v58 = vshrl.u32 %v132_v46, 16 }
  0x3d   : > { %560 = vst [vmem:[%s622_s15 + $0x2c] sm:$0x1] %v472_v51  ;;  %v369_v55 = vmax.bf16 %v362_v43, %v353_v47  ;;  %v309_v56 = vrot.slane %v308_v48, 4  ;;  %v162_v60 = vrot.slane %v132_v46, 4  ;;  %v316_v61 = vrot.slane %v314_v54, 5 }
  0x3e   : > { %v354_v59 = vmax.bf16 %v300_v53, %v189_v44  ;;  %v323_v62 = vshll.u32 %v132_v46, 16  ;;  %v191_v0 = vmax.bf16 %v161_v49, %v131_v37  ;;  %v322_v1 = vrot.slane %v320_v58, 4 }
  0x3f   : > { %v434_v63 = vrot.slane %v369_v55, 7  ;;  %v355_v3 = vmax.bf16 %v309_v56, %v190_v52  ;;  %v317_v5 = vor.u32 %v316_v61, %v313_v57  ;;  %v192_v9 = vmax.bf16 %v162_v60, %v132_v46 }
  0x40   : > { %v363_v4 = vmax.bf16 %v354_v59, %v353_v47  ;;  %v325_v6 = vrot.slane %v323_v62, 5 }
  0x41   : > { %v435_v7 = vrot.slane %v434_v63, 4  ;;  %561 = vst [vmem:[%s622_s15 + $0x30] sm:$0xe] %v434_v63  ;;  %v318_v10 = vrot.slane %v317_v5, 4 }
  0x42   : > { %v370_v8 = vmax.bf16 %v363_v4, %v355_v3  ;;  %v326_v11 = vor.u32 %v325_v6, %v322_v1 }
  0x43   : > { %v476_v12 = vsel %vm690_vm5, %v435_v7, %v562_v2  ;;  %v356_v15 = vmax.bf16 %v318_v10, %v191_v0 }
  0x44   : > { %563 = vst [vmem:[%s622_s15 + $0x34] sm:$0x1] %v476_v12  ;;  %v436_v13 = vrot.slane %v370_v8, 7  ;;  %v327_v14 = vrot.slane %v326_v11, 4 }
  0x45   : > { %v364_v19 = vmax.bf16 %v356_v15, %v355_v3 }
  0x46   : > { %v437_v17 = vrot.slane %v436_v13, 4  ;;  %564 = vst [vmem:[%s622_s15 + $0x38] sm:$0xe] %v436_v13  ;;  %v357_v18 = vmax.bf16 %v327_v14, %v192_v9 }
  0x48   : > { %v480_v20 = vsel %vm690_vm5, %v437_v17, %v565_v16  ;;  %v371_v21 = vmax.bf16 %v364_v19, %v357_v18 }
  0x49   : > { %566 = vst [vmem:[%s622_s15 + $0x3c] sm:$0x1] %v480_v20 }
  0x4a   : > { %v438_v22 = vrot.slane %v371_v21, 7 }
  0x4c   : > { %v439_v24 = vrot.slane %v438_v22, 4  ;;  %567 = vst [vmem:[%s622_s15 + $0x40] sm:$0xe] %v438_v22 }
  0x4e   : > { %v484_v25 = vsel %vm690_vm5, %v439_v24, %v568_v23 }
  0x4f   : > { %569 = vst [vmem:[%s622_s15 + $0x44] sm:$0x1] %v484_v25 }
  0x50 PF: > { %s11_s6 = sadd.s32 1, %s589_s6  }
  0x51   : > { %p8_p4 = scmp.ge.s32.totalorder %s11_s6, 4  }
  0x53   :  { %10 = sbr.rel (!%p8_p4) target bundleno = 1 (0x1), region = 55 }

// kernel: features_forward.10
= control target key start
LH: loop header
LB: loop body
LE: loop exit
PB: predicated region body
PF: predicated region fallthrough
CT: control target
= control target key end

     0   :  { %s424_s6 = smov 0   ;;  %s500_s0 = inlined_call_operand.vmem [shape: bf16[2,4,2,4,512], index: 0, kind: input, shape index: {}]   ;;  %s501_s1 = inlined_call_operand.vmem [shape: bf16[2,5,5,256], index: 1, kind: output, shape index: {}]  }
   0x1 LB: > { %s378_s7 = sadd.s32 4294967295, %s411_s6   ;;  %p382_p0 = scmp.ge.s32.totalorder %s411_s6, 1  ;;  %s411_s6 = sphi %s424_s6, %s11_s6  }
   0x2   : > { %p87_p1 = scmp.lt.s32.totalorder %s411_s6, 3 }
   0x4   : > { %p88_p2 = pnand %p382_p0, %p87_p1 }
   0x5   : > { %p107_p3 = scmp.lt.s32.totalorder (!%p88_p2), %s378_s7, 1 }
   0x6   : > { %91 = sbr.rel (%p88_p2) target bundleno = 54 (0x36), region = 24 }
   0xb   : > { %vm236_vm0 = vcmask 1042432   ;;  %vm237_vm1 = vsmask.f32 2304  ;;  %vm239_vm2 = vcmask 1046532   ;;  %vm240_vm4 = vsmask.f32 6400 }
   0xc   : > { %vm238_vm3 = vmand %vm236_vm0, %vm237_vm1  ;;  %v264_v0 = vlaneseq  ;;  %s507_s7 = smov (!%p107_p3, %s378_s7), 1  ;;  %v413_v1 = vmov 1983009808   ;;  %vm307_vm7 = vcmask 1041408   ;;  %vm310_vm8 = vcmask 1045508  }
   0xd   : > { %vm241_vm5 = vmand %vm239_vm2, %vm240_vm4  ;;  %v262_v2 = vunpack.c.l.s4 %v413_v1  ;;  %s395_s8 = smul.u32 40, %s507_s7  ;;  %s394_s9 = sshll.u32 %s507_s7, 6  ;;  %vm308_vm9 = vsmask.f32 7938  ;;  %vm311_vm10 = vsmask.f32 7954 }
   0xe   : > { %vm432_vm6 = vmor %vm241_vm5, %vm238_vm3  ;;  %s439_s12 = scalar_lea.vmem %s500_s0, %s394_s9  ;;  %v265_v5 = vshrl.u32 %v264_v0, 7 }
   0xf   : > { %v263_v4 = vunpack.c.0.s8 %v262_v2  ;;  %s444_s15 = scalar_lea.vmem %s501_s1, %s395_s8  ;;  %v118_v6 = vld [vmem:[%s439_s12] sm:$0xff]  ;;  %v119_v7 = vld [vmem:[%s439_s12 + $0x8] sm:$0xff]  ;;  %v120_v18 = vld [vmem:[%s439_s12 + $0x10] sm:$0xff] }
  0x10   : > { %v246_v8 = vld [vmem:[%s444_s15 + $0x8] sm:$0x77]  ;;  %v249_v9 = vld [vmem:[%s444_s15 + $0x10] sm:$0x77]  ;;  %v252_v10 = vld [vmem:[%s444_s15 + $0x18] sm:$0x77] }
  0x11   : > { %v247_v11 = vsel %vm432_vm6, 0, %v246_v8  ;;  %v250_v12 = vsel %vm432_vm6, 0, %v249_v9  ;;  %v253_v13 = vsel %vm432_vm6, 0, %v252_v10  ;;  %v243_v14 = vld [vmem:[%s444_s15] sm:$0x77]  ;;  %v132_v15 = vrot.slane %v118_v6, 4  ;;  %vm309_vm11 = vmand %vm307_vm7, %vm308_vm9 }
  0x12   : > { %248 = vst [vmem:[%s444_s15 + $0x8] sm:$0x77] %v247_v11  ;;  %251 = vst [vmem:[%s444_s15 + $0x10] sm:$0x77] %v250_v12  ;;  %v244_v16 = vsel %vm432_vm6, 0, %v243_v14  ;;  %v154_v19 = vshrl.u32 %v118_v6, 16  ;;  %v465_v20 = vsub.s32 %v263_v4, %v265_v5 }
  0x13   : > { %254 = vst [vmem:[%s444_s15 + $0x18] sm:$0x77] %v253_v13  ;;  %v255_v17 = vld [vmem:[%s444_s15 + $0x20] sm:$0x77]  ;;  %245 = vst [vmem:[%s444_s15] sm:$0x77] %v244_v16  ;;  %v133_v22 = vrot.slane %v119_v7, 4  ;;  %v146_v27 = vmax.bf16 %v132_v15, %v118_v6 }
  0x14   : > { %v256_v21 = vsel %vm432_vm6, 0, %v255_v17  ;;  %v157_v23 = vshll.u32 %v118_v6, 16  ;;  %v163_v24 = vshrl.u32 %v119_v7, 16  ;;  %v121_v25 = vld [vmem:[%s439_s12 + $0x18] sm:$0xff]  ;;  %v134_v26 = vrot.slane %v120_v18, 4  ;;  %v122_v34 = vld [vmem:[%s439_s12 + $0x20] sm:$0xff]  ;;  %vm312_vm12 = vmand %vm310_vm8, %vm311_vm10 }
  0x15   : > { %257 = vst [vmem:[%s444_s15 + $0x20] sm:$0x77] %v256_v21  ;;  %v156_v28 = vrot.slane %v154_v19, 6  ;;  %v166_v29 = vshll.u32 %v119_v7, 16  ;;  %v172_v32 = vshrl.u32 %v120_v18, 16  ;;  %v175_v33 = vshll.u32 %v120_v18, 16  ;;  %vm480_vm13 = vmor %vm312_vm12, %vm309_vm11 }
  0x16   : > { %v159_v30 = vrot.slane %v157_v23, 7  ;;  %v165_v31 = vrot.slane %v163_v24, 6  ;;  %v135_v36 = vrot.slane %v121_v25, 4  ;;  %v136_v37 = vrot.slane %v122_v34, 4  ;;  %v123_v55 = vld [vmem:[%s439_s12 + $0x28] sm:$0xff]  ;;  %v124_v60 = vld [vmem:[%s439_s12 + $0x30] sm:$0xff] }
  0x17   : > { %v168_v35 = vrot.slane %v166_v29, 7  ;;  %v181_v38 = vshrl.u32 %v121_v25, 16  ;;  %v174_v40 = vrot.slane %v172_v32, 6  ;;  %v177_v41 = vrot.slane %v175_v33, 7 }
  0x18   : > { %v160_v39 = vor.u32 %v159_v30, %v156_v28  ;;  %v184_v42 = vshll.u32 %v121_v25, 16  ;;  %v147_v43 = vmax.bf16 %v133_v22, %v119_v7  ;;  %v148_v44 = vmax.bf16 %v134_v26, %v120_v18 }
  0x19   : > { %v169_v45 = vor.u32 %v168_v35, %v165_v31  ;;  %v183_v46 = vrot.slane %v181_v38, 6  ;;  %v178_v48 = vor.u32 %v177_v41, %v174_v40  ;;  %v190_v50 = vshrl.u32 %v122_v34, 16 }
  0x1a   : > { %v161_v47 = vrot.slane %v160_v39, 2  ;;  %v186_v49 = vrot.slane %v184_v42, 7  ;;  %v149_v52 = vmax.bf16 %v135_v36, %v121_v25  ;;  %v150_v53 = vmax.bf16 %v136_v37, %v122_v34  ;;  %v388_v42 = vld [vmem:[%s444_s15 + $0x10] sm:$0x33] }
  0x1b   : > { %v170_v51 = vrot.slane %v169_v45, 2  ;;  %v193_v54 = vshll.u32 %v122_v34, 16  ;;  %v179_v56 = vrot.slane %v178_v48, 2  ;;  %v192_v59 = vrot.slane %v190_v50, 6  ;;  %v386_v34 = vld [vmem:[%s444_s15 + $0x8] sm:$0x33] }
  0x1c   : > { %v223_v57 = vmax.bf16 %v161_v47, %v146_v27  ;;  %v187_v58 = vor.u32 %v186_v49, %v183_v46  ;;  %v137_v63 = vrot.slane %v123_v55, 4  ;;  %v138_v0 = vrot.slane %v124_v60, 4  ;;  %v390_v49 = vld [vmem:[%s444_s15 + $0x18] sm:$0x33] }
  0x1d   : > { %v224_v61 = vmax.bf16 %v170_v51, %v147_v43  ;;  %v195_v62 = vrot.slane %v193_v54, 7  ;;  %v225_v1 = vmax.bf16 %v179_v56, %v148_v44  ;;  %v199_v3 = vshrl.u32 %v123_v55, 16 }
  0x1e   : > { %v188_v2 = vrot.slane %v187_v58, 2  ;;  %v202_v4 = vshll.u32 %v123_v55, 16  ;;  %v208_v7 = vshrl.u32 %v124_v60, 16  ;;  %v211_v8 = vshll.u32 %v124_v60, 16 }
  0x1f   : > { %v230_v5 = vmax.bf16 %v224_v61, %v223_v57  ;;  %v196_v6 = vor.u32 %v195_v62, %v192_v59  ;;  %v201_v10 = vrot.slane %v199_v3, 6  ;;  %v151_v17 = vmax.bf16 %v137_v63, %v123_v55 }
  0x20   : > { %v226_v9 = vmax.bf16 %v188_v2, %v149_v52  ;;  %v204_v11 = vrot.slane %v202_v4, 7  ;;  %v210_v14 = vrot.slane %v208_v7, 6  ;;  %v213_v15 = vrot.slane %v211_v8, 7 }
  0x21   : > { %v233_v12 = vmax.bf16 %v230_v5, %v225_v1  ;;  %v197_v13 = vrot.slane %v196_v6, 2  ;;  %v152_v22 = vmax.bf16 %v138_v0, %v124_v60 }
  0x22   : > { %v231_v16 = vmax.bf16 %v226_v9, %v225_v1  ;;  %v205_v18 = vor.u32 %v204_v11, %v201_v10  ;;  %v214_v23 = vor.u32 %v213_v15, %v210_v14 }
  0x23   : > { %v267_v19 = vrot.slane %v233_v12, %v465_v20  ;;  %v227_v21 = vmax.bf16 %v197_v13, %v150_v53 }
  0x24   : > { %v206_v24 = vrot.slane %v205_v18, 2  ;;  %v215_v28 = vrot.slane %v214_v23, 2 }
  0x25   : > { %v283_v25 = vshrl.u32 %v267_v19, 16  ;;  %v286_v26 = vshll.u32 %v267_v19, 16  ;;  %v234_v27 = vmax.bf16 %v231_v16, %v227_v21 }
  0x26   : > { %v228_v29 = vmax.bf16 %v206_v24, %v151_v17  ;;  %v229_v32 = vmax.bf16 %v215_v28, %v152_v22 }
  0x27   : > { %v285_v30 = vrot.slane %v283_v25, 7  ;;  %v274_v31 = vrot.slane %v234_v27, %v465_v20 }
  0x28   : > { %v232_v35 = vmax.bf16 %v228_v29, %v227_v21 }
  0x29   : > { %v288_v36 = vor.u32 %v286_v26, %v285_v30  ;;  %v290_v37 = vshrl.u32 %v274_v31, 16  ;;  %v293_v38 = vshll.u32 %v274_v31, 16 }
  0x2a   : > { %v235_v39 = vmax.bf16 %v232_v35, %v229_v32 }
  0x2b   : > { %v315_v40 = vsel %vm480_vm13, %v288_v36, %v386_v34  ;;  %v292_v41 = vrot.slane %v290_v37, 7 }
  0x2c   : > { %387 = vst [vmem:[%s444_s15 + $0x8] sm:$0x33] %v315_v40  ;;  %v281_v43 = vrot.slane %v235_v39, %v465_v20 }
  0x2d   : > { %v295_v44 = vor.u32 %v293_v38, %v292_v41 }
  0x2e   : > { %v297_v45 = vshrl.u32 %v281_v43, 16  ;;  %v300_v46 = vshll.u32 %v281_v43, 16 }
  0x2f   : > { %v318_v47 = vsel %vm480_vm13, %v295_v44, %v388_v42 }
  0x30   : > { %389 = vst [vmem:[%s444_s15 + $0x10] sm:$0x33] %v318_v47  ;;  %v299_v48 = vrot.slane %v297_v45, 7 }
  0x32   : > { %v302_v50 = vor.u32 %v300_v46, %v299_v48 }
  0x34   : > { %v321_v51 = vsel %vm480_vm13, %v302_v50, %v390_v49 }
  0x35   : > { %391 = vst [vmem:[%s444_s15 + $0x18] sm:$0x33] %v321_v51 }
  0x36 PF: > { %s11_s6 = sadd.s32 1, %s411_s6  }
  0x37   : > { %p8_p4 = scmp.ge.s32.totalorder %s11_s6, 4  }
  0x39   :  { %10 = sbr.rel (!%p8_p4) target bundleno = 1 (0x1), region = 55 }

// kernel: features_forward.9
= control target key start
LH: loop header
LB: loop body
LE: loop exit
PB: predicated region body
PF: predicated region fallthrough
CT: control target
= control target key end

     0   :  { %s5112_s12 = smov 0   ;;  %s6445_s0 = inlined_call_operand.vmem [shape: bf16[2,11,11,128], index: 0, kind: input, shape index: {}]   ;;  %s6446_s1 = inlined_call_operand.vmem [shape: bf16[3200,256], index: 1, kind: input, shape index: {}]   ;;  %s6447_s2 = inlined_call_operand.vmem [shape: f32[1,256], index: 2, kind: input, shape index: {}]   ;;  %s6448_s3 = inlined_call_operand.vmem [shape: bf16[2,8,8,256], index: 3, kind: output, shape index: {}]  }
   0x1 LB: > { %s3983_s13 = sadd.s32 4294967295, %s5084_s12   ;;  %p3987_p0 = scmp.ge.s32.totalorder %s5084_s12, 1  ;;  %s5084_s12 = sphi %s5112_s12, %s13_s12  }
   0x2   : > { %p137_p1 = scmp.lt.s32.totalorder %s5084_s12, 3 }
   0x4   : > { %p138_p2 = pnand %p3987_p0, %p137_p1 }
   0x5   : > { %p161_p3 = scmp.lt.s32.totalorder (!%p138_p2), %s3983_s13, 1  ;;  %s5143_s24 = smov (!%p138_p2), 0  }
   0x6   : > { %141 = sbr.rel (%p138_p2) target bundleno = 641 (0x281), region = 32 }
   0xb   : > { %v5123_v0 = vld [vmem:[%s6447_s2] sm:$0x3]  ;;  %s6450_s13 = smov (!%p161_p3, %s3983_s13), 1  ;;  %v5090_v1 = vmov 0  }
   0xc   : > { %s4440_s16 = smul.u32 88, %s6450_s13  ;;  %s4436_s17 = sshll.u32 %s6450_s13, 6 }
   0xd   : > { %s5128_s20 = scalar_lea.vmem %s6448_s3, %s4436_s17 }
   0xe   : > { %s5133_s23 = scalar_lea.vmem %s6445_s0, %s4440_s16  ;;  %173 = vst [vmem:[%s5128_s20] sm:$0xff] %v5090_v1  ;;  %174 = vst [vmem:[%s5128_s20 + $0x8] sm:$0xff] %v5090_v1 }
   0xf   : > { %175 = vst [vmem:[%s5128_s20 + $0x10] sm:$0xff] %v5090_v1  ;;  %176 = vst [vmem:[%s5128_s20 + $0x18] sm:$0xff] %v5090_v1 }
  0x10   : > { %177 = vst [vmem:[%s5128_s20 + $0x20] sm:$0xff] %v5090_v1  ;;  %178 = vst [vmem:[%s5128_s20 + $0x28] sm:$0xff] %v5090_v1 }
  0x11   : > { %179 = vst [vmem:[%s5128_s20 + $0x30] sm:$0xff] %v5090_v1  ;;  %180 = vst [vmem:[%s5128_s20 + $0x38] sm:$0xff] %v5090_v1 }
  0x12 LB: >> { %v4459_v2 = vld [vmem:[%s6446_s1 + $0xf4] ss:$8 sps:$4 sm:$0xff]   ;;  %v5091_v4 = vmov 0   ;;  %v4463_v5 = vld [vmem:[%s6446_s1 + $0xf0] ss:$8 sps:$4 sm:$0xff]   ;;  %s4437_s16 = sshll.u32 %s5088_s24, 3  ;;  %s5088_s24 = sphi %s5143_s24, %s186_s24  }
  0x13   : >> { %v4461_v3 = vld [vmem:[%s6446_s1 + $0x74] ss:$8 sps:$4 sm:$0xff]   ;;  %346 = vmatprep.mubr.bf16.mxu0 %v5091_v4  ;;  %467 = vmatprep.mubr.bf16.mxu1 %v5091_v4  ;;  %v4464_v6 = vld [vmem:[%s6446_s1 + $0x70] ss:$8 sps:$4 sm:$0xff]   ;;  %v4465_v7 = vld [vmem:[%s6446_s1 + $0xe4] ss:$8 sps:$4 sm:$0xff]   ;;  %s5220_s22 = scalar_lea.vmem %s5133_s23, %s4437_s16 }
  0x14   : >> { %314 = vmatprep.subr.bf16.mxu0 %v4459_v2  ;;  %435 = vmatprep.subr.bf16.mxu1 %v4461_v3  ;;  %v4467_v8 = vld [vmem:[%s6446_s1 + $0x64] ss:$8 sps:$4 sm:$0xff]   ;;  %v4469_v9 = vld [vmem:[%s6446_s1 + $0xe0] ss:$8 sps:$4 sm:$0xff]   ;;  %v4471_v11 = vld [vmem:[%s6446_s1 + $0xd4] ss:$8 sps:$4 sm:$0xff]  }
  0x15   : >> { %315 = vmatpush1.bf16.msra.mxu0 %v4463_v5  ;;  %436 = vmatpush1.bf16.msra.mxu1 %v4464_v6  ;;  %v4470_v10 = vld [vmem:[%s6446_s1 + $0x60] ss:$8 sps:$4 sm:$0xff]   ;;  %v4473_v12 = vld [vmem:[%s6446_s1 + $0x54] ss:$8 sps:$4 sm:$0xff]   ;;  %v4475_v13 = vld [vmem:[%s6446_s1 + $0xd0] ss:$8 sps:$4 sm:$0xff]  }
  0x16   : >> { %316 = vmatprep.subr.bf16.mxu0 %v4465_v7  ;;  %437 = vmatprep.subr.bf16.mxu1 %v4467_v8  ;;  %v4476_v14 = vld [vmem:[%s6446_s1 + $0x50] ss:$8 sps:$4 sm:$0xff]   ;;  %v4477_v15 = vld [vmem:[%s6446_s1 + $0xc4] ss:$8 sps:$4 sm:$0xff]   ;;  %v4481_v17 = vld [vmem:[%s6446_s1 + $0xc0] ss:$8 sps:$4 sm:$0xff]  }
  0x17   : >> { %v4479_v16 = vld [vmem:[%s6446_s1 + $0x44] ss:$8 sps:$4 sm:$0xff]   ;;  %v4482_v18 = vld [vmem:[%s6446_s1 + $0x40] ss:$8 sps:$4 sm:$0xff]   ;;  %v4483_v19 = vld [vmem:[%s6446_s1 + $0xb4] ss:$8 sps:$4 sm:$0xff]  }
  0x18   : >> { %v4485_v20 = vld [vmem:[%s6446_s1 + $0x34] ss:$8 sps:$4 sm:$0xff]   ;;  %v4487_v21 = vld [vmem:[%s6446_s1 + $0xb0] ss:$8 sps:$4 sm:$0xff]   ;;  %v4489_v23 = vld [vmem:[%s6446_s1 + $0xa4] ss:$8 sps:$4 sm:$0xff]  }
  0x19   : >> { %317 = vmatpush1.bf16.msra.mxu0 %v4469_v9  ;;  %438 = vmatpush1.bf16.msra.mxu1 %v4470_v10  ;;  %v4488_v22 = vld [vmem:[%s6446_s1 + $0x30] ss:$8 sps:$4 sm:$0xff]   ;;  %v4491_v24 = vld [vmem:[%s6446_s1 + $0x24] ss:$8 sps:$4 sm:$0xff]   ;;  %v4493_v25 = vld [vmem:[%s6446_s1 + $0xa0] ss:$8 sps:$4 sm:$0xff]  }
  0x1a   : >> { %318 = vmatprep.subr.bf16.mxu0 %v4471_v11  ;;  %439 = vmatprep.subr.bf16.mxu1 %v4473_v12  ;;  %v4494_v26 = vld [vmem:[%s6446_s1 + $0x20] ss:$8 sps:$4 sm:$0xff]   ;;  %v4495_v27 = vld [vmem:[%s6446_s1 + $0x94] ss:$8 sps:$4 sm:$0xff]   ;;  %v4499_v31 = vld [vmem:[%s6446_s1 + $0x90] ss:$8 sps:$4 sm:$0xff]  }
  0x1b   : >> { %v4497_v28 = vld [vmem:[%s6446_s1 + $0x14] ss:$8 sps:$4 sm:$0xff]   ;;  %v190_v29 = vld [vmem:[%s5220_s22] sm:$0xf]  ;;  %v4500_v32 = vld [vmem:[%s6446_s1 + $0x10] ss:$8 sps:$4 sm:$0xff]  }
  0x1c   : >> { %v3993_v30 = vcombine.low %v190_v29, %v190_v29  ;;  %v4501_v34 = vld [vmem:[%s6446_s1 + $0x84] ss:$8 sps:$4 sm:$0xff]   ;;  %v4505_v36 = vld [vmem:[%s6446_s1 + $0x80] ss:$8 sps:$4 sm:$0xff]   ;;  %v4510_v40 = vld [vmem:[%s6446_s1 + $0x174] ss:$8 sps:$4 sm:$0xff]  }
  0x1d   : >> { %319 = vmatpush1.bf16.msra.mxu0 %v4475_v13  ;;  %440 = vmatpush1.bf16.msra.mxu1 %v4476_v14  ;;  %v4503_v35 = vld [vmem:[%s6446_s1 + $0x4] ss:$8 sps:$4 sm:$0xff]   ;;  %v4506_v39 = vld [vmem:[%s6446_s1] ss:$8 sps:$4 sm:$0xff]   ;;  %v4513_v41 = vld [vmem:[%s6446_s1 + $0x1f4] ss:$8 sps:$4 sm:$0xff]  }
  0x1e   : >> { %320 = vmatprep.subr.bf16.mxu0 %v4477_v15  ;;  %441 = vmatprep.subr.bf16.mxu1 %v4479_v16  ;;  %v229_v33 = vshll.u32 %v3993_v30, 16  ;;  %v227_v37 = vshrl.u32 %v3993_v30, 16  ;;  %v4508_v43 = vld [vmem:[%s6446_s1 + $0x170] ss:$8 sps:$4 sm:$0xff]   ;;  %v4516_v45 = vld [vmem:[%s6446_s1 + $0x164] ss:$8 sps:$4 sm:$0xff]  }
  0x1f   : >> { %v4511_v44 = vld [vmem:[%s6446_s1 + $0x1f0] ss:$8 sps:$4 sm:$0xff]   ;;  %v4519_v46 = vld [vmem:[%s6446_s1 + $0x1e4] ss:$8 sps:$4 sm:$0xff]   ;;  %v4514_v47 = vld [vmem:[%s6446_s1 + $0x160] ss:$8 sps:$4 sm:$0xff]  }
  0x20   : >> { %v231_v38 = vrot.slane %v229_v33, 1  ;;  %v4517_v48 = vld [vmem:[%s6446_s1 + $0x1e0] ss:$8 sps:$4 sm:$0xff]   ;;  %v4522_v49 = vld [vmem:[%s6446_s1 + $0x154] ss:$8 sps:$4 sm:$0xff]   ;;  %vm3897_vm0 = vcmask 1043456  }
  0x21   : >> { %321 = vmatpush1.bf16.msra.mxu0 %v4481_v17  ;;  %442 = vmatpush1.bf16.msra.mxu1 %v4482_v18  ;;  %v4525_v50 = vld [vmem:[%s6446_s1 + $0x1d4] ss:$8 sps:$4 sm:$0xff]   ;;  %v4520_v51 = vld [vmem:[%s6446_s1 + $0x150] ss:$8 sps:$4 sm:$0xff]   ;;  %v4528_v53 = vld [vmem:[%s6446_s1 + $0x144] ss:$8 sps:$4 sm:$0xff]  }
  0x22   : >> { %322 = vmatprep.subr.bf16.mxu0 %v4483_v19  ;;  %443 = vmatprep.subr.bf16.mxu1 %v4485_v20  ;;  %v232_v42 = vor.u32 %v231_v38, %v227_v37  ;;  %v4523_v52 = vld [vmem:[%s6446_s1 + $0x1d0] ss:$8 sps:$4 sm:$0xff]   ;;  %v4531_v54 = vld [vmem:[%s6446_s1 + $0x1c4] ss:$8 sps:$4 sm:$0xff]   ;;  %v4526_v55 = vld [vmem:[%s6446_s1 + $0x140] ss:$8 sps:$4 sm:$0xff]  }
  0x23   : >> { %v4529_v56 = vld [vmem:[%s6446_s1 + $0x1c0] ss:$8 sps:$4 sm:$0xff]   ;;  %v4534_v57 = vld [vmem:[%s6446_s1 + $0x134] ss:$8 sps:$4 sm:$0xff]   ;;  %v4532_v59 = vld [vmem:[%s6446_s1 + $0x130] ss:$8 sps:$4 sm:$0xff]  }
  0x24   : >> { %v4537_v58 = vld [vmem:[%s6446_s1 + $0x1b4] ss:$8 sps:$4 sm:$0xff]   ;;  %v4535_v60 = vld [vmem:[%s6446_s1 + $0x1b0] ss:$8 sps:$4 sm:$0xff]   ;;  %v4540_v61 = vld [vmem:[%s6446_s1 + $0x124] ss:$8 sps:$4 sm:$0xff]  }
  0x25   : >> { %323 = vmatpush1.bf16.msra.mxu0 %v4487_v21  ;;  %444 = vmatpush1.bf16.msra.mxu1 %v4488_v22  ;;  %v4543_v62 = vld [vmem:[%s6446_s1 + $0x1a4] ss:$8 sps:$4 sm:$0xff]   ;;  %v4538_v63 = vld [vmem:[%s6446_s1 + $0x120] ss:$8 sps:$4 sm:$0xff]   ;;  %v4546_v3 = vld [vmem:[%s6446_s1 + $0x114] ss:$8 sps:$4 sm:$0xff]  }
  0x26   : >> { %324 = vmatprep.subr.bf16.mxu0 %v4489_v23  ;;  %445 = vmatprep.subr.bf16.mxu1 %v4491_v24  ;;  %v4556_v1 = vld [vmem:[%s5220_s22] sm:$0x1e]   ;;  %v4549_v5 = vld [vmem:[%s6446_s1 + $0x194] ss:$8 sps:$4 sm:$0xff]   ;;  %v4544_v6 = vld [vmem:[%s6446_s1 + $0x110] ss:$8 sps:$4 sm:$0xff]  }
  0x27   : >> { %v4541_v2 = vld [vmem:[%s6446_s1 + $0x1a0] ss:$8 sps:$4 sm:$0xff]   ;;  %v641_v7 = vshrl.u32 %v4556_v1, 16  ;;  %v644_v8 = vshll.u32 %v4556_v1, 16  ;;  %v4547_v9 = vld [vmem:[%s6446_s1 + $0x190] ss:$8 sps:$4 sm:$0xff]  }
  0x28   : >> { %v4552_v10 = vld [vmem:[%s6446_s1 + $0x104] ss:$8 sps:$4 sm:$0xff]   ;;  %v4550_v12 = vld [vmem:[%s6446_s1 + $0x100] ss:$8 sps:$4 sm:$0xff]   ;;  %v4559_v16 = vld [vmem:[%s6446_s1 + $0x274] ss:$8 sps:$4 sm:$0xff]  }
  0x29   : >> { %325 = vmatpush1.bf16.msra.mxu0 %v4493_v25  ;;  %446 = vmatpush1.bf16.msra.mxu1 %v4494_v26  ;;  %v4555_v11 = vld [vmem:[%s6446_s1 + $0x184] ss:$8 sps:$4 sm:$0xff]   ;;  %v643_v13 = vrot.slane %v641_v7, 1  ;;  %v646_v14 = vrot.slane %v644_v8, 2  ;;  %v4553_v15 = vld [vmem:[%s6446_s1 + $0x180] ss:$8 sps:$4 sm:$0xff]  }
  0x2a   : >> { %326 = vmatprep.subr.bf16.mxu0 %v4495_v27  ;;  %447 = vmatprep.subr.bf16.mxu1 %v4497_v28  ;;  %v4562_v17 = vld [vmem:[%s6446_s1 + $0x2f4] ss:$8 sps:$4 sm:$0xff]   ;;  %v499_v18 = vrot.slane %v4556_v1, 1  ;;  %v4557_v19 = vld [vmem:[%s6446_s1 + $0x270] ss:$8 sps:$4 sm:$0xff]   ;;  %vm3900_vm2 = vcmask 1047556  }
  0x2b   : >> { %v647_v20 = vor.u32 %v646_v14, %v643_v13  ;;  %v4560_v21 = vld [vmem:[%s6446_s1 + $0x2f0] ss:$8 sps:$4 sm:$0xff]   ;;  %v4565_v22 = vld [vmem:[%s6446_s1 + $0x264] ss:$8 sps:$4 sm:$0xff]   ;;  %v4563_v24 = vld [vmem:[%s6446_s1 + $0x260] ss:$8 sps:$4 sm:$0xff]  }
  0x2c   : >> { %v4568_v23 = vld [vmem:[%s6446_s1 + $0x2e4] ss:$8 sps:$4 sm:$0xff]   ;;  %v4566_v25 = vld [vmem:[%s6446_s1 + $0x2e0] ss:$8 sps:$4 sm:$0xff]   ;;  %v4571_v26 = vld [vmem:[%s6446_s1 + $0x254] ss:$8 sps:$4 sm:$0xff]  }
  0x2d   : >> { %327 = vmatpush1.bf16.msra.mxu0 %v4499_v31  ;;  %448 = vmatpush1.bf16.msra.mxu1 %v4500_v32  ;;  %v4574_v27 = vld [vmem:[%s6446_s1 + $0x2d4] ss:$8 sps:$4 sm:$0xff]   ;;  %v4569_v28 = vld [vmem:[%s6446_s1 + $0x250] ss:$8 sps:$4 sm:$0xff]   ;;  %v4577_v30 = vld [vmem:[%s6446_s1 + $0x244] ss:$8 sps:$4 sm:$0xff]  }
  0x2e   : >> { %328 = vmatprep.subr.bf16.mxu0 %v4501_v34  ;;  %449 = vmatprep.subr.bf16.mxu1 %v4503_v35  ;;  %v4580_v31 = vld [vmem:[%s6446_s1 + $0x2c4] ss:$8 sps:$4 sm:$0xff]   ;;  %v4575_v32 = vld [vmem:[%s6446_s1 + $0x240] ss:$8 sps:$4 sm:$0xff]   ;;  %v4583_v34 = vld [vmem:[%s6446_s1 + $0x234] ss:$8 sps:$4 sm:$0xff]  }
  0x2f   : >> { %v4578_v33 = vld [vmem:[%s6446_s1 + $0x2c0] ss:$8 sps:$4 sm:$0xff]   ;;  %v4586_v35 = vld [vmem:[%s6446_s1 + $0x2b4] ss:$8 sps:$4 sm:$0xff]   ;;  %v4584_v37 = vld [vmem:[%s6446_s1 + $0x2b0] ss:$8 sps:$4 sm:$0xff]  }
  0x30   : >> { %v4589_v38 = vld [vmem:[%s6446_s1 + $0x224] ss:$8 sps:$4 sm:$0xff]   ;;  %v4622_v1 = vld [vmem:[%s6446_s1 + $0x3d0] ss:$8 sps:$4 sm:$0xff]   ;;  %v4633_v7 = vld [vmem:[%s6446_s1 + $0x334] ss:$8 sps:$4 sm:$0xff]  }
  0x31   : >> { %329 = vmatpush1.bf16.msra.mxu0 %v4505_v36  ;;  %450 = vmatpush1.bf16.msra.mxu1 %v4506_v39  ;;  %v4581_v36 = vld [vmem:[%s6446_s1 + $0x230] ss:$8 sps:$4 sm:$0xff]   ;;  %v4592_v39 = vld [vmem:[%s6446_s1 + $0x2a4] ss:$8 sps:$4 sm:$0xff]   ;;  %v4636_v8 = vld [vmem:[%s6446_s1 + $0x3b4] ss:$8 sps:$4 sm:$0xff]  }
  0x32   : >> { %581 = vmatprep.subr.bf16.mxu0 %v4510_v40  ;;  %729 = vmatprep.subr.bf16.mxu1 %v4513_v41  ;;  %v4587_v40 = vld [vmem:[%s6446_s1 + $0x220] ss:$8 sps:$4 sm:$0xff]   ;;  %vm3898_vm1 = vsmask.f32 3328  ;;  %vm3901_vm3 = vsmask.f32 7424 }
  0x33   : >> { %v4590_v41 = vld [vmem:[%s6446_s1 + $0x2a0] ss:$8 sps:$4 sm:$0xff]   ;;  %vm3899_vm4 = vmand %vm3897_vm0, %vm3898_vm1  ;;  %s186_s24 = sadd.s32 1, %s5088_s24  }
  0x34   : >> { %347 = vmatmul.mubr.bf16.vlgmr.msra.gmra.mxu0 %v232_v42  ;;  %468 = vmatmul.mubr.bf16.vlgmr.msra.gmra.mxu1 %v190_v29  ;;  %v4572_v29 = vld [vmem:[%s6446_s1 + $0x2d0] ss:$8 sps:$4 sm:$0xff]   ;;  %v4595_v42 = vld [vmem:[%s6446_s1 + $0x214] ss:$8 sps:$4 sm:$0xff]   ;;  %v4637_v14 = vld [vmem:[%s6446_s1 + $0x320] ss:$8 sps:$4 sm:$0xff]  }
  0x35   : >> { %582 = vmatpush1.bf16.msra.mxu0 %v4508_v43  ;;  %730 = vmatpush1.bf16.msra.mxu1 %v4511_v44  ;;  %v4598_v43 = vld [vmem:[%s6446_s1 + $0x294] ss:$8 sps:$4 sm:$0xff]   ;;  %v4593_v44 = vld [vmem:[%s6446_s1 + $0x210] ss:$8 sps:$4 sm:$0xff]   ;;  %vm3902_vm5 = vmand %vm3900_vm2, %vm3901_vm3  ;;  %p183_p4 = scmp.ge.s32.totalorder %s186_s24, 7  }
  0x36   : >> { %583 = vmatprep.subr.bf16.mxu0 %v4516_v45  ;;  %731 = vmatprep.subr.bf16.mxu1 %v4519_v46  ;;  %v4596_v45 = vld [vmem:[%s6446_s1 + $0x290] ss:$8 sps:$4 sm:$0xff]   ;;  %v4601_v46 = vld [vmem:[%s6446_s1 + $0x204] ss:$8 sps:$4 sm:$0xff]   ;;  %vm3903_vm6 = vmor %vm3902_vm5, %vm3899_vm4 }
  0x37   : >> { %613 = vmatprep.mubr.bf16.mxu0 %v5091_v4  ;;  %761 = vmatprep.mubr.bf16.mxu1 %v5091_v4 }
  0x39   : >> { %584 = vmatpush1.bf16.msra.mxu0 %v4514_v47  ;;  %732 = vmatpush1.bf16.msra.mxu1 %v4517_v48  ;;  %v4604_v47 = vld [vmem:[%s6446_s1 + $0x284] ss:$8 sps:$4 sm:$0xff]   ;;  %v4599_v48 = vld [vmem:[%s6446_s1 + $0x200] ss:$8 sps:$4 sm:$0xff]  }
  0x3a   : >> { %585 = vmatprep.subr.bf16.mxu0 %v4522_v49  ;;  %733 = vmatprep.subr.bf16.mxu1 %v4525_v50  ;;  %v4602_v49 = vld [vmem:[%s6446_s1 + $0x280] ss:$8 sps:$4 sm:$0xff]  }
  0x3b   : >> { %v4605_v50 = vld [vmem:[%s5220_s22] sm:$0x3c]  }
  0x3d   : >> { %586 = vmatpush1.bf16.msra.mxu0 %v4520_v51  ;;  %734 = vmatpush1.bf16.msra.mxu1 %v4523_v52  ;;  %v4608_v51 = vld [vmem:[%s6446_s1 + $0x374] ss:$8 sps:$4 sm:$0xff]  }
  0x3e   : >> { %587 = vmatprep.subr.bf16.mxu0 %v4528_v53  ;;  %735 = vmatprep.subr.bf16.mxu1 %v4531_v54  ;;  %v4612_v52 = vld [vmem:[%s6446_s1 + $0x3f4] ss:$8 sps:$4 sm:$0xff]   ;;  %v4606_v53 = vld [vmem:[%s6446_s1 + $0x370] ss:$8 sps:$4 sm:$0xff]   ;;  %v795_v54 = vrot.slane %v4605_v50, 2 }
  0x3f   : >> { %v4688_v50 = vld [vmem:[%s6446_s1 + $0x424] ss:$8 sps:$4 sm:$0xff]  }
  0x41   : >> { %588 = vmatpush1.bf16.msra.mxu0 %v4526_v55  ;;  %736 = vmatpush1.bf16.msra.mxu1 %v4529_v56  ;;  %v4077_v55 = vld [vmem:[%s5220_s22 + $0x8] sm:$0xf]  ;;  %v4610_v56 = vld [vmem:[%s6446_s1 + $0x3f0] ss:$8 sps:$4 sm:$0xff]  }
  0x42   : >> { %589 = vmatprep.subr.bf16.mxu0 %v4534_v57  ;;  %737 = vmatprep.subr.bf16.mxu1 %v4537_v58  ;;  %v4615_v57 = vld [vmem:[%s6446_s1 + $0x364] ss:$8 sps:$4 sm:$0xff]   ;;  %v4094_v13 = vcombine.low %v4077_v55, %v4077_v55 }
  0x43   : >> { %v4618_v58 = vld [vmem:[%s6446_s1 + $0x3e4] ss:$8 sps:$4 sm:$0xff]  }
  0x45   : >> { %590 = vmatpush1.bf16.msra.mxu0 %v4532_v59  ;;  %738 = vmatpush1.bf16.msra.mxu1 %v4535_v60  ;;  %v4613_v59 = vld [vmem:[%s6446_s1 + $0x360] ss:$8 sps:$4 sm:$0xff]  }
  0x46   : >> { %591 = vmatprep.subr.bf16.mxu0 %v4540_v61  ;;  %739 = vmatprep.subr.bf16.mxu1 %v4543_v62  ;;  %v4616_v60 = vld [vmem:[%s6446_s1 + $0x3e0] ss:$8 sps:$4 sm:$0xff]   ;;  %v4621_v61 = vld [vmem:[%s6446_s1 + $0x354] ss:$8 sps:$4 sm:$0xff]  }
  0x47   : >> { %v4624_v62 = vld [vmem:[%s6446_s1 + $0x3d4] ss:$8 sps:$4 sm:$0xff]  }
  0x49   : >> { %592 = vmatpush1.bf16.msra.mxu0 %v4538_v63  ;;  %740 = vmatpush1.bf16.msra.mxu1 %v4541_v2  ;;  %v4619_v63 = vld [vmem:[%s6446_s1 + $0x350] ss:$8 sps:$4 sm:$0xff]   ;;  %v4627_v2 = vld [vmem:[%s6446_s1 + $0x344] ss:$8 sps:$4 sm:$0xff]  }
  0x4a   : >> { %593 = vmatprep.subr.bf16.mxu0 %v4546_v3  ;;  %741 = vmatprep.subr.bf16.mxu1 %v4549_v5  ;;  %v4630_v3 = vld [vmem:[%s6446_s1 + $0x3c4] ss:$8 sps:$4 sm:$0xff]   ;;  %v4625_v5 = vld [vmem:[%s6446_s1 + $0x340] ss:$8 sps:$4 sm:$0xff]  }
  0x4d   : >> { %594 = vmatpush1.bf16.msra.mxu0 %v4544_v6  ;;  %742 = vmatpush1.bf16.msra.mxu1 %v4547_v9  ;;  %v4628_v6 = vld [vmem:[%s6446_s1 + $0x3c0] ss:$8 sps:$4 sm:$0xff]   ;;  %v4631_v9 = vld [vmem:[%s6446_s1 + $0x330] ss:$8 sps:$4 sm:$0xff]  }
  0x4e   : >> { %595 = vmatprep.subr.bf16.mxu0 %v4552_v10  ;;  %743 = vmatprep.subr.bf16.mxu1 %v4555_v11  ;;  %v4634_v10 = vld [vmem:[%s6446_s1 + $0x3b0] ss:$8 sps:$4 sm:$0xff]   ;;  %v4639_v11 = vld [vmem:[%s6446_s1 + $0x324] ss:$8 sps:$4 sm:$0xff]  }
  0x51   : >> { %596 = vmatpush1.bf16.msra.mxu0 %v4550_v12  ;;  %744 = vmatpush1.bf16.msra.mxu1 %v4553_v15  ;;  %v4642_v12 = vld [vmem:[%s6446_s1 + $0x3a4] ss:$8 sps:$4 sm:$0xff]   ;;  %v4640_v15 = vld [vmem:[%s6446_s1 + $0x3a0] ss:$8 sps:$4 sm:$0xff]  }
  0x52   : >> { %877 = vmatprep.subr.bf16.mxu0 %v4559_v16  ;;  %1021 = vmatprep.subr.bf16.mxu1 %v4562_v17  ;;  %v4645_v16 = vld [vmem:[%s6446_s1 + $0x314] ss:$8 sps:$4 sm:$0xff]  }
  0x53   : >> { %v4648_v17 = vld [vmem:[%s6446_s1 + $0x394] ss:$8 sps:$4 sm:$0xff]  }
  0x54   : >> { %614 = vmatmul.mubr.bf16.vlgmr.msra.gmra.mxu0 %v499_v18  ;;  %762 = vmatmul.mubr.bf16.vlgmr.msra.gmra.mxu1 %v647_v20  ;;  %v1086_v18 = vshll.u32 %v4094_v13, 16  ;;  %v4646_v20 = vld [vmem:[%s6446_s1 + $0x390] ss:$8 sps:$4 sm:$0xff]  }
  0x55   : >> { %878 = vmatpush1.bf16.msra.mxu0 %v4557_v19  ;;  %1022 = vmatpush1.bf16.msra.mxu1 %v4560_v21  ;;  %v4643_v19 = vld [vmem:[%s6446_s1 + $0x310] ss:$8 sps:$4 sm:$0xff]   ;;  %v4651_v21 = vld [vmem:[%s6446_s1 + $0x304] ss:$8 sps:$4 sm:$0xff]  }
  0x56   : >> { %879 = vmatprep.subr.bf16.mxu0 %v4565_v22  ;;  %1023 = vmatprep.subr.bf16.mxu1 %v4568_v23  ;;  %v4654_v22 = vld [vmem:[%s6446_s1 + $0x384] ss:$8 sps:$4 sm:$0xff]   ;;  %v1084_v23 = vshrl.u32 %v4094_v13, 16  ;;  %v4711_v13 = vld [vmem:[%s6446_s1 + $0x560] ss:$8 sps:$4 sm:$0xff]  }
  0x57   : >> { %909 = vmatprep.mubr.bf16.mxu0 %v5091_v4  ;;  %1053 = vmatprep.mubr.bf16.mxu1 %v5091_v4 }
  0x59   : >> { %880 = vmatpush1.bf16.msra.mxu0 %v4563_v24  ;;  %1024 = vmatpush1.bf16.msra.mxu1 %v4566_v25  ;;  %v1088_v24 = vrot.slane %v1086_v18, 1  ;;  %v4649_v25 = vld [vmem:[%s6446_s1 + $0x300] ss:$8 sps:$4 sm:$0xff]   ;;  %v4720_v18 = vld [vmem:[%s6446_s1 + $0x5d0] ss:$8 sps:$4 sm:$0xff]  }
  0x5a   : >> { %881 = vmatprep.subr.bf16.mxu0 %v4571_v26  ;;  %1025 = vmatprep.subr.bf16.mxu1 %v4574_v27  ;;  %v5548_v26 = vld [vmem:[%s5220_s22 + $0x8] sm:$0x1e]  }
  0x5b   : >> { %v4652_v27 = vld [vmem:[%s6446_s1 + $0x380] ss:$8 sps:$4 sm:$0xff]  }
  0x5d   : >> { %882 = vmatpush1.bf16.msra.mxu0 %v4569_v28  ;;  %1026 = vmatpush1.bf16.msra.mxu1 %v4572_v29  ;;  %v4657_v28 = vld [vmem:[%s6446_s1 + $0x474] ss:$8 sps:$4 sm:$0xff]  }
  0x5e   : >> { %883 = vmatprep.subr.bf16.mxu0 %v4577_v30  ;;  %1027 = vmatprep.subr.bf16.mxu1 %v4580_v31  ;;  %v4661_v29 = vld [vmem:[%s6446_s1 + $0x4f4] ss:$8 sps:$4 sm:$0xff]   ;;  %v1089_v30 = vor.u32 %v1088_v24, %v1084_v23  ;;  %v4655_v31 = vld [vmem:[%s6446_s1 + $0x470] ss:$8 sps:$4 sm:$0xff]  }
  0x5f   : >> { %v4731_v23 = vld [vmem:[%s6446_s1 + $0x534] ss:$8 sps:$4 sm:$0xff]  }
  0x60   : >> { %v4734_v24 = vld [vmem:[%s6446_s1 + $0x5b4] ss:$8 sps:$4 sm:$0xff]  }
  0x61   : >> { %884 = vmatpush1.bf16.msra.mxu0 %v4575_v32  ;;  %1028 = vmatpush1.bf16.msra.mxu1 %v4578_v33  ;;  %v1237_v32 = vrot.slane %v5548_v26, 1  ;;  %v4659_v33 = vld [vmem:[%s6446_s1 + $0x4f0] ss:$8 sps:$4 sm:$0xff]  }
  0x62   : >> { %885 = vmatprep.subr.bf16.mxu0 %v4583_v34  ;;  %1029 = vmatprep.subr.bf16.mxu1 %v4586_v35  ;;  %v4664_v34 = vld [vmem:[%s6446_s1 + $0x464] ss:$8 sps:$4 sm:$0xff]  }
  0x63   : >> { %v4667_v35 = vld [vmem:[%s6446_s1 + $0x4e4] ss:$8 sps:$4 sm:$0xff]  }
  0x65   : >> { %886 = vmatpush1.bf16.msra.mxu0 %v4581_v36  ;;  %1030 = vmatpush1.bf16.msra.mxu1 %v4584_v37  ;;  %v4662_v36 = vld [vmem:[%s6446_s1 + $0x460] ss:$8 sps:$4 sm:$0xff]  }
  0x66   : >> { %887 = vmatprep.subr.bf16.mxu0 %v4589_v38  ;;  %1031 = vmatprep.subr.bf16.mxu1 %v4592_v39  ;;  %v4665_v37 = vld [vmem:[%s6446_s1 + $0x4e0] ss:$8 sps:$4 sm:$0xff]   ;;  %v4670_v38 = vld [vmem:[%s6446_s1 + $0x454] ss:$8 sps:$4 sm:$0xff]  }
  0x67   : >> { %v4673_v39 = vld [vmem:[%s6446_s1 + $0x4d4] ss:$8 sps:$4 sm:$0xff]  }
  0x69   : >> { %888 = vmatpush1.bf16.msra.mxu0 %v4587_v40  ;;  %1032 = vmatpush1.bf16.msra.mxu1 %v4590_v41  ;;  %v4668_v40 = vld [vmem:[%s6446_s1 + $0x450] ss:$8 sps:$4 sm:$0xff]  }
  0x6a   : >> { %889 = vmatprep.subr.bf16.mxu0 %v4595_v42  ;;  %1033 = vmatprep.subr.bf16.mxu1 %v4598_v43  ;;  %v4671_v41 = vld [vmem:[%s6446_s1 + $0x4d0] ss:$8 sps:$4 sm:$0xff]   ;;  %v4676_v42 = vld [vmem:[%s6446_s1 + $0x444] ss:$8 sps:$4 sm:$0xff]  }
  0x6b   : >> { %v4679_v43 = vld [vmem:[%s6446_s1 + $0x4c4] ss:$8 sps:$4 sm:$0xff]  }
  0x6d   : >> { %890 = vmatpush1.bf16.msra.mxu0 %v4593_v44  ;;  %1034 = vmatpush1.bf16.msra.mxu1 %v4596_v45  ;;  %v4674_v44 = vld [vmem:[%s6446_s1 + $0x440] ss:$8 sps:$4 sm:$0xff]  }
  0x6e   : >> { %891 = vmatprep.subr.bf16.mxu0 %v4601_v46  ;;  %1035 = vmatprep.subr.bf16.mxu1 %v4604_v47  ;;  %v4677_v45 = vld [vmem:[%s6446_s1 + $0x4c0] ss:$8 sps:$4 sm:$0xff]   ;;  %v4682_v46 = vld [vmem:[%s6446_s1 + $0x434] ss:$8 sps:$4 sm:$0xff]  }
  0x6f   : >> { %v4685_v47 = vld [vmem:[%s6446_s1 + $0x4b4] ss:$8 sps:$4 sm:$0xff]  }
  0x71   : >> { %892 = vmatpush1.bf16.msra.mxu0 %v4599_v48  ;;  %1036 = vmatpush1.bf16.msra.mxu1 %v4602_v49  ;;  %v4680_v48 = vld [vmem:[%s6446_s1 + $0x430] ss:$8 sps:$4 sm:$0xff]  }
  0x72   : >> { %1171 = vmatprep.subr.bf16.mxu0 %v4608_v51  ;;  %1319 = vmatprep.subr.bf16.mxu1 %v4612_v52  ;;  %v4683_v49 = vld [vmem:[%s6446_s1 + $0x4b0] ss:$8 sps:$4 sm:$0xff]   ;;  %v4691_v51 = vld [vmem:[%s6446_s1 + $0x4a4] ss:$8 sps:$4 sm:$0xff]   ;;  %v4686_v52 = vld [vmem:[%s6446_s1 + $0x420] ss:$8 sps:$4 sm:$0xff]  }
  0x74   : >> { %910 = vmatmul.mubr.bf16.vlgmr.msra.gmra.mxu0 %v795_v54  ;;  %1054 = vmatmul.mubr.bf16.vlgmr.msra.gmra.mxu1 %v4077_v55  ;;  %v4694_v54 = vld [vmem:[%s6446_s1 + $0x414] ss:$8 sps:$4 sm:$0xff]  }
  0x75   : >> { %1172 = vmatpush1.bf16.msra.mxu0 %v4606_v53  ;;  %1320 = vmatpush1.bf16.msra.mxu1 %v4610_v56  ;;  %v4689_v53 = vld [vmem:[%s6446_s1 + $0x4a0] ss:$8 sps:$4 sm:$0xff]   ;;  %v4697_v55 = vld [vmem:[%s6446_s1 + $0x494] ss:$8 sps:$4 sm:$0xff]   ;;  %v1379_v56 = vshrl.u32 %v5548_v26, 16 }
  0x76   : >> { %1173 = vmatprep.subr.bf16.mxu0 %v4615_v57  ;;  %1321 = vmatprep.subr.bf16.mxu1 %v4618_v58  ;;  %v4692_v57 = vld [vmem:[%s6446_s1 + $0x410] ss:$8 sps:$4 sm:$0xff]  }
  0x77   : >> { %1203 = vmatprep.mubr.bf16.mxu0 %v5091_v4  ;;  %1351 = vmatprep.mubr.bf16.mxu1 %v5091_v4  ;;  %v4695_v58 = vld [vmem:[%s6446_s1 + $0x490] ss:$8 sps:$4 sm:$0xff]  }
  0x79   : >> { %1174 = vmatpush1.bf16.msra.mxu0 %v4613_v59  ;;  %1322 = vmatpush1.bf16.msra.mxu1 %v4616_v60  ;;  %v1382_v59 = vshll.u32 %v5548_v26, 16  ;;  %v4700_v60 = vld [vmem:[%s6446_s1 + $0x404] ss:$8 sps:$4 sm:$0xff]   ;;  %v4732_v26 = vld [vmem:[%s6446_s1 + $0x5b0] ss:$8 sps:$4 sm:$0xff]  }
  0x7a   : >> { %1175 = vmatprep.subr.bf16.mxu0 %v4621_v61  ;;  %1323 = vmatprep.subr.bf16.mxu1 %v4624_v62  ;;  %v4703_v61 = vld [vmem:[%s6446_s1 + $0x484] ss:$8 sps:$4 sm:$0xff]   ;;  %v1381_v62 = vrot.slane %v1379_v56, 1  ;;  %v4769_v56 = vld [vmem:[%s6446_s1 + $0x6d0] ss:$8 sps:$4 sm:$0xff]  }
  0x7d   : >> { %1176 = vmatpush1.bf16.msra.mxu0 %v4619_v63  ;;  %1324 = vmatpush1.bf16.msra.mxu1 %v4622_v1  ;;  %v4698_v63 = vld [vmem:[%s6446_s1 + $0x400] ss:$8 sps:$4 sm:$0xff]  }
  0x7e   : >> { %1177 = vmatprep.subr.bf16.mxu0 %v4627_v2  ;;  %1325 = vmatprep.subr.bf16.mxu1 %v4630_v3  ;;  %v4701_v1 = vld [vmem:[%s6446_s1 + $0x480] ss:$8 sps:$4 sm:$0xff]   ;;  %v1384_v2 = vrot.slane %v1382_v59, 2 }
  0x7f   : >> { %v4707_v3 = vld [vmem:[%s5220_s22 + $0x8] sm:$0x3c]  }
  0x80   : >> { %v4772_v59 = vld [vmem:[%s6446_s1 + $0x640] ss:$8 sps:$4 sm:$0xff]  }
  0x81   : >> { %1178 = vmatpush1.bf16.msra.mxu0 %v4625_v5  ;;  %1326 = vmatpush1.bf16.msra.mxu1 %v4628_v6  ;;  %v4706_v5 = vld [vmem:[%s6446_s1 + $0x574] ss:$8 sps:$4 sm:$0xff]  }
  0x82   : >> { %1179 = vmatprep.subr.bf16.mxu0 %v4633_v7  ;;  %1327 = vmatprep.subr.bf16.mxu1 %v4636_v8  ;;  %v4710_v6 = vld [vmem:[%s6446_s1 + $0x5f4] ss:$8 sps:$4 sm:$0xff]   ;;  %v1385_v7 = vor.u32 %v1384_v2, %v1381_v62  ;;  %v4704_v8 = vld [vmem:[%s6446_s1 + $0x570] ss:$8 sps:$4 sm:$0xff]   ;;  %v4786_v2 = vld [vmem:[%s6446_s1 + $0x624] ss:$8 sps:$4 sm:$0xff]  }
  0x83   : >> { %v4783_v62 = vld [vmem:[%s6446_s1 + $0x6b4] ss:$8 sps:$4 sm:$0xff]  }
  0x85   : >> { %1180 = vmatpush1.bf16.msra.mxu0 %v4631_v9  ;;  %1328 = vmatpush1.bf16.msra.mxu1 %v4634_v10  ;;  %v1533_v9 = vrot.slane %v4707_v3, 2  ;;  %v4708_v10 = vld [vmem:[%s6446_s1 + $0x5f0] ss:$8 sps:$4 sm:$0xff]   ;;  %v4789_v3 = vld [vmem:[%s6446_s1 + $0x6a4] ss:$8 sps:$4 sm:$0xff]  }
  0x86   : >> { %1181 = vmatprep.subr.bf16.mxu0 %v4639_v11  ;;  %1329 = vmatprep.subr.bf16.mxu1 %v4642_v12  ;;  %v4713_v11 = vld [vmem:[%s6446_s1 + $0x564] ss:$8 sps:$4 sm:$0xff]  }
  0x87   : >> { %v4716_v12 = vld [vmem:[%s6446_s1 + $0x5e4] ss:$8 sps:$4 sm:$0xff]  }
  0x89   : >> { %1182 = vmatpush1.bf16.msra.mxu0 %v4637_v14  ;;  %1330 = vmatpush1.bf16.msra.mxu1 %v4640_v15  ;;  %v4714_v14 = vld [vmem:[%s6446_s1 + $0x5e0] ss:$8 sps:$4 sm:$0xff]   ;;  %v4719_v15 = vld [vmem:[%s6446_s1 + $0x554] ss:$8 sps:$4 sm:$0xff]  }
  0x8a   : >> { %1183 = vmatprep.subr.bf16.mxu0 %v4645_v16  ;;  %1331 = vmatprep.subr.bf16.mxu1 %v4648_v17  ;;  %v4722_v16 = vld [vmem:[%s6446_s1 + $0x5d4] ss:$8 sps:$4 sm:$0xff]   ;;  %v4717_v17 = vld [vmem:[%s6446_s1 + $0x550] ss:$8 sps:$4 sm:$0xff]  }
  0x8d   : >> { %1184 = vmatpush1.bf16.msra.mxu0 %v4643_v19  ;;  %1332 = vmatpush1.bf16.msra.mxu1 %v4646_v20  ;;  %v4725_v19 = vld [vmem:[%s6446_s1 + $0x544] ss:$8 sps:$4 sm:$0xff]  }
  0x8e   : >> { %1185 = vmatprep.subr.bf16.mxu0 %v4651_v21  ;;  %1333 = vmatprep.subr.bf16.mxu1 %v4654_v22  ;;  %v4728_v20 = vld [vmem:[%s6446_s1 + $0x5c4] ss:$8 sps:$4 sm:$0xff]   ;;  %v4723_v21 = vld [vmem:[%s6446_s1 + $0x540] ss:$8 sps:$4 sm:$0xff]  }
  0x8f   : >> { %v4726_v22 = vld [vmem:[%s6446_s1 + $0x5c0] ss:$8 sps:$4 sm:$0xff]  }
  0x91   : >> { %1186 = vmatpush1.bf16.msra.mxu0 %v4649_v25  ;;  %1334 = vmatpush1.bf16.msra.mxu1 %v4652_v27  ;;  %v4729_v25 = vld [vmem:[%s6446_s1 + $0x530] ss:$8 sps:$4 sm:$0xff]   ;;  %v4737_v27 = vld [vmem:[%s6446_s1 + $0x524] ss:$8 sps:$4 sm:$0xff]  }
  0x92   : >> { %1467 = vmatprep.subr.bf16.mxu0 %v4657_v28  ;;  %1615 = vmatprep.subr.bf16.mxu1 %v4661_v29  ;;  %v4166_v28 = vld [vmem:[%s5220_s22 + $0x10] sm:$0xf]  ;;  %v4740_v29 = vld [vmem:[%s6446_s1 + $0x5a4] ss:$8 sps:$4 sm:$0xff]  }
  0x94   : >> { %1204 = vmatmul.mubr.bf16.vlgmr.msra.gmra.mxu0 %v1089_v30  ;;  %1352 = vmatmul.mubr.bf16.vlgmr.msra.gmra.mxu1 %v1237_v32  ;;  %v4735_v30 = vld [vmem:[%s6446_s1 + $0x520] ss:$8 sps:$4 sm:$0xff]   ;;  %v4183_v32 = vcombine.low %v4166_v28, %v4166_v28 }
  0x95   : >> { %1468 = vmatpush1.bf16.msra.mxu0 %v4655_v31  ;;  %1616 = vmatpush1.bf16.msra.mxu1 %v4659_v33  ;;  %v4738_v31 = vld [vmem:[%s6446_s1 + $0x5a0] ss:$8 sps:$4 sm:$0xff]   ;;  %v4743_v33 = vld [vmem:[%s6446_s1 + $0x514] ss:$8 sps:$4 sm:$0xff]  }
  0x96   : >> { %1469 = vmatprep.subr.bf16.mxu0 %v4664_v34  ;;  %1617 = vmatprep.subr.bf16.mxu1 %v4667_v35  ;;  %v4746_v34 = vld [vmem:[%s6446_s1 + $0x594] ss:$8 sps:$4 sm:$0xff]   ;;  %v4741_v35 = vld [vmem:[%s6446_s1 + $0x510] ss:$8 sps:$4 sm:$0xff]  }
  0x97   : >> { %1499 = vmatprep.mubr.bf16.mxu0 %v5091_v4  ;;  %1647 = vmatprep.mubr.bf16.mxu1 %v5091_v4 }
  0x99   : >> { %1470 = vmatpush1.bf16.msra.mxu0 %v4662_v36  ;;  %1618 = vmatpush1.bf16.msra.mxu1 %v4665_v37  ;;  %v1824_v36 = vshll.u32 %v4183_v32, 16  ;;  %v4744_v37 = vld [vmem:[%s6446_s1 + $0x590] ss:$8 sps:$4 sm:$0xff]  }
  0x9a   : >> { %1471 = vmatprep.subr.bf16.mxu0 %v4670_v38  ;;  %1619 = vmatprep.subr.bf16.mxu1 %v4673_v39  ;;  %v4749_v38 = vld [vmem:[%s6446_s1 + $0x504] ss:$8 sps:$4 sm:$0xff]  }
  0x9b   : >> { %v4752_v39 = vld [vmem:[%s6446_s1 + $0x584] ss:$8 sps:$4 sm:$0xff]  }
  0x9d   : >> { %1472 = vmatpush1.bf16.msra.mxu0 %v4668_v40  ;;  %1620 = vmatpush1.bf16.msra.mxu1 %v4671_v41  ;;  %v4747_v40 = vld [vmem:[%s6446_s1 + $0x500] ss:$8 sps:$4 sm:$0xff]   ;;  %v1822_v41 = vshrl.u32 %v4183_v32, 16 }
  0x9e   : >> { %1473 = vmatprep.subr.bf16.mxu0 %v4676_v42  ;;  %1621 = vmatprep.subr.bf16.mxu1 %v4679_v43  ;;  %v1826_v42 = vrot.slane %v1824_v36, 1  ;;  %v4750_v43 = vld [vmem:[%s6446_s1 + $0x580] ss:$8 sps:$4 sm:$0xff]   ;;  %v4820_v36 = vld [vmem:[%s6446_s1 + $0x7d4] ss:$8 sps:$4 sm:$0xff]  }
  0x9f   : >> { %v4812_v32 = vld [vmem:[%s6446_s1 + $0x7e0] ss:$8 sps:$4 sm:$0xff]  }
  0xa1   : >> { %1474 = vmatpush1.bf16.msra.mxu0 %v4674_v44  ;;  %1622 = vmatpush1.bf16.msra.mxu1 %v4677_v45  ;;  %v4756_v44 = vld [vmem:[%s6446_s1 + $0x674] ss:$8 sps:$4 sm:$0xff]  }
  0xa2   : >> { %1475 = vmatprep.subr.bf16.mxu0 %v4682_v46  ;;  %1623 = vmatprep.subr.bf16.mxu1 %v4685_v47  ;;  %v4759_v45 = vld [vmem:[%s6446_s1 + $0x6f4] ss:$8 sps:$4 sm:$0xff]   ;;  %v4754_v46 = vld [vmem:[%s6446_s1 + $0x670] ss:$8 sps:$4 sm:$0xff]   ;;  %v1827_v47 = vor.u32 %v1826_v42, %v1822_v41  ;;  %v4823_v42 = vld [vmem:[%s6446_s1 + $0x744] ss:$8 sps:$4 sm:$0xff]  }
  0xa3   : >> { %v4818_v41 = vld [vmem:[%s6446_s1 + $0x7d0] ss:$8 sps:$4 sm:$0xff]  }
  0xa5   : >> { %1476 = vmatpush1.bf16.msra.mxu0 %v4680_v48  ;;  %1624 = vmatpush1.bf16.msra.mxu1 %v4683_v49  ;;  %v4757_v48 = vld [vmem:[%s6446_s1 + $0x6f0] ss:$8 sps:$4 sm:$0xff]   ;;  %v4762_v49 = vld [vmem:[%s6446_s1 + $0x664] ss:$8 sps:$4 sm:$0xff]  }
  0xa6   : >> { %1477 = vmatprep.subr.bf16.mxu0 %v4688_v50  ;;  %1625 = vmatprep.subr.bf16.mxu1 %v4691_v51  ;;  %v4765_v50 = vld [vmem:[%s6446_s1 + $0x6e4] ss:$8 sps:$4 sm:$0xff]   ;;  %v4760_v51 = vld [vmem:[%s6446_s1 + $0x660] ss:$8 sps:$4 sm:$0xff]  }
  0xa9   : >> { %1478 = vmatpush1.bf16.msra.mxu0 %v4686_v52  ;;  %1626 = vmatpush1.bf16.msra.mxu1 %v4689_v53  ;;  %v4763_v52 = vld [vmem:[%s6446_s1 + $0x6e0] ss:$8 sps:$4 sm:$0xff]   ;;  %v4768_v53 = vld [vmem:[%s6446_s1 + $0x654] ss:$8 sps:$4 sm:$0xff]  }
  0xaa   : >> { %1479 = vmatprep.subr.bf16.mxu0 %v4694_v54  ;;  %1627 = vmatprep.subr.bf16.mxu1 %v4697_v55  ;;  %v4771_v54 = vld [vmem:[%s6446_s1 + $0x6d4] ss:$8 sps:$4 sm:$0xff]   ;;  %v4766_v55 = vld [vmem:[%s6446_s1 + $0x650] ss:$8 sps:$4 sm:$0xff]  }
  0xad   : >> { %1480 = vmatpush1.bf16.msra.mxu0 %v4692_v57  ;;  %1628 = vmatpush1.bf16.msra.mxu1 %v4695_v58  ;;  %v4774_v57 = vld [vmem:[%s6446_s1 + $0x644] ss:$8 sps:$4 sm:$0xff]  }
  0xae   : >> { %1481 = vmatprep.subr.bf16.mxu0 %v4700_v60  ;;  %1629 = vmatprep.subr.bf16.mxu1 %v4703_v61  ;;  %v4777_v58 = vld [vmem:[%s6446_s1 + $0x6c4] ss:$8 sps:$4 sm:$0xff]   ;;  %v4775_v60 = vld [vmem:[%s6446_s1 + $0x6c0] ss:$8 sps:$4 sm:$0xff]   ;;  %v4780_v61 = vld [vmem:[%s6446_s1 + $0x634] ss:$8 sps:$4 sm:$0xff]  }
  0xb1   : >> { %1482 = vmatpush1.bf16.msra.mxu0 %v4698_v63  ;;  %1630 = vmatpush1.bf16.msra.mxu1 %v4701_v1  ;;  %v4778_v63 = vld [vmem:[%s6446_s1 + $0x630] ss:$8 sps:$4 sm:$0xff]  }
  0xb2   : >> { %1759 = vmatprep.subr.bf16.mxu0 %v4706_v5  ;;  %1909 = vmatprep.subr.bf16.mxu1 %v4710_v6  ;;  %v4781_v1 = vld [vmem:[%s6446_s1 + $0x6b0] ss:$8 sps:$4 sm:$0xff]   ;;  %v4784_v5 = vld [vmem:[%s6446_s1 + $0x620] ss:$8 sps:$4 sm:$0xff]  }
  0xb3   : >> { %v4787_v6 = vld [vmem:[%s6446_s1 + $0x6a0] ss:$8 sps:$4 sm:$0xff]  }
  0xb4   : >> { %1500 = vmatmul.mubr.bf16.vlgmr.msra.gmra.mxu0 %v1385_v7  ;;  %1648 = vmatmul.mubr.bf16.vlgmr.msra.gmra.mxu1 %v1533_v9  ;;  %v4802_v7 = vld [vmem:[%s5220_s22 + $0x10] sm:$0x1e]  }
  0xb5   : >> { %1760 = vmatpush1.bf16.msra.mxu0 %v4704_v8  ;;  %1910 = vmatpush1.bf16.msra.mxu1 %v4708_v10  ;;  %v4792_v8 = vld [vmem:[%s6446_s1 + $0x614] ss:$8 sps:$4 sm:$0xff]   ;;  %v4790_v10 = vld [vmem:[%s6446_s1 + $0x610] ss:$8 sps:$4 sm:$0xff]  }
  0xb6   : >> { %1761 = vmatprep.subr.bf16.mxu0 %v4713_v11  ;;  %1911 = vmatprep.subr.bf16.mxu1 %v4716_v12  ;;  %v4795_v9 = vld [vmem:[%s6446_s1 + $0x694] ss:$8 sps:$4 sm:$0xff]   ;;  %v4793_v11 = vld [vmem:[%s6446_s1 + $0x690] ss:$8 sps:$4 sm:$0xff]   ;;  %v2117_v12 = vshrl.u32 %v4802_v7, 16 }
  0xb7   : >> { %1791 = vmatprep.mubr.bf16.mxu0 %v5091_v4  ;;  %1941 = vmatprep.mubr.bf16.mxu1 %v5091_v4 }
  0xb9   : >> { %1762 = vmatpush1.bf16.msra.mxu0 %v4711_v13  ;;  %1912 = vmatpush1.bf16.msra.mxu1 %v4714_v14  ;;  %v2120_v13 = vshll.u32 %v4802_v7, 16  ;;  %v4798_v14 = vld [vmem:[%s6446_s1 + $0x604] ss:$8 sps:$4 sm:$0xff]  }
  0xba   : >> { %1763 = vmatprep.subr.bf16.mxu0 %v4719_v15  ;;  %1913 = vmatprep.subr.bf16.mxu1 %v4722_v16  ;;  %v4801_v15 = vld [vmem:[%s6446_s1 + $0x684] ss:$8 sps:$4 sm:$0xff]   ;;  %v4796_v16 = vld [vmem:[%s6446_s1 + $0x600] ss:$8 sps:$4 sm:$0xff]  }
  0xbd   : >> { %1764 = vmatpush1.bf16.msra.mxu0 %v4717_v17  ;;  %1914 = vmatpush1.bf16.msra.mxu1 %v4720_v18  ;;  %v4799_v17 = vld [vmem:[%s6446_s1 + $0x680] ss:$8 sps:$4 sm:$0xff]   ;;  %v2119_v18 = vrot.slane %v2117_v12, 1 }
  0xbe   : >> { %1765 = vmatprep.subr.bf16.mxu0 %v4725_v19  ;;  %1915 = vmatprep.subr.bf16.mxu1 %v4728_v20  ;;  %v2122_v19 = vrot.slane %v2120_v13, 2  ;;  %v4805_v20 = vld [vmem:[%s6446_s1 + $0x774] ss:$8 sps:$4 sm:$0xff]   ;;  %v4859_v13 = vld [vmem:[%s6446_s1 + $0x860] ss:$8 sps:$4 sm:$0xff]  }
  0xc1   : >> { %1766 = vmatpush1.bf16.msra.mxu0 %v4723_v21  ;;  %1916 = vmatpush1.bf16.msra.mxu1 %v4726_v22  ;;  %v4808_v21 = vld [vmem:[%s6446_s1 + $0x7f4] ss:$8 sps:$4 sm:$0xff]   ;;  %v1975_v22 = vrot.slane %v4802_v7, 1  ;;  %v4255_v7 = vld [vmem:[%s5220_s22 + $0x18] sm:$0xf] }
  0xc2   : >> { %1767 = vmatprep.subr.bf16.mxu0 %v4731_v23  ;;  %1917 = vmatprep.subr.bf16.mxu1 %v4734_v24  ;;  %v4803_v23 = vld [vmem:[%s6446_s1 + $0x770] ss:$8 sps:$4 sm:$0xff]   ;;  %v2123_v24 = vor.u32 %v2122_v19, %v2119_v18  ;;  %v4870_v19 = vld [vmem:[%s6446_s1 + $0x8d4] ss:$8 sps:$4 sm:$0xff]  }
  0xc5   : >> { %1768 = vmatpush1.bf16.msra.mxu0 %v4729_v25  ;;  %1918 = vmatpush1.bf16.msra.mxu1 %v4732_v26  ;;  %v4806_v25 = vld [vmem:[%s6446_s1 + $0x7f0] ss:$8 sps:$4 sm:$0xff]   ;;  %v4811_v26 = vld [vmem:[%s6446_s1 + $0x764] ss:$8 sps:$4 sm:$0xff]  }
  0xc6   : >> { %1769 = vmatprep.subr.bf16.mxu0 %v4737_v27  ;;  %1919 = vmatprep.subr.bf16.mxu1 %v4740_v29  ;;  %v4814_v27 = vld [vmem:[%s6446_s1 + $0x7e4] ss:$8 sps:$4 sm:$0xff]  }
  0xc9   : >> { %1770 = vmatpush1.bf16.msra.mxu0 %v4735_v30  ;;  %1920 = vmatpush1.bf16.msra.mxu1 %v4738_v31  ;;  %v4809_v30 = vld [vmem:[%s6446_s1 + $0x760] ss:$8 sps:$4 sm:$0xff]  }
  0xca   : >> { %1771 = vmatprep.subr.bf16.mxu0 %v4743_v33  ;;  %1921 = vmatprep.subr.bf16.mxu1 %v4746_v34  ;;  %v4817_v33 = vld [vmem:[%s6446_s1 + $0x754] ss:$8 sps:$4 sm:$0xff]  }
  0xcd   : >> { %1772 = vmatpush1.bf16.msra.mxu0 %v4741_v35  ;;  %1922 = vmatpush1.bf16.msra.mxu1 %v4744_v37 }
  0xce   : >> { %1773 = vmatprep.subr.bf16.mxu0 %v4749_v38  ;;  %1923 = vmatprep.subr.bf16.mxu1 %v4752_v39  ;;  %v4815_v39 = vld [vmem:[%s6446_s1 + $0x750] ss:$8 sps:$4 sm:$0xff]  }
  0xd1   : >> { %1774 = vmatpush1.bf16.msra.mxu0 %v4747_v40  ;;  %1924 = vmatpush1.bf16.msra.mxu1 %v4750_v43 }
  0xd2   : >> { %2057 = vmatprep.subr.bf16.mxu0 %v4756_v44  ;;  %2205 = vmatprep.subr.bf16.mxu1 %v4759_v45  ;;  %v4826_v44 = vld [vmem:[%s6446_s1 + $0x7c4] ss:$8 sps:$4 sm:$0xff]  }
  0xd4   : >> { %1792 = vmatmul.mubr.bf16.vlgmr.msra.gmra.mxu0 %v4166_v28  ;;  %1942 = vmatmul.mubr.bf16.vlgmr.msra.gmra.mxu1 %v1827_v47  ;;  %v4824_v47 = vld [vmem:[%s6446_s1 + $0x7c0] ss:$8 sps:$4 sm:$0xff]  }
  0xd5   : >> { %2058 = vmatpush1.bf16.msra.mxu0 %v4754_v46  ;;  %2206 = vmatpush1.bf16.msra.mxu1 %v4757_v48  ;;  %v4821_v46 = vld [vmem:[%s6446_s1 + $0x740] ss:$8 sps:$4 sm:$0xff]   ;;  %v4829_v48 = vld [vmem:[%s6446_s1 + $0x734] ss:$8 sps:$4 sm:$0xff]  }
  0xd6   : >> { %2059 = vmatprep.subr.bf16.mxu0 %v4762_v49  ;;  %2207 = vmatprep.subr.bf16.mxu1 %v4765_v50  ;;  %v4832_v49 = vld [vmem:[%s6446_s1 + $0x7b4] ss:$8 sps:$4 sm:$0xff]   ;;  %v4827_v50 = vld [vmem:[%s6446_s1 + $0x730] ss:$8 sps:$4 sm:$0xff]  }
  0xd7   : >> { %2089 = vmatprep.mubr.bf16.mxu0 %v5091_v4  ;;  %2237 = vmatprep.mubr.bf16.mxu1 %v5091_v4 }
  0xd9   : >> { %2060 = vmatpush1.bf16.msra.mxu0 %v4760_v51  ;;  %2208 = vmatpush1.bf16.msra.mxu1 %v4763_v52  ;;  %v4830_v51 = vld [vmem:[%s6446_s1 + $0x7b0] ss:$8 sps:$4 sm:$0xff]   ;;  %v4835_v52 = vld [vmem:[%s6446_s1 + $0x724] ss:$8 sps:$4 sm:$0xff]  }
  0xda   : >> { %2061 = vmatprep.subr.bf16.mxu0 %v4768_v53  ;;  %2209 = vmatprep.subr.bf16.mxu1 %v4771_v54  ;;  %v4838_v53 = vld [vmem:[%s6446_s1 + $0x7a4] ss:$8 sps:$4 sm:$0xff]   ;;  %v4833_v54 = vld [vmem:[%s6446_s1 + $0x720] ss:$8 sps:$4 sm:$0xff]  }
  0xdd   : >> { %2062 = vmatpush1.bf16.msra.mxu0 %v4766_v55  ;;  %2210 = vmatpush1.bf16.msra.mxu1 %v4769_v56  ;;  %v4836_v55 = vld [vmem:[%s6446_s1 + $0x7a0] ss:$8 sps:$4 sm:$0xff]   ;;  %v4841_v56 = vld [vmem:[%s6446_s1 + $0x714] ss:$8 sps:$4 sm:$0xff]  }
  0xde   : >> { %2063 = vmatprep.subr.bf16.mxu0 %v4774_v57  ;;  %2211 = vmatprep.subr.bf16.mxu1 %v4777_v58  ;;  %v4844_v57 = vld [vmem:[%s6446_s1 + $0x794] ss:$8 sps:$4 sm:$0xff]   ;;  %v4839_v58 = vld [vmem:[%s6446_s1 + $0x710] ss:$8 sps:$4 sm:$0xff]  }
  0xe1   : >> { %2064 = vmatpush1.bf16.msra.mxu0 %v4772_v59  ;;  %2212 = vmatpush1.bf16.msra.mxu1 %v4775_v60  ;;  %v4842_v59 = vld [vmem:[%s6446_s1 + $0x790] ss:$8 sps:$4 sm:$0xff]   ;;  %v4847_v60 = vld [vmem:[%s6446_s1 + $0x704] ss:$8 sps:$4 sm:$0xff]  }
  0xe2   : >> { %2065 = vmatprep.subr.bf16.mxu0 %v4780_v61  ;;  %2213 = vmatprep.subr.bf16.mxu1 %v4783_v62  ;;  %v4850_v61 = vld [vmem:[%s6446_s1 + $0x784] ss:$8 sps:$4 sm:$0xff]   ;;  %v4845_v62 = vld [vmem:[%s6446_s1 + $0x700] ss:$8 sps:$4 sm:$0xff]  }
  0xe5   : >> { %2066 = vmatpush1.bf16.msra.mxu0 %v4778_v63  ;;  %2214 = vmatpush1.bf16.msra.mxu1 %v4781_v1  ;;  %v4848_v63 = vld [vmem:[%s6446_s1 + $0x780] ss:$8 sps:$4 sm:$0xff]   ;;  %v4851_v1 = vld [vmem:[%s5220_s22 + $0x10] sm:$0x3c]  }
  0xe6   : >> { %2067 = vmatprep.subr.bf16.mxu0 %v4786_v2  ;;  %2215 = vmatprep.subr.bf16.mxu1 %v4789_v3  ;;  %v4854_v2 = vld [vmem:[%s6446_s1 + $0x874] ss:$8 sps:$4 sm:$0xff]  }
  0xe7   : >> { %v4858_v3 = vld [vmem:[%s6446_s1 + $0x8f4] ss:$8 sps:$4 sm:$0xff]  }
  0xe9   : >> { %2068 = vmatpush1.bf16.msra.mxu0 %v4784_v5  ;;  %2216 = vmatpush1.bf16.msra.mxu1 %v4787_v6  ;;  %v4852_v5 = vld [vmem:[%s6446_s1 + $0x870] ss:$8 sps:$4 sm:$0xff]   ;;  %v2271_v6 = vrot.slane %v4851_v1, 2 }
  0xea   : >> { %2069 = vmatprep.subr.bf16.mxu0 %v4792_v8  ;;  %2217 = vmatprep.subr.bf16.mxu1 %v4795_v9  ;;  %v4856_v8 = vld [vmem:[%s6446_s1 + $0x8f0] ss:$8 sps:$4 sm:$0xff]   ;;  %v4861_v9 = vld [vmem:[%s6446_s1 + $0x864] ss:$8 sps:$4 sm:$0xff]  }
  0xed   : >> { %2070 = vmatpush1.bf16.msra.mxu0 %v4790_v10  ;;  %2218 = vmatpush1.bf16.msra.mxu1 %v4793_v11  ;;  %v4864_v10 = vld [vmem:[%s6446_s1 + $0x8e4] ss:$8 sps:$4 sm:$0xff]  }
  0xee   : >> { %2071 = vmatprep.subr.bf16.mxu0 %v4798_v14  ;;  %2219 = vmatprep.subr.bf16.mxu1 %v4801_v15  ;;  %v4862_v14 = vld [vmem:[%s6446_s1 + $0x8e0] ss:$8 sps:$4 sm:$0xff]  }
  0xf1   : >> { %2072 = vmatpush1.bf16.msra.mxu0 %v4796_v16  ;;  %2220 = vmatpush1.bf16.msra.mxu1 %v4799_v17  ;;  %v4867_v16 = vld [vmem:[%s6446_s1 + $0x854] ss:$8 sps:$4 sm:$0xff]  }
  0xf2   : >> { %2353 = vmatprep.subr.bf16.mxu0 %v4805_v20  ;;  %2497 = vmatprep.subr.bf16.mxu1 %v4808_v21 }
  0xf4   : >> { %v348_v28 = vpop.f32.mrf.mxu0  ;;  %v469_v29 = vpop.f32.mrf.mxu1  ;;  %2090 = vmatmul.mubr.bf16.vlgmr.msra.gmra.mxu0 %v1975_v22  ;;  %2238 = vmatmul.mubr.bf16.vlgmr.msra.gmra.mxu1 %v2123_v24  ;;  %v4868_v24 = vld [vmem:[%s6446_s1 + $0x8d0] ss:$8 sps:$4 sm:$0xff]  }
  0xf5   : >> { %v5874_v31 = vadd.f32 %v469_v29, %v348_v28  ;;  %2354 = vmatpush1.bf16.msra.mxu0 %v4803_v23  ;;  %2498 = vmatpush1.bf16.msra.mxu1 %v4806_v25  ;;  %v4865_v23 = vld [vmem:[%s6446_s1 + $0x850] ss:$8 sps:$4 sm:$0xff]   ;;  %v4876_v29 = vld [vmem:[%s6446_s1 + $0x8c4] ss:$8 sps:$4 sm:$0xff]  }
  0xf6   : >> { %v350_v34 = vpop.f32.mrf.mxu0  ;;  %v471_v35 = vpop.f32.mrf.mxu1  ;;  %2355 = vmatprep.subr.bf16.mxu0 %v4811_v26  ;;  %2499 = vmatprep.subr.bf16.mxu1 %v4814_v27  ;;  %v4873_v27 = vld [vmem:[%s6446_s1 + $0x844] ss:$8 sps:$4 sm:$0xff]  }
  0xf7   : >> { %v5885_v37 = vadd.f32 %v471_v35, %v350_v34  ;;  %2385 = vmatprep.mubr.bf16.mxu0 %v5091_v4  ;;  %2529 = vmatprep.mubr.bf16.mxu1 %v5091_v4  ;;  %v4882_v34 = vld [vmem:[%s6446_s1 + $0x8b4] ss:$8 sps:$4 sm:$0xff]   ;;  %v4877_v35 = vld [vmem:[%s6446_s1 + $0x830] ss:$8 sps:$4 sm:$0xff]  }
  0xf8   : >> { %v352_v38 = vpop.f32.mrf.mxu0  ;;  %v473_v40 = vpop.f32.mrf.mxu1 }
  0xf9   : >> { %2356 = vmatpush1.bf16.msra.mxu0 %v4809_v30  ;;  %2500 = vmatpush1.bf16.msra.mxu1 %v4812_v32  ;;  %v4874_v32 = vld [vmem:[%s6446_s1 + $0x8c0] ss:$8 sps:$4 sm:$0xff]   ;;  %v4888_v38 = vld [vmem:[%s6446_s1 + $0x8a4] ss:$8 sps:$4 sm:$0xff]  }
  0xfa   : >> { %v353_v43 = vpop.f32.mrf.mxu0  ;;  %2357 = vmatprep.subr.bf16.mxu0 %v4817_v33  ;;  %2501 = vmatprep.subr.bf16.mxu1 %v4820_v36  ;;  %v474_v45 = vpop.f32.mrf.mxu1  ;;  %v4879_v33 = vld [vmem:[%s6446_s1 + $0x834] ss:$8 sps:$4 sm:$0xff]   ;;  %v4880_v36 = vld [vmem:[%s6446_s1 + $0x8b0] ss:$8 sps:$4 sm:$0xff]   ;;  %v4886_v40 = vld [vmem:[%s6446_s1 + $0x8a0] ss:$8 sps:$4 sm:$0xff]  }
  0xfb   : >> { %v4894_v43 = vld [vmem:[%s6446_s1 + $0x894] ss:$8 sps:$4 sm:$0xff]   ;;  %v4889_v45 = vld [vmem:[%s6446_s1 + $0x810] ss:$8 sps:$4 sm:$0xff]  }
  0xfd   : >> { %2358 = vmatpush1.bf16.msra.mxu0 %v4815_v39  ;;  %2502 = vmatpush1.bf16.msra.mxu1 %v4818_v41  ;;  %v4883_v39 = vld [vmem:[%s6446_s1 + $0x820] ss:$8 sps:$4 sm:$0xff]   ;;  %v4272_v41 = vcombine.low %v4255_v7, %v4255_v7 }
  0xfe   : >> { %2359 = vmatprep.subr.bf16.mxu0 %v4823_v42  ;;  %2503 = vmatprep.subr.bf16.mxu1 %v4826_v44  ;;  %v4891_v42 = vld [vmem:[%s6446_s1 + $0x814] ss:$8 sps:$4 sm:$0xff]  }
  0xff   : >> { %v2562_v44 = vshll.u32 %v4272_v41, 16 }
 0x101   : >> { %2360 = vmatpush1.bf16.msra.mxu0 %v4821_v46  ;;  %2504 = vmatpush1.bf16.msra.mxu1 %v4824_v47  ;;  %v4892_v46 = vld [vmem:[%s6446_s1 + $0x890] ss:$8 sps:$4 sm:$0xff]   ;;  %v4897_v47 = vld [vmem:[%s6446_s1 + $0x804] ss:$8 sps:$4 sm:$0xff]  }
 0x102   : >> { %2361 = vmatprep.subr.bf16.mxu0 %v4829_v48  ;;  %2505 = vmatprep.subr.bf16.mxu1 %v4832_v49  ;;  %v4900_v48 = vld [vmem:[%s6446_s1 + $0x884] ss:$8 sps:$4 sm:$0xff]   ;;  %v2560_v49 = vshrl.u32 %v4272_v41, 16  ;;  %v4944_v41 = vld [vmem:[%s6446_s1 + $0x900] ss:$8 sps:$4 sm:$0xff]  }
 0x105   : >> { %2362 = vmatpush1.bf16.msra.mxu0 %v4827_v50  ;;  %2506 = vmatpush1.bf16.msra.mxu1 %v4830_v51  ;;  %v2564_v50 = vrot.slane %v2562_v44, 1  ;;  %v6056_v51 = vld [vmem:[%s5220_s22 + $0x18] sm:$0x1e]  }
 0x106   : >> { %2363 = vmatprep.subr.bf16.mxu0 %v4835_v52  ;;  %2507 = vmatprep.subr.bf16.mxu1 %v4838_v53  ;;  %v4895_v52 = vld [vmem:[%s6446_s1 + $0x800] ss:$8 sps:$4 sm:$0xff]   ;;  %v4956_v44 = vld [vmem:[%s6446_s1 + $0xaf4] ss:$8 sps:$4 sm:$0xff]  }
 0x107   : >> { %v4898_v53 = vld [vmem:[%s6446_s1 + $0x880] ss:$8 sps:$4 sm:$0xff]  }
 0x109   : >> { %2364 = vmatpush1.bf16.msra.mxu0 %v4833_v54  ;;  %2508 = vmatpush1.bf16.msra.mxu1 %v4836_v55  ;;  %v4903_v54 = vld [vmem:[%s6446_s1 + $0x974] ss:$8 sps:$4 sm:$0xff]  }
 0x10a   : >> { %2365 = vmatprep.subr.bf16.mxu0 %v4841_v56  ;;  %2509 = vmatprep.subr.bf16.mxu1 %v4844_v57  ;;  %v4907_v55 = vld [vmem:[%s6446_s1 + $0x9f4] ss:$8 sps:$4 sm:$0xff]   ;;  %v2565_v56 = vor.u32 %v2564_v50, %v2560_v49  ;;  %v2713_v57 = vrot.slane %v6056_v51, 1  ;;  %v4959_v49 = vld [vmem:[%s6446_s1 + $0xa64] ss:$8 sps:$4 sm:$0xff]  }
 0x10b   : >> { %v4962_v50 = vld [vmem:[%s6446_s1 + $0xae4] ss:$8 sps:$4 sm:$0xff]  }
 0x10d   : >> { %2366 = vmatpush1.bf16.msra.mxu0 %v4839_v58  ;;  %2510 = vmatpush1.bf16.msra.mxu1 %v4842_v59  ;;  %v4901_v58 = vld [vmem:[%s6446_s1 + $0x970] ss:$8 sps:$4 sm:$0xff]  }
 0x10e   : >> { %2367 = vmatprep.subr.bf16.mxu0 %v4847_v60  ;;  %2511 = vmatprep.subr.bf16.mxu1 %v4850_v61  ;;  %v4905_v59 = vld [vmem:[%s6446_s1 + $0x9f0] ss:$8 sps:$4 sm:$0xff]   ;;  %v4910_v60 = vld [vmem:[%s6446_s1 + $0x964] ss:$8 sps:$4 sm:$0xff]  }
 0x10f   : >> { %v4913_v61 = vld [vmem:[%s6446_s1 + $0x9e4] ss:$8 sps:$4 sm:$0xff]  }
 0x111   : >> { %2368 = vmatpush1.bf16.msra.mxu0 %v4845_v62  ;;  %2512 = vmatpush1.bf16.msra.mxu1 %v4848_v63 }
 0x112   : >> { %2647 = vmatprep.subr.bf16.mxu0 %v4854_v2  ;;  %2795 = vmatprep.subr.bf16.mxu1 %v4858_v3  ;;  %v4908_v2 = vld [vmem:[%s6446_s1 + $0x960] ss:$8 sps:$4 sm:$0xff]  }
 0x113   : >> { %v4911_v3 = vld [vmem:[%s6446_s1 + $0x9e0] ss:$8 sps:$4 sm:$0xff]  }
 0x114   : >> { %v615_v11 = vpop.f32.mrf.mxu0  ;;  %2386 = vmatmul.mubr.bf16.vlgmr.msra.gmra.mxu0 %v2271_v6  ;;  %v763_v12 = vpop.f32.mrf.mxu1  ;;  %2530 = vmatmul.mubr.bf16.vlgmr.msra.gmra.mxu1 %v4255_v7  ;;  %v4916_v7 = vld [vmem:[%s6446_s1 + $0x954] ss:$8 sps:$4 sm:$0xff]  }
 0x115   : >> { %v622_v15 = vadd.f32 %v615_v11, %v5874_v31  ;;  %2648 = vmatpush1.bf16.msra.mxu0 %v4852_v5  ;;  %2796 = vmatpush1.bf16.msra.mxu1 %v4856_v8  ;;  %v4871_v31 = vld [vmem:[%s6446_s1 + $0x840] ss:$8 sps:$4 sm:$0xff]   ;;  %v4919_v8 = vld [vmem:[%s6446_s1 + $0x9d4] ss:$8 sps:$4 sm:$0xff]  }
 0x116   : >> { %v617_v17 = vpop.f32.mrf.mxu0  ;;  %v765_v18 = vpop.f32.mrf.mxu1  ;;  %2649 = vmatprep.subr.bf16.mxu0 %v4861_v9  ;;  %2797 = vmatprep.subr.bf16.mxu1 %v4864_v10 }
 0x117   : >> { %v623_v20 = vadd.f32 %v617_v17, %v5885_v37  ;;  %v5989_v21 = vadd.f32 %v763_v12, %v622_v15  ;;  %2679 = vmatprep.mubr.bf16.mxu0 %v5091_v4  ;;  %2827 = vmatprep.mubr.bf16.mxu1 %v5091_v4  ;;  %v4885_v37 = vld [vmem:[%s6446_s1 + $0x824] ss:$8 sps:$4 sm:$0xff]   ;;  %v4917_v15 = vld [vmem:[%s6446_s1 + $0x9d0] ss:$8 sps:$4 sm:$0xff]  }
 0x118   : >> { %v619_v22 = vpop.f32.mrf.mxu0  ;;  %v767_v25 = vpop.f32.mrf.mxu1  ;;  %v4922_v17 = vld [vmem:[%s6446_s1 + $0x944] ss:$8 sps:$4 sm:$0xff]  }
 0x119   : >> { %v5999_v26 = vadd.f32 %v765_v18, %v623_v20  ;;  %2650 = vmatpush1.bf16.msra.mxu0 %v4859_v13  ;;  %2798 = vmatpush1.bf16.msra.mxu1 %v4862_v14  ;;  %v4914_v14 = vld [vmem:[%s6446_s1 + $0x950] ss:$8 sps:$4 sm:$0xff]   ;;  %v4925_v18 = vld [vmem:[%s6446_s1 + $0x9c4] ss:$8 sps:$4 sm:$0xff]   ;;  %v4920_v20 = vld [vmem:[%s6446_s1 + $0x940] ss:$8 sps:$4 sm:$0xff]  }
 0x11a   : >> { %v620_v28 = vpop.f32.mrf.mxu0  ;;  %2651 = vmatprep.subr.bf16.mxu0 %v4867_v16  ;;  %2799 = vmatprep.subr.bf16.mxu1 %v4870_v19  ;;  %v768_v30 = vpop.f32.mrf.mxu1  ;;  %v4928_v22 = vld [vmem:[%s6446_s1 + $0x934] ss:$8 sps:$4 sm:$0xff]   ;;  %v4929_v25 = vld [vmem:[%s6446_s1 + $0x9b0] ss:$8 sps:$4 sm:$0xff]  }
 0x11b   : >> { %v4932_v28 = vld [vmem:[%s6446_s1 + $0x920] ss:$8 sps:$4 sm:$0xff]   ;;  %v4940_v30 = vld [vmem:[%s6446_s1 + $0x914] ss:$8 sps:$4 sm:$0xff]  }
 0x11d   : >> { %2652 = vmatpush1.bf16.msra.mxu0 %v4865_v23  ;;  %2800 = vmatpush1.bf16.msra.mxu1 %v4868_v24  ;;  %v4931_v23 = vld [vmem:[%s6446_s1 + $0x9b4] ss:$8 sps:$4 sm:$0xff]   ;;  %v4926_v24 = vld [vmem:[%s6446_s1 + $0x930] ss:$8 sps:$4 sm:$0xff]  }
 0x11e   : >> { %2653 = vmatprep.subr.bf16.mxu0 %v4873_v27  ;;  %2801 = vmatprep.subr.bf16.mxu1 %v4876_v29  ;;  %v4937_v27 = vld [vmem:[%s6446_s1 + $0x9a4] ss:$8 sps:$4 sm:$0xff]   ;;  %v4935_v29 = vld [vmem:[%s6446_s1 + $0x9a0] ss:$8 sps:$4 sm:$0xff]  }
 0x121   : >> { %2654 = vmatpush1.bf16.msra.mxu0 %v4871_v31  ;;  %2802 = vmatpush1.bf16.msra.mxu1 %v4874_v32  ;;  %v4943_v31 = vld [vmem:[%s6446_s1 + $0x994] ss:$8 sps:$4 sm:$0xff]   ;;  %v2855_v32 = vshrl.u32 %v6056_v51, 16 }
 0x122   : >> { %2655 = vmatprep.subr.bf16.mxu0 %v4879_v33  ;;  %2803 = vmatprep.subr.bf16.mxu1 %v4882_v34  ;;  %v2858_v33 = vshll.u32 %v6056_v51, 16  ;;  %v4938_v34 = vld [vmem:[%s6446_s1 + $0x910] ss:$8 sps:$4 sm:$0xff]  }
 0x125   : >> { %2656 = vmatpush1.bf16.msra.mxu0 %v4877_v35  ;;  %2804 = vmatpush1.bf16.msra.mxu1 %v4880_v36  ;;  %v4941_v35 = vld [vmem:[%s6446_s1 + $0x990] ss:$8 sps:$4 sm:$0xff]   ;;  %v4946_v36 = vld [vmem:[%s6446_s1 + $0x904] ss:$8 sps:$4 sm:$0xff]  }
 0x126   : >> { %2657 = vmatprep.subr.bf16.mxu0 %v4885_v37  ;;  %2805 = vmatprep.subr.bf16.mxu1 %v4888_v38  ;;  %v4949_v37 = vld [vmem:[%s6446_s1 + $0x984] ss:$8 sps:$4 sm:$0xff]   ;;  %v2857_v38 = vrot.slane %v2855_v32, 1  ;;  %v5002_v32 = vld [vmem:[%s6446_s1 + $0xb74] ss:$8 sps:$4 sm:$0xff]  }
 0x129   : >> { %2658 = vmatpush1.bf16.msra.mxu0 %v4883_v39  ;;  %2806 = vmatpush1.bf16.msra.mxu1 %v4886_v40  ;;  %v2860_v39 = vrot.slane %v2858_v33, 2  ;;  %v4953_v40 = vld [vmem:[%s5220_s22 + $0x18] sm:$0x3c]  }
 0x12a   : >> { %2659 = vmatprep.subr.bf16.mxu0 %v4891_v42  ;;  %2807 = vmatprep.subr.bf16.mxu1 %v4894_v43  ;;  %v4947_v42 = vld [vmem:[%s6446_s1 + $0x980] ss:$8 sps:$4 sm:$0xff]   ;;  %v4952_v43 = vld [vmem:[%s6446_s1 + $0xa74] ss:$8 sps:$4 sm:$0xff]  }
 0x12b   : >> { %v5005_v33 = vld [vmem:[%s6446_s1 + $0xbf4] ss:$8 sps:$4 sm:$0xff]  }
 0x12d   : >> { %2660 = vmatpush1.bf16.msra.mxu0 %v4889_v45  ;;  %2808 = vmatpush1.bf16.msra.mxu1 %v4892_v46  ;;  %v2861_v45 = vor.u32 %v2860_v39, %v2857_v38  ;;  %v3009_v46 = vrot.slane %v4953_v40, 2  ;;  %v5011_v38 = vld [vmem:[%s6446_s1 + $0xbe4] ss:$8 sps:$4 sm:$0xff]  }
 0x12e   : >> { %2661 = vmatprep.subr.bf16.mxu0 %v4897_v47  ;;  %2809 = vmatprep.subr.bf16.mxu1 %v4900_v48  ;;  %v4950_v47 = vld [vmem:[%s6446_s1 + $0xa70] ss:$8 sps:$4 sm:$0xff]  }
 0x12f   : >> { %v4954_v48 = vld [vmem:[%s6446_s1 + $0xaf0] ss:$8 sps:$4 sm:$0xff]  }
 0x131   : >> { %2662 = vmatpush1.bf16.msra.mxu0 %v4895_v52  ;;  %2810 = vmatpush1.bf16.msra.mxu1 %v4898_v53 }
 0x132   : >> { %2943 = vmatprep.subr.bf16.mxu0 %v4903_v54  ;;  %3091 = vmatprep.subr.bf16.mxu1 %v4907_v55  ;;  %v4957_v54 = vld [vmem:[%s6446_s1 + $0xa60] ss:$8 sps:$4 sm:$0xff]  }
 0x133   : >> { %v4960_v55 = vld [vmem:[%s6446_s1 + $0xae0] ss:$8 sps:$4 sm:$0xff]  }
 0x134   : >> { %v911_v62 = vpop.f32.mrf.mxu0  ;;  %2680 = vmatmul.mubr.bf16.vlgmr.msra.gmra.mxu0 %v2565_v56  ;;  %v1055_v63 = vpop.f32.mrf.mxu1  ;;  %2828 = vmatmul.mubr.bf16.vlgmr.msra.gmra.mxu1 %v2713_v57 }
 0x135   : >> { %v918_v1 = vadd.f32 %v911_v62, %v5989_v21  ;;  %2944 = vmatpush1.bf16.msra.mxu0 %v4901_v58  ;;  %3092 = vmatpush1.bf16.msra.mxu1 %v4905_v59  ;;  %v4923_v21 = vld [vmem:[%s6446_s1 + $0x9c0] ss:$8 sps:$4 sm:$0xff]   ;;  %v4965_v58 = vld [vmem:[%s6446_s1 + $0xa54] ss:$8 sps:$4 sm:$0xff]  }
 0x136   : >> { %v913_v5 = vpop.f32.mrf.mxu0  ;;  %v1057_v6 = vpop.f32.mrf.mxu1  ;;  %2945 = vmatprep.subr.bf16.mxu0 %v4910_v60  ;;  %3093 = vmatprep.subr.bf16.mxu1 %v4913_v61  ;;  %v4968_v59 = vld [vmem:[%s6446_s1 + $0xad4] ss:$8 sps:$4 sm:$0xff]  }
 0x137   : >> { %v919_v9 = vadd.f32 %v913_v5, %v5999_v26  ;;  %v6097_v10 = vadd.f32 %v1055_v63, %v918_v1  ;;  %2975 = vmatprep.mubr.bf16.mxu0 %v5091_v4  ;;  %3123 = vmatprep.mubr.bf16.mxu1 %v5091_v4  ;;  %v4934_v26 = vld [vmem:[%s6446_s1 + $0x924] ss:$8 sps:$4 sm:$0xff]  }
 0x138   : >> { %v915_v11 = vpop.f32.mrf.mxu0  ;;  %v1059_v12 = vpop.f32.mrf.mxu1 }
 0x139   : >> { %v6101_v13 = vadd.f32 %v1057_v6, %v919_v9  ;;  %2946 = vmatpush1.bf16.msra.mxu0 %v4908_v2  ;;  %3094 = vmatpush1.bf16.msra.mxu1 %v4911_v3  ;;  %v4963_v2 = vld [vmem:[%s6446_s1 + $0xa50] ss:$8 sps:$4 sm:$0xff]   ;;  %v4971_v6 = vld [vmem:[%s6446_s1 + $0xa44] ss:$8 sps:$4 sm:$0xff]   ;;  %v4969_v9 = vld [vmem:[%s6446_s1 + $0xa40] ss:$8 sps:$4 sm:$0xff]  }
 0x13a   : >> { %v916_v16 = vpop.f32.mrf.mxu0  ;;  %2947 = vmatprep.subr.bf16.mxu0 %v4916_v7  ;;  %3095 = vmatprep.subr.bf16.mxu1 %v4919_v8  ;;  %v1060_v19 = vpop.f32.mrf.mxu1  ;;  %v4966_v3 = vld [vmem:[%s6446_s1 + $0xad0] ss:$8 sps:$4 sm:$0xff]   ;;  %v4974_v7 = vld [vmem:[%s6446_s1 + $0xac4] ss:$8 sps:$4 sm:$0xff]   ;;  %v4977_v11 = vld [vmem:[%s6446_s1 + $0xa34] ss:$8 sps:$4 sm:$0xff]  }
 0x13b   : >> { %v4980_v12 = vld [vmem:[%s6446_s1 + $0xab4] ss:$8 sps:$4 sm:$0xff]   ;;  %v4983_v16 = vld [vmem:[%s6446_s1 + $0xa24] ss:$8 sps:$4 sm:$0xff]   ;;  %v4981_v19 = vld [vmem:[%s6446_s1 + $0xa20] ss:$8 sps:$4 sm:$0xff]  }
 0x13d   : >> { %2948 = vmatpush1.bf16.msra.mxu0 %v4914_v14  ;;  %3096 = vmatpush1.bf16.msra.mxu1 %v4917_v15  ;;  %v4978_v14 = vld [vmem:[%s6446_s1 + $0xab0] ss:$8 sps:$4 sm:$0xff]   ;;  %v4344_v15 = vld [vmem:[%s5220_s22 + $0x20] sm:$0xf] }
 0x13e   : >> { %2949 = vmatprep.subr.bf16.mxu0 %v4922_v17  ;;  %3097 = vmatprep.subr.bf16.mxu1 %v4925_v18  ;;  %v4986_v17 = vld [vmem:[%s6446_s1 + $0xaa4] ss:$8 sps:$4 sm:$0xff]   ;;  %v4361_v18 = vcombine.low %v4344_v15, %v4344_v15 }
 0x141   : >> { %2950 = vmatpush1.bf16.msra.mxu0 %v4920_v20  ;;  %3098 = vmatpush1.bf16.msra.mxu1 %v4923_v21  ;;  %v4984_v20 = vld [vmem:[%s6446_s1 + $0xaa0] ss:$8 sps:$4 sm:$0xff]   ;;  %v4989_v21 = vld [vmem:[%s6446_s1 + $0xa14] ss:$8 sps:$4 sm:$0xff]  }
 0x142   : >> { %2951 = vmatprep.subr.bf16.mxu0 %v4928_v22  ;;  %3099 = vmatprep.subr.bf16.mxu1 %v4931_v23  ;;  %v4992_v22 = vld [vmem:[%s6446_s1 + $0xa94] ss:$8 sps:$4 sm:$0xff]   ;;  %v3300_v23 = vshll.u32 %v4361_v18, 16 }
 0x145   : >> { %2952 = vmatpush1.bf16.msra.mxu0 %v4926_v24  ;;  %3100 = vmatpush1.bf16.msra.mxu1 %v4929_v25  ;;  %v4987_v24 = vld [vmem:[%s6446_s1 + $0xa10] ss:$8 sps:$4 sm:$0xff]  }
 0x146   : >> { %2953 = vmatprep.subr.bf16.mxu0 %v4934_v26  ;;  %3101 = vmatprep.subr.bf16.mxu1 %v4937_v27  ;;  %v4990_v25 = vld [vmem:[%s6446_s1 + $0xa90] ss:$8 sps:$4 sm:$0xff]   ;;  %v4995_v26 = vld [vmem:[%s6446_s1 + $0xa04] ss:$8 sps:$4 sm:$0xff]  }
 0x147   : >> { %v4998_v27 = vld [vmem:[%s6446_s1 + $0xa84] ss:$8 sps:$4 sm:$0xff]  }
 0x149   : >> { %2954 = vmatpush1.bf16.msra.mxu0 %v4932_v28  ;;  %3102 = vmatpush1.bf16.msra.mxu1 %v4935_v29  ;;  %v3298_v28 = vshrl.u32 %v4361_v18, 16  ;;  %v3302_v29 = vrot.slane %v3300_v23, 1  ;;  %v5042_v18 = vld [vmem:[%s6446_s1 + $0xb00] ss:$8 sps:$4 sm:$0xff]   ;;  %v5049_v23 = vld [vmem:[%s6446_s1 + $0xc70] ss:$8 sps:$4 sm:$0xff]  }
 0x14a   : >> { %2955 = vmatprep.subr.bf16.mxu0 %v4940_v30  ;;  %3103 = vmatprep.subr.bf16.mxu1 %v4943_v31  ;;  %v4993_v30 = vld [vmem:[%s6446_s1 + $0xa00] ss:$8 sps:$4 sm:$0xff]  }
 0x14b   : >> { %v4996_v31 = vld [vmem:[%s6446_s1 + $0xa80] ss:$8 sps:$4 sm:$0xff]  }
 0x14d   : >> { %2956 = vmatpush1.bf16.msra.mxu0 %v4938_v34  ;;  %3104 = vmatpush1.bf16.msra.mxu1 %v4941_v35  ;;  %v3303_v34 = vor.u32 %v3302_v29, %v3298_v28  ;;  %v5000_v35 = vld [vmem:[%s6446_s1 + $0xb70] ss:$8 sps:$4 sm:$0xff]   ;;  %v5052_v28 = vld [vmem:[%s6446_s1 + $0xc60] ss:$8 sps:$4 sm:$0xff]  }
 0x14e   : >> { %2957 = vmatprep.subr.bf16.mxu0 %v4946_v36  ;;  %3105 = vmatprep.subr.bf16.mxu1 %v4949_v37  ;;  %v5003_v36 = vld [vmem:[%s6446_s1 + $0xbf0] ss:$8 sps:$4 sm:$0xff]   ;;  %v5008_v37 = vld [vmem:[%s6446_s1 + $0xb64] ss:$8 sps:$4 sm:$0xff]  }
 0x151   : >> { %2958 = vmatpush1.bf16.msra.mxu0 %v4944_v41  ;;  %3106 = vmatpush1.bf16.msra.mxu1 %v4947_v42  ;;  %v5006_v42 = vld [vmem:[%s6446_s1 + $0xb60] ss:$8 sps:$4 sm:$0xff]  }
 0x152   : >> { %3235 = vmatprep.subr.bf16.mxu0 %v4952_v43  ;;  %3385 = vmatprep.subr.bf16.mxu1 %v4956_v44  ;;  %v5009_v43 = vld [vmem:[%s6446_s1 + $0xbe0] ss:$8 sps:$4 sm:$0xff]  }
 0x154   : >> { %v1205_v51 = vpop.f32.mrf.mxu0  ;;  %2976 = vmatmul.mubr.bf16.vlgmr.msra.gmra.mxu0 %v2861_v45  ;;  %v1353_v52 = vpop.f32.mrf.mxu1  ;;  %3124 = vmatmul.mubr.bf16.vlgmr.msra.gmra.mxu1 %v3009_v46  ;;  %v5014_v46 = vld [vmem:[%s6446_s1 + $0xb54] ss:$8 sps:$4 sm:$0xff]  }
 0x155   : >> { %v1212_v53 = vadd.f32 %v1205_v51, %v6097_v10  ;;  %3236 = vmatpush1.bf16.msra.mxu0 %v4950_v47  ;;  %3386 = vmatpush1.bf16.msra.mxu1 %v4954_v48  ;;  %v4972_v10 = vld [vmem:[%s6446_s1 + $0xac0] ss:$8 sps:$4 sm:$0xff]   ;;  %v5017_v47 = vld [vmem:[%s6446_s1 + $0xbd4] ss:$8 sps:$4 sm:$0xff]  }
 0x156   : >> { %v1207_v56 = vpop.f32.mrf.mxu0  ;;  %v1355_v57 = vpop.f32.mrf.mxu1  ;;  %3237 = vmatprep.subr.bf16.mxu0 %v4959_v49  ;;  %3387 = vmatprep.subr.bf16.mxu1 %v4962_v50 }
 0x157   : >> { %v1213_v60 = vadd.f32 %v1207_v56, %v6101_v13  ;;  %v6204_v61 = vadd.f32 %v1353_v52, %v1212_v53  ;;  %3267 = vmatprep.mubr.bf16.mxu0 %v5091_v4  ;;  %3417 = vmatprep.mubr.bf16.mxu1 %v5091_v4  ;;  %v4975_v13 = vld [vmem:[%s6446_s1 + $0xa30] ss:$8 sps:$4 sm:$0xff]   ;;  %v5020_v56 = vld [vmem:[%s6446_s1 + $0xb44] ss:$8 sps:$4 sm:$0xff]  }
 0x158   : >> { %v1209_v62 = vpop.f32.mrf.mxu0  ;;  %v1357_v63 = vpop.f32.mrf.mxu1  ;;  %v5012_v53 = vld [vmem:[%s6446_s1 + $0xb50] ss:$8 sps:$4 sm:$0xff]  }
 0x159   : >> { %v6208_v1 = vadd.f32 %v1355_v57, %v1213_v60  ;;  %3238 = vmatpush1.bf16.msra.mxu0 %v4957_v54  ;;  %3388 = vmatpush1.bf16.msra.mxu1 %v4960_v55  ;;  %v5015_v54 = vld [vmem:[%s6446_s1 + $0xbd0] ss:$8 sps:$4 sm:$0xff]   ;;  %v5023_v57 = vld [vmem:[%s6446_s1 + $0xbc4] ss:$8 sps:$4 sm:$0xff]   ;;  %v5021_v60 = vld [vmem:[%s6446_s1 + $0xbc0] ss:$8 sps:$4 sm:$0xff]  }
 0x15a   : >> { %v1210_v5 = vpop.f32.mrf.mxu0  ;;  %3239 = vmatprep.subr.bf16.mxu0 %v4965_v58  ;;  %3389 = vmatprep.subr.bf16.mxu1 %v4968_v59  ;;  %v1358_v8 = vpop.f32.mrf.mxu1  ;;  %v5018_v59 = vld [vmem:[%s6446_s1 + $0xb40] ss:$8 sps:$4 sm:$0xff]   ;;  %v5029_v62 = vld [vmem:[%s6446_s1 + $0xbb4] ss:$8 sps:$4 sm:$0xff]   ;;  %v5024_v63 = vld [vmem:[%s6446_s1 + $0xb30] ss:$8 sps:$4 sm:$0xff]  }
 0x15b   : >> { %v5048_v5 = vld [vmem:[%s5220_s22 + $0x20] sm:$0x1e]   ;;  %v5038_v8 = vld [vmem:[%s6446_s1 + $0xb14] ss:$8 sps:$4 sm:$0xff]  }
 0x15d   : >> { %3240 = vmatpush1.bf16.msra.mxu0 %v4963_v2  ;;  %3390 = vmatpush1.bf16.msra.mxu1 %v4966_v3  ;;  %v5032_v2 = vld [vmem:[%s6446_s1 + $0xb24] ss:$8 sps:$4 sm:$0xff]  }
 0x15e   : >> { %3241 = vmatprep.subr.bf16.mxu0 %v4971_v6  ;;  %3391 = vmatprep.subr.bf16.mxu1 %v4974_v7  ;;  %v5035_v3 = vld [vmem:[%s6446_s1 + $0xba4] ss:$8 sps:$4 sm:$0xff]   ;;  %v5030_v6 = vld [vmem:[%s6446_s1 + $0xb20] ss:$8 sps:$4 sm:$0xff]  }
 0x15f   : >> { %v5033_v7 = vld [vmem:[%s6446_s1 + $0xba0] ss:$8 sps:$4 sm:$0xff]  }
 0x161   : >> { %3242 = vmatpush1.bf16.msra.mxu0 %v4969_v9  ;;  %3392 = vmatpush1.bf16.msra.mxu1 %v4972_v10  ;;  %v5041_v9 = vld [vmem:[%s6446_s1 + $0xb94] ss:$8 sps:$4 sm:$0xff]   ;;  %v3593_v10 = vshrl.u32 %v5048_v5, 16 }
 0x162   : >> { %3243 = vmatprep.subr.bf16.mxu0 %v4977_v11  ;;  %3393 = vmatprep.subr.bf16.mxu1 %v4980_v12  ;;  %v3596_v11 = vshll.u32 %v5048_v5, 16  ;;  %v5036_v12 = vld [vmem:[%s6446_s1 + $0xb10] ss:$8 sps:$4 sm:$0xff]  }
 0x165   : >> { %3244 = vmatpush1.bf16.msra.mxu0 %v4975_v13  ;;  %3394 = vmatpush1.bf16.msra.mxu1 %v4978_v14  ;;  %v5039_v13 = vld [vmem:[%s6446_s1 + $0xb90] ss:$8 sps:$4 sm:$0xff]   ;;  %v5044_v14 = vld [vmem:[%s6446_s1 + $0xb04] ss:$8 sps:$4 sm:$0xff]  }
 0x166   : >> { %3245 = vmatprep.subr.bf16.mxu0 %v4983_v16  ;;  %3395 = vmatprep.subr.bf16.mxu1 %v4986_v17  ;;  %v3595_v16 = vrot.slane %v3593_v10, 1  ;;  %v3598_v17 = vrot.slane %v3596_v11, 2 }
 0x169   : >> { %3246 = vmatpush1.bf16.msra.mxu0 %v4981_v19  ;;  %3396 = vmatpush1.bf16.msra.mxu1 %v4984_v20  ;;  %v5045_v19 = vld [vmem:[%s6446_s1 + $0xb80] ss:$8 sps:$4 sm:$0xff]   ;;  %v5051_v20 = vld [vmem:[%s6446_s1 + $0xc74] ss:$8 sps:$4 sm:$0xff]  }
 0x16a   : >> { %3247 = vmatprep.subr.bf16.mxu0 %v4989_v21  ;;  %3397 = vmatprep.subr.bf16.mxu1 %v4992_v22  ;;  %v3451_v21 = vrot.slane %v5048_v5, 1  ;;  %v3599_v22 = vor.u32 %v3598_v17, %v3595_v16 }
 0x16d   : >> { %3248 = vmatpush1.bf16.msra.mxu0 %v4987_v24  ;;  %3398 = vmatpush1.bf16.msra.mxu1 %v4990_v25  ;;  %v5054_v24 = vld [vmem:[%s6446_s1 + $0xc64] ss:$8 sps:$4 sm:$0xff]  }
 0x16e   : >> { %3249 = vmatprep.subr.bf16.mxu0 %v4995_v26  ;;  %3399 = vmatprep.subr.bf16.mxu1 %v4998_v27 }
 0x171   : >> { %3250 = vmatpush1.bf16.msra.mxu0 %v4993_v30  ;;  %3400 = vmatpush1.bf16.msra.mxu1 %v4996_v31  ;;  %v5057_v31 = vld [vmem:[%s6446_s1 + $0xc54] ss:$8 sps:$4 sm:$0xff]  }
 0x172   : >> { %3533 = vmatprep.subr.bf16.mxu0 %v5002_v32  ;;  %3681 = vmatprep.subr.bf16.mxu1 %v5005_v33 }
 0x174   : >> { %v1501_v39 = vpop.f32.mrf.mxu0  ;;  %3268 = vmatmul.mubr.bf16.vlgmr.msra.gmra.mxu0 %v4344_v15  ;;  %v1649_v40 = vpop.f32.mrf.mxu1  ;;  %3418 = vmatmul.mubr.bf16.vlgmr.msra.gmra.mxu1 %v3303_v34  ;;  %v5047_v15 = vld [vmem:[%s6446_s1 + $0xb84] ss:$8 sps:$4 sm:$0xff]  }
 0x175   : >> { %v1508_v41 = vadd.f32 %v1501_v39, %v6204_v61  ;;  %3534 = vmatpush1.bf16.msra.mxu0 %v5000_v35  ;;  %3682 = vmatpush1.bf16.msra.mxu1 %v5003_v36  ;;  %v5026_v61 = vld [vmem:[%s6446_s1 + $0xb34] ss:$8 sps:$4 sm:$0xff]  }
 0x176   : >> { %v1503_v44 = vpop.f32.mrf.mxu0  ;;  %v1651_v45 = vpop.f32.mrf.mxu1  ;;  %3535 = vmatprep.subr.bf16.mxu0 %v5008_v37  ;;  %3683 = vmatprep.subr.bf16.mxu1 %v5011_v38  ;;  %v5055_v37 = vld [vmem:[%s6446_s1 + $0xc50] ss:$8 sps:$4 sm:$0xff]  }
 0x177   : >> { %v1509_v48 = vadd.f32 %v1503_v44, %v6208_v1  ;;  %v6309_v49 = vadd.f32 %v1649_v40, %v1508_v41  ;;  %3565 = vmatprep.mubr.bf16.mxu0 %v5091_v4  ;;  %3713 = vmatprep.mubr.bf16.mxu1 %v5091_v4  ;;  %v5027_v1 = vld [vmem:[%s6446_s1 + $0xbb0] ss:$8 sps:$4 sm:$0xff]   ;;  %v5058_v40 = vld [vmem:[%s6446_s1 + $0xc40] ss:$8 sps:$4 sm:$0xff]   ;;  %v5063_v41 = vld [vmem:[%s6446_s1 + $0xc34] ss:$8 sps:$4 sm:$0xff]  }
 0x178   : >> { %v1505_v50 = vpop.f32.mrf.mxu0  ;;  %v1653_v51 = vpop.f32.mrf.mxu1  ;;  %v5064_v44 = vld [vmem:[%s6446_s1 + $0xc20] ss:$8 sps:$4 sm:$0xff]  }
 0x179   : >> { %v6313_v52 = vadd.f32 %v1651_v45, %v1509_v48  ;;  %3536 = vmatpush1.bf16.msra.mxu0 %v5006_v42  ;;  %3684 = vmatpush1.bf16.msra.mxu1 %v5009_v43  ;;  %v5061_v42 = vld [vmem:[%s6446_s1 + $0xc30] ss:$8 sps:$4 sm:$0xff]   ;;  %v5066_v43 = vld [vmem:[%s6446_s1 + $0xc24] ss:$8 sps:$4 sm:$0xff]   ;;  %v5069_v45 = vld [vmem:[%s6446_s1 + $0xc14] ss:$8 sps:$4 sm:$0xff]  }
 0x17a   : >> { %v1506_v55 = vpop.f32.mrf.mxu0  ;;  %3537 = vmatprep.subr.bf16.mxu0 %v5014_v46  ;;  %3685 = vmatprep.subr.bf16.mxu1 %v5017_v47  ;;  %v1654_v58 = vpop.f32.mrf.mxu1  ;;  %v5067_v46 = vld [vmem:[%s6446_s1 + $0xc10] ss:$8 sps:$4 sm:$0xff]   ;;  %v5072_v47 = vld [vmem:[%s6446_s1 + $0xc04] ss:$8 sps:$4 sm:$0xff]  }
 0x17b   : >> { %v5073_v48 = vld [vmem:[%s5220_s22 + $0x20] sm:$0x3c]   ;;  %s3896_s22 = scalar_lea.vmem %s5128_s20, %s4437_s16 }
 0x17c   : >> { %v3747_v50 = vrot.slane %v5073_v48, 2 }
 0x17d   : >> { %3538 = vmatpush1.bf16.msra.mxu0 %v5012_v53  ;;  %3686 = vmatpush1.bf16.msra.mxu1 %v5015_v54 }
 0x17e   : >> { %3539 = vmatprep.subr.bf16.mxu0 %v5020_v56  ;;  %3687 = vmatprep.subr.bf16.mxu1 %v5023_v57 }
 0x181   : >> { %3540 = vmatpush1.bf16.msra.mxu0 %v5018_v59  ;;  %3688 = vmatpush1.bf16.msra.mxu1 %v5021_v60 }
 0x182   : >> { %3541 = vmatprep.subr.bf16.mxu0 %v5026_v61  ;;  %3689 = vmatprep.subr.bf16.mxu1 %v5029_v62 }
 0x185   : >> { %3542 = vmatpush1.bf16.msra.mxu0 %v5024_v63  ;;  %3690 = vmatpush1.bf16.msra.mxu1 %v5027_v1 }
 0x186   : >> { %3543 = vmatprep.subr.bf16.mxu0 %v5032_v2  ;;  %3691 = vmatprep.subr.bf16.mxu1 %v5035_v3 }
 0x189   : >> { %3544 = vmatpush1.bf16.msra.mxu0 %v5030_v6  ;;  %3692 = vmatpush1.bf16.msra.mxu1 %v5033_v7 }
 0x18a   : >> { %3545 = vmatprep.subr.bf16.mxu0 %v5038_v8  ;;  %3693 = vmatprep.subr.bf16.mxu1 %v5041_v9 }
 0x18d   : >> { %3546 = vmatpush1.bf16.msra.mxu0 %v5036_v12  ;;  %3694 = vmatpush1.bf16.msra.mxu1 %v5039_v13 }
 0x18e   : >> { %3547 = vmatprep.subr.bf16.mxu0 %v5044_v14  ;;  %3695 = vmatprep.subr.bf16.mxu1 %v5047_v15 }
 0x191   : >> { %3548 = vmatpush1.bf16.msra.mxu0 %v5042_v18  ;;  %3696 = vmatpush1.bf16.msra.mxu1 %v5045_v19 }
 0x192   : >> { %3829 = vmatprep.subr.bf16.mxu0 %v5051_v20 }
 0x194   : >> { %v1793_v25 = vpop.f32.mrf.mxu0  ;;  %3566 = vmatmul.mubr.bf16.vlgmr.msra.gmra.mxu0 %v3451_v21  ;;  %v1943_v26 = vpop.f32.mrf.mxu1  ;;  %3714 = vmatmul.mubr.bf16.vlgmr.msra.gmra.mxu1 %v3599_v22 }
 0x195   : >> { %v1800_v27 = vadd.f32 %v1793_v25, %v6309_v49  ;;  %3830 = vmatpush1.bf16.msra.mxu0 %v5049_v23  ;;  %3861 = vmatprep.mubr.bf16.mxu0 %v5091_v4  ;;  %v5060_v4 = vld [vmem:[%s6446_s1 + $0xc44] ss:$8 sps:$4 sm:$0xff]   ;;  %v5070_v49 = vld [vmem:[%s6446_s1 + $0xc00] ss:$8 sps:$4 sm:$0xff]  }
 0x196   : >> { %v1795_v29 = vpop.f32.mrf.mxu0  ;;  %v1945_v30 = vpop.f32.mrf.mxu1  ;;  %3831 = vmatprep.subr.bf16.mxu0 %v5054_v24 }
 0x197   : >> { %v1801_v32 = vadd.f32 %v1795_v29, %v6313_v52  ;;  %v1950_v33 = vadd.f32 %v1943_v26, %v1800_v27 }
 0x198   : >> { %v1797_v34 = vpop.f32.mrf.mxu0  ;;  %v1947_v35 = vpop.f32.mrf.mxu1 }
 0x199   : >> { %v1951_v36 = vadd.f32 %v1945_v30, %v1801_v32  ;;  %3832 = vmatpush1.bf16.msra.mxu0 %v5052_v28 }
 0x19a   : >> { %v1798_v38 = vpop.f32.mrf.mxu0  ;;  %3833 = vmatprep.subr.bf16.mxu0 %v5057_v31  ;;  %v1948_v39 = vpop.f32.mrf.mxu1 }
 0x19d   : >> { %3834 = vmatpush1.bf16.msra.mxu0 %v5055_v37 }
 0x19e   : >> { %3835 = vmatprep.subr.bf16.mxu0 %v5060_v4 }
 0x1a1   : >> { %3836 = vmatpush1.bf16.msra.mxu0 %v5058_v40 }
 0x1a2   : >> { %3837 = vmatprep.subr.bf16.mxu0 %v5063_v41 }
 0x1a5   : >> { %3838 = vmatpush1.bf16.msra.mxu0 %v5061_v42 }
 0x1a6   : >> { %3839 = vmatprep.subr.bf16.mxu0 %v5066_v43 }
 0x1a9   : >> { %3840 = vmatpush1.bf16.msra.mxu0 %v5064_v44 }
 0x1aa   : >> { %3841 = vmatprep.subr.bf16.mxu0 %v5069_v45 }
 0x1ad   : >> { %3842 = vmatpush1.bf16.msra.mxu0 %v5067_v46 }
 0x1ae   : >> { %3843 = vmatprep.subr.bf16.mxu0 %v5072_v47 }
 0x1b1   : >> { %3844 = vmatpush1.bf16.msra.mxu0 %v5070_v49 }
 0x1b4   : >> { %v2091_v51 = vpop.f32.mrf.mxu0  ;;  %3862 = vmatmul.mubr.bf16.vlgmr.msra.gmra.mxu0 %v3747_v50  ;;  %v2239_v52 = vpop.f32.mrf.mxu1 }
 0x1b5   : >> { %v2098_v53 = vadd.f32 %v2091_v51, %v1950_v33 }
 0x1b6   : >> { %v2093_v54 = vpop.f32.mrf.mxu0  ;;  %v2241_v55 = vpop.f32.mrf.mxu1 }
 0x1b7   : >> { %v2099_v56 = vadd.f32 %v2093_v54, %v1951_v36  ;;  %v2246_v57 = vadd.f32 %v2239_v52, %v2098_v53  ;;  %v3873_v52 = vlaneseq }
 0x1b8   : >> { %v2095_v58 = vpop.f32.mrf.mxu0  ;;  %v2243_v59 = vpop.f32.mrf.mxu1 }
 0x1b9   : >> { %v2247_v60 = vadd.f32 %v2241_v55, %v2099_v56  ;;  %v3874_v55 = vshrl.u32 %v3873_v52, 7 }
 0x1ba   : >> { %v2096_v61 = vpop.f32.mrf.mxu0  ;;  %v2244_v62 = vpop.f32.mrf.mxu1 }
 0x1bb   : >> { %v3875_v59 = vsub.s32 0, %v3874_v55 }
 0x1d4   : >> { %v2387_v63 = vpop.f32.mrf.mxu0  ;;  %v2531_v1 = vpop.f32.mrf.mxu1 }
 0x1d5   : >> { %v2394_v2 = vadd.f32 %v2387_v63, %v2246_v57  ;;  %v3876_v63 = vrot.slane %v5123_v0, %v3875_v59 }
 0x1d6   : >> { %v2389_v3 = vpop.f32.mrf.mxu0  ;;  %v2533_v5 = vpop.f32.mrf.mxu1 }
 0x1d7   : >> { %v2395_v6 = vadd.f32 %v2389_v3, %v2247_v60  ;;  %v2538_v7 = vadd.f32 %v2531_v1, %v2394_v2  ;;  %v3879_v60 = vsub.s32 1, %v3874_v55 }
 0x1d8   : >> { %v2391_v8 = vpop.f32.mrf.mxu0  ;;  %v2535_v9 = vpop.f32.mrf.mxu1 }
 0x1d9   : >> { %v2539_v10 = vadd.f32 %v2533_v5, %v2395_v6  ;;  %v3880_v2 = vrot.slane %v5123_v0, %v3879_v60 }
 0x1da   : >> { %v2392_v11 = vpop.f32.mrf.mxu0  ;;  %v2536_v12 = vpop.f32.mrf.mxu1 }
 0x1f4   : >> { %v2681_v13 = vpop.f32.mrf.mxu0  ;;  %v2829_v14 = vpop.f32.mrf.mxu1 }
 0x1f5   : >> { %v2688_v15 = vadd.f32 %v2681_v13, %v2538_v7 }
 0x1f6   : >> { %v2683_v16 = vpop.f32.mrf.mxu0  ;;  %v2831_v17 = vpop.f32.mrf.mxu1 }
 0x1f7   : >> { %v2689_v18 = vadd.f32 %v2683_v16, %v2539_v10  ;;  %v2836_v19 = vadd.f32 %v2829_v14, %v2688_v15  ;;  %v3904_v14 = vld [vmem:[%s3896_s22] sm:$0xff] }
 0x1f8   : >> { %v2685_v20 = vpop.f32.mrf.mxu0  ;;  %v2833_v21 = vpop.f32.mrf.mxu1 }
 0x1f9   : >> { %v2837_v22 = vadd.f32 %v2831_v17, %v2689_v18 }
 0x1fa   : >> { %v2686_v23 = vpop.f32.mrf.mxu0  ;;  %v2834_v24 = vpop.f32.mrf.mxu1 }
 0x214   : >> { %v2977_v25 = vpop.f32.mrf.mxu0  ;;  %v3125_v26 = vpop.f32.mrf.mxu1 }
 0x215   : >> { %v2984_v27 = vadd.f32 %v2977_v25, %v2836_v19 }
 0x216   : >> { %v2979_v28 = vpop.f32.mrf.mxu0  ;;  %v3127_v29 = vpop.f32.mrf.mxu1 }
 0x217   : >> { %v2985_v30 = vadd.f32 %v2979_v28, %v2837_v22  ;;  %v3132_v31 = vadd.f32 %v3125_v26, %v2984_v27 }
 0x218   : >> { %v2981_v32 = vpop.f32.mrf.mxu0  ;;  %v3129_v33 = vpop.f32.mrf.mxu1 }
 0x219   : >> { %v3133_v34 = vadd.f32 %v3127_v29, %v2985_v30 }
 0x21a   : >> { %v2982_v35 = vpop.f32.mrf.mxu0  ;;  %v3130_v36 = vpop.f32.mrf.mxu1 }
 0x234   : >> { %v3269_v37 = vpop.f32.mrf.mxu0  ;;  %v3419_v38 = vpop.f32.mrf.mxu1 }
 0x235   : >> { %v3276_v53 = vadd.f32 %v3269_v37, %v3132_v31 }
 0x236   : >> { %v3271_v4 = vpop.f32.mrf.mxu0  ;;  %v3421_v39 = vpop.f32.mrf.mxu1 }
 0x237   : >> { %v3277_v54 = vadd.f32 %v3271_v4, %v3133_v34  ;;  %v3426_v56 = vadd.f32 %v3419_v38, %v3276_v53 }
 0x238   : >> { %v3273_v40 = vpop.f32.mrf.mxu0  ;;  %v3423_v41 = vpop.f32.mrf.mxu1 }
 0x239   : >> { %v3427_v57 = vadd.f32 %v3421_v39, %v3277_v54 }
 0x23a   : >> { %v3274_v42 = vpop.f32.mrf.mxu0  ;;  %v3424_v43 = vpop.f32.mrf.mxu1 }
 0x254   : >> { %v3567_v44 = vpop.f32.mrf.mxu0  ;;  %v3715_v45 = vpop.f32.mrf.mxu1 }
 0x255   : >> { %v3574_v58 = vadd.f32 %v3567_v44, %v3426_v56 }
 0x256   : >> { %v3569_v46 = vpop.f32.mrf.mxu0  ;;  %v3717_v47 = vpop.f32.mrf.mxu1 }
 0x257   : >> { %v3575_v61 = vadd.f32 %v3569_v46, %v3427_v57  ;;  %v3722_v62 = vadd.f32 %v3715_v45, %v3574_v58 }
 0x258   : >> { %v3571_v48 = vpop.f32.mrf.mxu0  ;;  %v3719_v49 = vpop.f32.mrf.mxu1 }
 0x259   : >> { %v3723_v3 = vadd.f32 %v3717_v47, %v3575_v61 }
 0x25a   : >> { %v3572_v50 = vpop.f32.mrf.mxu0  ;;  %v3720_v51 = vpop.f32.mrf.mxu1 }
 0x274   : >> { %v3863_v1 = vpop.f32.mrf.mxu0 }
 0x275   : >> { %v3870_v5 = vadd.f32 %v3863_v1, %v3722_v62 }
 0x276   : >> { %v3865_v6 = vpop.f32.mrf.mxu0 }
 0x277   : >> { %v3883_v7 = vadd.f32 %v3876_v63, %v3870_v5  ;;  %v3871_v8 = vadd.f32 %v3865_v6, %v3723_v3 }
 0x278   : >> { %v3867_v9 = vpop.f32.mrf.mxu0 }
 0x279   : >> { %v3884_v10 = vadd.f32 %v3880_v2, %v3871_v8  ;;  %v3885_v12 = vmax.f32 %v3883_v7, 0.0 }
 0x27a   : >> { %v3868_v11 = vpop.f32.mrf.mxu0 }
 0x27b   : >> { %v3886_v13 = vmax.f32 %v3884_v10, 0.0 }
 0x27c   : > { %185 = sbr.rel (!%p183_p4) target bundleno = 18 (0x12), region = 75 }
 0x27d   : >> { %v4438_v15 = vpack.c.bf16 %v3886_v13, %v3885_v12 }
 0x27f   : >> { %v3905_v16 = vsel %vm3903_vm6, %v4438_v15, %v3904_v14 }
 0x280   : >> { %3906 = vst [vmem:[%s3896_s22] sm:$0xff] %v3905_v16 }
 0x281 PF: > { %s13_s12 = sadd.s32 1, %s5084_s12  }
 0x282   : > { %p10_p5 = scmp.ge.s32.totalorder %s13_s12, 4  }
 0x284   :  { %12 = sbr.rel (!%p10_p5) target bundleno = 1 (0x1), region = 86 }

// kernel: features_forward.12
= control target key start
LH: loop header
LB: loop body
LE: loop exit
PB: predicated region body
PF: predicated region fallthrough
CT: control target
= control target key end

     0   :  { %s5025_s12 = smov 0   ;;  %s6514_s0 = inlined_call_operand.vmem [shape: bf16[2,5,5,384], index: 0, kind: input, shape index: {}]   ;;  %s6515_s1 = inlined_call_operand.vmem [shape: bf16[3456,256], index: 1, kind: input, shape index: {}]   ;;  %s6516_s2 = inlined_call_operand.vmem [shape: f32[1,256], index: 2, kind: input, shape index: {}]   ;;  %s6517_s3 = inlined_call_operand.vmem [shape: bf16[2,5,5,256], index: 3, kind: output, shape index: {}]  }
   0x1 LB: > { %s3829_s13 = sadd.s32 4294967295, %s4998_s12   ;;  %p3833_p0 = scmp.ge.s32.totalorder %s4998_s12, 1  ;;  %s4998_s12 = sphi %s5025_s12, %s13_s12  }
   0x2   : > { %p137_p1 = scmp.lt.s32.totalorder %s4998_s12, 3 }
   0x4   : > { %p138_p2 = pnand %p3833_p0, %p137_p1 }
   0x5   : > { %p161_p3 = scmp.lt.s32.totalorder (!%p138_p2), %s3829_s13, 1  ;;  %s5072_s24 = smov (!%p138_p2), 0  }
   0x6   : > { %141 = sbr.rel (%p138_p2) target bundleno = 684 (0x2ac), region = 32 }
   0xb   : > { %v5036_v0 = vld [vmem:[%s6516_s2] sm:$0x3]  ;;  %vm173_vm0 = vcmask 1042432   ;;  %vm174_vm1 = vsmask.f32 2304  ;;  %vm176_vm2 = vcmask 1046532  }
   0xc   : > { %vm177_vm3 = vsmask.f32 6400  ;;  %s6521_s13 = smov (!%p161_p3, %s3829_s13), 1  ;;  %vm175_vm4 = vmand %vm173_vm0, %vm174_vm1 }
   0xd   : > { %vm178_vm5 = vmand %vm176_vm2, %vm177_vm3  ;;  %s4303_s16 = smul.u32 60, %s6521_s13 }
   0xe   : > { %s4304_s17 = smul.u32 40, %s6521_s13  ;;  %vm5043_vm6 = vmor %vm178_vm5, %vm175_vm4 }
   0xf   : > { %s5041_s20 = scalar_lea.vmem %s6514_s0, %s4303_s16 }
  0x10   : > { %s5050_s23 = scalar_lea.vmem %s6517_s3, %s4304_s17 }
  0x11   : > { %v180_v2 = vld [vmem:[%s5050_s23] sm:$0x77]  ;;  %v183_v3 = vld [vmem:[%s5050_s23 + $0x8] sm:$0x77]  ;;  %v186_v4 = vld [vmem:[%s5050_s23 + $0x10] sm:$0x77] }
  0x12   : > { %v181_v5 = vsel %vm5043_vm6, 0, %v180_v2  ;;  %v184_v6 = vsel %vm5043_vm6, 0, %v183_v3  ;;  %v187_v7 = vsel %vm5043_vm6, 0, %v186_v4  ;;  %v189_v8 = vld [vmem:[%s5050_s23 + $0x18] sm:$0x77] }
  0x13   : > { %182 = vst [vmem:[%s5050_s23] sm:$0x77] %v181_v5  ;;  %185 = vst [vmem:[%s5050_s23 + $0x8] sm:$0x77] %v184_v6  ;;  %v190_v9 = vsel %vm5043_vm6, 0, %v189_v8  ;;  %v192_v10 = vld [vmem:[%s5050_s23 + $0x20] sm:$0x77] }
  0x14   : > { %188 = vst [vmem:[%s5050_s23 + $0x10] sm:$0x77] %v187_v7  ;;  %191 = vst [vmem:[%s5050_s23 + $0x18] sm:$0x77] %v190_v9  ;;  %v193_v11 = vsel %vm5043_vm6, 0, %v192_v10 }
  0x15   : > { %194 = vst [vmem:[%s5050_s23 + $0x20] sm:$0x77] %v193_v11 }
  0x16 LB: >> { %v4322_v12 = vld [vmem:[%s6515_s1 + $0x1f4] ss:$8 sps:$4 sm:$0xff]   ;;  %v5004_v14 = vmov 0   ;;  %v4326_v15 = vld [vmem:[%s6515_s1 + $0x1f0] ss:$8 sps:$4 sm:$0xff]   ;;  %s4301_s21 = smul.u32 12, %s5002_s24  ;;  %s5002_s24 = sphi %s5072_s24, %s200_s24  }
  0x17   : >> { %v4324_v13 = vld [vmem:[%s6515_s1 + $0x2f4] ss:$8 sps:$4 sm:$0xff]   ;;  %647 = vmatprep.mubr.bf16.mxu1 %v5004_v14  ;;  %574 = vmatprep.subr.bf16.mxu0 %v4322_v12  ;;  %v4327_v16 = vld [vmem:[%s6515_s1 + $0x2f0] ss:$8 sps:$4 sm:$0xff]   ;;  %v4328_v17 = vld [vmem:[%s6515_s1 + $0x1e4] ss:$8 sps:$4 sm:$0xff]  }
  0x18   : >> { %615 = vmatprep.subr.bf16.mxu1 %v4324_v13  ;;  %575 = vmatpush1.bf16.msra.mxu0 %v4326_v15  ;;  %v4330_v18 = vld [vmem:[%s6515_s1 + $0x2e4] ss:$8 sps:$4 sm:$0xff]   ;;  %v4332_v19 = vld [vmem:[%s6515_s1 + $0x1e0] ss:$8 sps:$4 sm:$0xff]   ;;  %v4334_v21 = vld [vmem:[%s6515_s1 + $0x1d4] ss:$8 sps:$4 sm:$0xff]   ;;  %s5158_s5 = scalar_lea.vmem %s5041_s20, %s4301_s21 }
  0x19   : >> { %616 = vmatpush1.bf16.msra.mxu1 %v4327_v16  ;;  %576 = vmatprep.subr.bf16.mxu0 %v4328_v17  ;;  %v4333_v20 = vld [vmem:[%s6515_s1 + $0x2e0] ss:$8 sps:$4 sm:$0xff]   ;;  %v4336_v22 = vld [vmem:[%s6515_s1 + $0x2d4] ss:$8 sps:$4 sm:$0xff]   ;;  %v4338_v23 = vld [vmem:[%s6515_s1 + $0x1d0] ss:$8 sps:$4 sm:$0xff]  }
  0x1a   : >> { %617 = vmatprep.subr.bf16.mxu1 %v4330_v18  ;;  %v4339_v24 = vld [vmem:[%s6515_s1 + $0x2d0] ss:$8 sps:$4 sm:$0xff]   ;;  %v4340_v25 = vld [vmem:[%s6515_s1 + $0x1c4] ss:$8 sps:$4 sm:$0xff]   ;;  %v4344_v27 = vld [vmem:[%s6515_s1 + $0x1c0] ss:$8 sps:$4 sm:$0xff]  }
  0x1b   : >> { %v4342_v26 = vld [vmem:[%s6515_s1 + $0x2c4] ss:$8 sps:$4 sm:$0xff]   ;;  %v4345_v28 = vld [vmem:[%s6515_s1 + $0x2c0] ss:$8 sps:$4 sm:$0xff]   ;;  %v4346_v29 = vld [vmem:[%s6515_s1 + $0x1b4] ss:$8 sps:$4 sm:$0xff]  }
  0x1c   : >> { %577 = vmatpush1.bf16.msra.mxu0 %v4332_v19  ;;  %v4348_v30 = vld [vmem:[%s6515_s1 + $0x2b4] ss:$8 sps:$4 sm:$0xff]   ;;  %v4350_v31 = vld [vmem:[%s6515_s1 + $0x1b0] ss:$8 sps:$4 sm:$0xff]   ;;  %v4352_v33 = vld [vmem:[%s6515_s1 + $0x1a4] ss:$8 sps:$4 sm:$0xff]  }
  0x1d   : >> { %618 = vmatpush1.bf16.msra.mxu1 %v4333_v20  ;;  %578 = vmatprep.subr.bf16.mxu0 %v4334_v21  ;;  %v4351_v32 = vld [vmem:[%s6515_s1 + $0x2b0] ss:$8 sps:$4 sm:$0xff]   ;;  %v4354_v34 = vld [vmem:[%s6515_s1 + $0x2a4] ss:$8 sps:$4 sm:$0xff]   ;;  %v4356_v35 = vld [vmem:[%s6515_s1 + $0x1a0] ss:$8 sps:$4 sm:$0xff]  }
  0x1e   : >> { %619 = vmatprep.subr.bf16.mxu1 %v4336_v22  ;;  %v4357_v36 = vld [vmem:[%s6515_s1 + $0x2a0] ss:$8 sps:$4 sm:$0xff]   ;;  %v4358_v37 = vld [vmem:[%s6515_s1 + $0x194] ss:$8 sps:$4 sm:$0xff]   ;;  %v4362_v39 = vld [vmem:[%s6515_s1 + $0x190] ss:$8 sps:$4 sm:$0xff]  }
  0x1f   : >> { %v4360_v38 = vld [vmem:[%s6515_s1 + $0x294] ss:$8 sps:$4 sm:$0xff]   ;;  %v4363_v40 = vld [vmem:[%s6515_s1 + $0x290] ss:$8 sps:$4 sm:$0xff]   ;;  %v4364_v41 = vld [vmem:[%s6515_s1 + $0x184] ss:$8 sps:$4 sm:$0xff]  }
  0x20   : >> { %579 = vmatpush1.bf16.msra.mxu0 %v4338_v23  ;;  %v5170_v42 = vld [vmem:[%s5158_s5 + $0x8] ss:$0 sps:$4 sm:$0x33]   ;;  %v4366_v43 = vld [vmem:[%s6515_s1 + $0x284] ss:$8 sps:$4 sm:$0xff]   ;;  %vm3748_vm7 = vcmask 1041408  }
  0x21   : >> { %620 = vmatpush1.bf16.msra.mxu1 %v4339_v24  ;;  %580 = vmatprep.subr.bf16.mxu0 %v4340_v25  ;;  %v327_v44 = vshll.u32 %v5170_v42, 16  ;;  %v4368_v45 = vld [vmem:[%s6515_s1 + $0x180] ss:$8 sps:$4 sm:$0xff]   ;;  %v325_v46 = vshrl.u32 %v5170_v42, 16  ;;  %v4370_v49 = vld [vmem:[%s6515_s1 + $0x274] ss:$8 sps:$4 sm:$0xff]  }
  0x22   : >> { %621 = vmatprep.subr.bf16.mxu1 %v4342_v26  ;;  %v4369_v47 = vld [vmem:[%s6515_s1 + $0x280] ss:$8 sps:$4 sm:$0xff]   ;;  %v4374_v50 = vld [vmem:[%s6515_s1 + $0x74] ss:$8 sps:$4 sm:$0xff]   ;;  %v4372_v51 = vld [vmem:[%s6515_s1 + $0x70] ss:$8 sps:$4 sm:$0xff]  }
  0x23   : >> { %v329_v48 = vrot.slane %v327_v44, 1  ;;  %v4375_v53 = vld [vmem:[%s6515_s1 + $0x270] ss:$8 sps:$4 sm:$0xff]   ;;  %v4377_v54 = vld [vmem:[%s6515_s1 + $0x264] ss:$8 sps:$4 sm:$0xff]   ;;  %s4296_s28 = sshll.u32 %s5002_s24, 3 }
  0x24   : >> { %581 = vmatpush1.bf16.msra.mxu0 %v4344_v27  ;;  %v4381_v55 = vld [vmem:[%s6515_s1 + $0x64] ss:$8 sps:$4 sm:$0xff]   ;;  %v4379_v56 = vld [vmem:[%s6515_s1 + $0x60] ss:$8 sps:$4 sm:$0xff]   ;;  %v4383_v58 = vld [vmem:[%s6515_s1 + $0x254] ss:$8 sps:$4 sm:$0xff]   ;;  %s3798_s29 = scalar_lea.vmem %s5050_s23, %s4296_s28 }
  0x25   : >> { %622 = vmatpush1.bf16.msra.mxu1 %v4345_v28  ;;  %582 = vmatprep.subr.bf16.mxu0 %v4346_v29  ;;  %v330_v52 = vor.u32 %v329_v48, %v325_v46  ;;  %v4382_v57 = vld [vmem:[%s6515_s1 + $0x260] ss:$8 sps:$4 sm:$0xff]   ;;  %v4387_v59 = vld [vmem:[%s6515_s1 + $0x54] ss:$8 sps:$4 sm:$0xff]   ;;  %v4385_v60 = vld [vmem:[%s6515_s1 + $0x50] ss:$8 sps:$4 sm:$0xff]  }
  0x26   : >> { %623 = vmatprep.subr.bf16.mxu1 %v4348_v30  ;;  %v4388_v61 = vld [vmem:[%s6515_s1 + $0x250] ss:$8 sps:$4 sm:$0xff]   ;;  %v4389_v62 = vld [vmem:[%s6515_s1 + $0x244] ss:$8 sps:$4 sm:$0xff]   ;;  %v4391_v1 = vld [vmem:[%s6515_s1 + $0x40] ss:$8 sps:$4 sm:$0xff]  }
  0x27   : >> { %v4393_v63 = vld [vmem:[%s6515_s1 + $0x44] ss:$8 sps:$4 sm:$0xff]   ;;  %v4394_v3 = vld [vmem:[%s6515_s1 + $0x240] ss:$8 sps:$4 sm:$0xff]   ;;  %v4395_v4 = vld [vmem:[%s6515_s1 + $0x234] ss:$8 sps:$4 sm:$0xff]  }
  0x28   : >> { %583 = vmatpush1.bf16.msra.mxu0 %v4350_v31  ;;  %v204_v2 = vld [vmem:[%s5158_s5] sm:$0x33]  ;;  %v4399_v6 = vld [vmem:[%s6515_s1 + $0x34] ss:$8 sps:$4 sm:$0xff]   ;;  %v4397_v9 = vld [vmem:[%s6515_s1 + $0x30] ss:$8 sps:$4 sm:$0xff]  }
  0x29   : >> { %624 = vmatpush1.bf16.msra.mxu1 %v4351_v32  ;;  %584 = vmatprep.subr.bf16.mxu0 %v4352_v33  ;;  %v3838_v5 = vcombine.high %v204_v2, %v204_v2  ;;  %v4400_v10 = vld [vmem:[%s6515_s1 + $0x230] ss:$8 sps:$4 sm:$0xff]   ;;  %v4401_v12 = vld [vmem:[%s6515_s1 + $0x224] ss:$8 sps:$4 sm:$0xff]   ;;  %v4403_v16 = vld [vmem:[%s6515_s1 + $0x20] ss:$8 sps:$4 sm:$0xff]   ;;  %v5253_v17 = vcombine.low %v204_v2, %v204_v2 }
  0x2a   : >> { %625 = vmatprep.subr.bf16.mxu1 %v4354_v34  ;;  %v4405_v13 = vld [vmem:[%s6515_s1 + $0x24] ss:$8 sps:$4 sm:$0xff]   ;;  %v4406_v18 = vld [vmem:[%s6515_s1 + $0x220] ss:$8 sps:$4 sm:$0xff]   ;;  %v4407_v19 = vld [vmem:[%s6515_s1 + $0x214] ss:$8 sps:$4 sm:$0xff]  }
  0x2b   : >> { %v318_v7 = vshrl.u32 %v3838_v5, 16  ;;  %v320_v8 = vshll.u32 %v3838_v5, 16  ;;  %v4411_v20 = vld [vmem:[%s6515_s1 + $0x14] ss:$8 sps:$4 sm:$0xff]   ;;  %v4409_v21 = vld [vmem:[%s6515_s1 + $0x10] ss:$8 sps:$4 sm:$0xff]  }
  0x2c   : >> { %585 = vmatpush1.bf16.msra.mxu0 %v4356_v35  ;;  %v313_v22 = vshll.u32 %v5253_v17, 16  ;;  %v4412_v23 = vld [vmem:[%s6515_s1 + $0x210] ss:$8 sps:$4 sm:$0xff]   ;;  %v4413_v24 = vld [vmem:[%s6515_s1 + $0x204] ss:$8 sps:$4 sm:$0xff]   ;;  %v311_v27 = vshrl.u32 %v5253_v17, 16 }
  0x2d   : >> { %626 = vmatpush1.bf16.msra.mxu1 %v4357_v36  ;;  %586 = vmatprep.subr.bf16.mxu0 %v4358_v37  ;;  %v322_v11 = vrot.slane %v320_v8, 1  ;;  %v4417_v25 = vld [vmem:[%s6515_s1 + $0x4] ss:$8 sps:$4 sm:$0xff]   ;;  %v4415_v26 = vld [vmem:[%s6515_s1] ss:$8 sps:$4 sm:$0xff]   ;;  %vm3751_vm9 = vcmask 1045508  }
  0x2e   : >> { %627 = vmatprep.subr.bf16.mxu1 %v4360_v38  ;;  %v315_v28 = vrot.slane %v313_v22, 1  ;;  %v4418_v29 = vld [vmem:[%s6515_s1 + $0x200] ss:$8 sps:$4 sm:$0xff]   ;;  %v4423_v30 = vld [vmem:[%s6515_s1 + $0xf4] ss:$8 sps:$4 sm:$0xff]   ;;  %s200_s24 = sadd.s32 1, %s5002_s24  }
  0x2f   : >> { %v323_v15 = vor.u32 %v322_v11, %v318_v7  ;;  %v4426_v31 = vld [vmem:[%s6515_s1 + $0x174] ss:$8 sps:$4 sm:$0xff]   ;;  %v4421_v33 = vld [vmem:[%s6515_s1 + $0xf0] ss:$8 sps:$4 sm:$0xff]   ;;  %v4429_v35 = vld [vmem:[%s6515_s1 + $0xe4] ss:$8 sps:$4 sm:$0xff]  }
  0x30   : >> { %587 = vmatpush1.bf16.msra.mxu0 %v4362_v39  ;;  %v316_v32 = vor.u32 %v315_v28, %v311_v27  ;;  %v4424_v34 = vld [vmem:[%s6515_s1 + $0x170] ss:$8 sps:$4 sm:$0xff]   ;;  %v4432_v36 = vld [vmem:[%s6515_s1 + $0x164] ss:$8 sps:$4 sm:$0xff]   ;;  %v4427_v37 = vld [vmem:[%s6515_s1 + $0xe0] ss:$8 sps:$4 sm:$0xff]  }
  0x31   : >> { %628 = vmatpush1.bf16.msra.mxu1 %v4363_v40  ;;  %588 = vmatprep.subr.bf16.mxu0 %v4364_v41  ;;  %v4430_v38 = vld [vmem:[%s6515_s1 + $0x160] ss:$8 sps:$4 sm:$0xff]   ;;  %v4435_v39 = vld [vmem:[%s6515_s1 + $0xd4] ss:$8 sps:$4 sm:$0xff]   ;;  %v4433_v41 = vld [vmem:[%s6515_s1 + $0xd0] ss:$8 sps:$4 sm:$0xff]  }
  0x32   : >> { %629 = vmatprep.subr.bf16.mxu1 %v4366_v43  ;;  %606 = vmatprep.mubr.bf16.mxu0 %v323_v15  ;;  %v4438_v40 = vld [vmem:[%s6515_s1 + $0x154] ss:$8 sps:$4 sm:$0xff]   ;;  %v4436_v43 = vld [vmem:[%s6515_s1 + $0x150] ss:$8 sps:$4 sm:$0xff]   ;;  %v4441_v44 = vld [vmem:[%s6515_s1 + $0xc4] ss:$8 sps:$4 sm:$0xff]  }
  0x33   : >> { %v4439_v46 = vld [vmem:[%s6515_s1 + $0xc0] ss:$8 sps:$4 sm:$0xff]   ;;  %v4447_v48 = vld [vmem:[%s6515_s1 + $0xb4] ss:$8 sps:$4 sm:$0xff]   ;;  %v4484_v11 = vld [vmem:[%s6515_s1 + $0x450] ss:$8 sps:$4 sm:$0xff]  }
  0x34   : >> { %589 = vmatpush1.bf16.msra.mxu0 %v4368_v45  ;;  %v4444_v45 = vld [vmem:[%s6515_s1 + $0x144] ss:$8 sps:$4 sm:$0xff]   ;;  %v4474_v2 = vld [vmem:[%s6515_s1 + $0x474] ss:$8 sps:$4 sm:$0xff]   ;;  %v4475_v7 = vld [vmem:[%s6515_s1 + $0x360] ss:$8 sps:$4 sm:$0xff]  }
  0x35   : >> { %630 = vmatpush1.bf16.msra.mxu1 %v4369_v47  ;;  %590 = vmatprep.subr.bf16.mxu0 %v4370_v49  ;;  %v4442_v47 = vld [vmem:[%s6515_s1 + $0x140] ss:$8 sps:$4 sm:$0xff]   ;;  %v4450_v49 = vld [vmem:[%s6515_s1 + $0x134] ss:$8 sps:$4 sm:$0xff]   ;;  %v4496_v22 = vld [vmem:[%s6515_s1 + $0x430] ss:$8 sps:$4 sm:$0xff]  }
  0x36   : >> { %899 = vmatprep.subr.bf16.mxu1 %v4374_v50  ;;  %v4445_v50 = vld [vmem:[%s6515_s1 + $0xb0] ss:$8 sps:$4 sm:$0xff]   ;;  %v4478_v8 = vld [vmem:[%s6515_s1 + $0x460] ss:$8 sps:$4 sm:$0xff]   ;;  %v4507_v28 = vld [vmem:[%s6515_s1 + $0x314] ss:$8 sps:$4 sm:$0xff]  }
  0x37   : >> { %v4487_v15 = vld [vmem:[%s6515_s1 + $0x340] ss:$8 sps:$4 sm:$0xff]   ;;  %vm3749_vm8 = vsmask.f32 7938  ;;  %vm3752_vm10 = vsmask.f32 7954 }
  0x38   : >> { %648 = vmatmul.mubr.bf16.vlgmr.msra.gmra.mxu1 %v330_v52  ;;  %591 = vmatpush2.bf16.msra.mxu0 %v4375_v53  ;;  %v4453_v52 = vld [vmem:[%s6515_s1 + $0xa4] ss:$8 sps:$4 sm:$0xff]   ;;  %v4502_v27 = vld [vmem:[%s6515_s1 + $0x420] ss:$8 sps:$4 sm:$0xff]   ;;  %vm3750_vm11 = vmand %vm3748_vm7, %vm3749_vm8  ;;  %p197_p4 = scmp.ge.s32.totalorder %s200_s24, 3  }
  0x39   : >> { %900 = vmatpush1.bf16.msra.mxu1 %v4372_v51  ;;  %592 = vmatprep.subr.bf16.mxu0 %v4377_v54  ;;  %v4448_v51 = vld [vmem:[%s6515_s1 + $0x130] ss:$8 sps:$4 sm:$0xff]   ;;  %v4456_v53 = vld [vmem:[%s6515_s1 + $0x124] ss:$8 sps:$4 sm:$0xff]   ;;  %v4451_v54 = vld [vmem:[%s6515_s1 + $0xa0] ss:$8 sps:$4 sm:$0xff]  }
  0x3a   : >> { %901 = vmatprep.subr.bf16.mxu1 %v4381_v55  ;;  %931 = vmatprep.mubr.bf16.mxu1 %v3838_v5  ;;  %v4454_v55 = vld [vmem:[%s6515_s1 + $0x120] ss:$8 sps:$4 sm:$0xff]   ;;  %v4477_v5 = vld [vmem:[%s6515_s1 + $0x364] ss:$8 sps:$4 sm:$0xff]   ;;  %vm3753_vm12 = vmand %vm3751_vm9, %vm3752_vm10 }
  0x3b   : >> { %vm3754_vm13 = vmor %vm3753_vm12, %vm3750_vm11 }
  0x3c   : >> { %593 = vmatpush2.bf16.msra.mxu0 %v4382_v57  ;;  %v4462_v57 = vld [vmem:[%s6515_s1 + $0x114] ss:$8 sps:$4 sm:$0xff]  }
  0x3d   : >> { %902 = vmatpush1.bf16.msra.mxu1 %v4379_v56  ;;  %594 = vmatprep.subr.bf16.mxu0 %v4383_v58  ;;  %v4459_v56 = vld [vmem:[%s6515_s1 + $0x94] ss:$8 sps:$4 sm:$0xff]   ;;  %v4457_v58 = vld [vmem:[%s6515_s1 + $0x90] ss:$8 sps:$4 sm:$0xff]  }
  0x3e   : >> { %903 = vmatprep.subr.bf16.mxu1 %v4387_v59  ;;  %v4460_v59 = vld [vmem:[%s6515_s1 + $0x110] ss:$8 sps:$4 sm:$0xff]  }
  0x40   : >> { %595 = vmatpush2.bf16.msra.mxu0 %v4388_v61  ;;  %v4468_v61 = vld [vmem:[%s6515_s1 + $0x104] ss:$8 sps:$4 sm:$0xff]  }
  0x41   : >> { %904 = vmatpush1.bf16.msra.mxu1 %v4385_v60  ;;  %596 = vmatprep.subr.bf16.mxu0 %v4389_v62  ;;  %v4465_v60 = vld [vmem:[%s6515_s1 + $0x84] ss:$8 sps:$4 sm:$0xff]   ;;  %v4463_v62 = vld [vmem:[%s6515_s1 + $0x80] ss:$8 sps:$4 sm:$0xff]  }
  0x42   : >> { %905 = vmatprep.subr.bf16.mxu1 %v4393_v63  ;;  %v4466_v63 = vld [vmem:[%s6515_s1 + $0x100] ss:$8 sps:$4 sm:$0xff]  }
  0x44   : >> { %597 = vmatpush2.bf16.msra.mxu0 %v4394_v3  ;;  %v4469_v3 = vld [vmem:[%s6515_s1 + $0x370] ss:$8 sps:$4 sm:$0xff]  }
  0x45   : >> { %906 = vmatpush1.bf16.msra.mxu1 %v4391_v1  ;;  %598 = vmatprep.subr.bf16.mxu0 %v4395_v4  ;;  %v4471_v1 = vld [vmem:[%s6515_s1 + $0x374] ss:$8 sps:$4 sm:$0xff]   ;;  %v4472_v4 = vld [vmem:[%s6515_s1 + $0x470] ss:$8 sps:$4 sm:$0xff]  }
  0x46   : >> { %907 = vmatprep.subr.bf16.mxu1 %v4399_v6  ;;  %v4480_v6 = vld [vmem:[%s6515_s1 + $0x464] ss:$8 sps:$4 sm:$0xff]  }
  0x48   : >> { %599 = vmatpush2.bf16.msra.mxu0 %v4400_v10  ;;  %v4481_v10 = vld [vmem:[%s6515_s1 + $0x350] ss:$8 sps:$4 sm:$0xff]  }
  0x49   : >> { %908 = vmatpush1.bf16.msra.mxu1 %v4397_v9  ;;  %600 = vmatprep.subr.bf16.mxu0 %v4401_v12  ;;  %v4483_v9 = vld [vmem:[%s6515_s1 + $0x354] ss:$8 sps:$4 sm:$0xff]   ;;  %v4489_v12 = vld [vmem:[%s6515_s1 + $0x344] ss:$8 sps:$4 sm:$0xff]  }
  0x4a   : >> { %909 = vmatprep.subr.bf16.mxu1 %v4405_v13  ;;  %v4492_v13 = vld [vmem:[%s6515_s1 + $0x444] ss:$8 sps:$4 sm:$0xff]  }
  0x4c   : >> { %601 = vmatpush2.bf16.msra.mxu0 %v4406_v18  ;;  %v4498_v18 = vld [vmem:[%s6515_s1 + $0x434] ss:$8 sps:$4 sm:$0xff]  }
  0x4d   : >> { %910 = vmatpush1.bf16.msra.mxu1 %v4403_v16  ;;  %602 = vmatprep.subr.bf16.mxu0 %v4407_v19  ;;  %v4490_v16 = vld [vmem:[%s6515_s1 + $0x440] ss:$8 sps:$4 sm:$0xff]  }
  0x4e   : >> { %911 = vmatprep.subr.bf16.mxu1 %v4411_v20  ;;  %v5439_v19 = vld [vmem:[%s5158_s5] sm:$0x66] }
  0x4f   : >> { %v3937_v20 = vcombine.high %v5439_v19, %v5439_v19 }
  0x50   : >> { %603 = vmatpush2.bf16.msra.mxu0 %v4412_v23  ;;  %v4501_v23 = vld [vmem:[%s6515_s1 + $0x324] ss:$8 sps:$4 sm:$0xff]  }
  0x51   : >> { %912 = vmatpush1.bf16.msra.mxu1 %v4409_v21  ;;  %604 = vmatprep.subr.bf16.mxu0 %v4413_v24  ;;  %v4493_v21 = vld [vmem:[%s6515_s1 + $0x330] ss:$8 sps:$4 sm:$0xff]   ;;  %v1040_v24 = vrot.slane %v3937_v20, 1  ;;  %v4582_v20 = vld [vmem:[%s6515_s1 + $0x554] ss:$8 sps:$4 sm:$0xff]  }
  0x52   : >> { %913 = vmatprep.subr.bf16.mxu1 %v4417_v25  ;;  %v4504_v25 = vld [vmem:[%s6515_s1 + $0x424] ss:$8 sps:$4 sm:$0xff]  }
  0x54   : >> { %605 = vmatpush2.bf16.msra.mxu0 %v4418_v29  ;;  %v4510_v29 = vld [vmem:[%s6515_s1 + $0x414] ss:$8 sps:$4 sm:$0xff]  }
  0x55   : >> { %914 = vmatpush1.bf16.msra.mxu1 %v4415_v26  ;;  %940 = vmatprep.subr.bf16.mxu0 %v4426_v31  ;;  %v4499_v26 = vld [vmem:[%s6515_s1 + $0x320] ss:$8 sps:$4 sm:$0xff]   ;;  %v4508_v31 = vld [vmem:[%s6515_s1 + $0x410] ss:$8 sps:$4 sm:$0xff]  }
  0x56   : >> { %915 = vmatprep.subr.bf16.mxu1 %v4423_v30  ;;  %v4505_v30 = vld [vmem:[%s6515_s1 + $0x310] ss:$8 sps:$4 sm:$0xff]  }
  0x57   : >> { %607 = vmatmul.mubr.bf16.vlgmr.msra.gmra.mxu0 %v316_v32  ;;  %v4513_v32 = vld [vmem:[%s6515_s1 + $0x304] ss:$8 sps:$4 sm:$0xff]  }
  0x58   : >> { %941 = vmatpush1.bf16.msra.mxu0 %v4424_v34  ;;  %972 = vmatprep.mubr.bf16.mxu0 %v5004_v14  ;;  %v4511_v34 = vld [vmem:[%s6515_s1 + $0x300] ss:$8 sps:$4 sm:$0xff]  }
  0x59   : >> { %916 = vmatpush2.bf16.msra.mxu1 %v4421_v33  ;;  %942 = vmatprep.subr.bf16.mxu0 %v4432_v36  ;;  %v4516_v33 = vld [vmem:[%s6515_s1 + $0x404] ss:$8 sps:$4 sm:$0xff]   ;;  %v4523_v36 = vld [vmem:[%s5158_s5 + $0x8] ss:$0 sps:$4 sm:$0x66]  }
  0x5a   : >> { %917 = vmatprep.subr.bf16.mxu1 %v4429_v35  ;;  %v4514_v35 = vld [vmem:[%s6515_s1 + $0x400] ss:$8 sps:$4 sm:$0xff]  }
  0x5c   : >> { %943 = vmatpush1.bf16.msra.mxu0 %v4430_v38  ;;  %v4522_v38 = vld [vmem:[%s6515_s1 + $0x4f4] ss:$8 sps:$4 sm:$0xff]  }
  0x5d   : >> { %918 = vmatpush2.bf16.msra.mxu1 %v4427_v37  ;;  %944 = vmatprep.subr.bf16.mxu0 %v4438_v40  ;;  %v4519_v37 = vld [vmem:[%s6515_s1 + $0x3f4] ss:$8 sps:$4 sm:$0xff]   ;;  %v4520_v40 = vld [vmem:[%s6515_s1 + $0x4f0] ss:$8 sps:$4 sm:$0xff]  }
  0x5e   : >> { %919 = vmatprep.subr.bf16.mxu1 %v4435_v39  ;;  %v4517_v39 = vld [vmem:[%s6515_s1 + $0x3f0] ss:$8 sps:$4 sm:$0xff]  }
  0x60   : >> { %945 = vmatpush1.bf16.msra.mxu0 %v4436_v43  ;;  %v4526_v43 = vld [vmem:[%s6515_s1 + $0x3e4] ss:$8 sps:$4 sm:$0xff]  }
  0x61   : >> { %920 = vmatpush2.bf16.msra.mxu1 %v4433_v41  ;;  %946 = vmatprep.subr.bf16.mxu0 %v4444_v45  ;;  %v1041_v41 = vrot.slane %v4523_v36, 1  ;;  %v5505_v45 = vld [vmem:[%s5158_s5 + $0xc] sm:$0x33]  ;;  %v4606_v36 = vld [vmem:[%s6515_s1 + $0x514] ss:$8 sps:$4 sm:$0xff]  }
  0x62   : >> { %921 = vmatprep.subr.bf16.mxu1 %v4441_v44  ;;  %v4529_v44 = vld [vmem:[%s6515_s1 + $0x4e4] ss:$8 sps:$4 sm:$0xff]  }
  0x64   : >> { %947 = vmatpush1.bf16.msra.mxu0 %v4442_v47  ;;  %v5512_v47 = vcombine.high %v5505_v45, %v5505_v45 }
  0x65   : >> { %922 = vmatpush2.bf16.msra.mxu1 %v4439_v46  ;;  %948 = vmatprep.subr.bf16.mxu0 %v4450_v49  ;;  %v4524_v46 = vld [vmem:[%s6515_s1 + $0x3e0] ss:$8 sps:$4 sm:$0xff]   ;;  %v4532_v49 = vld [vmem:[%s6515_s1 + $0x3d4] ss:$8 sps:$4 sm:$0xff]  }
  0x66   : >> { %923 = vmatprep.subr.bf16.mxu1 %v4447_v48  ;;  %v4527_v48 = vld [vmem:[%s6515_s1 + $0x4e0] ss:$8 sps:$4 sm:$0xff]  }
  0x68   : >> { %949 = vmatpush1.bf16.msra.mxu0 %v4448_v51  ;;  %v4530_v51 = vld [vmem:[%s6515_s1 + $0x3d0] ss:$8 sps:$4 sm:$0xff]  }
  0x69   : >> { %924 = vmatpush2.bf16.msra.mxu1 %v4445_v50  ;;  %950 = vmatprep.subr.bf16.mxu0 %v4456_v53  ;;  %v4535_v50 = vld [vmem:[%s6515_s1 + $0x4d4] ss:$8 sps:$4 sm:$0xff]   ;;  %v4538_v53 = vld [vmem:[%s6515_s1 + $0x3c4] ss:$8 sps:$4 sm:$0xff]  }
  0x6a   : >> { %925 = vmatprep.subr.bf16.mxu1 %v4453_v52  ;;  %v4533_v52 = vld [vmem:[%s6515_s1 + $0x4d0] ss:$8 sps:$4 sm:$0xff]  }
  0x6c   : >> { %951 = vmatpush1.bf16.msra.mxu0 %v4454_v55  ;;  %v4536_v55 = vld [vmem:[%s6515_s1 + $0x3c0] ss:$8 sps:$4 sm:$0xff]  }
  0x6d   : >> { %926 = vmatpush2.bf16.msra.mxu1 %v4451_v54  ;;  %952 = vmatprep.subr.bf16.mxu0 %v4462_v57  ;;  %v4541_v54 = vld [vmem:[%s6515_s1 + $0x4c4] ss:$8 sps:$4 sm:$0xff]   ;;  %v4544_v57 = vld [vmem:[%s6515_s1 + $0x3b4] ss:$8 sps:$4 sm:$0xff]  }
  0x6e   : >> { %927 = vmatprep.subr.bf16.mxu1 %v4459_v56  ;;  %v4539_v56 = vld [vmem:[%s6515_s1 + $0x4c0] ss:$8 sps:$4 sm:$0xff]  }
  0x70   : >> { %953 = vmatpush1.bf16.msra.mxu0 %v4460_v59  ;;  %v4542_v59 = vld [vmem:[%s6515_s1 + $0x3b0] ss:$8 sps:$4 sm:$0xff]  }
  0x71   : >> { %928 = vmatpush2.bf16.msra.mxu1 %v4457_v58  ;;  %954 = vmatprep.subr.bf16.mxu0 %v4468_v61  ;;  %v4547_v58 = vld [vmem:[%s6515_s1 + $0x4b4] ss:$8 sps:$4 sm:$0xff]   ;;  %v4550_v61 = vld [vmem:[%s6515_s1 + $0x3a4] ss:$8 sps:$4 sm:$0xff]  }
  0x72   : >> { %929 = vmatprep.subr.bf16.mxu1 %v4465_v60  ;;  %v4545_v60 = vld [vmem:[%s6515_s1 + $0x4b0] ss:$8 sps:$4 sm:$0xff]  }
  0x74   : >> { %955 = vmatpush1.bf16.msra.mxu0 %v4466_v63  ;;  %v4548_v63 = vld [vmem:[%s6515_s1 + $0x3a0] ss:$8 sps:$4 sm:$0xff]  }
  0x75   : >> { %930 = vmatpush2.bf16.msra.mxu1 %v4463_v62  ;;  %1285 = vmatprep.subr.bf16.mxu0 %v4471_v1  ;;  %v4553_v62 = vld [vmem:[%s6515_s1 + $0x4a4] ss:$8 sps:$4 sm:$0xff]   ;;  %v4551_v1 = vld [vmem:[%s6515_s1 + $0x4a0] ss:$8 sps:$4 sm:$0xff]  }
  0x76   : >> { %1326 = vmatprep.subr.bf16.mxu1 %v4474_v2  ;;  %v4556_v2 = vld [vmem:[%s6515_s1 + $0x394] ss:$8 sps:$4 sm:$0xff]  }
  0x77   : >> { %973 = vmatmul.mubr.bf16.vlgmr.msra.gmra.mxu0 %v5170_v42  ;;  %v4486_v42 = vld [vmem:[%s6515_s1 + $0x454] ss:$8 sps:$4 sm:$0xff]  }
  0x78   : >> { %932 = vmatmul.mubr.bf16.vlgmr.msra.gmra.mxu1 %v5253_v17  ;;  %1286 = vmatpush1.bf16.msra.mxu0 %v4469_v3  ;;  %v4495_v17 = vld [vmem:[%s6515_s1 + $0x334] ss:$8 sps:$4 sm:$0xff]  }
  0x79   : >> { %1327 = vmatpush1.bf16.msra.mxu1 %v4472_v4  ;;  %1287 = vmatprep.subr.bf16.mxu0 %v4477_v5  ;;  %v4559_v3 = vld [vmem:[%s6515_s1 + $0x494] ss:$8 sps:$4 sm:$0xff]   ;;  %v4554_v4 = vld [vmem:[%s6515_s1 + $0x390] ss:$8 sps:$4 sm:$0xff]  }
  0x7a   : >> { %1328 = vmatprep.subr.bf16.mxu1 %v4480_v6  ;;  %1358 = vmatprep.mubr.bf16.mxu1 %v5004_v14  ;;  %v4557_v5 = vld [vmem:[%s6515_s1 + $0x490] ss:$8 sps:$4 sm:$0xff]   ;;  %v4562_v6 = vld [vmem:[%s6515_s1 + $0x384] ss:$8 sps:$4 sm:$0xff]  }
  0x7b   : >> { %1317 = vmatprep.mubr.bf16.mxu0 %v1040_v24  ;;  %v4588_v24 = vld [vmem:[%s6515_s1 + $0x544] ss:$8 sps:$4 sm:$0xff]  }
  0x7c   : >> { %1288 = vmatpush1.bf16.msra.mxu0 %v4475_v7  ;;  %v4565_v7 = vld [vmem:[%s6515_s1 + $0x484] ss:$8 sps:$4 sm:$0xff]  }
  0x7d   : >> { %1329 = vmatpush1.bf16.msra.mxu1 %v4478_v8  ;;  %1289 = vmatprep.subr.bf16.mxu0 %v4483_v9  ;;  %v4560_v8 = vld [vmem:[%s6515_s1 + $0x380] ss:$8 sps:$4 sm:$0xff]   ;;  %v3936_v9 = vcombine.low %v5439_v19, %v5439_v19 }
  0x7e   : >> { %1330 = vmatprep.subr.bf16.mxu1 %v4486_v42  ;;  %v4563_v42 = vld [vmem:[%s6515_s1 + $0x480] ss:$8 sps:$4 sm:$0xff]  }
  0x7f   : >> { %v4577_v19 = vld [vmem:[%s6515_s1 + $0x5e0] ss:$8 sps:$4 sm:$0xff]  }
  0x80   : >> { %1290 = vmatpush1.bf16.msra.mxu0 %v4481_v10  ;;  %v4570_v10 = vld [vmem:[%s6515_s1 + $0x574] ss:$8 sps:$4 sm:$0xff]  }
  0x81   : >> { %1331 = vmatpush1.bf16.msra.mxu1 %v4484_v11  ;;  %1291 = vmatprep.subr.bf16.mxu0 %v4489_v12  ;;  %v4573_v11 = vld [vmem:[%s6515_s1 + $0x5f4] ss:$8 sps:$4 sm:$0xff]   ;;  %v1039_v12 = vrot.slane %v3936_v9, 1  ;;  %v4654_v9 = vld [vmem:[%s6515_s1 + $0x724] ss:$8 sps:$4 sm:$0xff]  }
  0x82   : >> { %1332 = vmatprep.subr.bf16.mxu1 %v4492_v13  ;;  %v4568_v13 = vld [vmem:[%s6515_s1 + $0x570] ss:$8 sps:$4 sm:$0xff]  }
  0x84   : >> { %1292 = vmatpush1.bf16.msra.mxu0 %v4487_v15  ;;  %v4571_v15 = vld [vmem:[%s6515_s1 + $0x5f0] ss:$8 sps:$4 sm:$0xff]  }
  0x85   : >> { %1333 = vmatpush1.bf16.msra.mxu1 %v4490_v16  ;;  %1293 = vmatprep.subr.bf16.mxu0 %v4495_v17  ;;  %v4576_v16 = vld [vmem:[%s6515_s1 + $0x564] ss:$8 sps:$4 sm:$0xff]  }
  0x86   : >> { %1334 = vmatprep.subr.bf16.mxu1 %v4498_v18  ;;  %v4579_v17 = vld [vmem:[%s6515_s1 + $0x5e4] ss:$8 sps:$4 sm:$0xff]   ;;  %v4574_v18 = vld [vmem:[%s6515_s1 + $0x560] ss:$8 sps:$4 sm:$0xff]  }
  0x88   : >> { %1294 = vmatpush1.bf16.msra.mxu0 %v4493_v21  ;;  %v4585_v21 = vld [vmem:[%s6515_s1 + $0x5d4] ss:$8 sps:$4 sm:$0xff]  }
  0x89   : >> { %1335 = vmatpush1.bf16.msra.mxu1 %v4496_v22  ;;  %1295 = vmatprep.subr.bf16.mxu0 %v4501_v23  ;;  %v4580_v22 = vld [vmem:[%s6515_s1 + $0x550] ss:$8 sps:$4 sm:$0xff]  }
  0x8a   : >> { %1336 = vmatprep.subr.bf16.mxu1 %v4504_v25  ;;  %v4583_v23 = vld [vmem:[%s6515_s1 + $0x5d0] ss:$8 sps:$4 sm:$0xff]   ;;  %v4591_v25 = vld [vmem:[%s6515_s1 + $0x5c4] ss:$8 sps:$4 sm:$0xff]  }
  0x8c   : >> { %1296 = vmatpush1.bf16.msra.mxu0 %v4499_v26  ;;  %v4586_v26 = vld [vmem:[%s6515_s1 + $0x540] ss:$8 sps:$4 sm:$0xff]  }
  0x8d   : >> { %1337 = vmatpush1.bf16.msra.mxu1 %v4502_v27  ;;  %1297 = vmatprep.subr.bf16.mxu0 %v4507_v28  ;;  %v4589_v27 = vld [vmem:[%s6515_s1 + $0x5c0] ss:$8 sps:$4 sm:$0xff]   ;;  %v4594_v28 = vld [vmem:[%s6515_s1 + $0x534] ss:$8 sps:$4 sm:$0xff]  }
  0x8e   : >> { %1338 = vmatprep.subr.bf16.mxu1 %v4510_v29  ;;  %v4597_v29 = vld [vmem:[%s6515_s1 + $0x5b4] ss:$8 sps:$4 sm:$0xff]  }
  0x90   : >> { %1298 = vmatpush1.bf16.msra.mxu0 %v4505_v30  ;;  %v4592_v30 = vld [vmem:[%s6515_s1 + $0x530] ss:$8 sps:$4 sm:$0xff]  }
  0x91   : >> { %1339 = vmatpush1.bf16.msra.mxu1 %v4508_v31  ;;  %1299 = vmatprep.subr.bf16.mxu0 %v4513_v32  ;;  %v4595_v31 = vld [vmem:[%s6515_s1 + $0x5b0] ss:$8 sps:$4 sm:$0xff]   ;;  %v4600_v32 = vld [vmem:[%s6515_s1 + $0x524] ss:$8 sps:$4 sm:$0xff]  }
  0x92   : >> { %1340 = vmatprep.subr.bf16.mxu1 %v4516_v33  ;;  %v4603_v33 = vld [vmem:[%s6515_s1 + $0x5a4] ss:$8 sps:$4 sm:$0xff]  }
  0x94   : >> { %1300 = vmatpush1.bf16.msra.mxu0 %v4511_v34  ;;  %v4598_v34 = vld [vmem:[%s6515_s1 + $0x520] ss:$8 sps:$4 sm:$0xff]  }
  0x95   : >> { %1341 = vmatpush1.bf16.msra.mxu1 %v4514_v35  ;;  %1301 = vmatprep.subr.bf16.mxu0 %v4519_v37  ;;  %v4601_v35 = vld [vmem:[%s6515_s1 + $0x5a0] ss:$8 sps:$4 sm:$0xff]   ;;  %v4609_v37 = vld [vmem:[%s6515_s1 + $0x594] ss:$8 sps:$4 sm:$0xff]  }
  0x96   : >> { %1674 = vmatprep.subr.bf16.mxu1 %v4522_v38  ;;  %v4604_v38 = vld [vmem:[%s6515_s1 + $0x510] ss:$8 sps:$4 sm:$0xff]  }
  0x98   : >> { %1359 = vmatmul.mubr.bf16.vlgmr.msra.gmra.mxu1 %v1041_v41  ;;  %1302 = vmatpush2.bf16.msra.mxu0 %v4517_v39  ;;  %v4607_v39 = vld [vmem:[%s6515_s1 + $0x590] ss:$8 sps:$4 sm:$0xff]   ;;  %v4615_v41 = vld [vmem:[%s6515_s1 + $0x584] ss:$8 sps:$4 sm:$0xff]  }
  0x99   : >> { %1675 = vmatpush1.bf16.msra.mxu1 %v4520_v40  ;;  %1303 = vmatprep.subr.bf16.mxu0 %v4526_v43  ;;  %v4612_v40 = vld [vmem:[%s6515_s1 + $0x504] ss:$8 sps:$4 sm:$0xff]   ;;  %v1816_v43 = vshll.u32 %v5512_v47, 16 }
  0x9a   : >> { %1676 = vmatprep.subr.bf16.mxu1 %v4529_v44  ;;  %1706 = vmatprep.mubr.bf16.mxu1 %v5512_v47  ;;  %v4610_v44 = vld [vmem:[%s6515_s1 + $0x500] ss:$8 sps:$4 sm:$0xff]  }
  0x9c   : >> { %1304 = vmatpush2.bf16.msra.mxu0 %v4524_v46  ;;  %v4613_v46 = vld [vmem:[%s6515_s1 + $0x580] ss:$8 sps:$4 sm:$0xff]  }
  0x9d   : >> { %1677 = vmatpush1.bf16.msra.mxu1 %v4527_v48  ;;  %1305 = vmatprep.subr.bf16.mxu0 %v4532_v49  ;;  %v4621_v48 = vld [vmem:[%s6515_s1 + $0x674] ss:$8 sps:$4 sm:$0xff]  }
  0x9e   : >> { %1678 = vmatprep.subr.bf16.mxu1 %v4535_v50  ;;  %v4624_v49 = vld [vmem:[%s6515_s1 + $0x774] ss:$8 sps:$4 sm:$0xff]   ;;  %v1814_v50 = vshrl.u32 %v5512_v47, 16  ;;  %v4627_v47 = vld [vmem:[%s6515_s1 + $0x664] ss:$8 sps:$4 sm:$0xff]  }
  0xa0   : >> { %1306 = vmatpush2.bf16.msra.mxu0 %v4530_v51  ;;  %v1818_v51 = vrot.slane %v1816_v43, 1  ;;  %v4687_v43 = vld [vmem:[%s6515_s1 + $0x6c4] ss:$8 sps:$4 sm:$0xff]  }
  0xa1   : >> { %1679 = vmatpush1.bf16.msra.mxu1 %v4533_v52  ;;  %1307 = vmatprep.subr.bf16.mxu0 %v4538_v53  ;;  %v5699_v52 = vcombine.low %v5505_v45, %v5505_v45  ;;  %v5702_v53 = vld [vmem:[%s5158_s5 + $0x14] ss:$0 sps:$4 sm:$0x33]   ;;  %v4630_v45 = vld [vmem:[%s6515_s1 + $0x764] ss:$8 sps:$4 sm:$0xff]  }
  0xa2   : >> { %1680 = vmatprep.subr.bf16.mxu1 %v4541_v54  ;;  %v4619_v54 = vld [vmem:[%s6515_s1 + $0x670] ss:$8 sps:$4 sm:$0xff]  }
  0xa4   : >> { %1308 = vmatpush2.bf16.msra.mxu0 %v4536_v55  ;;  %v4622_v55 = vld [vmem:[%s6515_s1 + $0x770] ss:$8 sps:$4 sm:$0xff]  }
  0xa5   : >> { %1681 = vmatpush1.bf16.msra.mxu1 %v4539_v56  ;;  %1309 = vmatprep.subr.bf16.mxu0 %v4544_v57  ;;  %v1819_v56 = vor.u32 %v1818_v51, %v1814_v50  ;;  %v4625_v57 = vld [vmem:[%s6515_s1 + $0x660] ss:$8 sps:$4 sm:$0xff]   ;;  %v4693_v50 = vld [vmem:[%s6515_s1 + $0x6b4] ss:$8 sps:$4 sm:$0xff]  }
  0xa6   : >> { %1682 = vmatprep.subr.bf16.mxu1 %v4547_v58  ;;  %v4628_v58 = vld [vmem:[%s6515_s1 + $0x760] ss:$8 sps:$4 sm:$0xff]   ;;  %v4696_v51 = vld [vmem:[%s6515_s1 + $0x7b4] ss:$8 sps:$4 sm:$0xff]  }
  0xa8   : >> { %1310 = vmatpush2.bf16.msra.mxu0 %v4542_v59  ;;  %v4633_v59 = vld [vmem:[%s6515_s1 + $0x654] ss:$8 sps:$4 sm:$0xff]  }
  0xa9   : >> { %1683 = vmatpush1.bf16.msra.mxu1 %v4545_v60  ;;  %1311 = vmatprep.subr.bf16.mxu0 %v4550_v61  ;;  %v4636_v60 = vld [vmem:[%s6515_s1 + $0x754] ss:$8 sps:$4 sm:$0xff]   ;;  %v4631_v61 = vld [vmem:[%s6515_s1 + $0x650] ss:$8 sps:$4 sm:$0xff]  }
  0xaa   : >> { %1684 = vmatprep.subr.bf16.mxu1 %v4553_v62  ;;  %v4634_v62 = vld [vmem:[%s6515_s1 + $0x750] ss:$8 sps:$4 sm:$0xff]  }
  0xac   : >> { %1312 = vmatpush2.bf16.msra.mxu0 %v4548_v63  ;;  %v4639_v63 = vld [vmem:[%s6515_s1 + $0x644] ss:$8 sps:$4 sm:$0xff]  }
  0xad   : >> { %1685 = vmatpush1.bf16.msra.mxu1 %v4551_v1  ;;  %1313 = vmatprep.subr.bf16.mxu0 %v4556_v2  ;;  %v4642_v1 = vld [vmem:[%s6515_s1 + $0x744] ss:$8 sps:$4 sm:$0xff]   ;;  %v4637_v2 = vld [vmem:[%s6515_s1 + $0x640] ss:$8 sps:$4 sm:$0xff]  }
  0xae   : >> { %1686 = vmatprep.subr.bf16.mxu1 %v4559_v3  ;;  %v4640_v3 = vld [vmem:[%s6515_s1 + $0x740] ss:$8 sps:$4 sm:$0xff]  }
  0xb0   : >> { %1314 = vmatpush2.bf16.msra.mxu0 %v4554_v4  ;;  %v4645_v4 = vld [vmem:[%s6515_s1 + $0x634] ss:$8 sps:$4 sm:$0xff]  }
  0xb1   : >> { %1687 = vmatpush1.bf16.msra.mxu1 %v4557_v5  ;;  %1315 = vmatprep.subr.bf16.mxu0 %v4562_v6  ;;  %v4648_v5 = vld [vmem:[%s6515_s1 + $0x734] ss:$8 sps:$4 sm:$0xff]   ;;  %v4643_v6 = vld [vmem:[%s6515_s1 + $0x630] ss:$8 sps:$4 sm:$0xff]  }
  0xb2   : >> { %1688 = vmatprep.subr.bf16.mxu1 %v4565_v7  ;;  %v4646_v7 = vld [vmem:[%s6515_s1 + $0x730] ss:$8 sps:$4 sm:$0xff]  }
  0xb4   : >> { %1316 = vmatpush2.bf16.msra.mxu0 %v4560_v8  ;;  %v4651_v8 = vld [vmem:[%s6515_s1 + $0x624] ss:$8 sps:$4 sm:$0xff]  }
  0xb5   : >> { %1689 = vmatpush1.bf16.msra.mxu1 %v4563_v42  ;;  %1715 = vmatprep.subr.bf16.mxu0 %v4573_v11  ;;  %v4649_v42 = vld [vmem:[%s6515_s1 + $0x620] ss:$8 sps:$4 sm:$0xff]   ;;  %v4657_v11 = vld [vmem:[%s6515_s1 + $0x614] ss:$8 sps:$4 sm:$0xff]  }
  0xb6   : >> { %1690 = vmatprep.subr.bf16.mxu1 %v4570_v10  ;;  %v4652_v10 = vld [vmem:[%s6515_s1 + $0x720] ss:$8 sps:$4 sm:$0xff]  }
  0xb7   : >> { %1318 = vmatmul.mubr.bf16.vlgmr.msra.gmra.mxu0 %v1039_v12  ;;  %v4660_v12 = vld [vmem:[%s6515_s1 + $0x714] ss:$8 sps:$4 sm:$0xff]  }
  0xb8   : >> { %1716 = vmatpush1.bf16.msra.mxu0 %v4571_v15  ;;  %1747 = vmatprep.mubr.bf16.mxu0 %v5004_v14  ;;  %v4655_v15 = vld [vmem:[%s6515_s1 + $0x610] ss:$8 sps:$4 sm:$0xff]  }
  0xb9   : >> { %1691 = vmatpush2.bf16.msra.mxu1 %v4568_v13  ;;  %1717 = vmatprep.subr.bf16.mxu0 %v4579_v17  ;;  %v1823_v13 = vshll.u32 %v5702_v53, 16  ;;  %v4663_v17 = vld [vmem:[%s6515_s1 + $0x604] ss:$8 sps:$4 sm:$0xff]  }
  0xba   : >> { %1692 = vmatprep.subr.bf16.mxu1 %v4576_v16  ;;  %v4658_v16 = vld [vmem:[%s6515_s1 + $0x710] ss:$8 sps:$4 sm:$0xff]  }
  0xbc   : >> { %1718 = vmatpush1.bf16.msra.mxu0 %v4577_v19  ;;  %v4661_v19 = vld [vmem:[%s6515_s1 + $0x600] ss:$8 sps:$4 sm:$0xff]  }
  0xbd   : >> { %1693 = vmatpush2.bf16.msra.mxu1 %v4574_v18  ;;  %1719 = vmatprep.subr.bf16.mxu0 %v4585_v21  ;;  %v4666_v18 = vld [vmem:[%s6515_s1 + $0x704] ss:$8 sps:$4 sm:$0xff]   ;;  %v1825_v21 = vrot.slane %v1823_v13, 1  ;;  %v4724_v13 = vld [vmem:[%s6515_s1 + $0x8e0] ss:$8 sps:$4 sm:$0xff]  }
  0xbe   : >> { %1694 = vmatprep.subr.bf16.mxu1 %v4582_v20  ;;  %v1821_v20 = vshrl.u32 %v5702_v53, 16 }
  0xc0   : >> { %1720 = vmatpush1.bf16.msra.mxu0 %v4583_v23  ;;  %v4664_v23 = vld [vmem:[%s6515_s1 + $0x700] ss:$8 sps:$4 sm:$0xff]  }
  0xc1   : >> { %1695 = vmatpush2.bf16.msra.mxu1 %v4580_v22  ;;  %1721 = vmatprep.subr.bf16.mxu0 %v4591_v25  ;;  %v5797_v22 = vld [vmem:[%s5158_s5 + $0xc] sm:$0x66]  ;;  %v4672_v25 = vld [vmem:[%s6515_s1 + $0x7f4] ss:$8 sps:$4 sm:$0xff]  }
  0xc2   : >> { %1696 = vmatprep.subr.bf16.mxu1 %v4588_v24  ;;  %v4669_v24 = vld [vmem:[%s6515_s1 + $0x6f4] ss:$8 sps:$4 sm:$0xff]  }
  0xc4   : >> { %1722 = vmatpush1.bf16.msra.mxu0 %v4589_v27  ;;  %v4667_v27 = vld [vmem:[%s6515_s1 + $0x6f0] ss:$8 sps:$4 sm:$0xff]  }
  0xc5   : >> { %1697 = vmatpush2.bf16.msra.mxu1 %v4586_v26  ;;  %1723 = vmatprep.subr.bf16.mxu0 %v4597_v29  ;;  %v4091_v26 = vcombine.high %v5797_v22, %v5797_v22  ;;  %v1826_v29 = vor.u32 %v1825_v21, %v1821_v20  ;;  %v4727_v20 = vld [vmem:[%s6515_s1 + $0x850] ss:$8 sps:$4 sm:$0xff]  }
  0xc6   : >> { %1698 = vmatprep.subr.bf16.mxu1 %v4594_v28  ;;  %v4670_v28 = vld [vmem:[%s6515_s1 + $0x7f0] ss:$8 sps:$4 sm:$0xff]  }
  0xc7   : >> { %v4730_v21 = vld [vmem:[%s6515_s1 + $0x8d0] ss:$8 sps:$4 sm:$0xff]  }
  0xc8   : >> { %1724 = vmatpush1.bf16.msra.mxu0 %v4595_v31  ;;  %v4678_v31 = vld [vmem:[%s6515_s1 + $0x7e4] ss:$8 sps:$4 sm:$0xff]  }
  0xc9   : >> { %1699 = vmatpush2.bf16.msra.mxu1 %v4592_v30  ;;  %1725 = vmatprep.subr.bf16.mxu0 %v4603_v33  ;;  %v4675_v30 = vld [vmem:[%s6515_s1 + $0x6e4] ss:$8 sps:$4 sm:$0xff]   ;;  %v4673_v33 = vld [vmem:[%s6515_s1 + $0x6e0] ss:$8 sps:$4 sm:$0xff]  }
  0xca   : >> { %1700 = vmatprep.subr.bf16.mxu1 %v4600_v32  ;;  %v2213_v32 = vrot.slane %v4091_v26, 1  ;;  %v4733_v26 = vld [vmem:[%s6515_s1 + $0x840] ss:$8 sps:$4 sm:$0xff]  }
  0xcc   : >> { %1726 = vmatpush1.bf16.msra.mxu0 %v4601_v35 }
  0xcd   : >> { %1701 = vmatpush2.bf16.msra.mxu1 %v4598_v34  ;;  %1727 = vmatprep.subr.bf16.mxu0 %v4609_v37  ;;  %v4676_v34 = vld [vmem:[%s6515_s1 + $0x7e0] ss:$8 sps:$4 sm:$0xff]   ;;  %v4684_v37 = vld [vmem:[%s6515_s1 + $0x7d4] ss:$8 sps:$4 sm:$0xff]  }
  0xce   : >> { %1702 = vmatprep.subr.bf16.mxu1 %v4606_v36  ;;  %v4681_v36 = vld [vmem:[%s6515_s1 + $0x6d4] ss:$8 sps:$4 sm:$0xff]  }
  0xd0   : >> { %1728 = vmatpush1.bf16.msra.mxu0 %v4607_v39  ;;  %v4679_v39 = vld [vmem:[%s6515_s1 + $0x6d0] ss:$8 sps:$4 sm:$0xff]  }
  0xd1   : >> { %1703 = vmatpush2.bf16.msra.mxu1 %v4604_v38  ;;  %1729 = vmatprep.subr.bf16.mxu0 %v4615_v41 }
  0xd2   : >> { %1704 = vmatprep.subr.bf16.mxu1 %v4612_v40  ;;  %v4682_v40 = vld [vmem:[%s6515_s1 + $0x7d0] ss:$8 sps:$4 sm:$0xff]  }
  0xd4   : >> { %1730 = vmatpush1.bf16.msra.mxu0 %v4613_v46 }
  0xd5   : >> { %1705 = vmatpush2.bf16.msra.mxu1 %v4610_v44  ;;  %2070 = vmatprep.subr.bf16.mxu0 %v4621_v48  ;;  %v4690_v44 = vld [vmem:[%s6515_s1 + $0x7c4] ss:$8 sps:$4 sm:$0xff]   ;;  %v4685_v48 = vld [vmem:[%s6515_s1 + $0x6c0] ss:$8 sps:$4 sm:$0xff]  }
  0xd6   : >> { %2111 = vmatprep.subr.bf16.mxu1 %v4624_v49  ;;  %v4688_v49 = vld [vmem:[%s6515_s1 + $0x7c0] ss:$8 sps:$4 sm:$0xff]  }
  0xd7   : >> { %1748 = vmatmul.mubr.bf16.vlgmr.msra.gmra.mxu0 %v5702_v53  ;;  %v4691_v53 = vld [vmem:[%s6515_s1 + $0x6b0] ss:$8 sps:$4 sm:$0xff]  }
  0xd8   : >> { %1707 = vmatmul.mubr.bf16.vlgmr.msra.gmra.mxu1 %v5699_v52  ;;  %2071 = vmatpush1.bf16.msra.mxu0 %v4619_v54  ;;  %v4694_v54 = vld [vmem:[%s6515_s1 + $0x7b0] ss:$8 sps:$4 sm:$0xff]  }
  0xd9   : >> { %2112 = vmatpush1.bf16.msra.mxu1 %v4622_v55  ;;  %2072 = vmatprep.subr.bf16.mxu0 %v4627_v47  ;;  %v4699_v55 = vld [vmem:[%s6515_s1 + $0x6a4] ss:$8 sps:$4 sm:$0xff]  }
  0xda   : >> { %2113 = vmatprep.subr.bf16.mxu1 %v4630_v45  ;;  %2143 = vmatprep.mubr.bf16.mxu1 %v5004_v14  ;;  %v4702_v47 = vld [vmem:[%s6515_s1 + $0x7a4] ss:$8 sps:$4 sm:$0xff]   ;;  %v4697_v45 = vld [vmem:[%s6515_s1 + $0x6a0] ss:$8 sps:$4 sm:$0xff]  }
  0xdb   : >> { %2102 = vmatprep.mubr.bf16.mxu0 %v1819_v56  ;;  %v4700_v56 = vld [vmem:[%s6515_s1 + $0x7a0] ss:$8 sps:$4 sm:$0xff]  }
  0xdc   : >> { %2073 = vmatpush1.bf16.msra.mxu0 %v4625_v57  ;;  %v4705_v57 = vld [vmem:[%s6515_s1 + $0x694] ss:$8 sps:$4 sm:$0xff]  }
  0xdd   : >> { %2114 = vmatpush1.bf16.msra.mxu1 %v4628_v58  ;;  %2074 = vmatprep.subr.bf16.mxu0 %v4633_v59  ;;  %v4708_v58 = vld [vmem:[%s6515_s1 + $0x794] ss:$8 sps:$4 sm:$0xff]   ;;  %v4703_v59 = vld [vmem:[%s6515_s1 + $0x690] ss:$8 sps:$4 sm:$0xff]  }
  0xde   : >> { %2115 = vmatprep.subr.bf16.mxu1 %v4636_v60  ;;  %v1809_v60 = vshll.u32 %v5699_v52, 16 }
  0xe0   : >> { %2075 = vmatpush1.bf16.msra.mxu0 %v4631_v61  ;;  %v4706_v61 = vld [vmem:[%s6515_s1 + $0x790] ss:$8 sps:$4 sm:$0xff]  }
  0xe1   : >> { %2116 = vmatpush1.bf16.msra.mxu1 %v4634_v62  ;;  %2076 = vmatprep.subr.bf16.mxu0 %v4639_v63  ;;  %v4711_v62 = vld [vmem:[%s6515_s1 + $0x684] ss:$8 sps:$4 sm:$0xff]  }
  0xe2   : >> { %2117 = vmatprep.subr.bf16.mxu1 %v4642_v1  ;;  %v4714_v63 = vld [vmem:[%s6515_s1 + $0x784] ss:$8 sps:$4 sm:$0xff]   ;;  %v4709_v1 = vld [vmem:[%s6515_s1 + $0x680] ss:$8 sps:$4 sm:$0xff]  }
  0xe4   : >> { %2077 = vmatpush1.bf16.msra.mxu0 %v4637_v2  ;;  %v1807_v2 = vshrl.u32 %v5699_v52, 16  ;;  %v4715_v52 = vld [vmem:[%s6515_s1 + $0x870] ss:$8 sps:$4 sm:$0xff]  }
  0xe5   : >> { %2118 = vmatpush1.bf16.msra.mxu1 %v4640_v3  ;;  %2078 = vmatprep.subr.bf16.mxu0 %v4645_v4  ;;  %v1811_v3 = vrot.slane %v1809_v60, 1  ;;  %v4712_v4 = vld [vmem:[%s6515_s1 + $0x780] ss:$8 sps:$4 sm:$0xff]  }
  0xe6   : >> { %2119 = vmatprep.subr.bf16.mxu1 %v4648_v5  ;;  %v4717_v5 = vld [vmem:[%s6515_s1 + $0x874] ss:$8 sps:$4 sm:$0xff]   ;;  %v4772_v60 = vld [vmem:[%s6515_s1 + $0x960] ss:$8 sps:$4 sm:$0xff]  }
  0xe8   : >> { %2079 = vmatpush1.bf16.msra.mxu0 %v4643_v6  ;;  %v4720_v6 = vld [vmem:[%s6515_s1 + $0x8f4] ss:$8 sps:$4 sm:$0xff]  }
  0xe9   : >> { %2120 = vmatpush1.bf16.msra.mxu1 %v4646_v7  ;;  %2080 = vmatprep.subr.bf16.mxu0 %v4651_v8  ;;  %v1812_v7 = vor.u32 %v1811_v3, %v1807_v2  ;;  %v4718_v8 = vld [vmem:[%s6515_s1 + $0x8f0] ss:$8 sps:$4 sm:$0xff]   ;;  %v4783_v2 = vld [vmem:[%s6515_s1 + $0xa54] ss:$8 sps:$4 sm:$0xff]  }
  0xea   : >> { %2121 = vmatprep.subr.bf16.mxu1 %v4654_v9  ;;  %v4723_v9 = vld [vmem:[%s6515_s1 + $0x864] ss:$8 sps:$4 sm:$0xff]  }
  0xec   : >> { %2081 = vmatpush1.bf16.msra.mxu0 %v4649_v42  ;;  %v4726_v42 = vld [vmem:[%s6515_s1 + $0x8e4] ss:$8 sps:$4 sm:$0xff]  }
  0xed   : >> { %2122 = vmatpush1.bf16.msra.mxu1 %v4652_v10  ;;  %2082 = vmatprep.subr.bf16.mxu0 %v4657_v11  ;;  %v4721_v11 = vld [vmem:[%s6515_s1 + $0x860] ss:$8 sps:$4 sm:$0xff]  }
  0xee   : >> { %2123 = vmatprep.subr.bf16.mxu1 %v4660_v12 }
  0xf0   : >> { %2083 = vmatpush1.bf16.msra.mxu0 %v4655_v15 }
  0xf1   : >> { %2124 = vmatpush1.bf16.msra.mxu1 %v4658_v16  ;;  %2084 = vmatprep.subr.bf16.mxu0 %v4663_v17  ;;  %v4729_v16 = vld [vmem:[%s6515_s1 + $0x854] ss:$8 sps:$4 sm:$0xff]  }
  0xf2   : >> { %2125 = vmatprep.subr.bf16.mxu1 %v4666_v18  ;;  %v4732_v17 = vld [vmem:[%s6515_s1 + $0x8d4] ss:$8 sps:$4 sm:$0xff]  }
  0xf4   : >> { %2085 = vmatpush1.bf16.msra.mxu0 %v4661_v19 }
  0xf5   : >> { %2126 = vmatpush1.bf16.msra.mxu1 %v4664_v23  ;;  %2086 = vmatprep.subr.bf16.mxu0 %v4669_v24  ;;  %v4735_v24 = vld [vmem:[%s6515_s1 + $0x844] ss:$8 sps:$4 sm:$0xff]  }
  0xf6   : >> { %2458 = vmatprep.subr.bf16.mxu1 %v4672_v25  ;;  %v4738_v25 = vld [vmem:[%s6515_s1 + $0x8c4] ss:$8 sps:$4 sm:$0xff]  }
  0xf8   : >> { %2144 = vmatmul.mubr.bf16.vlgmr.msra.gmra.mxu1 %v1826_v29  ;;  %v5828_v35 = vpop.f32.mrf.mxu1  ;;  %2087 = vmatpush2.bf16.msra.mxu0 %v4667_v27  ;;  %v4736_v27 = vld [vmem:[%s6515_s1 + $0x8c0] ss:$8 sps:$4 sm:$0xff]   ;;  %v4744_v29 = vld [vmem:[%s6515_s1 + $0x8b4] ss:$8 sps:$4 sm:$0xff]  }
  0xf9   : >> { %2459 = vmatpush1.bf16.msra.mxu1 %v4670_v28  ;;  %2088 = vmatprep.subr.bf16.mxu0 %v4675_v30  ;;  %v4741_v28 = vld [vmem:[%s6515_s1 + $0x834] ss:$8 sps:$4 sm:$0xff]   ;;  %v4739_v30 = vld [vmem:[%s6515_s1 + $0x830] ss:$8 sps:$4 sm:$0xff]  }
  0xfa   : >> { %2460 = vmatprep.subr.bf16.mxu1 %v4678_v31  ;;  %v5836_v38 = vpop.f32.mrf.mxu1  ;;  %2490 = vmatprep.mubr.bf16.mxu1 %v2213_v32  ;;  %v4742_v31 = vld [vmem:[%s6515_s1 + $0x8b0] ss:$8 sps:$4 sm:$0xff]   ;;  %v4747_v32 = vld [vmem:[%s6515_s1 + $0x824] ss:$8 sps:$4 sm:$0xff]  }
  0xfc   : >> { %v653_v41 = vpop.f32.mrf.mxu1  ;;  %2089 = vmatpush2.bf16.msra.mxu0 %v4673_v33  ;;  %v4750_v33 = vld [vmem:[%s6515_s1 + $0x8a4] ss:$8 sps:$4 sm:$0xff]  }
  0xfd   : >> { %2461 = vmatpush1.bf16.msra.mxu1 %v4676_v34  ;;  %2090 = vmatprep.subr.bf16.mxu0 %v4681_v36  ;;  %v4745_v34 = vld [vmem:[%s6515_s1 + $0x820] ss:$8 sps:$4 sm:$0xff]   ;;  %v4753_v36 = vld [vmem:[%s6515_s1 + $0x814] ss:$8 sps:$4 sm:$0xff]   ;;  %v4762_v41 = vld [vmem:[%s6515_s1 + $0x884] ss:$8 sps:$4 sm:$0xff]  }
  0xfe   : >> { %2462 = vmatprep.subr.bf16.mxu1 %v4684_v37  ;;  %v654_v46 = vpop.f32.mrf.mxu1  ;;  %v4756_v37 = vld [vmem:[%s6515_s1 + $0x894] ss:$8 sps:$4 sm:$0xff]  }
  0xff   : >> { %v4757_v46 = vld [vmem:[%s6515_s1 + $0x800] ss:$8 sps:$4 sm:$0xff]  }
 0x100   : >> { %2091 = vmatpush2.bf16.msra.mxu0 %v4679_v39  ;;  %v4754_v39 = vld [vmem:[%s6515_s1 + $0x890] ss:$8 sps:$4 sm:$0xff]  }
 0x101   : >> { %2463 = vmatpush1.bf16.msra.mxu1 %v4682_v40  ;;  %2092 = vmatprep.subr.bf16.mxu0 %v4687_v43  ;;  %v4759_v40 = vld [vmem:[%s6515_s1 + $0x804] ss:$8 sps:$4 sm:$0xff]   ;;  %v4090_v43 = vcombine.low %v5797_v22, %v5797_v22  ;;  %v4771_v22 = vld [vmem:[%s6515_s1 + $0xa74] ss:$8 sps:$4 sm:$0xff]  }
 0x102   : >> { %2464 = vmatprep.subr.bf16.mxu1 %v4690_v44  ;;  %v4765_v44 = vld [vmem:[%s5158_s5 + $0x14] ss:$0 sps:$4 sm:$0x66]  }
 0x104   : >> { %2093 = vmatpush2.bf16.msra.mxu0 %v4685_v48  ;;  %v4760_v48 = vld [vmem:[%s6515_s1 + $0x880] ss:$8 sps:$4 sm:$0xff]  }
 0x105   : >> { %2465 = vmatpush1.bf16.msra.mxu1 %v4688_v49  ;;  %2094 = vmatprep.subr.bf16.mxu0 %v4693_v50  ;;  %v4768_v49 = vld [vmem:[%s6515_s1 + $0x974] ss:$8 sps:$4 sm:$0xff]   ;;  %v2212_v50 = vrot.slane %v4090_v43, 1 }
 0x106   : >> { %2466 = vmatprep.subr.bf16.mxu1 %v4696_v51  ;;  %v2214_v51 = vrot.slane %v4765_v44, 1 }
 0x108   : >> { %2095 = vmatpush2.bf16.msra.mxu0 %v4691_v53  ;;  %v6019_v53 = vld [vmem:[%s5158_s5 + $0x18] sm:$0x33] }
 0x109   : >> { %2467 = vmatpush1.bf16.msra.mxu1 %v4694_v54  ;;  %2096 = vmatprep.subr.bf16.mxu0 %v4699_v55  ;;  %v4766_v54 = vld [vmem:[%s6515_s1 + $0x970] ss:$8 sps:$4 sm:$0xff]  }
 0x10a   : >> { %2468 = vmatprep.subr.bf16.mxu1 %v4702_v47  ;;  %v4769_v55 = vld [vmem:[%s6515_s1 + $0xa70] ss:$8 sps:$4 sm:$0xff]   ;;  %v4774_v47 = vld [vmem:[%s6515_s1 + $0x964] ss:$8 sps:$4 sm:$0xff]  }
 0x10c   : >> { %2097 = vmatpush2.bf16.msra.mxu0 %v4697_v45  ;;  %v4777_v45 = vld [vmem:[%s6515_s1 + $0xa64] ss:$8 sps:$4 sm:$0xff]  }
 0x10d   : >> { %2469 = vmatpush1.bf16.msra.mxu1 %v4700_v56  ;;  %2098 = vmatprep.subr.bf16.mxu0 %v4705_v57  ;;  %v6035_v56 = vcombine.high %v6019_v53, %v6019_v53 }
 0x10e   : >> { %2470 = vmatprep.subr.bf16.mxu1 %v4708_v58 }
 0x110   : >> { %2099 = vmatpush2.bf16.msra.mxu0 %v4703_v59 }
 0x111   : >> { %2471 = vmatpush1.bf16.msra.mxu1 %v4706_v61  ;;  %2100 = vmatprep.subr.bf16.mxu0 %v4711_v62  ;;  %v4775_v61 = vld [vmem:[%s6515_s1 + $0xa60] ss:$8 sps:$4 sm:$0xff]  }
 0x112   : >> { %2472 = vmatprep.subr.bf16.mxu1 %v4714_v63 }
 0x114   : >> { %2101 = vmatpush2.bf16.msra.mxu0 %v4709_v1  ;;  %v4780_v1 = vld [vmem:[%s6515_s1 + $0x954] ss:$8 sps:$4 sm:$0xff]  }
 0x115   : >> { %2473 = vmatpush1.bf16.msra.mxu1 %v4712_v4  ;;  %2499 = vmatprep.subr.bf16.mxu0 %v4720_v6 }
 0x116   : >> { %2474 = vmatprep.subr.bf16.mxu1 %v4717_v5 }
 0x117   : >> { %v608_v10 = vpop.f32.mrf.mxu0  ;;  %2103 = vmatmul.mubr.bf16.vlgmr.msra.gmra.mxu0 %v1812_v7 }
 0x118   : >> { %v5928_v12 = vadd.f32 %v5828_v35, %v608_v10  ;;  %2500 = vmatpush1.bf16.msra.mxu0 %v4718_v8  ;;  %2531 = vmatprep.mubr.bf16.mxu0 %v5004_v14  ;;  %v4748_v35 = vld [vmem:[%s6515_s1 + $0x8a0] ss:$8 sps:$4 sm:$0xff]   ;;  %v4781_v8 = vld [vmem:[%s6515_s1 + $0xa50] ss:$8 sps:$4 sm:$0xff]   ;;  %v4789_v10 = vld [vmem:[%s6515_s1 + $0xa44] ss:$8 sps:$4 sm:$0xff]  }
 0x119   : >> { %2475 = vmatpush2.bf16.msra.mxu1 %v4715_v52  ;;  %v610_v15 = vpop.f32.mrf.mxu0  ;;  %2501 = vmatprep.subr.bf16.mxu0 %v4726_v42  ;;  %v4778_v52 = vld [vmem:[%s6515_s1 + $0x950] ss:$8 sps:$4 sm:$0xff]   ;;  %v4786_v42 = vld [vmem:[%s6515_s1 + $0x944] ss:$8 sps:$4 sm:$0xff]  }
 0x11a   : >> { %2476 = vmatprep.subr.bf16.mxu1 %v4723_v9  ;;  %v5940_v18 = vadd.f32 %v5836_v38, %v610_v15  ;;  %v4751_v38 = vld [vmem:[%s6515_s1 + $0x810] ss:$8 sps:$4 sm:$0xff]   ;;  %v4792_v15 = vld [vmem:[%s6515_s1 + $0x934] ss:$8 sps:$4 sm:$0xff]  }
 0x11b   : >> { %v612_v19 = vpop.f32.mrf.mxu0 }
 0x11c   : >> { %2502 = vmatpush1.bf16.msra.mxu0 %v4724_v13  ;;  %v4787_v13 = vld [vmem:[%s6515_s1 + $0xa40] ss:$8 sps:$4 sm:$0xff]   ;;  %v4798_v19 = vld [vmem:[%s6515_s1 + $0x924] ss:$8 sps:$4 sm:$0xff]  }
 0x11d   : >> { %2477 = vmatpush2.bf16.msra.mxu1 %v4721_v11  ;;  %v613_v23 = vpop.f32.mrf.mxu0  ;;  %2503 = vmatprep.subr.bf16.mxu0 %v4732_v17  ;;  %v4790_v17 = vld [vmem:[%s6515_s1 + $0x930] ss:$8 sps:$4 sm:$0xff]  }
 0x11e   : >> { %2478 = vmatprep.subr.bf16.mxu1 %v4729_v16  ;;  %v4795_v16 = vld [vmem:[%s6515_s1 + $0xa34] ss:$8 sps:$4 sm:$0xff]   ;;  %v4799_v23 = vld [vmem:[%s6515_s1 + $0xa20] ss:$8 sps:$4 sm:$0xff]  }
 0x120   : >> { %2504 = vmatpush1.bf16.msra.mxu0 %v4730_v21  ;;  %v4796_v21 = vld [vmem:[%s6515_s1 + $0x920] ss:$8 sps:$4 sm:$0xff]  }
 0x121   : >> { %2479 = vmatpush2.bf16.msra.mxu1 %v4727_v20  ;;  %2505 = vmatprep.subr.bf16.mxu0 %v4738_v25  ;;  %v4801_v20 = vld [vmem:[%s6515_s1 + $0xa24] ss:$8 sps:$4 sm:$0xff]   ;;  %v4807_v25 = vld [vmem:[%s6515_s1 + $0xa14] ss:$8 sps:$4 sm:$0xff]  }
 0x122   : >> { %2480 = vmatprep.subr.bf16.mxu1 %v4735_v24  ;;  %v4804_v24 = vld [vmem:[%s6515_s1 + $0x914] ss:$8 sps:$4 sm:$0xff]  }
 0x124   : >> { %2506 = vmatpush1.bf16.msra.mxu0 %v4736_v27  ;;  %v4805_v27 = vld [vmem:[%s6515_s1 + $0xa10] ss:$8 sps:$4 sm:$0xff]  }
 0x125   : >> { %2481 = vmatpush2.bf16.msra.mxu1 %v4733_v26  ;;  %2507 = vmatprep.subr.bf16.mxu0 %v4744_v29  ;;  %v4802_v26 = vld [vmem:[%s6515_s1 + $0x910] ss:$8 sps:$4 sm:$0xff]   ;;  %v4813_v29 = vld [vmem:[%s6515_s1 + $0xa04] ss:$8 sps:$4 sm:$0xff]  }
 0x126   : >> { %2482 = vmatprep.subr.bf16.mxu1 %v4741_v28  ;;  %v4810_v28 = vld [vmem:[%s6515_s1 + $0x904] ss:$8 sps:$4 sm:$0xff]  }
 0x128   : >> { %2508 = vmatpush1.bf16.msra.mxu0 %v4742_v31  ;;  %v4808_v31 = vld [vmem:[%s6515_s1 + $0x900] ss:$8 sps:$4 sm:$0xff]  }
 0x129   : >> { %2483 = vmatpush2.bf16.msra.mxu1 %v4739_v30  ;;  %2509 = vmatprep.subr.bf16.mxu0 %v4750_v33  ;;  %v2989_v30 = vshll.u32 %v6035_v56, 16  ;;  %v4816_v33 = vld [vmem:[%s6515_s1 + $0x9f4] ss:$8 sps:$4 sm:$0xff]  }
 0x12a   : >> { %2484 = vmatprep.subr.bf16.mxu1 %v4747_v32  ;;  %v4811_v32 = vld [vmem:[%s6515_s1 + $0xa00] ss:$8 sps:$4 sm:$0xff]  }
 0x12c   : >> { %2510 = vmatpush1.bf16.msra.mxu0 %v4748_v35  ;;  %v2987_v35 = vshrl.u32 %v6035_v56, 16 }
 0x12d   : >> { %2485 = vmatpush2.bf16.msra.mxu1 %v4745_v34  ;;  %2511 = vmatprep.subr.bf16.mxu0 %v4756_v37  ;;  %v4819_v34 = vld [vmem:[%s6515_s1 + $0xaf4] ss:$8 sps:$4 sm:$0xff]   ;;  %v6132_v37 = vld [vmem:[%s5158_s5 + $0x20] ss:$0 sps:$4 sm:$0x33]  }
 0x12e   : >> { %2486 = vmatprep.subr.bf16.mxu1 %v4753_v36  ;;  %v2991_v36 = vrot.slane %v2989_v30, 1 }
 0x130   : >> { %2512 = vmatpush1.bf16.msra.mxu0 %v4754_v39  ;;  %v4817_v39 = vld [vmem:[%s6515_s1 + $0xaf0] ss:$8 sps:$4 sm:$0xff]   ;;  %v2992_v43 = vor.u32 %v2991_v36, %v2987_v35  ;;  %v4886_v35 = vld [vmem:[%s6515_s1 + $0xbc0] ss:$8 sps:$4 sm:$0xff]   ;;  %v4891_v36 = vld [vmem:[%s6515_s1 + $0xb34] ss:$8 sps:$4 sm:$0xff]  }
 0x131   : >> { %2487 = vmatpush2.bf16.msra.mxu1 %v4751_v38  ;;  %2513 = vmatprep.subr.bf16.mxu0 %v4762_v41  ;;  %v4814_v38 = vld [vmem:[%s6515_s1 + $0x9f0] ss:$8 sps:$4 sm:$0xff]   ;;  %v4826_v41 = vld [vmem:[%s6515_s1 + $0xae4] ss:$8 sps:$4 sm:$0xff]  }
 0x132   : >> { %2488 = vmatprep.subr.bf16.mxu1 %v4759_v40  ;;  %v4823_v40 = vld [vmem:[%s6515_s1 + $0x9e4] ss:$8 sps:$4 sm:$0xff]  }
 0x134   : >> { %2514 = vmatpush1.bf16.msra.mxu0 %v4760_v48  ;;  %v4824_v48 = vld [vmem:[%s6515_s1 + $0xae0] ss:$8 sps:$4 sm:$0xff]  }
 0x135   : >> { %2489 = vmatpush2.bf16.msra.mxu1 %v4757_v46  ;;  %2847 = vmatprep.subr.bf16.mxu0 %v4768_v49  ;;  %v4821_v46 = vld [vmem:[%s6515_s1 + $0x9e0] ss:$8 sps:$4 sm:$0xff]   ;;  %v4829_v49 = vld [vmem:[%s6515_s1 + $0x9d4] ss:$8 sps:$4 sm:$0xff]  }
 0x136   : >> { %2888 = vmatprep.subr.bf16.mxu1 %v4771_v22  ;;  %v4832_v22 = vld [vmem:[%s6515_s1 + $0xad4] ss:$8 sps:$4 sm:$0xff]  }
 0x137   : >> { %v974_v58 = vpop.f32.mrf.mxu0  ;;  %2532 = vmatmul.mubr.bf16.vlgmr.msra.gmra.mxu0 %v2214_v51 }
 0x138   : >> { %v933_v57 = vpop.f32.mrf.mxu1  ;;  %2491 = vmatmul.mubr.bf16.vlgmr.msra.gmra.mxu1 %v2212_v50  ;;  %2848 = vmatpush1.bf16.msra.mxu0 %v4766_v54  ;;  %v4827_v54 = vld [vmem:[%s6515_s1 + $0x9d0] ss:$8 sps:$4 sm:$0xff]  }
 0x139   : >> { %v934_v59 = vadd.f32 %v933_v57, %v5928_v12  ;;  %2889 = vmatpush1.bf16.msra.mxu1 %v4769_v55  ;;  %v976_v63 = vpop.f32.mrf.mxu0  ;;  %2849 = vmatprep.subr.bf16.mxu0 %v4774_v47  ;;  %v4784_v12 = vld [vmem:[%s6515_s1 + $0x940] ss:$8 sps:$4 sm:$0xff]   ;;  %v4830_v55 = vld [vmem:[%s6515_s1 + $0xad0] ss:$8 sps:$4 sm:$0xff]   ;;  %v4835_v47 = vld [vmem:[%s6515_s1 + $0x9c4] ss:$8 sps:$4 sm:$0xff]  }
 0x13a   : >> { %v935_v62 = vpop.f32.mrf.mxu1  ;;  %2890 = vmatprep.subr.bf16.mxu1 %v4777_v45  ;;  %2920 = vmatprep.mubr.bf16.mxu1 %v5004_v14  ;;  %v4838_v45 = vld [vmem:[%s6515_s1 + $0xac4] ss:$8 sps:$4 sm:$0xff]   ;;  %v4833_v57 = vld [vmem:[%s6515_s1 + $0x9c0] ss:$8 sps:$4 sm:$0xff]  }
 0x13b   : >> { %v6050_v3 = vadd.f32 %v974_v58, %v934_v59  ;;  %v936_v4 = vadd.f32 %v935_v62, %v5940_v18  ;;  %2879 = vmatprep.mubr.bf16.mxu0 %v6035_v56  ;;  %v978_v5 = vpop.f32.mrf.mxu0  ;;  %v4793_v18 = vld [vmem:[%s6515_s1 + $0xa30] ss:$8 sps:$4 sm:$0xff]   ;;  %v4836_v58 = vld [vmem:[%s6515_s1 + $0xac0] ss:$8 sps:$4 sm:$0xff]   ;;  %v4841_v59 = vld [vmem:[%s6515_s1 + $0x9b4] ss:$8 sps:$4 sm:$0xff]  }
 0x13c   : >> { %v937_v6 = vpop.f32.mrf.mxu1  ;;  %2850 = vmatpush1.bf16.msra.mxu0 %v4772_v60  ;;  %v4844_v60 = vld [vmem:[%s6515_s1 + $0xab4] ss:$8 sps:$4 sm:$0xff]   ;;  %v4842_v62 = vld [vmem:[%s6515_s1 + $0xab0] ss:$8 sps:$4 sm:$0xff]  }
 0x13d   : >> { %v6055_v7 = vadd.f32 %v976_v63, %v936_v4  ;;  %2891 = vmatpush1.bf16.msra.mxu1 %v4775_v61  ;;  %v979_v9 = vpop.f32.mrf.mxu0  ;;  %2851 = vmatprep.subr.bf16.mxu0 %v4780_v1  ;;  %v4839_v61 = vld [vmem:[%s6515_s1 + $0x9b0] ss:$8 sps:$4 sm:$0xff]   ;;  %v4847_v63 = vld [vmem:[%s6515_s1 + $0x9a4] ss:$8 sps:$4 sm:$0xff]   ;;  %v4848_v4 = vld [vmem:[%s6515_s1 + $0xaa0] ss:$8 sps:$4 sm:$0xff]  }
 0x13e   : >> { %2892 = vmatprep.subr.bf16.mxu1 %v4783_v2  ;;  %v938_v11 = vpop.f32.mrf.mxu1  ;;  %v4850_v1 = vld [vmem:[%s6515_s1 + $0xaa4] ss:$8 sps:$4 sm:$0xff]   ;;  %v4845_v2 = vld [vmem:[%s6515_s1 + $0x9a0] ss:$8 sps:$4 sm:$0xff]   ;;  %v4853_v5 = vld [vmem:[%s6515_s1 + $0x994] ss:$8 sps:$4 sm:$0xff]  }
 0x13f   : >> { %v4856_v6 = vld [vmem:[%s6515_s1 + $0xa94] ss:$8 sps:$4 sm:$0xff]   ;;  %v4859_v9 = vld [vmem:[%s6515_s1 + $0x984] ss:$8 sps:$4 sm:$0xff]   ;;  %v4860_v11 = vld [vmem:[%s6515_s1 + $0xa80] ss:$8 sps:$4 sm:$0xff]  }
 0x140   : >> { %2852 = vmatpush1.bf16.msra.mxu0 %v4778_v52  ;;  %v4851_v52 = vld [vmem:[%s6515_s1 + $0x990] ss:$8 sps:$4 sm:$0xff]  }
 0x141   : >> { %2893 = vmatpush1.bf16.msra.mxu1 %v4781_v8  ;;  %2853 = vmatprep.subr.bf16.mxu0 %v4786_v42  ;;  %v4854_v8 = vld [vmem:[%s6515_s1 + $0xa90] ss:$8 sps:$4 sm:$0xff]   ;;  %v4862_v42 = vld [vmem:[%s6515_s1 + $0xa84] ss:$8 sps:$4 sm:$0xff]  }
 0x142   : >> { %2894 = vmatprep.subr.bf16.mxu1 %v4789_v10  ;;  %v4857_v10 = vld [vmem:[%s6515_s1 + $0x980] ss:$8 sps:$4 sm:$0xff]  }
 0x144   : >> { %2854 = vmatpush1.bf16.msra.mxu0 %v4784_v12  ;;  %v4867_v12 = vld [vmem:[%s6515_s1 + $0xb74] ss:$8 sps:$4 sm:$0xff]  }
 0x145   : >> { %2895 = vmatpush1.bf16.msra.mxu1 %v4787_v13  ;;  %2855 = vmatprep.subr.bf16.mxu0 %v4792_v15  ;;  %v4870_v13 = vld [vmem:[%s6515_s1 + $0xbf4] ss:$8 sps:$4 sm:$0xff]   ;;  %v6237_v15 = vcombine.low %v6019_v53, %v6019_v53  ;;  %v4876_v53 = vld [vmem:[%s6515_s1 + $0xbe4] ss:$8 sps:$4 sm:$0xff]  }
 0x146   : >> { %2896 = vmatprep.subr.bf16.mxu1 %v4795_v16  ;;  %v4865_v16 = vld [vmem:[%s6515_s1 + $0xb70] ss:$8 sps:$4 sm:$0xff]  }
 0x148   : >> { %2856 = vmatpush1.bf16.msra.mxu0 %v4790_v17  ;;  %v4868_v17 = vld [vmem:[%s6515_s1 + $0xbf0] ss:$8 sps:$4 sm:$0xff]  }
 0x149   : >> { %2897 = vmatpush1.bf16.msra.mxu1 %v4793_v18  ;;  %2857 = vmatprep.subr.bf16.mxu0 %v4798_v19  ;;  %v4873_v18 = vld [vmem:[%s6515_s1 + $0xb64] ss:$8 sps:$4 sm:$0xff]  }
 0x14a   : >> { %2898 = vmatprep.subr.bf16.mxu1 %v4801_v20 }
 0x14c   : >> { %2858 = vmatpush1.bf16.msra.mxu0 %v4796_v21  ;;  %v4871_v21 = vld [vmem:[%s6515_s1 + $0xb60] ss:$8 sps:$4 sm:$0xff]  }
 0x14d   : >> { %2899 = vmatpush1.bf16.msra.mxu1 %v4799_v23  ;;  %2859 = vmatprep.subr.bf16.mxu0 %v4804_v24  ;;  %v4874_v23 = vld [vmem:[%s6515_s1 + $0xbe0] ss:$8 sps:$4 sm:$0xff]  }
 0x14e   : >> { %2900 = vmatprep.subr.bf16.mxu1 %v4807_v25  ;;  %v4879_v25 = vld [vmem:[%s6515_s1 + $0xb54] ss:$8 sps:$4 sm:$0xff]  }
 0x150   : >> { %2860 = vmatpush1.bf16.msra.mxu0 %v4802_v26  ;;  %v4882_v26 = vld [vmem:[%s6515_s1 + $0xbd4] ss:$8 sps:$4 sm:$0xff]  }
 0x151   : >> { %2901 = vmatpush1.bf16.msra.mxu1 %v4805_v27  ;;  %2861 = vmatprep.subr.bf16.mxu0 %v4810_v28 }
 0x152   : >> { %2902 = vmatprep.subr.bf16.mxu1 %v4813_v29 }
 0x154   : >> { %2862 = vmatpush1.bf16.msra.mxu0 %v4808_v31  ;;  %v4877_v31 = vld [vmem:[%s6515_s1 + $0xb50] ss:$8 sps:$4 sm:$0xff]  }
 0x155   : >> { %2903 = vmatpush1.bf16.msra.mxu1 %v4811_v32  ;;  %2863 = vmatprep.subr.bf16.mxu0 %v4816_v33  ;;  %v4880_v32 = vld [vmem:[%s6515_s1 + $0xbd0] ss:$8 sps:$4 sm:$0xff]   ;;  %v4885_v33 = vld [vmem:[%s6515_s1 + $0xb44] ss:$8 sps:$4 sm:$0xff]  }
 0x156   : >> { %3243 = vmatprep.subr.bf16.mxu1 %v4819_v34  ;;  %v4883_v34 = vld [vmem:[%s6515_s1 + $0xb40] ss:$8 sps:$4 sm:$0xff]  }
 0x158   : >> { %2921 = vmatmul.mubr.bf16.vlgmr.msra.gmra.mxu1 %v6132_v37  ;;  %v6147_v44 = vpop.f32.mrf.mxu1  ;;  %2864 = vmatpush2.bf16.msra.mxu0 %v4814_v38  ;;  %v4894_v38 = vld [vmem:[%s6515_s1 + $0xbb4] ss:$8 sps:$4 sm:$0xff]  }
 0x159   : >> { %3244 = vmatpush1.bf16.msra.mxu1 %v4817_v39  ;;  %2865 = vmatprep.subr.bf16.mxu0 %v4823_v40  ;;  %v4889_v39 = vld [vmem:[%s6515_s1 + $0xb30] ss:$8 sps:$4 sm:$0xff]  }
 0x15a   : >> { %3245 = vmatprep.subr.bf16.mxu1 %v4826_v41  ;;  %v6161_v50 = vpop.f32.mrf.mxu1  ;;  %3275 = vmatprep.mubr.bf16.mxu1 %v2992_v43  ;;  %v4892_v40 = vld [vmem:[%s6515_s1 + $0xbb0] ss:$8 sps:$4 sm:$0xff]   ;;  %v4897_v41 = vld [vmem:[%s6515_s1 + $0xb24] ss:$8 sps:$4 sm:$0xff]  }
 0x15b   : >> { %v4900_v43 = vld [vmem:[%s6515_s1 + $0xba4] ss:$8 sps:$4 sm:$0xff]  }
 0x15c   : >> { %v1364_v51 = vpop.f32.mrf.mxu1  ;;  %2866 = vmatpush2.bf16.msra.mxu0 %v4821_v46  ;;  %v4898_v46 = vld [vmem:[%s6515_s1 + $0xba0] ss:$8 sps:$4 sm:$0xff]  }
 0x15d   : >> { %3246 = vmatpush1.bf16.msra.mxu1 %v4824_v48  ;;  %2867 = vmatprep.subr.bf16.mxu0 %v4829_v49  ;;  %v4903_v48 = vld [vmem:[%s6515_s1 + $0xb14] ss:$8 sps:$4 sm:$0xff]   ;;  %v4901_v51 = vld [vmem:[%s6515_s1 + $0xb10] ss:$8 sps:$4 sm:$0xff]  }
 0x15e   : >> { %3247 = vmatprep.subr.bf16.mxu1 %v4832_v22  ;;  %v1365_v56 = vpop.f32.mrf.mxu1  ;;  %v4906_v49 = vld [vmem:[%s6515_s1 + $0xb94] ss:$8 sps:$4 sm:$0xff]   ;;  %v2982_v22 = vshll.u32 %v6237_v15, 16 }
 0x160   : >> { %2868 = vmatpush2.bf16.msra.mxu0 %v4827_v54  ;;  %v4904_v54 = vld [vmem:[%s6515_s1 + $0xb90] ss:$8 sps:$4 sm:$0xff]   ;;  %v2984_v56 = vrot.slane %v2982_v22, 1 }
 0x161   : >> { %3248 = vmatpush1.bf16.msra.mxu1 %v4830_v55  ;;  %2869 = vmatprep.subr.bf16.mxu0 %v4835_v47  ;;  %v4909_v55 = vld [vmem:[%s6515_s1 + $0xb04] ss:$8 sps:$4 sm:$0xff]  }
 0x162   : >> { %3249 = vmatprep.subr.bf16.mxu1 %v4838_v45  ;;  %v4912_v47 = vld [vmem:[%s6515_s1 + $0xb84] ss:$8 sps:$4 sm:$0xff]   ;;  %v2980_v45 = vshrl.u32 %v6237_v15, 16 }
 0x164   : >> { %2870 = vmatpush2.bf16.msra.mxu0 %v4833_v57  ;;  %v2994_v57 = vshrl.u32 %v6132_v37, 16 }
 0x165   : >> { %3250 = vmatpush1.bf16.msra.mxu1 %v4836_v58  ;;  %2871 = vmatprep.subr.bf16.mxu0 %v4841_v59  ;;  %v6338_v59 = vld [vmem:[%s5158_s5 + $0x18] sm:$0x66] }
 0x166   : >> { %3251 = vmatprep.subr.bf16.mxu1 %v4844_v60  ;;  %v4907_v60 = vld [vmem:[%s6515_s1 + $0xb00] ss:$8 sps:$4 sm:$0xff]  }
 0x168   : >> { %2872 = vmatpush2.bf16.msra.mxu0 %v4839_v61  ;;  %v4910_v61 = vld [vmem:[%s6515_s1 + $0xb80] ss:$8 sps:$4 sm:$0xff]  }
 0x169   : >> { %3252 = vmatpush1.bf16.msra.mxu1 %v4842_v62  ;;  %2873 = vmatprep.subr.bf16.mxu0 %v4847_v63  ;;  %v4915_v62 = vld [vmem:[%s6515_s1 + $0xc74] ss:$8 sps:$4 sm:$0xff]   ;;  %v4245_v63 = vcombine.high %v6338_v59, %v6338_v59 }
 0x16a   : >> { %3253 = vmatprep.subr.bf16.mxu1 %v4850_v1  ;;  %v2985_v1 = vor.u32 %v2984_v56, %v2980_v45 }
 0x16c   : >> { %2874 = vmatpush2.bf16.msra.mxu0 %v4845_v2 }
 0x16d   : >> { %3254 = vmatpush1.bf16.msra.mxu1 %v4848_v4  ;;  %2875 = vmatprep.subr.bf16.mxu0 %v4853_v5  ;;  %v4913_v4 = vld [vmem:[%s6515_s1 + $0xc70] ss:$8 sps:$4 sm:$0xff]  }
 0x16e   : >> { %3255 = vmatprep.subr.bf16.mxu1 %v4856_v6  ;;  %v4934_v5 = vld [vmem:[%s6515_s1 + $0xd70] ss:$8 sps:$4 sm:$0xff]   ;;  %v4918_v6 = vld [vmem:[%s6515_s1 + $0xc64] ss:$8 sps:$4 sm:$0xff]  }
 0x170   : >> { %2876 = vmatpush2.bf16.msra.mxu0 %v4851_v52  ;;  %v4942_v52 = vld [vmem:[%s6515_s1 + $0xd64] ss:$8 sps:$4 sm:$0xff]  }
 0x171   : >> { %3256 = vmatpush1.bf16.msra.mxu1 %v4854_v8  ;;  %2877 = vmatprep.subr.bf16.mxu0 %v4859_v9  ;;  %v3386_v8 = vrot.slane %v4245_v63, 1  ;;  %v4975_v63 = vld [vmem:[%s6515_s1 + $0xca4] ss:$8 sps:$4 sm:$0xff]  }
 0x172   : >> { %3257 = vmatprep.subr.bf16.mxu1 %v4862_v42 }
 0x174   : >> { %2878 = vmatpush2.bf16.msra.mxu0 %v4857_v10 }
 0x175   : >> { %3258 = vmatpush1.bf16.msra.mxu1 %v4860_v11  ;;  %3284 = vmatprep.subr.bf16.mxu0 %v4870_v13  ;;  %v4916_v11 = vld [vmem:[%s6515_s1 + $0xc60] ss:$8 sps:$4 sm:$0xff]  }
 0x176   : >> { %3259 = vmatprep.subr.bf16.mxu1 %v4867_v12  ;;  %v4940_v12 = vld [vmem:[%s6515_s1 + $0xd60] ss:$8 sps:$4 sm:$0xff]  }
 0x177   : >> { %v1319_v19 = vpop.f32.mrf.mxu0  ;;  %2880 = vmatmul.mubr.bf16.vlgmr.msra.gmra.mxu0 %v6237_v15 }
 0x178   : >> { %v1361_v20 = vadd.f32 %v6147_v44, %v1319_v19  ;;  %3285 = vmatpush1.bf16.msra.mxu0 %v4868_v17  ;;  %3316 = vmatprep.mubr.bf16.mxu0 %v5004_v14  ;;  %v4895_v44 = vld [vmem:[%s6515_s1 + $0xb20] ss:$8 sps:$4 sm:$0xff]   ;;  %v4948_v17 = vld [vmem:[%s6515_s1 + $0xd54] ss:$8 sps:$4 sm:$0xff]  }
 0x179   : >> { %3260 = vmatpush2.bf16.msra.mxu1 %v4865_v16  ;;  %v1321_v24 = vpop.f32.mrf.mxu0  ;;  %3286 = vmatprep.subr.bf16.mxu0 %v4876_v53  ;;  %v4921_v16 = vld [vmem:[%s6515_s1 + $0xc54] ss:$8 sps:$4 sm:$0xff]  }
 0x17a   : >> { %3261 = vmatprep.subr.bf16.mxu1 %v4873_v18  ;;  %v6266_v27 = vadd.f32 %v1361_v20, %v6050_v3  ;;  %v1363_v28 = vadd.f32 %v6161_v50, %v1321_v24  ;;  %v2996_v50 = vshll.u32 %v6132_v37, 16  ;;  %v4936_v37 = vld [vmem:[%s6515_s1 + $0xd74] ss:$8 sps:$4 sm:$0xff]   ;;  %v4946_v24 = vld [vmem:[%s6515_s1 + $0xd50] ss:$8 sps:$4 sm:$0xff]  }
 0x17b   : >> { %v1323_v29 = vpop.f32.mrf.mxu0 }
 0x17c   : >> { %v6271_v30 = vadd.f32 %v1363_v28, %v6055_v7  ;;  %3287 = vmatpush1.bf16.msra.mxu0 %v4874_v23  ;;  %v4888_v7 = vld [vmem:[%s6515_s1 + $0xbc4] ss:$8 sps:$4 sm:$0xff]   ;;  %v2998_v58 = vrot.slane %v2996_v50, 1  ;;  %v4919_v23 = vld [vmem:[%s6515_s1 + $0xc50] ss:$8 sps:$4 sm:$0xff]  }
 0x17d   : >> { %3262 = vmatpush2.bf16.msra.mxu1 %v4871_v21  ;;  %v1324_v3 = vpop.f32.mrf.mxu0  ;;  %3288 = vmatprep.subr.bf16.mxu0 %v4882_v26  ;;  %v4922_v28 = vld [vmem:[%s6515_s1 + $0xc40] ss:$8 sps:$4 sm:$0xff]   ;;  %v4943_v50 = vld [vmem:[%s6515_s1 + $0xcf0] ss:$8 sps:$4 sm:$0xff]  }
 0x17e   : >> { %3263 = vmatprep.subr.bf16.mxu1 %v4879_v25  ;;  %v2999_v2 = vor.u32 %v2998_v58, %v2994_v57  ;;  %v4952_v29 = vld [vmem:[%s6515_s1 + $0xd40] ss:$8 sps:$4 sm:$0xff]   ;;  %v4958_v3 = vld [vmem:[%s6515_s1 + $0xd30] ss:$8 sps:$4 sm:$0xff]   ;;  %v4963_v58 = vld [vmem:[%s6515_s1 + $0xcc4] ss:$8 sps:$4 sm:$0xff]  }
 0x17f   : >> { %v4955_v57 = vld [vmem:[%s6515_s1 + $0xcd0] ss:$8 sps:$4 sm:$0xff]  }
 0x180   : >> { %3289 = vmatpush1.bf16.msra.mxu0 %v4880_v32  ;;  %v4925_v32 = vld [vmem:[%s6515_s1 + $0xc30] ss:$8 sps:$4 sm:$0xff]  }
 0x181   : >> { %3264 = vmatpush2.bf16.msra.mxu1 %v4877_v31  ;;  %3290 = vmatprep.subr.bf16.mxu0 %v4888_v7  ;;  %v4960_v31 = vld [vmem:[%s6515_s1 + $0xd34] ss:$8 sps:$4 sm:$0xff]   ;;  %v4966_v7 = vld [vmem:[%s6515_s1 + $0xd24] ss:$8 sps:$4 sm:$0xff]  }
 0x182   : >> { %3265 = vmatprep.subr.bf16.mxu1 %v4885_v33  ;;  %v4930_v33 = vld [vmem:[%s6515_s1 + $0xc24] ss:$8 sps:$4 sm:$0xff]  }
 0x184   : >> { %3291 = vmatpush1.bf16.msra.mxu0 %v4886_v35  ;;  %v4964_v35 = vld [vmem:[%s6515_s1 + $0xd20] ss:$8 sps:$4 sm:$0xff]  }
 0x185   : >> { %3266 = vmatpush2.bf16.msra.mxu1 %v4883_v34  ;;  %3292 = vmatprep.subr.bf16.mxu0 %v4894_v38  ;;  %v4928_v34 = vld [vmem:[%s6515_s1 + $0xc20] ss:$8 sps:$4 sm:$0xff]   ;;  %v4972_v38 = vld [vmem:[%s6515_s1 + $0xd14] ss:$8 sps:$4 sm:$0xff]  }
 0x186   : >> { %3267 = vmatprep.subr.bf16.mxu1 %v4891_v36  ;;  %v4933_v36 = vld [vmem:[%s6515_s1 + $0xc14] ss:$8 sps:$4 sm:$0xff]  }
 0x188   : >> { %3293 = vmatpush1.bf16.msra.mxu0 %v4892_v40  ;;  %v4970_v40 = vld [vmem:[%s6515_s1 + $0xd10] ss:$8 sps:$4 sm:$0xff]  }
 0x189   : >> { %3268 = vmatpush2.bf16.msra.mxu1 %v4889_v39  ;;  %3294 = vmatprep.subr.bf16.mxu0 %v4900_v43  ;;  %v4931_v39 = vld [vmem:[%s6515_s1 + $0xc10] ss:$8 sps:$4 sm:$0xff]   ;;  %v4978_v43 = vld [vmem:[%s6515_s1 + $0xd04] ss:$8 sps:$4 sm:$0xff]  }
 0x18a   : >> { %3269 = vmatprep.subr.bf16.mxu1 %v4897_v41  ;;  %v4939_v41 = vld [vmem:[%s6515_s1 + $0xc04] ss:$8 sps:$4 sm:$0xff]  }
 0x18c   : >> { %3295 = vmatpush1.bf16.msra.mxu0 %v4898_v46  ;;  %v4937_v46 = vld [vmem:[%s6515_s1 + $0xc00] ss:$8 sps:$4 sm:$0xff]  }
 0x18d   : >> { %3270 = vmatpush2.bf16.msra.mxu1 %v4895_v44  ;;  %3296 = vmatprep.subr.bf16.mxu0 %v4906_v49  ;;  %v4982_v44 = vld [vmem:[%s5158_s5 + $0x20] ss:$0 sps:$4 sm:$0x66]   ;;  %v4945_v49 = vld [vmem:[%s6515_s1 + $0xcf4] ss:$8 sps:$4 sm:$0xff]  }
 0x18e   : >> { %3271 = vmatprep.subr.bf16.mxu1 %v4903_v48  ;;  %v4976_v48 = vld [vmem:[%s6515_s1 + $0xd00] ss:$8 sps:$4 sm:$0xff]   ;;  %v3387_v22 = vrot.slane %v4982_v44, 1 }
 0x190   : >> { %3297 = vmatpush1.bf16.msra.mxu0 %v4904_v54 }
 0x191   : >> { %3272 = vmatpush2.bf16.msra.mxu1 %v4901_v51  ;;  %3298 = vmatprep.subr.bf16.mxu0 %v4912_v47  ;;  %v4951_v51 = vld [vmem:[%s6515_s1 + $0xce4] ss:$8 sps:$4 sm:$0xff]   ;;  %v4957_v47 = vld [vmem:[%s6515_s1 + $0xcd4] ss:$8 sps:$4 sm:$0xff]  }
 0x192   : >> { %3273 = vmatprep.subr.bf16.mxu1 %v4909_v55  ;;  %v4949_v55 = vld [vmem:[%s6515_s1 + $0xce0] ss:$8 sps:$4 sm:$0xff]  }
 0x194   : >> { %3299 = vmatpush1.bf16.msra.mxu0 %v4910_v61  ;;  %v4961_v61 = vld [vmem:[%s6515_s1 + $0xcc0] ss:$8 sps:$4 sm:$0xff]  }
 0x195   : >> { %3274 = vmatpush2.bf16.msra.mxu1 %v4907_v60  ;;  %3631 = vmatprep.subr.bf16.mxu0 %v4915_v62  ;;  %v4969_v62 = vld [vmem:[%s6515_s1 + $0xcb4] ss:$8 sps:$4 sm:$0xff]  }
 0x196   : >> { %3672 = vmatprep.subr.bf16.mxu1 %v4936_v37  ;;  %v4967_v37 = vld [vmem:[%s6515_s1 + $0xcb0] ss:$8 sps:$4 sm:$0xff]  }
 0x197   : >> { %v1749_v42 = vpop.f32.mrf.mxu0  ;;  %3317 = vmatmul.mubr.bf16.vlgmr.msra.gmra.mxu0 %v2999_v2  ;;  %v4981_v2 = vld [vmem:[%s6515_s1 + $0xc94] ss:$8 sps:$4 sm:$0xff]  }
 0x198   : >> { %v1708_v9 = vpop.f32.mrf.mxu1  ;;  %3276 = vmatmul.mubr.bf16.vlgmr.msra.gmra.mxu1 %v2985_v1  ;;  %3632 = vmatpush1.bf16.msra.mxu0 %v4913_v4  ;;  %v4973_v1 = vld [vmem:[%s6515_s1 + $0xca0] ss:$8 sps:$4 sm:$0xff]   ;;  %v4979_v4 = vld [vmem:[%s6515_s1 + $0xc90] ss:$8 sps:$4 sm:$0xff]  }
 0x199   : >> { %v1750_v10 = vadd.f32 %v1749_v42, %v1708_v9  ;;  %3673 = vmatpush1.bf16.msra.mxu1 %v4934_v5  ;;  %v1751_v15 = vpop.f32.mrf.mxu0  ;;  %3633 = vmatprep.subr.bf16.mxu0 %v4918_v6  ;;  %v4985_v5 = vld [vmem:[%s6515_s1 + $0xc84] ss:$8 sps:$4 sm:$0xff]   ;;  %v4244_v6 = vcombine.low %v6338_v59, %v6338_v59 }
 0x19a   : >> { %v1710_v13 = vpop.f32.mrf.mxu1  ;;  %3674 = vmatprep.subr.bf16.mxu1 %v4942_v52  ;;  %3704 = vmatprep.mubr.bf16.mxu1 %v5004_v14  ;;  %v4924_v14 = vld [vmem:[%s6515_s1 + $0xc44] ss:$8 sps:$4 sm:$0xff]   ;;  %v4983_v52 = vld [vmem:[%s6515_s1 + $0xc80] ss:$8 sps:$4 sm:$0xff]  }
 0x19b   : >> { %v6379_v18 = vadd.f32 %v1750_v10, %v6266_v27  ;;  %v1752_v53 = vadd.f32 %v1751_v15, %v1710_v13  ;;  %3663 = vmatprep.mubr.bf16.mxu0 %v3386_v8  ;;  %v1753_v19 = vpop.f32.mrf.mxu0  ;;  %v4954_v27 = vld [vmem:[%s6515_s1 + $0xd44] ss:$8 sps:$4 sm:$0xff]   ;;  %v3385_v8 = vrot.slane %v4244_v6, 1 }
 0x19c   : >> { %v1712_v20 = vpop.f32.mrf.mxu1  ;;  %3634 = vmatpush1.bf16.msra.mxu0 %v4916_v11 }
 0x19d   : >> { %v6383_v21 = vadd.f32 %v1752_v53, %v6271_v30  ;;  %3675 = vmatpush1.bf16.msra.mxu1 %v4940_v12  ;;  %v1754_v25 = vpop.f32.mrf.mxu0  ;;  %3635 = vmatprep.subr.bf16.mxu0 %v4921_v16  ;;  %v4927_v30 = vld [vmem:[%s6515_s1 + $0xc34] ss:$8 sps:$4 sm:$0xff]  }
 0x19e   : >> { %v1713_v26 = vpop.f32.mrf.mxu1  ;;  %3676 = vmatprep.subr.bf16.mxu1 %v4948_v17 }
 0x1a0   : >> { %3636 = vmatpush1.bf16.msra.mxu0 %v4919_v23 }
 0x1a1   : >> { %3677 = vmatpush1.bf16.msra.mxu1 %v4946_v24  ;;  %3637 = vmatprep.subr.bf16.mxu0 %v4924_v14 }
 0x1a2   : >> { %3678 = vmatprep.subr.bf16.mxu1 %v4954_v27 }
 0x1a4   : >> { %3638 = vmatpush1.bf16.msra.mxu0 %v4922_v28 }
 0x1a5   : >> { %3679 = vmatpush1.bf16.msra.mxu1 %v4952_v29  ;;  %3639 = vmatprep.subr.bf16.mxu0 %v4927_v30 }
 0x1a6   : >> { %3680 = vmatprep.subr.bf16.mxu1 %v4960_v31 }
 0x1a8   : >> { %3640 = vmatpush1.bf16.msra.mxu0 %v4925_v32 }
 0x1a9   : >> { %3681 = vmatpush1.bf16.msra.mxu1 %v4958_v3  ;;  %3641 = vmatprep.subr.bf16.mxu0 %v4930_v33 }
 0x1aa   : >> { %3682 = vmatprep.subr.bf16.mxu1 %v4966_v7 }
 0x1ac   : >> { %3642 = vmatpush1.bf16.msra.mxu0 %v4928_v34 }
 0x1ad   : >> { %3683 = vmatpush1.bf16.msra.mxu1 %v4964_v35  ;;  %3643 = vmatprep.subr.bf16.mxu0 %v4933_v36 }
 0x1ae   : >> { %3684 = vmatprep.subr.bf16.mxu1 %v4972_v38 }
 0x1b0   : >> { %3644 = vmatpush1.bf16.msra.mxu0 %v4931_v39 }
 0x1b1   : >> { %3685 = vmatpush1.bf16.msra.mxu1 %v4970_v40  ;;  %3645 = vmatprep.subr.bf16.mxu0 %v4939_v41 }
 0x1b2   : >> { %3686 = vmatprep.subr.bf16.mxu1 %v4978_v43 }
 0x1b4   : >> { %3646 = vmatpush1.bf16.msra.mxu0 %v4937_v46 }
 0x1b5   : >> { %3687 = vmatpush1.bf16.msra.mxu1 %v4976_v48  ;;  %3647 = vmatprep.subr.bf16.mxu0 %v4945_v49 }
 0x1b8   : >> { %3705 = vmatmul.mubr.bf16.vlgmr.msra.gmra.mxu1 %v3387_v22  ;;  %v2145_v54 = vpop.f32.mrf.mxu1  ;;  %3648 = vmatpush2.bf16.msra.mxu0 %v4943_v50 }
 0x1b9   : >> { %3649 = vmatprep.subr.bf16.mxu0 %v4951_v51 }
 0x1ba   : >> { %v2147_v45 = vpop.f32.mrf.mxu1 }
 0x1bc   : >> { %v2149_v56 = vpop.f32.mrf.mxu1  ;;  %3650 = vmatpush2.bf16.msra.mxu0 %v4949_v55 }
 0x1bd   : >> { %3651 = vmatprep.subr.bf16.mxu0 %v4957_v47  ;;  %v3716_v47 = vlaneseq }
 0x1be   : >> { %v2150_v60 = vpop.f32.mrf.mxu1 }
 0x1c0   : >> { %3652 = vmatpush2.bf16.msra.mxu0 %v4955_v57 }
 0x1c1   : >> { %3653 = vmatprep.subr.bf16.mxu0 %v4963_v58 }
 0x1c4   : >> { %3654 = vmatpush2.bf16.msra.mxu0 %v4961_v61 }
 0x1c5   : >> { %3655 = vmatprep.subr.bf16.mxu0 %v4969_v62 }
 0x1c8   : >> { %3656 = vmatpush2.bf16.msra.mxu0 %v4967_v37 }
 0x1c9   : >> { %3657 = vmatprep.subr.bf16.mxu0 %v4975_v63 }
 0x1cc   : >> { %3658 = vmatpush2.bf16.msra.mxu0 %v4973_v1 }
 0x1cd   : >> { %3659 = vmatprep.subr.bf16.mxu0 %v4981_v2 }
 0x1d0   : >> { %3660 = vmatpush2.bf16.msra.mxu0 %v4979_v4 }
 0x1d1   : >> { %3661 = vmatprep.subr.bf16.mxu0 %v4985_v5 }
 0x1d4   : >> { %3662 = vmatpush2.bf16.msra.mxu0 %v4983_v52 }
 0x1d7   : >> { %v2104_v9 = vpop.f32.mrf.mxu0  ;;  %3664 = vmatmul.mubr.bf16.vlgmr.msra.gmra.mxu0 %v3385_v8 }
 0x1d8   : >> { %v2146_v42 = vadd.f32 %v2145_v54, %v2104_v9 }
 0x1d9   : >> { %v2106_v10 = vpop.f32.mrf.mxu0 }
 0x1da   : >> { %v2152_v11 = vadd.f32 %v2146_v42, %v6379_v18  ;;  %v2148_v12 = vadd.f32 %v2147_v45, %v2106_v10  ;;  %v3717_v45 = vshrl.u32 %v3716_v47, 7 }
 0x1db   : >> { %v2108_v13 = vpop.f32.mrf.mxu0 }
 0x1dc   : >> { %v2153_v15 = vadd.f32 %v2148_v12, %v6383_v21  ;;  %v3718_v56 = vsub.s32 0, %v3717_v45  ;;  %v3722_v58 = vsub.s32 1, %v3717_v45 }
 0x1dd   : >> { %v2109_v16 = vpop.f32.mrf.mxu0 }
 0x1de   : >> { %v3719_v62 = vrot.slane %v5036_v0, %v3718_v56  ;;  %v3723_v4 = vrot.slane %v5036_v0, %v3722_v58  ;;  %v4297_v16 = vld [vmem:[%s3798_s29 + $0x8] sm:$0x33] }
 0x1f7   : >> { %v2533_v17 = vpop.f32.mrf.mxu0 }
 0x1f8   : >> { %v2492_v59 = vpop.f32.mrf.mxu1 }
 0x1f9   : >> { %v2534_v53 = vadd.f32 %v2533_v17, %v2492_v59  ;;  %v2535_v20 = vpop.f32.mrf.mxu0 }
 0x1fa   : >> { %v2494_v19 = vpop.f32.mrf.mxu1 }
 0x1fb   : >> { %v2540_v23 = vadd.f32 %v2534_v53, %v2152_v11  ;;  %v2536_v24 = vadd.f32 %v2535_v20, %v2494_v19  ;;  %v2537_v25 = vpop.f32.mrf.mxu0 }
 0x1fc   : >> { %v2496_v14 = vpop.f32.mrf.mxu1 }
 0x1fd   : >> { %v2541_v26 = vadd.f32 %v2536_v24, %v2153_v15  ;;  %v2538_v27 = vpop.f32.mrf.mxu0 }
 0x1fe   : >> { %v2497_v28 = vpop.f32.mrf.mxu1 }
 0x218   : >> { %v2922_v29 = vpop.f32.mrf.mxu1 }
 0x21a   : >> { %v2924_v30 = vpop.f32.mrf.mxu1 }
 0x21c   : >> { %v2926_v18 = vpop.f32.mrf.mxu1 }
 0x21e   : >> { %v2927_v31 = vpop.f32.mrf.mxu1 }
 0x237   : >> { %v2881_v32 = vpop.f32.mrf.mxu0 }
 0x238   : >> { %v2923_v3 = vadd.f32 %v2922_v29, %v2881_v32 }
 0x239   : >> { %v2883_v21 = vpop.f32.mrf.mxu0 }
 0x23a   : >> { %v2929_v33 = vadd.f32 %v2923_v3, %v2540_v23  ;;  %v2925_v7 = vadd.f32 %v2924_v30, %v2883_v21 }
 0x23b   : >> { %v2885_v34 = vpop.f32.mrf.mxu0 }
 0x23c   : >> { %v2930_v35 = vadd.f32 %v2925_v7, %v2541_v26 }
 0x23d   : >> { %v2886_v36 = vpop.f32.mrf.mxu0 }
 0x257   : >> { %v3318_v39 = vpop.f32.mrf.mxu0 }
 0x258   : >> { %v3277_v38 = vpop.f32.mrf.mxu1 }
 0x259   : >> { %v3319_v40 = vadd.f32 %v3318_v39, %v3277_v38  ;;  %v3320_v43 = vpop.f32.mrf.mxu0 }
 0x25a   : >> { %v3279_v41 = vpop.f32.mrf.mxu1 }
 0x25b   : >> { %v3325_v44 = vadd.f32 %v3319_v40, %v2929_v33  ;;  %v3322_v46 = vpop.f32.mrf.mxu0  ;;  %v3321_v57 = vadd.f32 %v3320_v43, %v3279_v41 }
 0x25c   : >> { %v3281_v48 = vpop.f32.mrf.mxu1 }
 0x25d   : >> { %v3323_v49 = vpop.f32.mrf.mxu0  ;;  %v3326_v63 = vadd.f32 %v3321_v57, %v2930_v35 }
 0x25e   : >> { %v3282_v22 = vpop.f32.mrf.mxu1 }
 0x278   : >> { %v3706_v50 = vpop.f32.mrf.mxu1 }
 0x27a   : >> { %v3708_v51 = vpop.f32.mrf.mxu1 }
 0x27c   : >> { %v3710_v54 = vpop.f32.mrf.mxu1 }
 0x27e   : >> { %v3711_v55 = vpop.f32.mrf.mxu1 }
 0x297   : >> { %v3665_v60 = vpop.f32.mrf.mxu0 }
 0x298   : >> { %v3707_v61 = vadd.f32 %v3706_v50, %v3665_v60 }
 0x299   : >> { %v3667_v37 = vpop.f32.mrf.mxu0 }
 0x29a   : >> { %v3713_v1 = vadd.f32 %v3707_v61, %v3325_v44  ;;  %v3709_v2 = vadd.f32 %v3708_v51, %v3667_v37 }
 0x29b   : >> { %v3669_v5 = vpop.f32.mrf.mxu0 }
 0x29c   : >> { %v3726_v6 = vadd.f32 %v3719_v62, %v3713_v1  ;;  %v3714_v52 = vadd.f32 %v3709_v2, %v3326_v63 }
 0x29d   : >> { %v3670_v8 = vpop.f32.mrf.mxu0 }
 0x29e   : >> { %v3727_v9 = vadd.f32 %v3723_v4, %v3714_v52  ;;  %v3728_v42 = vmax.f32 %v3726_v6, 0.0 }
 0x2a0   : >> { %v3729_v10 = vmax.f32 %v3727_v9, 0.0 }
 0x2a2   : >> { %v4302_v11 = vpack.c.bf16 %v3729_v10, %v3728_v42 }
 0x2a4   : >> { %v3738_v12 = vshrl.u32 %v4302_v11, 16  ;;  %v3741_v15 = vshll.u32 %v4302_v11, 16 }
 0x2a6   : >> { %v3740_v13 = vrot.slane %v3738_v12, 7 }
 0x2a7   : > { %199 = sbr.rel (!%p197_p4) target bundleno = 22 (0x16), region = 73 }
 0x2a8   : >> { %v3743_v59 = vor.u32 %v3741_v15, %v3740_v13 }
 0x2aa   : >> { %v3756_v17 = vsel %vm3754_vm13, %v3743_v59, %v4297_v16 }
 0x2ab   : >> { %4298 = vst [vmem:[%s3798_s29 + $0x8] sm:$0x33] %v3756_v17 }
 0x2ac PF: > { %s13_s12 = sadd.s32 1, %s4998_s12  }
 0x2ad   : > { %p10_p5 = scmp.ge.s32.totalorder %s13_s12, 4  }
 0x2af   :  { %12 = sbr.rel (!%p10_p5) target bundleno = 1 (0x1), region = 84 }

// kernel: features_forward.11
= control target key start
LH: loop header
LB: loop body
LE: loop exit
PB: predicated region body
PF: predicated region fallthrough
CT: control target
= control target key end

     0   :  { %s5405_s12 = smov 0   ;;  %s6930_s0 = inlined_call_operand.vmem [shape: bf16[2,5,5,256], index: 0, kind: input, shape index: {}]   ;;  %s6931_s1 = inlined_call_operand.vmem [shape: bf16[2304,384], index: 1, kind: input, shape index: {}]   ;;  %s6932_s2 = inlined_call_operand.vmem [shape: f32[1,384], index: 2, kind: input, shape index: {}]   ;;  %s6933_s3 = inlined_call_operand.vmem [shape: bf16[2,5,5,384], index: 3, kind: output, shape index: {}]  }
   0x1 LB: > { %s4095_s13 = sadd.s32 4294967295, %s5379_s12   ;;  %p4099_p0 = scmp.ge.s32.totalorder %s5379_s12, 1  ;;  %s5379_s12 = sphi %s5405_s12, %s13_s12  }
   0x2   : > { %p137_p1 = scmp.lt.s32.totalorder %s5379_s12, 3 }
   0x4   : > { %p138_p2 = pnand %p4099_p0, %p137_p1 }
   0x5   : > { %p161_p3 = scmp.lt.s32.totalorder (!%p138_p2), %s4095_s13, 1  ;;  %s5478_s24 = smov (!%p138_p2), 0  }
   0x6   : > { %141 = sbr.rel (%p138_p2) target bundleno = 686 (0x2ae), region = 32 }
   0xb   : > { %v5416_v0 = vld [vmem:[%s6932_s2] sm:$0x7]  ;;  %vm173_vm0 = vcmask 1042432   ;;  %vm174_vm1 = vsmask.f32 2304  ;;  %vm176_vm2 = vcmask 1046532  }
   0xc   : > { %vm177_vm3 = vsmask.f32 6400  ;;  %s6941_s13 = smov (!%p161_p3, %s4095_s13), 1  ;;  %vm5418_vm4 = vmand %vm173_vm0, %vm174_vm1 }
   0xd   : > { %vm178_vm5 = vmand %vm176_vm2, %vm177_vm3  ;;  %s4763_s16 = smul.u32 40, %s6941_s13 }
   0xe   : > { %s4764_s17 = smul.u32 60, %s6941_s13  ;;  %vm5429_vm6 = vmor %vm178_vm5, %vm5418_vm4 }
   0xf   : > { %s5425_s20 = scalar_lea.vmem %s6930_s0, %s4763_s16 }
  0x10   : > { %s5436_s23 = scalar_lea.vmem %s6933_s3, %s4764_s17 }
  0x11   : > { %v180_v3 = vld [vmem:[%s5436_s23] sm:$0x77]  ;;  %v183_v4 = vld [vmem:[%s5436_s23 + $0x8] sm:$0x7]  ;;  %v186_v5 = vld [vmem:[%s5436_s23 + $0xc] sm:$0x77] }
  0x12   : > { %v181_v6 = vsel %vm5429_vm6, 0, %v180_v3  ;;  %v184_v7 = vsel %vm5418_vm4, 0, %v183_v4  ;;  %v187_v8 = vsel %vm5429_vm6, 0, %v186_v5  ;;  %v189_v9 = vld [vmem:[%s5436_s23 + $0x14] sm:$0x7] }
  0x13   : > { %182 = vst [vmem:[%s5436_s23] sm:$0x77] %v181_v6  ;;  %185 = vst [vmem:[%s5436_s23 + $0x8] sm:$0x7] %v184_v7  ;;  %v190_v10 = vsel %vm5418_vm4, 0, %v189_v9  ;;  %v192_v11 = vld [vmem:[%s5436_s23 + $0x18] sm:$0x77] }
  0x14   : > { %188 = vst [vmem:[%s5436_s23 + $0xc] sm:$0x77] %v187_v8  ;;  %v195_v12 = vld [vmem:[%s5436_s23 + $0x20] sm:$0x7]  ;;  %191 = vst [vmem:[%s5436_s23 + $0x14] sm:$0x7] %v190_v10 }
  0x15   : > { %v193_v13 = vsel %vm5429_vm6, 0, %v192_v11  ;;  %v196_v14 = vsel %vm5418_vm4, 0, %v195_v12  ;;  %v198_v15 = vld [vmem:[%s5436_s23 + $0x24] sm:$0x77]  ;;  %v201_v16 = vld [vmem:[%s5436_s23 + $0x2c] sm:$0x7] }
  0x16   : > { %194 = vst [vmem:[%s5436_s23 + $0x18] sm:$0x77] %v193_v13  ;;  %197 = vst [vmem:[%s5436_s23 + $0x20] sm:$0x7] %v196_v14  ;;  %v199_v17 = vsel %vm5429_vm6, 0, %v198_v15  ;;  %v202_v18 = vsel %vm5418_vm4, 0, %v201_v16 }
  0x17   : > { %v204_v19 = vld [vmem:[%s5436_s23 + $0x30] sm:$0x77]  ;;  %v207_v20 = vld [vmem:[%s5436_s23 + $0x38] sm:$0x7]  ;;  %200 = vst [vmem:[%s5436_s23 + $0x24] sm:$0x77] %v199_v17 }
  0x18   : > { %203 = vst [vmem:[%s5436_s23 + $0x2c] sm:$0x7] %v202_v18  ;;  %v205_v21 = vsel %vm5429_vm6, 0, %v204_v19  ;;  %v208_v22 = vsel %vm5418_vm4, 0, %v207_v20 }
  0x19   : > { %206 = vst [vmem:[%s5436_s23 + $0x30] sm:$0x77] %v205_v21  ;;  %209 = vst [vmem:[%s5436_s23 + $0x38] sm:$0x7] %v208_v22 }
  0x1a LB: >> { %v4781_v23 = vld [vmem:[%s6931_s1 + $0x22c] ss:$12 sps:$4 sm:$0xff]   ;;  %v4783_v24 = vld [vmem:[%s6931_s1 + $0x2f0] ss:$12 sps:$4 sm:$0xff]   ;;  %v4784_v25 = vld [vmem:[%s6931_s1 + $0x228] ss:$12 sps:$4 sm:$0xff]   ;;  %s5383_s24 = sphi %s5478_s24, %s215_s24  }
  0x1b   : >> { %625 = vmatprep.subr.bf16.mxu0 %v4781_v23  ;;  %4565 = vmatprep.subr.bf16.mxu1 %v4783_v24  ;;  %v4785_v26 = vld [vmem:[%s6931_s1 + $0x230] ss:$12 sps:$4 sm:$0xff]   ;;  %v4786_v27 = vld [vmem:[%s6931_s1 + $0x214] ss:$12 sps:$4 sm:$0xff]   ;;  %v4788_v28 = vld [vmem:[%s6931_s1 + $0x2d8] ss:$12 sps:$4 sm:$0xff]  }
  0x1c   : >> { %626 = vmatpush1.bf16.msra.mxu0 %v4784_v25  ;;  %4566 = vmatpush3.bf16.msra.mxu1 %v4785_v26  ;;  %v4789_v29 = vld [vmem:[%s6931_s1 + $0x210] ss:$12 sps:$4 sm:$0xff]   ;;  %v4790_v30 = vld [vmem:[%s6931_s1 + $0x218] ss:$12 sps:$4 sm:$0xff]   ;;  %v4793_v32 = vld [vmem:[%s6931_s1 + $0x2c0] ss:$12 sps:$4 sm:$0xff]  }
  0x1d   : >> { %627 = vmatprep.subr.bf16.mxu0 %v4786_v27  ;;  %4567 = vmatprep.subr.bf16.mxu1 %v4788_v28  ;;  %v4791_v31 = vld [vmem:[%s6931_s1 + $0x1fc] ss:$12 sps:$4 sm:$0xff]   ;;  %v4794_v33 = vld [vmem:[%s6931_s1 + $0x1f8] ss:$12 sps:$4 sm:$0xff]   ;;  %v4795_v34 = vld [vmem:[%s6931_s1 + $0x200] ss:$12 sps:$4 sm:$0xff]  }
  0x1e   : >> { %v4796_v35 = vld [vmem:[%s6931_s1 + $0x1e4] ss:$12 sps:$4 sm:$0xff]   ;;  %v4798_v36 = vld [vmem:[%s6931_s1 + $0x2a8] ss:$12 sps:$4 sm:$0xff]   ;;  %v4799_v37 = vld [vmem:[%s6931_s1 + $0x1e0] ss:$12 sps:$4 sm:$0xff]  }
  0x1f   : >> { %v4800_v38 = vld [vmem:[%s6931_s1 + $0x1e8] ss:$12 sps:$4 sm:$0xff]   ;;  %v4801_v39 = vld [vmem:[%s6931_s1 + $0x1cc] ss:$12 sps:$4 sm:$0xff]   ;;  %v4803_v40 = vld [vmem:[%s6931_s1 + $0x290] ss:$12 sps:$4 sm:$0xff]  }
  0x20   : >> { %628 = vmatpush1.bf16.msra.mxu0 %v4789_v29  ;;  %4568 = vmatpush3.bf16.msra.mxu1 %v4790_v30  ;;  %v4804_v41 = vld [vmem:[%s6931_s1 + $0x1c8] ss:$12 sps:$4 sm:$0xff]   ;;  %v4805_v42 = vld [vmem:[%s6931_s1 + $0x1d0] ss:$12 sps:$4 sm:$0xff]   ;;  %v4808_v44 = vld [vmem:[%s6931_s1 + $0x278] ss:$12 sps:$4 sm:$0xff]  }
  0x21   : >> { %629 = vmatprep.subr.bf16.mxu0 %v4791_v31  ;;  %4569 = vmatprep.subr.bf16.mxu1 %v4793_v32  ;;  %v4806_v43 = vld [vmem:[%s6931_s1 + $0x1b4] ss:$12 sps:$4 sm:$0xff]   ;;  %v4809_v45 = vld [vmem:[%s6931_s1 + $0x1b0] ss:$12 sps:$4 sm:$0xff]   ;;  %v4810_v46 = vld [vmem:[%s6931_s1 + $0x1b8] ss:$12 sps:$4 sm:$0xff]  }
  0x22   : >> { %s4562_s27 = sshll.u32 %s5383_s24, 3  ;;  %v4811_v47 = vld [vmem:[%s6931_s1 + $0x19c] ss:$12 sps:$4 sm:$0xff]   ;;  %v4813_v48 = vld [vmem:[%s6931_s1 + $0x260] ss:$12 sps:$4 sm:$0xff]   ;;  %s4063_s25 = smul.u32 12, %s5383_s24 }
  0x23   : >> { %v4814_v49 = vld [vmem:[%s6931_s1 + $0x198] ss:$12 sps:$4 sm:$0xff]   ;;  %s5566_s7 = scalar_lea.vmem %s5425_s20, %s4562_s27  ;;  %v4815_v50 = vld [vmem:[%s6931_s1 + $0x1a0] ss:$12 sps:$4 sm:$0xff]   ;;  %v4818_v52 = vld [vmem:[%s6931_s1 + $0x248] ss:$12 sps:$4 sm:$0xff]  }
  0x24   : >> { %630 = vmatpush1.bf16.msra.mxu0 %v4794_v33  ;;  %4570 = vmatpush3.bf16.msra.mxu1 %v4795_v34  ;;  %v4816_v51 = vld [vmem:[%s6931_s1 + $0x184] ss:$12 sps:$4 sm:$0xff]   ;;  %v4819_v53 = vld [vmem:[%s6931_s1 + $0x180] ss:$12 sps:$4 sm:$0xff]   ;;  %v4820_v55 = vld [vmem:[%s6931_s1 + $0x188] ss:$12 sps:$4 sm:$0xff]   ;;  %s6908_s26 = scalar_lea.vmem %s5436_s23, %s4063_s25 }
  0x25   : >> { %631 = vmatprep.subr.bf16.mxu0 %v4796_v35  ;;  %4571 = vmatprep.subr.bf16.mxu1 %v4798_v36  ;;  %v219_v54 = vld [vmem:[%s5566_s7] sm:$0x33]  ;;  %v4821_v58 = vld [vmem:[%s6931_s1 + $0x2ec] ss:$12 sps:$4 sm:$0xff]   ;;  %v4828_v2 = vld [vmem:[%s6931_s1 + $0x2e8] ss:$12 sps:$4 sm:$0xff]  }
  0x26   : >> { %v5584_v56 = vcombine.low %v219_v54, %v219_v54  ;;  %v5586_v57 = vcombine.high %v219_v54, %v219_v54  ;;  %v4827_v59 = vld [vmem:[%s6931_s1 + $0xac] ss:$12 sps:$4 sm:$0xff]   ;;  %v4829_v4 = vld [vmem:[%s6931_s1 + $0x2d4] ss:$12 sps:$4 sm:$0xff]   ;;  %v4834_v9 = vld [vmem:[%s6931_s1 + $0x2d0] ss:$12 sps:$4 sm:$0xff]  }
  0x27   : >> { %v4825_v6 = vld [vmem:[%s6931_s1 + $0xa8] ss:$12 sps:$4 sm:$0xff]   ;;  %v4831_v11 = vld [vmem:[%s6931_s1 + $0x90] ss:$12 sps:$4 sm:$0xff]   ;;  %v4840_v13 = vld [vmem:[%s6931_s1 + $0x2b8] ss:$12 sps:$4 sm:$0xff]  }
  0x28   : >> { %632 = vmatpush1.bf16.msra.mxu0 %v4799_v37  ;;  %4572 = vmatpush3.bf16.msra.mxu1 %v4800_v38  ;;  %v361_v60 = vshrl.u32 %v5586_v57, 16  ;;  %v363_v61 = vshll.u32 %v5586_v57, 16  ;;  %v354_v62 = vshrl.u32 %v5584_v56, 16  ;;  %v356_v63 = vshll.u32 %v5584_v56, 16  ;;  %v4833_v8 = vld [vmem:[%s6931_s1 + $0x94] ss:$12 sps:$4 sm:$0xff]  }
  0x29   : >> { %633 = vmatprep.subr.bf16.mxu0 %v4801_v39  ;;  %4573 = vmatprep.subr.bf16.mxu1 %v4803_v40  ;;  %v4835_v10 = vld [vmem:[%s6931_s1 + $0x2bc] ss:$12 sps:$4 sm:$0xff]   ;;  %v4841_v14 = vld [vmem:[%s6931_s1 + $0x2a4] ss:$12 sps:$4 sm:$0xff]   ;;  %v4846_v17 = vld [vmem:[%s6931_s1 + $0x2a0] ss:$12 sps:$4 sm:$0xff]  }
  0x2a   : >> { %v365_v1 = vrot.slane %v363_v61, 1  ;;  %v358_v3 = vrot.slane %v356_v63, 1  ;;  %v4839_v12 = vld [vmem:[%s6931_s1 + $0x7c] ss:$12 sps:$4 sm:$0xff]   ;;  %v4837_v15 = vld [vmem:[%s6931_s1 + $0x78] ss:$12 sps:$4 sm:$0xff]  }
  0x2b   : >> { %v4845_v16 = vld [vmem:[%s6931_s1 + $0x64] ss:$12 sps:$4 sm:$0xff]   ;;  %v4847_v18 = vld [vmem:[%s6931_s1 + $0x28c] ss:$12 sps:$4 sm:$0xff]   ;;  %v4852_v21 = vld [vmem:[%s6931_s1 + $0x288] ss:$12 sps:$4 sm:$0xff]  }
  0x2c   : >> { %634 = vmatpush1.bf16.msra.mxu0 %v4804_v41  ;;  %4574 = vmatpush3.bf16.msra.mxu1 %v4805_v42  ;;  %v366_v5 = vor.u32 %v365_v1, %v361_v60  ;;  %v5607_v7 = vor.u32 %v358_v3, %v354_v62  ;;  %v4843_v19 = vld [vmem:[%s6931_s1 + $0x60] ss:$12 sps:$4 sm:$0xff]   ;;  %v4849_v23 = vld [vmem:[%s6931_s1 + $0x48] ss:$12 sps:$4 sm:$0xff]   ;;  %v4858_v25 = vld [vmem:[%s6931_s1 + $0x270] ss:$12 sps:$4 sm:$0xff]  }
  0x2d   : >> { %635 = vmatprep.subr.bf16.mxu0 %v4806_v43  ;;  %4575 = vmatprep.subr.bf16.mxu1 %v4808_v44  ;;  %v4851_v20 = vld [vmem:[%s6931_s1 + $0x4c] ss:$12 sps:$4 sm:$0xff]   ;;  %v4853_v22 = vld [vmem:[%s6931_s1 + $0x274] ss:$12 sps:$4 sm:$0xff]   ;;  %v4859_v26 = vld [vmem:[%s6931_s1 + $0x25c] ss:$12 sps:$4 sm:$0xff]  }
  0x2e   : >> { %698 = vmatprep.mubr.bf16.mxu1 %v366_v5  ;;  %657 = vmatprep.mubr.bf16.mxu0 %v366_v5  ;;  %v4857_v24 = vld [vmem:[%s6931_s1 + $0x34] ss:$12 sps:$4 sm:$0xff]   ;;  %v4855_v27 = vld [vmem:[%s6931_s1 + $0x30] ss:$12 sps:$4 sm:$0xff]   ;;  %v4864_v29 = vld [vmem:[%s6931_s1 + $0x258] ss:$12 sps:$4 sm:$0xff]  }
  0x2f   : >> { %v4863_v28 = vld [vmem:[%s6931_s1 + $0x1c] ss:$12 sps:$4 sm:$0xff]   ;;  %v4865_v30 = vld [vmem:[%s6931_s1 + $0x244] ss:$12 sps:$4 sm:$0xff]   ;;  %v4870_v33 = vld [vmem:[%s6931_s1 + $0x240] ss:$12 sps:$4 sm:$0xff]  }
  0x30   : >> { %636 = vmatpush1.bf16.msra.mxu0 %v4809_v45  ;;  %4576 = vmatpush3.bf16.msra.mxu1 %v4810_v46  ;;  %v4861_v31 = vld [vmem:[%s6931_s1 + $0x18] ss:$12 sps:$4 sm:$0xff]   ;;  %v4874_v34 = vld [vmem:[%s6931_s1 + $0x170] ss:$12 sps:$4 sm:$0xff]   ;;  %v4867_v35 = vld [vmem:[%s6931_s1] ss:$12 sps:$4 sm:$0xff]  }
  0x31   : >> { %637 = vmatprep.subr.bf16.mxu0 %v4811_v47  ;;  %4577 = vmatprep.subr.bf16.mxu1 %v4813_v48  ;;  %v4869_v32 = vld [vmem:[%s6931_s1 + $0x4] ss:$12 sps:$4 sm:$0xff]   ;;  %v4873_v36 = vld [vmem:[%s6931_s1 + $0x16c] ss:$12 sps:$4 sm:$0xff]   ;;  %v4871_v39 = vld [vmem:[%s6931_s1 + $0x168] ss:$12 sps:$4 sm:$0xff]  }
  0x32   : >> { %v4875_v37 = vld [vmem:[%s6931_s1 + $0xb0] ss:$12 sps:$4 sm:$0xff]   ;;  %v4879_v38 = vld [vmem:[%s6931_s1 + $0x158] ss:$12 sps:$4 sm:$0xff]   ;;  %v4878_v40 = vld [vmem:[%s6931_s1 + $0x154] ss:$12 sps:$4 sm:$0xff]  }
  0x33   : >> { %v4880_v41 = vld [vmem:[%s6931_s1 + $0x98] ss:$12 sps:$4 sm:$0xff]   ;;  %v4884_v42 = vld [vmem:[%s6931_s1 + $0x140] ss:$12 sps:$4 sm:$0xff]   ;;  %v4876_v43 = vld [vmem:[%s6931_s1 + $0x150] ss:$12 sps:$4 sm:$0xff]  }
  0x34   : >> { %638 = vmatpush1.bf16.msra.mxu0 %v4814_v49  ;;  %4578 = vmatpush3.bf16.msra.mxu1 %v4815_v50  ;;  %v4883_v44 = vld [vmem:[%s6931_s1 + $0x13c] ss:$12 sps:$4 sm:$0xff]   ;;  %v4885_v45 = vld [vmem:[%s6931_s1 + $0x80] ss:$12 sps:$4 sm:$0xff]   ;;  %v4881_v47 = vld [vmem:[%s6931_s1 + $0x138] ss:$12 sps:$4 sm:$0xff]  }
  0x35   : >> { %639 = vmatprep.subr.bf16.mxu0 %v4816_v51  ;;  %4579 = vmatprep.subr.bf16.mxu1 %v4818_v52  ;;  %v4889_v46 = vld [vmem:[%s6931_s1 + $0x128] ss:$12 sps:$4 sm:$0xff]   ;;  %v4888_v48 = vld [vmem:[%s6931_s1 + $0x124] ss:$12 sps:$4 sm:$0xff]   ;;  %v4886_v51 = vld [vmem:[%s6931_s1 + $0x120] ss:$12 sps:$4 sm:$0xff]  }
  0x36   : >> { %v4890_v49 = vld [vmem:[%s6931_s1 + $0x68] ss:$12 sps:$4 sm:$0xff]   ;;  %v4894_v50 = vld [vmem:[%s6931_s1 + $0x110] ss:$12 sps:$4 sm:$0xff]   ;;  %v4893_v52 = vld [vmem:[%s6931_s1 + $0x10c] ss:$12 sps:$4 sm:$0xff]  }
  0x37   : >> { %v4899_v54 = vld [vmem:[%s6931_s1 + $0xf8] ss:$12 sps:$4 sm:$0xff]   ;;  %v4896_v60 = vld [vmem:[%s6931_s1 + $0xf0] ss:$12 sps:$4 sm:$0xff]   ;;  %v4905_v62 = vld [vmem:[%s6931_s1 + $0x20] ss:$12 sps:$4 sm:$0xff]  }
  0x38   : >> { %640 = vmatpush1.bf16.msra.mxu0 %v4819_v53  ;;  %4580 = vmatpush3.bf16.msra.mxu1 %v4820_v55  ;;  %v4895_v53 = vld [vmem:[%s6931_s1 + $0x50] ss:$12 sps:$4 sm:$0xff]   ;;  %v4891_v55 = vld [vmem:[%s6931_s1 + $0x108] ss:$12 sps:$4 sm:$0xff]   ;;  %v4901_v1 = vld [vmem:[%s6931_s1 + $0xd8] ss:$12 sps:$4 sm:$0xff]  }
  0x39   : >> { %641 = vmatprep.subr.bf16.mxu0 %v4821_v58  ;;  %964 = vmatprep.subr.bf16.mxu1 %v4827_v59  ;;  %v4900_v58 = vld [vmem:[%s6931_s1 + $0x38] ss:$12 sps:$4 sm:$0xff]   ;;  %v4904_v59 = vld [vmem:[%s6931_s1 + $0xe0] ss:$12 sps:$4 sm:$0xff]   ;;  %v4903_v61 = vld [vmem:[%s6931_s1 + $0xdc] ss:$12 sps:$4 sm:$0xff]  }
  0x3a   : >> { %v4909_v63 = vld [vmem:[%s6931_s1 + $0xc8] ss:$12 sps:$4 sm:$0xff]   ;;  %v4906_v5 = vld [vmem:[%s6931_s1 + $0xc0] ss:$12 sps:$4 sm:$0xff]   ;;  %vm4011_vm7 = vcmask 1041408   ;;  %vm4014_vm10 = vcmask 1045508  }
  0x3b   : >> { %699 = vmatmul.mubr.bf16.vlgmr.msra.gmra.mxu1 %v5607_v7  ;;  %v4910_v3 = vld [vmem:[%s6931_s1 + $0x8] ss:$12 sps:$4 sm:$0xff]   ;;  %vm4012_vm8 = vsmask.f32 7938  ;;  %vm4015_vm11 = vsmask.f32 7954 }
  0x3c   : >> { %642 = vmatpush2.bf16.msra.mxu0 %v4828_v2  ;;  %965 = vmatpush1.bf16.msra.mxu1 %v4825_v6  ;;  %v4908_v2 = vld [vmem:[%s6931_s1 + $0xc4] ss:$12 sps:$4 sm:$0xff]   ;;  %vm6910_vm9 = vmand %vm4011_vm7, %vm4012_vm8  ;;  %s215_s24 = sadd.s32 1, %s5383_s24  }
  0x3d   : >> { %643 = vmatprep.subr.bf16.mxu0 %v4829_v4  ;;  %966 = vmatprep.subr.bf16.mxu1 %v4833_v8  ;;  %v4913_v4 = vld [vmem:[%s6931_s1 + $0x3ac] ss:$12 sps:$4 sm:$0xff]   ;;  %v4914_v6 = vld [vmem:[%s6931_s1 + $0x470] ss:$12 sps:$4 sm:$0xff]   ;;  %v4918_v8 = vld [vmem:[%s6931_s1 + $0x394] ss:$12 sps:$4 sm:$0xff]  }
  0x3e   : >> { %996 = vmatprep.mubr.bf16.mxu1 %v5586_v57  ;;  %vm4016_vm12 = vmand %vm4014_vm10, %vm4015_vm11  ;;  %p212_p4 = scmp.ge.s32.totalorder %s215_s24, 3  }
  0x3f   : >> { %vm4017_vm13 = vmor %vm4016_vm12, %vm6910_vm9 }
  0x40   : >> { %644 = vmatpush2.bf16.msra.mxu0 %v4834_v9  ;;  %967 = vmatpush1.bf16.msra.mxu1 %v4831_v11  ;;  %v4915_v9 = vld [vmem:[%s6931_s1 + $0x3b0] ss:$12 sps:$4 sm:$0xff]  }
  0x41   : >> { %645 = vmatprep.subr.bf16.mxu0 %v4835_v10  ;;  %968 = vmatprep.subr.bf16.mxu1 %v4839_v12  ;;  %v4919_v10 = vld [vmem:[%s6931_s1 + $0x458] ss:$12 sps:$4 sm:$0xff]   ;;  %v4916_v11 = vld [vmem:[%s6931_s1 + $0x390] ss:$12 sps:$4 sm:$0xff]  }
  0x42   : >> { %v4923_v12 = vld [vmem:[%s6931_s1 + $0x37c] ss:$12 sps:$4 sm:$0xff]  }
  0x44   : >> { %646 = vmatpush2.bf16.msra.mxu0 %v4840_v13  ;;  %969 = vmatpush1.bf16.msra.mxu1 %v4837_v15  ;;  %v4920_v13 = vld [vmem:[%s6931_s1 + $0x398] ss:$12 sps:$4 sm:$0xff]   ;;  %v4924_v15 = vld [vmem:[%s6931_s1 + $0x440] ss:$12 sps:$4 sm:$0xff]  }
  0x45   : >> { %647 = vmatprep.subr.bf16.mxu0 %v4841_v14  ;;  %970 = vmatprep.subr.bf16.mxu1 %v4845_v16  ;;  %v1045_v14 = vld [vmem:[%s5566_s7] sm:$0x66] }
  0x46   : >> { %v4203_v16 = vcombine.high %v1045_v14, %v1045_v14 }
  0x48   : >> { %648 = vmatpush2.bf16.msra.mxu0 %v4846_v17  ;;  %971 = vmatpush1.bf16.msra.mxu1 %v4843_v19  ;;  %v4928_v17 = vld [vmem:[%s6931_s1 + $0x364] ss:$12 sps:$4 sm:$0xff]   ;;  %v4925_v19 = vld [vmem:[%s6931_s1 + $0x380] ss:$12 sps:$4 sm:$0xff]  }
  0x49   : >> { %649 = vmatprep.subr.bf16.mxu0 %v4847_v18  ;;  %972 = vmatprep.subr.bf16.mxu1 %v4851_v20  ;;  %v1116_v18 = vrot.slane %v4203_v16, 1  ;;  %v4929_v20 = vld [vmem:[%s6931_s1 + $0x428] ss:$12 sps:$4 sm:$0xff]   ;;  %v5009_v16 = vld [vmem:[%s6931_s1 + $0x5d8] ss:$12 sps:$4 sm:$0xff]  }
  0x4c   : >> { %650 = vmatpush2.bf16.msra.mxu0 %v4852_v21  ;;  %973 = vmatpush1.bf16.msra.mxu1 %v4849_v23  ;;  %v4926_v21 = vld [vmem:[%s6931_s1 + $0x360] ss:$12 sps:$4 sm:$0xff]   ;;  %v4930_v23 = vld [vmem:[%s6931_s1 + $0x368] ss:$12 sps:$4 sm:$0xff]  }
  0x4d   : >> { %651 = vmatprep.subr.bf16.mxu0 %v4853_v22  ;;  %974 = vmatprep.subr.bf16.mxu1 %v4857_v24  ;;  %v4933_v22 = vld [vmem:[%s6931_s1 + $0x34c] ss:$12 sps:$4 sm:$0xff]   ;;  %v4934_v24 = vld [vmem:[%s6931_s1 + $0x410] ss:$12 sps:$4 sm:$0xff]  }
  0x50   : >> { %652 = vmatpush2.bf16.msra.mxu0 %v4858_v25  ;;  %975 = vmatpush1.bf16.msra.mxu1 %v4855_v27  ;;  %v4931_v25 = vld [vmem:[%s6931_s1 + $0x348] ss:$12 sps:$4 sm:$0xff]   ;;  %v4935_v27 = vld [vmem:[%s6931_s1 + $0x350] ss:$12 sps:$4 sm:$0xff]  }
  0x51   : >> { %653 = vmatprep.subr.bf16.mxu0 %v4859_v26  ;;  %976 = vmatprep.subr.bf16.mxu1 %v4863_v28  ;;  %v4938_v26 = vld [vmem:[%s6931_s1 + $0x334] ss:$12 sps:$4 sm:$0xff]   ;;  %v4939_v28 = vld [vmem:[%s6931_s1 + $0x3f8] ss:$12 sps:$4 sm:$0xff]  }
  0x54   : >> { %654 = vmatpush2.bf16.msra.mxu0 %v4864_v29  ;;  %977 = vmatpush1.bf16.msra.mxu1 %v4861_v31  ;;  %v4936_v29 = vld [vmem:[%s6931_s1 + $0x330] ss:$12 sps:$4 sm:$0xff]   ;;  %v4940_v31 = vld [vmem:[%s6931_s1 + $0x338] ss:$12 sps:$4 sm:$0xff]  }
  0x55   : >> { %655 = vmatprep.subr.bf16.mxu0 %v4865_v30  ;;  %978 = vmatprep.subr.bf16.mxu1 %v4869_v32  ;;  %v4943_v30 = vld [vmem:[%s6931_s1 + $0x31c] ss:$12 sps:$4 sm:$0xff]   ;;  %v4944_v32 = vld [vmem:[%s6931_s1 + $0x3e0] ss:$12 sps:$4 sm:$0xff]  }
  0x58   : >> { %656 = vmatpush2.bf16.msra.mxu0 %v4870_v33  ;;  %979 = vmatpush1.bf16.msra.mxu1 %v4867_v35  ;;  %v4941_v33 = vld [vmem:[%s6931_s1 + $0x318] ss:$12 sps:$4 sm:$0xff]   ;;  %v4945_v35 = vld [vmem:[%s6931_s1 + $0x320] ss:$12 sps:$4 sm:$0xff]  }
  0x59   : >> { %4587 = vmatprep.subr.bf16.mxu0 %v4874_v34  ;;  %980 = vmatprep.subr.bf16.mxu1 %v4873_v36  ;;  %v4948_v34 = vld [vmem:[%s6931_s1 + $0x304] ss:$12 sps:$4 sm:$0xff]   ;;  %v4949_v36 = vld [vmem:[%s6931_s1 + $0x3c8] ss:$12 sps:$4 sm:$0xff]  }
  0x5b   : >> { %658 = vmatmul.mubr.bf16.vlgmr.msra.gmra.mxu0 %v5607_v7  ;;  %v4911_v7 = vld [vmem:[%s6931_s1 + $0x3a8] ss:$12 sps:$4 sm:$0xff]  }
  0x5c   : >> { %4588 = vmatpush3.bf16.msra.mxu0 %v4875_v37  ;;  %1037 = vmatprep.mubr.bf16.mxu0 %v5586_v57  ;;  %v4898_v57 = vld [vmem:[%s6931_s1 + $0xf4] ss:$12 sps:$4 sm:$0xff]  }
  0x5d   : >> { %4589 = vmatprep.subr.bf16.mxu0 %v4879_v38  ;;  %981 = vmatpush2.bf16.msra.mxu1 %v4871_v39  ;;  %v4946_v37 = vld [vmem:[%s6931_s1 + $0x300] ss:$12 sps:$4 sm:$0xff]   ;;  %v4202_v38 = vcombine.low %v1045_v14, %v1045_v14 }
  0x5e   : >> { %982 = vmatprep.subr.bf16.mxu1 %v4878_v40  ;;  %v4955_v39 = vld [vmem:[%s6931_s1 + $0x46c] ss:$12 sps:$4 sm:$0xff]   ;;  %v4950_v40 = vld [vmem:[%s6931_s1 + $0x308] ss:$12 sps:$4 sm:$0xff]  }
  0x5f   : >> { %v5003_v14 = vld [vmem:[%s6931_s1 + $0x5ec] ss:$12 sps:$4 sm:$0xff]  }
  0x60   : >> { %4590 = vmatpush3.bf16.msra.mxu0 %v4880_v41  ;;  %v4958_v41 = vld [vmem:[%s6931_s1 + $0x52c] ss:$12 sps:$4 sm:$0xff]  }
  0x61   : >> { %4591 = vmatprep.subr.bf16.mxu0 %v4884_v42  ;;  %983 = vmatpush2.bf16.msra.mxu1 %v4876_v43  ;;  %v5895_v42 = vrot.slane %v4202_v38, 1  ;;  %v4953_v43 = vld [vmem:[%s6931_s1 + $0x468] ss:$12 sps:$4 sm:$0xff]   ;;  %v5035_v38 = vld [vmem:[%s6931_s1 + $0x4a0] ss:$12 sps:$4 sm:$0xff]  }
  0x62   : >> { %984 = vmatprep.subr.bf16.mxu1 %v4883_v44  ;;  %v4961_v44 = vld [vmem:[%s6931_s1 + $0x454] ss:$12 sps:$4 sm:$0xff]  }
  0x64   : >> { %4592 = vmatpush3.bf16.msra.mxu0 %v4885_v45  ;;  %v4956_v45 = vld [vmem:[%s6931_s1 + $0x528] ss:$12 sps:$4 sm:$0xff]  }
  0x65   : >> { %4593 = vmatprep.subr.bf16.mxu0 %v4889_v46  ;;  %985 = vmatpush2.bf16.msra.mxu1 %v4881_v47  ;;  %v4964_v46 = vld [vmem:[%s6931_s1 + $0x514] ss:$12 sps:$4 sm:$0xff]   ;;  %v4959_v47 = vld [vmem:[%s6931_s1 + $0x450] ss:$12 sps:$4 sm:$0xff]  }
  0x66   : >> { %986 = vmatprep.subr.bf16.mxu1 %v4888_v48  ;;  %v4967_v48 = vld [vmem:[%s6931_s1 + $0x43c] ss:$12 sps:$4 sm:$0xff]  }
  0x68   : >> { %4594 = vmatpush3.bf16.msra.mxu0 %v4890_v49  ;;  %v4962_v49 = vld [vmem:[%s6931_s1 + $0x510] ss:$12 sps:$4 sm:$0xff]  }
  0x69   : >> { %4595 = vmatprep.subr.bf16.mxu0 %v4894_v50  ;;  %987 = vmatpush2.bf16.msra.mxu1 %v4886_v51  ;;  %v4970_v50 = vld [vmem:[%s6931_s1 + $0x4fc] ss:$12 sps:$4 sm:$0xff]   ;;  %v4965_v51 = vld [vmem:[%s6931_s1 + $0x438] ss:$12 sps:$4 sm:$0xff]  }
  0x6a   : >> { %988 = vmatprep.subr.bf16.mxu1 %v4893_v52  ;;  %v4973_v52 = vld [vmem:[%s6931_s1 + $0x424] ss:$12 sps:$4 sm:$0xff]  }
  0x6c   : >> { %4596 = vmatpush3.bf16.msra.mxu0 %v4895_v53  ;;  %v4968_v53 = vld [vmem:[%s6931_s1 + $0x4f8] ss:$12 sps:$4 sm:$0xff]  }
  0x6d   : >> { %4597 = vmatprep.subr.bf16.mxu0 %v4899_v54  ;;  %989 = vmatpush2.bf16.msra.mxu1 %v4891_v55  ;;  %v4976_v54 = vld [vmem:[%s6931_s1 + $0x4e4] ss:$12 sps:$4 sm:$0xff]   ;;  %v4971_v55 = vld [vmem:[%s6931_s1 + $0x420] ss:$12 sps:$4 sm:$0xff]  }
  0x6e   : >> { %990 = vmatprep.subr.bf16.mxu1 %v4898_v57  ;;  %v4979_v57 = vld [vmem:[%s6931_s1 + $0x40c] ss:$12 sps:$4 sm:$0xff]  }
  0x70   : >> { %4598 = vmatpush3.bf16.msra.mxu0 %v4900_v58  ;;  %v4974_v58 = vld [vmem:[%s6931_s1 + $0x4e0] ss:$12 sps:$4 sm:$0xff]  }
  0x71   : >> { %4599 = vmatprep.subr.bf16.mxu0 %v4904_v59  ;;  %991 = vmatpush2.bf16.msra.mxu1 %v4896_v60  ;;  %v4982_v59 = vld [vmem:[%s6931_s1 + $0x4cc] ss:$12 sps:$4 sm:$0xff]   ;;  %v4977_v60 = vld [vmem:[%s6931_s1 + $0x408] ss:$12 sps:$4 sm:$0xff]  }
  0x72   : >> { %992 = vmatprep.subr.bf16.mxu1 %v4903_v61  ;;  %v4985_v61 = vld [vmem:[%s6931_s1 + $0x3f4] ss:$12 sps:$4 sm:$0xff]  }
  0x74   : >> { %4600 = vmatpush3.bf16.msra.mxu0 %v4905_v62  ;;  %v4980_v62 = vld [vmem:[%s6931_s1 + $0x4c8] ss:$12 sps:$4 sm:$0xff]  }
  0x75   : >> { %4601 = vmatprep.subr.bf16.mxu0 %v4909_v63  ;;  %993 = vmatpush2.bf16.msra.mxu1 %v4901_v1  ;;  %v4988_v63 = vld [vmem:[%s6931_s1 + $0x4b4] ss:$12 sps:$4 sm:$0xff]   ;;  %v4983_v1 = vld [vmem:[%s6931_s1 + $0x3f0] ss:$12 sps:$4 sm:$0xff]  }
  0x76   : >> { %994 = vmatprep.subr.bf16.mxu1 %v4908_v2  ;;  %v4991_v2 = vld [vmem:[%s6931_s1 + $0x3dc] ss:$12 sps:$4 sm:$0xff]  }
  0x78   : >> { %4602 = vmatpush3.bf16.msra.mxu0 %v4910_v3  ;;  %v4986_v3 = vld [vmem:[%s6931_s1 + $0x4b0] ss:$12 sps:$4 sm:$0xff]  }
  0x79   : >> { %1375 = vmatprep.subr.bf16.mxu0 %v4913_v4  ;;  %995 = vmatpush2.bf16.msra.mxu1 %v4906_v5  ;;  %v5968_v4 = vld [vmem:[%s5566_s7 + $0x8] sm:$0x33] }
  0x7a   : >> { %4609 = vmatprep.subr.bf16.mxu1 %v4914_v6  ;;  %v4994_v5 = vld [vmem:[%s6931_s1 + $0x49c] ss:$12 sps:$4 sm:$0xff]   ;;  %v5975_v6 = vcombine.high %v5968_v4, %v5968_v4 }
  0x7b   : >> { %1038 = vmatmul.mubr.bf16.vlgmr.msra.gmra.mxu0 %v5584_v56 }
  0x7c   : >> { %1376 = vmatpush1.bf16.msra.mxu0 %v4911_v7  ;;  %997 = vmatmul.mubr.bf16.vlgmr.msra.gmra.mxu1 %v5584_v56  ;;  %v4921_v56 = vld [vmem:[%s6931_s1 + $0x378] ss:$12 sps:$4 sm:$0xff]  }
  0x7d   : >> { %1377 = vmatprep.subr.bf16.mxu0 %v4918_v8  ;;  %4610 = vmatpush3.bf16.msra.mxu1 %v4915_v9  ;;  %v4989_v7 = vld [vmem:[%s6931_s1 + $0x3d8] ss:$12 sps:$4 sm:$0xff]  }
  0x7e   : >> { %4611 = vmatprep.subr.bf16.mxu1 %v4919_v10  ;;  %1448 = vmatprep.mubr.bf16.mxu1 %v1116_v18  ;;  %v4997_v8 = vld [vmem:[%s6931_s1 + $0x3c4] ss:$12 sps:$4 sm:$0xff]  }
  0x7f   : >> { %1407 = vmatprep.mubr.bf16.mxu0 %v1116_v18  ;;  %v4992_v9 = vld [vmem:[%s6931_s1 + $0x498] ss:$12 sps:$4 sm:$0xff]  }
  0x80   : >> { %1378 = vmatpush1.bf16.msra.mxu0 %v4916_v11  ;;  %v5000_v10 = vld [vmem:[%s6931_s1 + $0x484] ss:$12 sps:$4 sm:$0xff]   ;;  %v4995_v11 = vld [vmem:[%s6931_s1 + $0x3c0] ss:$12 sps:$4 sm:$0xff]  }
  0x81   : >> { %1379 = vmatprep.subr.bf16.mxu0 %v4923_v12  ;;  %4612 = vmatpush3.bf16.msra.mxu1 %v4920_v13  ;;  %v5004_v12 = vld [vmem:[%s6931_s1 + $0x5f0] ss:$12 sps:$4 sm:$0xff]   ;;  %v4998_v13 = vld [vmem:[%s6931_s1 + $0x480] ss:$12 sps:$4 sm:$0xff]   ;;  %v5010_v18 = vld [vmem:[%s6931_s1 + $0x518] ss:$12 sps:$4 sm:$0xff]  }
  0x82   : >> { %4613 = vmatprep.subr.bf16.mxu1 %v4924_v15  ;;  %v5005_v15 = vld [vmem:[%s6931_s1 + $0x530] ss:$12 sps:$4 sm:$0xff]  }
  0x84   : >> { %1380 = vmatpush1.bf16.msra.mxu0 %v4921_v56  ;;  %v5001_v56 = vld [vmem:[%s6931_s1 + $0x5e8] ss:$12 sps:$4 sm:$0xff]  }
  0x85   : >> { %1381 = vmatprep.subr.bf16.mxu0 %v4928_v17  ;;  %4614 = vmatpush3.bf16.msra.mxu1 %v4925_v19  ;;  %v5008_v17 = vld [vmem:[%s6931_s1 + $0x5d4] ss:$12 sps:$4 sm:$0xff]  }
  0x86   : >> { %4615 = vmatprep.subr.bf16.mxu1 %v4929_v20  ;;  %v5014_v19 = vld [vmem:[%s6931_s1 + $0x5c0] ss:$12 sps:$4 sm:$0xff]   ;;  %v5006_v20 = vld [vmem:[%s6931_s1 + $0x5d0] ss:$12 sps:$4 sm:$0xff]  }
  0x88   : >> { %1382 = vmatpush1.bf16.msra.mxu0 %v4926_v21  ;;  %v5013_v21 = vld [vmem:[%s6931_s1 + $0x5bc] ss:$12 sps:$4 sm:$0xff]  }
  0x89   : >> { %1383 = vmatprep.subr.bf16.mxu0 %v4933_v22  ;;  %4616 = vmatpush3.bf16.msra.mxu1 %v4930_v23  ;;  %v5015_v22 = vld [vmem:[%s6931_s1 + $0x500] ss:$12 sps:$4 sm:$0xff]   ;;  %v5019_v23 = vld [vmem:[%s6931_s1 + $0x5a8] ss:$12 sps:$4 sm:$0xff]  }
  0x8a   : >> { %4617 = vmatprep.subr.bf16.mxu1 %v4934_v24  ;;  %v5011_v24 = vld [vmem:[%s6931_s1 + $0x5b8] ss:$12 sps:$4 sm:$0xff]  }
  0x8c   : >> { %1384 = vmatpush1.bf16.msra.mxu0 %v4931_v25  ;;  %v5018_v25 = vld [vmem:[%s6931_s1 + $0x5a4] ss:$12 sps:$4 sm:$0xff]  }
  0x8d   : >> { %1385 = vmatprep.subr.bf16.mxu0 %v4938_v26  ;;  %4618 = vmatpush3.bf16.msra.mxu1 %v4935_v27  ;;  %v5020_v26 = vld [vmem:[%s6931_s1 + $0x4e8] ss:$12 sps:$4 sm:$0xff]   ;;  %v5024_v27 = vld [vmem:[%s6931_s1 + $0x590] ss:$12 sps:$4 sm:$0xff]  }
  0x8e   : >> { %4619 = vmatprep.subr.bf16.mxu1 %v4939_v28  ;;  %v5016_v28 = vld [vmem:[%s6931_s1 + $0x5a0] ss:$12 sps:$4 sm:$0xff]  }
  0x90   : >> { %1386 = vmatpush1.bf16.msra.mxu0 %v4936_v29  ;;  %v5023_v29 = vld [vmem:[%s6931_s1 + $0x58c] ss:$12 sps:$4 sm:$0xff]  }
  0x91   : >> { %1387 = vmatprep.subr.bf16.mxu0 %v4943_v30  ;;  %4620 = vmatpush3.bf16.msra.mxu1 %v4940_v31  ;;  %v5025_v30 = vld [vmem:[%s6931_s1 + $0x4d0] ss:$12 sps:$4 sm:$0xff]   ;;  %v5029_v31 = vld [vmem:[%s6931_s1 + $0x578] ss:$12 sps:$4 sm:$0xff]  }
  0x92   : >> { %4621 = vmatprep.subr.bf16.mxu1 %v4944_v32  ;;  %v5021_v32 = vld [vmem:[%s6931_s1 + $0x588] ss:$12 sps:$4 sm:$0xff]  }
  0x94   : >> { %1388 = vmatpush1.bf16.msra.mxu0 %v4941_v33  ;;  %v5028_v33 = vld [vmem:[%s6931_s1 + $0x574] ss:$12 sps:$4 sm:$0xff]  }
  0x95   : >> { %1389 = vmatprep.subr.bf16.mxu0 %v4948_v34  ;;  %4622 = vmatpush3.bf16.msra.mxu1 %v4945_v35  ;;  %v5030_v34 = vld [vmem:[%s6931_s1 + $0x4b8] ss:$12 sps:$4 sm:$0xff]   ;;  %v5034_v35 = vld [vmem:[%s6931_s1 + $0x560] ss:$12 sps:$4 sm:$0xff]  }
  0x96   : >> { %4623 = vmatprep.subr.bf16.mxu1 %v4949_v36  ;;  %v5026_v36 = vld [vmem:[%s6931_s1 + $0x570] ss:$12 sps:$4 sm:$0xff]  }
  0x98   : >> { %1390 = vmatpush1.bf16.msra.mxu0 %v4946_v37  ;;  %v5033_v37 = vld [vmem:[%s6931_s1 + $0x55c] ss:$12 sps:$4 sm:$0xff]  }
  0x99   : >> { %1391 = vmatprep.subr.bf16.mxu0 %v4955_v39  ;;  %4624 = vmatpush3.bf16.msra.mxu1 %v4950_v40  ;;  %v5039_v39 = vld [vmem:[%s6931_s1 + $0x548] ss:$12 sps:$4 sm:$0xff]   ;;  %v5031_v40 = vld [vmem:[%s6931_s1 + $0x558] ss:$12 sps:$4 sm:$0xff]  }
  0x9a   : >> { %1791 = vmatprep.subr.bf16.mxu1 %v4958_v41  ;;  %v1949_v41 = vshll.u32 %v5975_v6, 16 }
  0x9c   : >> { %1392 = vmatpush2.bf16.msra.mxu0 %v4953_v43  ;;  %1449 = vmatmul.mubr.bf16.vlgmr.msra.gmra.mxu1 %v5895_v42  ;;  %v5040_v43 = vld [vmem:[%s6931_s1 + $0x488] ss:$12 sps:$4 sm:$0xff]  }
  0x9d   : >> { %1393 = vmatprep.subr.bf16.mxu0 %v4961_v44  ;;  %1792 = vmatpush1.bf16.msra.mxu1 %v4956_v45  ;;  %v5045_v44 = vld [vmem:[%s6931_s1 + $0x6ac] ss:$12 sps:$4 sm:$0xff]  }
  0x9e   : >> { %1793 = vmatprep.subr.bf16.mxu1 %v4964_v46  ;;  %1823 = vmatprep.mubr.bf16.mxu1 %v5975_v6  ;;  %v5036_v45 = vld [vmem:[%s6931_s1 + $0x540] ss:$12 sps:$4 sm:$0xff]   ;;  %v1947_v46 = vshrl.u32 %v5975_v6, 16 }
  0xa0   : >> { %1394 = vmatpush2.bf16.msra.mxu0 %v4959_v47  ;;  %v1951_v47 = vrot.slane %v1949_v41, 1  ;;  %v5098_v41 = vld [vmem:[%s6931_s1 + $0x7f8] ss:$12 sps:$4 sm:$0xff]  }
  0xa1   : >> { %1395 = vmatprep.subr.bf16.mxu0 %v4967_v48  ;;  %1794 = vmatpush1.bf16.msra.mxu1 %v4962_v49  ;;  %v6101_v48 = vcombine.low %v5968_v4, %v5968_v4  ;;  %v5046_v49 = vld [vmem:[%s6931_s1 + $0x770] ss:$12 sps:$4 sm:$0xff]  }
  0xa2   : >> { %1795 = vmatprep.subr.bf16.mxu1 %v4970_v50  ;;  %v5043_v50 = vld [vmem:[%s6931_s1 + $0x6a8] ss:$12 sps:$4 sm:$0xff]   ;;  %v5066_v4 = vld [vmem:[%s6931_s1 + $0x710] ss:$12 sps:$4 sm:$0xff]  }
  0xa4   : >> { %1396 = vmatpush2.bf16.msra.mxu0 %v4965_v51  ;;  %v5050_v51 = vld [vmem:[%s6931_s1 + $0x694] ss:$12 sps:$4 sm:$0xff]  }
  0xa5   : >> { %1397 = vmatprep.subr.bf16.mxu0 %v4973_v52  ;;  %1796 = vmatpush1.bf16.msra.mxu1 %v4968_v53  ;;  %v5047_v52 = vld [vmem:[%s6931_s1 + $0x6b0] ss:$12 sps:$4 sm:$0xff]   ;;  %v1952_v53 = vor.u32 %v1951_v47, %v1947_v46  ;;  %v5104_v46 = vld [vmem:[%s6931_s1 + $0x7e0] ss:$12 sps:$4 sm:$0xff]  }
  0xa6   : >> { %1797 = vmatprep.subr.bf16.mxu1 %v4976_v54  ;;  %v5051_v54 = vld [vmem:[%s6931_s1 + $0x758] ss:$12 sps:$4 sm:$0xff]  }
  0xa7   : >> { %v5112_v47 = vld [vmem:[%s6931_s1 + $0x7cc] ss:$12 sps:$4 sm:$0xff]  }
  0xa8   : >> { %1398 = vmatpush2.bf16.msra.mxu0 %v4971_v55  ;;  %v5048_v55 = vld [vmem:[%s6931_s1 + $0x690] ss:$12 sps:$4 sm:$0xff]  }
  0xa9   : >> { %1399 = vmatprep.subr.bf16.mxu0 %v4979_v57  ;;  %1798 = vmatpush1.bf16.msra.mxu1 %v4974_v58  ;;  %v5055_v57 = vld [vmem:[%s6931_s1 + $0x67c] ss:$12 sps:$4 sm:$0xff]   ;;  %v5052_v58 = vld [vmem:[%s6931_s1 + $0x698] ss:$12 sps:$4 sm:$0xff]  }
  0xaa   : >> { %1799 = vmatprep.subr.bf16.mxu1 %v4982_v59  ;;  %v5056_v59 = vld [vmem:[%s6931_s1 + $0x740] ss:$12 sps:$4 sm:$0xff]  }
  0xac   : >> { %1400 = vmatpush2.bf16.msra.mxu0 %v4977_v60  ;;  %v5053_v60 = vld [vmem:[%s6931_s1 + $0x678] ss:$12 sps:$4 sm:$0xff]  }
  0xad   : >> { %1401 = vmatprep.subr.bf16.mxu0 %v4985_v61  ;;  %1800 = vmatpush1.bf16.msra.mxu1 %v4980_v62  ;;  %v5060_v61 = vld [vmem:[%s6931_s1 + $0x664] ss:$12 sps:$4 sm:$0xff]   ;;  %v5057_v62 = vld [vmem:[%s6931_s1 + $0x680] ss:$12 sps:$4 sm:$0xff]  }
  0xae   : >> { %1801 = vmatprep.subr.bf16.mxu1 %v4988_v63  ;;  %v5061_v63 = vld [vmem:[%s6931_s1 + $0x728] ss:$12 sps:$4 sm:$0xff]  }
  0xb0   : >> { %1402 = vmatpush2.bf16.msra.mxu0 %v4983_v1  ;;  %v5058_v1 = vld [vmem:[%s6931_s1 + $0x660] ss:$12 sps:$4 sm:$0xff]  }
  0xb1   : >> { %1403 = vmatprep.subr.bf16.mxu0 %v4991_v2  ;;  %1802 = vmatpush1.bf16.msra.mxu1 %v4986_v3  ;;  %v5065_v2 = vld [vmem:[%s6931_s1 + $0x64c] ss:$12 sps:$4 sm:$0xff]   ;;  %v5062_v3 = vld [vmem:[%s6931_s1 + $0x668] ss:$12 sps:$4 sm:$0xff]  }
  0xb2   : >> { %1803 = vmatprep.subr.bf16.mxu1 %v4994_v5  ;;  %v5063_v5 = vld [vmem:[%s6931_s1 + $0x648] ss:$12 sps:$4 sm:$0xff]  }
  0xb4   : >> { %1404 = vmatpush2.bf16.msra.mxu0 %v4989_v7  ;;  %v5067_v7 = vld [vmem:[%s6931_s1 + $0x650] ss:$12 sps:$4 sm:$0xff]  }
  0xb5   : >> { %1405 = vmatprep.subr.bf16.mxu0 %v4997_v8  ;;  %1804 = vmatpush1.bf16.msra.mxu1 %v4992_v9  ;;  %v5071_v8 = vld [vmem:[%s6931_s1 + $0x6f8] ss:$12 sps:$4 sm:$0xff]   ;;  %v5068_v9 = vld [vmem:[%s6931_s1 + $0x630] ss:$12 sps:$4 sm:$0xff]  }
  0xb6   : >> { %1805 = vmatprep.subr.bf16.mxu1 %v5000_v10  ;;  %v5075_v10 = vld [vmem:[%s6931_s1 + $0x61c] ss:$12 sps:$4 sm:$0xff]  }
  0xb8   : >> { %1406 = vmatpush2.bf16.msra.mxu0 %v4995_v11  ;;  %v5072_v11 = vld [vmem:[%s6931_s1 + $0x638] ss:$12 sps:$4 sm:$0xff]  }
  0xb9   : >> { %4631 = vmatprep.subr.bf16.mxu0 %v5004_v12  ;;  %1806 = vmatpush1.bf16.msra.mxu1 %v4998_v13  ;;  %v5076_v12 = vld [vmem:[%s6931_s1 + $0x6e0] ss:$12 sps:$4 sm:$0xff]   ;;  %v1942_v13 = vshll.u32 %v6101_v48, 16 }
  0xba   : >> { %1807 = vmatprep.subr.bf16.mxu1 %v5003_v14  ;;  %v5073_v14 = vld [vmem:[%s6931_s1 + $0x618] ss:$12 sps:$4 sm:$0xff]  }
  0xbb   : >> { %1408 = vmatmul.mubr.bf16.vlgmr.msra.gmra.mxu0 %v5895_v42  ;;  %v5038_v42 = vld [vmem:[%s6931_s1 + $0x544] ss:$12 sps:$4 sm:$0xff]  }
  0xbc   : >> { %4632 = vmatpush3.bf16.msra.mxu0 %v5005_v15  ;;  %1864 = vmatprep.mubr.bf16.mxu0 %v5975_v6  ;;  %v5070_v6 = vld [vmem:[%s6931_s1 + $0x634] ss:$12 sps:$4 sm:$0xff]   ;;  %v5080_v15 = vld [vmem:[%s6931_s1 + $0x604] ss:$12 sps:$4 sm:$0xff]  }
  0xbd   : >> { %4633 = vmatprep.subr.bf16.mxu0 %v5009_v16  ;;  %1808 = vmatpush2.bf16.msra.mxu1 %v5001_v56  ;;  %v5077_v16 = vld [vmem:[%s6931_s1 + $0x620] ss:$12 sps:$4 sm:$0xff]   ;;  %v5081_v56 = vld [vmem:[%s6931_s1 + $0x6c8] ss:$12 sps:$4 sm:$0xff]  }
  0xbe   : >> { %1809 = vmatprep.subr.bf16.mxu1 %v5008_v17  ;;  %v1940_v17 = vshrl.u32 %v6101_v48, 16 }
  0xc0   : >> { %4634 = vmatpush3.bf16.msra.mxu0 %v5010_v18  ;;  %v1944_v18 = vrot.slane %v1942_v13, 1  ;;  %v5145_v13 = vld [vmem:[%s6931_s1 + $0x800] ss:$12 sps:$4 sm:$0xff]  }
  0xc1   : >> { %4635 = vmatprep.subr.bf16.mxu0 %v5014_v19  ;;  %1810 = vmatpush2.bf16.msra.mxu1 %v5006_v20  ;;  %v5078_v19 = vld [vmem:[%s6931_s1 + $0x600] ss:$12 sps:$4 sm:$0xff]  }
  0xc2   : >> { %1811 = vmatprep.subr.bf16.mxu1 %v5013_v21  ;;  %v5085_v20 = vld [vmem:[%s6931_s1 + $0x76c] ss:$12 sps:$4 sm:$0xff]   ;;  %v5082_v21 = vld [vmem:[%s6931_s1 + $0x608] ss:$12 sps:$4 sm:$0xff]  }
  0xc4   : >> { %4636 = vmatpush3.bf16.msra.mxu0 %v5015_v22  ;;  %v5088_v22 = vld [vmem:[%s6931_s1 + $0x82c] ss:$12 sps:$4 sm:$0xff]  }
  0xc5   : >> { %4637 = vmatprep.subr.bf16.mxu0 %v5019_v23  ;;  %1812 = vmatpush2.bf16.msra.mxu1 %v5011_v24  ;;  %v5083_v23 = vld [vmem:[%s6931_s1 + $0x768] ss:$12 sps:$4 sm:$0xff]   ;;  %v6209_v24 = vor.u32 %v1944_v18, %v1940_v17  ;;  %v5154_v18 = vld [vmem:[%s6931_s1 + $0x890] ss:$12 sps:$4 sm:$0xff]  }
  0xc6   : >> { %1813 = vmatprep.subr.bf16.mxu1 %v5018_v25  ;;  %v5091_v25 = vld [vmem:[%s6931_s1 + $0x754] ss:$12 sps:$4 sm:$0xff]  }
  0xc7   : >> { %v5150_v17 = vld [vmem:[%s6931_s1 + $0x7e8] ss:$12 sps:$4 sm:$0xff]  }
  0xc8   : >> { %4638 = vmatpush3.bf16.msra.mxu0 %v5020_v26  ;;  %v6215_v26 = vld [vmem:[%s5566_s7 + $0x8] sm:$0x66] }
  0xc9   : >> { %4639 = vmatprep.subr.bf16.mxu0 %v5024_v27  ;;  %1814 = vmatpush2.bf16.msra.mxu1 %v5016_v28  ;;  %v5086_v27 = vld [vmem:[%s6931_s1 + $0x828] ss:$12 sps:$4 sm:$0xff]   ;;  %v4354_v28 = vcombine.high %v6215_v26, %v6215_v26 }
  0xca   : >> { %1815 = vmatprep.subr.bf16.mxu1 %v5023_v29  ;;  %v5094_v29 = vld [vmem:[%s6931_s1 + $0x814] ss:$12 sps:$4 sm:$0xff]  }
  0xcc   : >> { %4640 = vmatpush3.bf16.msra.mxu0 %v5025_v30  ;;  %v5089_v30 = vld [vmem:[%s6931_s1 + $0x750] ss:$12 sps:$4 sm:$0xff]  }
  0xcd   : >> { %4641 = vmatprep.subr.bf16.mxu0 %v5029_v31  ;;  %1816 = vmatpush2.bf16.msra.mxu1 %v5021_v32  ;;  %v6228_v31 = vrot.slane %v4354_v28, 1  ;;  %v5097_v32 = vld [vmem:[%s6931_s1 + $0x73c] ss:$12 sps:$4 sm:$0xff]  }
  0xce   : >> { %1817 = vmatprep.subr.bf16.mxu1 %v5028_v33  ;;  %v5156_v28 = vld [vmem:[%s6931_s1 + $0x870] ss:$12 sps:$4 sm:$0xff]  }
  0xd0   : >> { %4642 = vmatpush3.bf16.msra.mxu0 %v5030_v34  ;;  %v5092_v34 = vld [vmem:[%s6931_s1 + $0x810] ss:$12 sps:$4 sm:$0xff]  }
  0xd1   : >> { %4643 = vmatprep.subr.bf16.mxu0 %v5034_v35  ;;  %1818 = vmatpush2.bf16.msra.mxu1 %v5026_v36  ;;  %v5100_v35 = vld [vmem:[%s6931_s1 + $0x7fc] ss:$12 sps:$4 sm:$0xff]  }
  0xd2   : >> { %1819 = vmatprep.subr.bf16.mxu1 %v5033_v37  ;;  %v5095_v37 = vld [vmem:[%s6931_s1 + $0x738] ss:$12 sps:$4 sm:$0xff]  }
  0xd4   : >> { %4644 = vmatpush3.bf16.msra.mxu0 %v5035_v38 }
  0xd5   : >> { %4645 = vmatprep.subr.bf16.mxu0 %v5039_v39  ;;  %1820 = vmatpush2.bf16.msra.mxu1 %v5031_v40  ;;  %v5103_v39 = vld [vmem:[%s6931_s1 + $0x724] ss:$12 sps:$4 sm:$0xff]  }
  0xd6   : >> { %1821 = vmatprep.subr.bf16.mxu1 %v5038_v42  ;;  %v5106_v42 = vld [vmem:[%s6931_s1 + $0x7e4] ss:$12 sps:$4 sm:$0xff]  }
  0xd8   : >> { %4646 = vmatpush3.bf16.msra.mxu0 %v5040_v43 }
  0xd9   : >> { %2211 = vmatprep.subr.bf16.mxu0 %v5045_v44  ;;  %1822 = vmatpush2.bf16.msra.mxu1 %v5036_v45  ;;  %v5101_v44 = vld [vmem:[%s6931_s1 + $0x720] ss:$12 sps:$4 sm:$0xff]  }
  0xda   : >> { %4653 = vmatprep.subr.bf16.mxu1 %v5046_v49  ;;  %v5109_v45 = vld [vmem:[%s6931_s1 + $0x70c] ss:$12 sps:$4 sm:$0xff]   ;;  %v5115_v49 = vld [vmem:[%s6931_s1 + $0x6f4] ss:$12 sps:$4 sm:$0xff]  }
  0xdb   : >> { %1865 = vmatmul.mubr.bf16.vlgmr.msra.gmra.mxu0 %v6101_v48 }
  0xdc   : >> { %2212 = vmatpush1.bf16.msra.mxu0 %v5043_v50  ;;  %2243 = vmatprep.mubr.bf16.mxu0 %v1952_v53  ;;  %v5110_v50 = vld [vmem:[%s6931_s1 + $0x7c8] ss:$12 sps:$4 sm:$0xff]  }
  0xdd   : >> { %1824 = vmatmul.mubr.bf16.vlgmr.msra.gmra.mxu1 %v6101_v48  ;;  %2213 = vmatprep.subr.bf16.mxu0 %v5050_v51  ;;  %v5107_v48 = vld [vmem:[%s6931_s1 + $0x708] ss:$12 sps:$4 sm:$0xff]  }
  0xde   : >> { %4654 = vmatpush3.bf16.msra.mxu1 %v5047_v52  ;;  %2284 = vmatprep.mubr.bf16.mxu1 %v1952_v53  ;;  %v5118_v51 = vld [vmem:[%s6931_s1 + $0x7b4] ss:$12 sps:$4 sm:$0xff]   ;;  %v5113_v52 = vld [vmem:[%s6931_s1 + $0x6f0] ss:$12 sps:$4 sm:$0xff]  }
  0xdf   : >> { %4655 = vmatprep.subr.bf16.mxu1 %v5051_v54  ;;  %v5121_v53 = vld [vmem:[%s6931_s1 + $0x6dc] ss:$12 sps:$4 sm:$0xff]  }
  0xe0   : >> { %2214 = vmatpush1.bf16.msra.mxu0 %v5048_v55  ;;  %v5116_v54 = vld [vmem:[%s6931_s1 + $0x7b0] ss:$12 sps:$4 sm:$0xff]  }
  0xe1   : >> { %2215 = vmatprep.subr.bf16.mxu0 %v5055_v57  ;;  %v5124_v55 = vld [vmem:[%s6931_s1 + $0x79c] ss:$12 sps:$4 sm:$0xff]   ;;  %v5119_v57 = vld [vmem:[%s6931_s1 + $0x6d8] ss:$12 sps:$4 sm:$0xff]  }
  0xe2   : >> { %4656 = vmatpush3.bf16.msra.mxu1 %v5052_v58  ;;  %v5127_v58 = vld [vmem:[%s6931_s1 + $0x6c4] ss:$12 sps:$4 sm:$0xff]  }
  0xe3   : >> { %4657 = vmatprep.subr.bf16.mxu1 %v5056_v59  ;;  %v5122_v59 = vld [vmem:[%s6931_s1 + $0x798] ss:$12 sps:$4 sm:$0xff]  }
  0xe4   : >> { %2216 = vmatpush1.bf16.msra.mxu0 %v5053_v60  ;;  %v5130_v60 = vld [vmem:[%s6931_s1 + $0x784] ss:$12 sps:$4 sm:$0xff]  }
  0xe5   : >> { %2217 = vmatprep.subr.bf16.mxu0 %v5060_v61  ;;  %v5125_v61 = vld [vmem:[%s6931_s1 + $0x6c0] ss:$12 sps:$4 sm:$0xff]  }
  0xe6   : >> { %4658 = vmatpush3.bf16.msra.mxu1 %v5057_v62  ;;  %v5134_v62 = vld [vmem:[%s6931_s1 + $0x8f0] ss:$12 sps:$4 sm:$0xff]  }
  0xe7   : >> { %4659 = vmatprep.subr.bf16.mxu1 %v5061_v63  ;;  %v5128_v63 = vld [vmem:[%s6931_s1 + $0x780] ss:$12 sps:$4 sm:$0xff]  }
  0xe8   : >> { %2218 = vmatpush1.bf16.msra.mxu0 %v5058_v1  ;;  %v5133_v1 = vld [vmem:[%s6931_s1 + $0x8ec] ss:$12 sps:$4 sm:$0xff]  }
  0xe9   : >> { %2219 = vmatprep.subr.bf16.mxu0 %v5065_v2  ;;  %v5135_v2 = vld [vmem:[%s6931_s1 + $0x830] ss:$12 sps:$4 sm:$0xff]  }
  0xea   : >> { %4660 = vmatpush3.bf16.msra.mxu1 %v5062_v3  ;;  %v5139_v3 = vld [vmem:[%s6931_s1 + $0x8d8] ss:$12 sps:$4 sm:$0xff]  }
  0xeb   : >> { %4661 = vmatprep.subr.bf16.mxu1 %v5066_v4  ;;  %v5131_v4 = vld [vmem:[%s6931_s1 + $0x8e8] ss:$12 sps:$4 sm:$0xff]  }
  0xec   : >> { %2220 = vmatpush1.bf16.msra.mxu0 %v5063_v5 }
  0xed   : >> { %2221 = vmatprep.subr.bf16.mxu0 %v5070_v6  ;;  %v5138_v6 = vld [vmem:[%s6931_s1 + $0x8d4] ss:$12 sps:$4 sm:$0xff]  }
  0xee   : >> { %4662 = vmatpush3.bf16.msra.mxu1 %v5067_v7  ;;  %v5140_v7 = vld [vmem:[%s6931_s1 + $0x818] ss:$12 sps:$4 sm:$0xff]  }
  0xef   : >> { %4663 = vmatprep.subr.bf16.mxu1 %v5071_v8 }
  0xf0   : >> { %2222 = vmatpush1.bf16.msra.mxu0 %v5068_v9  ;;  %v5144_v9 = vld [vmem:[%s6931_s1 + $0x8c0] ss:$12 sps:$4 sm:$0xff]  }
  0xf1   : >> { %2223 = vmatprep.subr.bf16.mxu0 %v5075_v10  ;;  %v5136_v10 = vld [vmem:[%s6931_s1 + $0x8d0] ss:$12 sps:$4 sm:$0xff]  }
  0xf2   : >> { %4664 = vmatpush3.bf16.msra.mxu1 %v5072_v11 }
  0xf3   : >> { %4665 = vmatprep.subr.bf16.mxu1 %v5076_v12  ;;  %v5143_v12 = vld [vmem:[%s6931_s1 + $0x8bc] ss:$12 sps:$4 sm:$0xff]  }
  0xf4   : >> { %2224 = vmatpush1.bf16.msra.mxu0 %v5073_v14 }
  0xf5   : >> { %2225 = vmatprep.subr.bf16.mxu0 %v5080_v15  ;;  %v5149_v15 = vld [vmem:[%s6931_s1 + $0x8a8] ss:$12 sps:$4 sm:$0xff]  }
  0xf6   : >> { %4666 = vmatpush3.bf16.msra.mxu1 %v5077_v16  ;;  %v5141_v16 = vld [vmem:[%s6931_s1 + $0x8b8] ss:$12 sps:$4 sm:$0xff]  }
  0xf7   : >> { %4667 = vmatprep.subr.bf16.mxu1 %v5081_v56  ;;  %v5148_v56 = vld [vmem:[%s6931_s1 + $0x8a4] ss:$12 sps:$4 sm:$0xff]  }
  0xf8   : >> { %2226 = vmatpush1.bf16.msra.mxu0 %v5078_v19  ;;  %v5146_v19 = vld [vmem:[%s6931_s1 + $0x8a0] ss:$12 sps:$4 sm:$0xff]  }
  0xf9   : >> { %2227 = vmatprep.subr.bf16.mxu0 %v5085_v20  ;;  %v5153_v20 = vld [vmem:[%s6931_s1 + $0x88c] ss:$12 sps:$4 sm:$0xff]  }
  0xfa   : >> { %4668 = vmatpush3.bf16.msra.mxu1 %v5082_v21  ;;  %v5155_v21 = vld [vmem:[%s6931_s1 + $0x7d0] ss:$12 sps:$4 sm:$0xff]  }
  0xfb   : >> { %2625 = vmatprep.subr.bf16.mxu1 %v5088_v22  ;;  %v4581_v33 = vpop.f32.mrf.mxu1  ;;  %v5159_v22 = vld [vmem:[%s6931_s1 + $0x878] ss:$12 sps:$4 sm:$0xff]  }
  0xfc   : >> { %2228 = vmatpush2.bf16.msra.mxu0 %v5083_v23  ;;  %v5151_v23 = vld [vmem:[%s6931_s1 + $0x888] ss:$12 sps:$4 sm:$0xff]  }
  0xfd   : >> { %2285 = vmatmul.mubr.bf16.vlgmr.msra.gmra.mxu1 %v6209_v24  ;;  %2229 = vmatprep.subr.bf16.mxu0 %v5091_v25  ;;  %v4582_v36 = vpop.f32.mrf.mxu1  ;;  %v5160_v25 = vld [vmem:[%s6931_s1 + $0x7b8] ss:$12 sps:$4 sm:$0xff]  }
  0xfe   : >> { %2626 = vmatpush1.bf16.msra.mxu1 %v5086_v27  ;;  %2657 = vmatprep.mubr.bf16.mxu1 %v6228_v31  ;;  %v6244_v38 = vadd.f32 %v4582_v36, %v4581_v33  ;;  %v5164_v27 = vld [vmem:[%s6931_s1 + $0x860] ss:$12 sps:$4 sm:$0xff]   ;;  %v5161_v33 = vld [vmem:[%s6931_s1 + $0x858] ss:$12 sps:$4 sm:$0xff]  }
  0xff   : >> { %2627 = vmatprep.subr.bf16.mxu1 %v5094_v29  ;;  %v4584_v40 = vpop.f32.mrf.mxu1  ;;  %v5163_v29 = vld [vmem:[%s6931_s1 + $0x85c] ss:$12 sps:$4 sm:$0xff]   ;;  %v5166_v36 = vld [vmem:[%s6931_s1 + $0x840] ss:$12 sps:$4 sm:$0xff]  }
 0x100   : >> { %2230 = vmatpush2.bf16.msra.mxu0 %v5089_v30  ;;  %v5165_v30 = vld [vmem:[%s6931_s1 + $0x7a0] ss:$12 sps:$4 sm:$0xff]   ;;  %v6420_v40 = vld [vmem:[%s5566_s7 + $0x10] sm:$0x33] }
 0x101   : >> { %2231 = vmatprep.subr.bf16.mxu0 %v5097_v32  ;;  %v4585_v43 = vpop.f32.mrf.mxu1  ;;  %v4353_v32 = vcombine.low %v6215_v26, %v6215_v26 }
 0x102   : >> { %2628 = vmatpush1.bf16.msra.mxu1 %v5092_v34  ;;  %v5168_v34 = vld [vmem:[%s6931_s1 + $0x844] ss:$12 sps:$4 sm:$0xff]  }
 0x103   : >> { %2629 = vmatprep.subr.bf16.mxu1 %v5100_v35  ;;  %v5170_v35 = vld [vmem:[%s6931_s1 + $0x788] ss:$12 sps:$4 sm:$0xff]   ;;  %v2365_v26 = vrot.slane %v4353_v32, 1  ;;  %v5177_v43 = vld [vmem:[%s6931_s1 + $0x9b0] ss:$12 sps:$4 sm:$0xff]  }
 0x104   : >> { %2232 = vmatpush2.bf16.msra.mxu0 %v5095_v37  ;;  %v5175_v37 = vld [vmem:[%s6931_s1 + $0x9ac] ss:$12 sps:$4 sm:$0xff]   ;;  %v5221_v32 = vld [vmem:[%s6931_s1 + $0xa50] ss:$12 sps:$4 sm:$0xff]  }
 0x105   : >> { %2233 = vmatprep.subr.bf16.mxu0 %v5103_v39  ;;  %v5176_v39 = vld [vmem:[%s6931_s1 + $0xa70] ss:$12 sps:$4 sm:$0xff]  }
 0x106   : >> { %2630 = vmatpush1.bf16.msra.mxu1 %v5098_v41  ;;  %v5173_v41 = vld [vmem:[%s6931_s1 + $0x9a8] ss:$12 sps:$4 sm:$0xff]  }
 0x107   : >> { %2631 = vmatprep.subr.bf16.mxu1 %v5106_v42  ;;  %v5180_v42 = vld [vmem:[%s6931_s1 + $0x994] ss:$12 sps:$4 sm:$0xff]  }
 0x108   : >> { %2234 = vmatpush2.bf16.msra.mxu0 %v5101_v44  ;;  %v6433_v44 = vcombine.high %v6420_v40, %v6420_v40 }
 0x109   : >> { %2235 = vmatprep.subr.bf16.mxu0 %v5109_v45 }
 0x10a   : >> { %2632 = vmatpush1.bf16.msra.mxu1 %v5104_v46  ;;  %v5181_v46 = vld [vmem:[%s6931_s1 + $0xa58] ss:$12 sps:$4 sm:$0xff]  }
 0x10b   : >> { %2633 = vmatprep.subr.bf16.mxu1 %v5112_v47  ;;  %v5178_v47 = vld [vmem:[%s6931_s1 + $0x990] ss:$12 sps:$4 sm:$0xff]  }
 0x10c   : >> { %2236 = vmatpush2.bf16.msra.mxu0 %v5107_v48 }
 0x10d   : >> { %2237 = vmatprep.subr.bf16.mxu0 %v5115_v49 }
 0x10e   : >> { %2634 = vmatpush1.bf16.msra.mxu1 %v5110_v50  ;;  %v5185_v50 = vld [vmem:[%s6931_s1 + $0x97c] ss:$12 sps:$4 sm:$0xff]  }
 0x10f   : >> { %2635 = vmatprep.subr.bf16.mxu1 %v5118_v51 }
 0x110   : >> { %2238 = vmatpush2.bf16.msra.mxu0 %v5113_v52 }
 0x111   : >> { %2239 = vmatprep.subr.bf16.mxu0 %v5121_v53  ;;  %v5182_v53 = vld [vmem:[%s6931_s1 + $0x998] ss:$12 sps:$4 sm:$0xff]  }
 0x112   : >> { %2636 = vmatpush1.bf16.msra.mxu1 %v5116_v54 }
 0x113   : >> { %2637 = vmatprep.subr.bf16.mxu1 %v5124_v55 }
 0x114   : >> { %2240 = vmatpush2.bf16.msra.mxu0 %v5119_v57  ;;  %v5186_v57 = vld [vmem:[%s6931_s1 + $0xa40] ss:$12 sps:$4 sm:$0xff]  }
 0x115   : >> { %2241 = vmatprep.subr.bf16.mxu0 %v5127_v58 }
 0x116   : >> { %2638 = vmatpush1.bf16.msra.mxu1 %v5122_v59 }
 0x117   : >> { %2639 = vmatprep.subr.bf16.mxu1 %v5130_v60  ;;  %v5183_v60 = vld [vmem:[%s6931_s1 + $0x978] ss:$12 sps:$4 sm:$0xff]  }
 0x118   : >> { %2242 = vmatpush2.bf16.msra.mxu0 %v5125_v61 }
 0x119   : >> { %4675 = vmatprep.subr.bf16.mxu0 %v5134_v62  ;;  %v5190_v62 = vld [vmem:[%s6931_s1 + $0x964] ss:$12 sps:$4 sm:$0xff]  }
 0x11a   : >> { %2640 = vmatpush1.bf16.msra.mxu1 %v5128_v63 }
 0x11b   : >> { %v6324_v5 = vpop.f32.mrf.mxu0  ;;  %2244 = vmatmul.mubr.bf16.vlgmr.msra.gmra.mxu0 %v6209_v24  ;;  %2641 = vmatprep.subr.bf16.mxu1 %v5133_v1  ;;  %v5158_v24 = vld [vmem:[%s6931_s1 + $0x874] ss:$12 sps:$4 sm:$0xff]  }
 0x11c   : >> { %4676 = vmatpush3.bf16.msra.mxu0 %v5135_v2  ;;  %2698 = vmatprep.mubr.bf16.mxu0 %v6228_v31  ;;  %v5169_v31 = vld [vmem:[%s6931_s1 + $0x848] ss:$12 sps:$4 sm:$0xff]   ;;  %v5187_v1 = vld [vmem:[%s6931_s1 + $0x980] ss:$12 sps:$4 sm:$0xff]  }
 0x11d   : >> { %v6334_v8 = vpop.f32.mrf.mxu0  ;;  %4677 = vmatprep.subr.bf16.mxu0 %v5139_v3  ;;  %v5188_v3 = vld [vmem:[%s6931_s1 + $0x960] ss:$12 sps:$4 sm:$0xff]  }
 0x11e   : >> { %2642 = vmatpush2.bf16.msra.mxu1 %v5131_v4  ;;  %v5195_v4 = vld [vmem:[%s6931_s1 + $0x94c] ss:$12 sps:$4 sm:$0xff]  }
 0x11f   : >> { %v663_v11 = vpop.f32.mrf.mxu0  ;;  %2643 = vmatprep.subr.bf16.mxu1 %v5138_v6  ;;  %v5196_v6 = vld [vmem:[%s6931_s1 + $0xa10] ss:$12 sps:$4 sm:$0xff]  }
 0x120   : >> { %4678 = vmatpush3.bf16.msra.mxu0 %v5140_v7  ;;  %v5193_v7 = vld [vmem:[%s6931_s1 + $0x948] ss:$12 sps:$4 sm:$0xff]   ;;  %v5198_v11 = vld [vmem:[%s6931_s1 + $0x930] ss:$12 sps:$4 sm:$0xff]  }
 0x121   : >> { %v664_v14 = vpop.f32.mrf.mxu0  ;;  %4679 = vmatprep.subr.bf16.mxu0 %v5144_v9  ;;  %v5197_v9 = vld [vmem:[%s6931_s1 + $0x950] ss:$12 sps:$4 sm:$0xff]  }
 0x122   : >> { %2644 = vmatpush2.bf16.msra.mxu1 %v5136_v10  ;;  %v5201_v10 = vld [vmem:[%s6931_s1 + $0x9f8] ss:$12 sps:$4 sm:$0xff]   ;;  %v5206_v14 = vld [vmem:[%s6931_s1 + $0x9e0] ss:$12 sps:$4 sm:$0xff]  }
 0x123   : >> { %2645 = vmatprep.subr.bf16.mxu1 %v5143_v12  ;;  %v5205_v12 = vld [vmem:[%s6931_s1 + $0x91c] ss:$12 sps:$4 sm:$0xff]  }
 0x124   : >> { %4680 = vmatpush3.bf16.msra.mxu0 %v5145_v13  ;;  %v5202_v13 = vld [vmem:[%s6931_s1 + $0x938] ss:$12 sps:$4 sm:$0xff]  }
 0x125   : >> { %4681 = vmatprep.subr.bf16.mxu0 %v5149_v15  ;;  %v5203_v15 = vld [vmem:[%s6931_s1 + $0x918] ss:$12 sps:$4 sm:$0xff]  }
 0x126   : >> { %2646 = vmatpush2.bf16.msra.mxu1 %v5141_v16  ;;  %v5210_v16 = vld [vmem:[%s6931_s1 + $0x904] ss:$12 sps:$4 sm:$0xff]  }
 0x127   : >> { %2647 = vmatprep.subr.bf16.mxu1 %v5148_v56  ;;  %v5207_v56 = vld [vmem:[%s6931_s1 + $0x920] ss:$12 sps:$4 sm:$0xff]  }
 0x128   : >> { %4682 = vmatpush3.bf16.msra.mxu0 %v5150_v17  ;;  %v3199_v17 = vshll.u32 %v6433_v44, 16 }
 0x129   : >> { %4683 = vmatprep.subr.bf16.mxu0 %v5154_v18  ;;  %v5211_v18 = vld [vmem:[%s6931_s1 + $0x9c8] ss:$12 sps:$4 sm:$0xff]  }
 0x12a   : >> { %2648 = vmatpush2.bf16.msra.mxu1 %v5146_v19  ;;  %v5208_v19 = vld [vmem:[%s6931_s1 + $0x900] ss:$12 sps:$4 sm:$0xff]  }
 0x12b   : >> { %2649 = vmatprep.subr.bf16.mxu1 %v5153_v20  ;;  %v5216_v20 = vld [vmem:[%s6931_s1 + $0xa6c] ss:$12 sps:$4 sm:$0xff]  }
 0x12c   : >> { %4684 = vmatpush3.bf16.msra.mxu0 %v5155_v21  ;;  %v5212_v21 = vld [vmem:[%s6931_s1 + $0x908] ss:$12 sps:$4 sm:$0xff]  }
 0x12d   : >> { %4685 = vmatprep.subr.bf16.mxu0 %v5159_v22  ;;  %v3197_v22 = vshrl.u32 %v6433_v44, 16 }
 0x12e   : >> { %2650 = vmatpush2.bf16.msra.mxu1 %v5151_v23  ;;  %v3201_v23 = vrot.slane %v3199_v17, 1 }
 0x12f   : >> { %2651 = vmatprep.subr.bf16.mxu1 %v5158_v24  ;;  %v5220_v24 = vld [vmem:[%s6931_s1 + $0xb2c] ss:$12 sps:$4 sm:$0xff]  }
 0x130   : >> { %4686 = vmatpush3.bf16.msra.mxu0 %v5160_v25  ;;  %v5214_v25 = vld [vmem:[%s6931_s1 + $0xa68] ss:$12 sps:$4 sm:$0xff]  }
 0x131   : >> { %4687 = vmatprep.subr.bf16.mxu0 %v5164_v27  ;;  %v6540_v27 = vcombine.low %v6420_v40, %v6420_v40  ;;  %v5235_v40 = vld [vmem:[%s6931_s1 + $0xa24] ss:$12 sps:$4 sm:$0xff]  }
 0x132   : >> { %2652 = vmatpush2.bf16.msra.mxu1 %v5156_v28  ;;  %v5223_v28 = vld [vmem:[%s6931_s1 + $0xa54] ss:$12 sps:$4 sm:$0xff]  }
 0x133   : >> { %2653 = vmatprep.subr.bf16.mxu1 %v5163_v29  ;;  %v5218_v29 = vld [vmem:[%s6931_s1 + $0xb28] ss:$12 sps:$4 sm:$0xff]  }
 0x134   : >> { %4688 = vmatpush3.bf16.msra.mxu0 %v5165_v30  ;;  %v6548_v30 = vor.u32 %v3201_v23, %v3197_v22  ;;  %v5278_v22 = vld [vmem:[%s6931_s1 + $0xba0] ss:$12 sps:$4 sm:$0xff]  }
 0x135   : >> { %4689 = vmatprep.subr.bf16.mxu0 %v5169_v31  ;;  %v5226_v31 = vld [vmem:[%s6931_s1 + $0xb14] ss:$12 sps:$4 sm:$0xff]   ;;  %v5285_v23 = vld [vmem:[%s6931_s1 + $0xb8c] ss:$12 sps:$4 sm:$0xff]  }
 0x136   : >> { %2654 = vmatpush2.bf16.msra.mxu1 %v5161_v33 }
 0x137   : >> { %2655 = vmatprep.subr.bf16.mxu1 %v5168_v34  ;;  %v5229_v34 = vld [vmem:[%s6931_s1 + $0xa3c] ss:$12 sps:$4 sm:$0xff]  }
 0x138   : >> { %4690 = vmatpush3.bf16.msra.mxu0 %v5170_v35  ;;  %v5224_v35 = vld [vmem:[%s6931_s1 + $0xb10] ss:$12 sps:$4 sm:$0xff]  }
 0x139   : >> { %3041 = vmatprep.subr.bf16.mxu0 %v5175_v37 }
 0x13a   : >> { %2656 = vmatpush2.bf16.msra.mxu1 %v5166_v36 }
 0x13b   : >> { %v4603_v45 = vpop.f32.mrf.mxu0  ;;  %2699 = vmatmul.mubr.bf16.vlgmr.msra.gmra.mxu0 %v2365_v26  ;;  %4697 = vmatprep.subr.bf16.mxu1 %v5176_v39  ;;  %v5227_v39 = vld [vmem:[%s6931_s1 + $0xa38] ss:$12 sps:$4 sm:$0xff]  }
 0x13c   : >> { %3042 = vmatpush1.bf16.msra.mxu0 %v5173_v41  ;;  %3073 = vmatprep.mubr.bf16.mxu0 %v6433_v44  ;;  %v998_v48 = vpop.f32.mrf.mxu1 }
 0x13d   : >> { %2658 = vmatmul.mubr.bf16.vlgmr.msra.gmra.mxu1 %v2365_v26  ;;  %v4604_v49 = vpop.f32.mrf.mxu0  ;;  %3043 = vmatprep.subr.bf16.mxu0 %v5180_v42  ;;  %v6446_v51 = vadd.f32 %v998_v48, %v6324_v5  ;;  %v5192_v5 = vld [vmem:[%s6931_s1 + $0x968] ss:$12 sps:$4 sm:$0xff]   ;;  %v5236_v48 = vld [vmem:[%s6931_s1 + $0xae0] ss:$12 sps:$4 sm:$0xff]  }
 0x13e   : >> { %4698 = vmatpush3.bf16.msra.mxu1 %v5177_v43  ;;  %v4605_v52 = vadd.f32 %v4604_v49, %v4603_v45  ;;  %3114 = vmatprep.mubr.bf16.mxu1 %v6433_v44  ;;  %v1000_v54 = vpop.f32.mrf.mxu1  ;;  %v5232_v26 = vld [vmem:[%s6931_s1 + $0xafc] ss:$12 sps:$4 sm:$0xff]   ;;  %v5230_v43 = vld [vmem:[%s6931_s1 + $0xaf8] ss:$12 sps:$4 sm:$0xff]  }
 0x13f   : >> { %v4606_v55 = vpop.f32.mrf.mxu0  ;;  %4699 = vmatprep.subr.bf16.mxu1 %v5181_v46  ;;  %v6456_v58 = vadd.f32 %v1000_v54, %v6334_v8  ;;  %v5200_v8 = vld [vmem:[%s6931_s1 + $0x934] ss:$12 sps:$4 sm:$0xff]   ;;  %v5238_v44 = vld [vmem:[%s6931_s1 + $0xae4] ss:$12 sps:$4 sm:$0xff]   ;;  %v5244_v49 = vld [vmem:[%s6931_s1 + $0xacc] ss:$12 sps:$4 sm:$0xff]  }
 0x140   : >> { %v6459_v59 = vadd.f32 %v4605_v52, %v6244_v38  ;;  %3044 = vmatpush1.bf16.msra.mxu0 %v5178_v47  ;;  %v1002_v63 = vpop.f32.mrf.mxu1  ;;  %v5191_v38 = vld [vmem:[%s6931_s1 + $0xa28] ss:$12 sps:$4 sm:$0xff]   ;;  %v5233_v46 = vld [vmem:[%s6931_s1 + $0xa20] ss:$12 sps:$4 sm:$0xff]   ;;  %v5245_v55 = vld [vmem:[%s6931_s1 + $0x9f0] ss:$12 sps:$4 sm:$0xff]  }
 0x141   : >> { %v4607_v61 = vpop.f32.mrf.mxu0  ;;  %3045 = vmatprep.subr.bf16.mxu0 %v5185_v50  ;;  %v5241_v47 = vld [vmem:[%s6931_s1 + $0xa0c] ss:$12 sps:$4 sm:$0xff]   ;;  %v5239_v50 = vld [vmem:[%s6931_s1 + $0xa08] ss:$12 sps:$4 sm:$0xff]  }
 0x142   : >> { %4700 = vmatpush3.bf16.msra.mxu1 %v5182_v53  ;;  %v1003_v2 = vpop.f32.mrf.mxu1  ;;  %v5247_v52 = vld [vmem:[%s6931_s1 + $0x9f4] ss:$12 sps:$4 sm:$0xff]   ;;  %v5251_v61 = vld [vmem:[%s6931_s1 + $0x9d8] ss:$12 sps:$4 sm:$0xff]  }
 0x143   : >> { %4701 = vmatprep.subr.bf16.mxu1 %v5186_v57  ;;  %v5242_v53 = vld [vmem:[%s6931_s1 + $0xac8] ss:$12 sps:$4 sm:$0xff]   ;;  %v5254_v63 = vld [vmem:[%s6931_s1 + $0xa98] ss:$12 sps:$4 sm:$0xff]   ;;  %v5266_v2 = vld [vmem:[%s6931_s1 + $0xbf0] ss:$12 sps:$4 sm:$0xff]  }
 0x144   : >> { %3046 = vmatpush1.bf16.msra.mxu0 %v5183_v60  ;;  %v5250_v54 = vld [vmem:[%s6931_s1 + $0xab4] ss:$12 sps:$4 sm:$0xff]   ;;  %v5253_v57 = vld [vmem:[%s6931_s1 + $0x9dc] ss:$12 sps:$4 sm:$0xff]  }
 0x145   : >> { %3047 = vmatprep.subr.bf16.mxu0 %v5190_v62  ;;  %v5256_v60 = vld [vmem:[%s6931_s1 + $0xa9c] ss:$12 sps:$4 sm:$0xff]   ;;  %v5259_v62 = vld [vmem:[%s6931_s1 + $0x9c4] ss:$12 sps:$4 sm:$0xff]  }
 0x146   : >> { %4702 = vmatpush3.bf16.msra.mxu1 %v5187_v1  ;;  %v5262_v1 = vld [vmem:[%s6931_s1 + $0xa84] ss:$12 sps:$4 sm:$0xff]  }
 0x147   : >> { %4703 = vmatprep.subr.bf16.mxu1 %v5191_v38  ;;  %v5257_v38 = vld [vmem:[%s6931_s1 + $0x9c0] ss:$12 sps:$4 sm:$0xff]  }
 0x148   : >> { %3048 = vmatpush1.bf16.msra.mxu0 %v5188_v3  ;;  %v5260_v3 = vld [vmem:[%s6931_s1 + $0xa80] ss:$12 sps:$4 sm:$0xff]  }
 0x149   : >> { %3049 = vmatprep.subr.bf16.mxu0 %v5195_v4  ;;  %v5265_v4 = vld [vmem:[%s6931_s1 + $0xbec] ss:$12 sps:$4 sm:$0xff]  }
 0x14a   : >> { %4704 = vmatpush3.bf16.msra.mxu1 %v5192_v5  ;;  %v5267_v5 = vld [vmem:[%s6931_s1 + $0xb30] ss:$12 sps:$4 sm:$0xff]  }
 0x14b   : >> { %4705 = vmatprep.subr.bf16.mxu1 %v5196_v6  ;;  %v5271_v6 = vld [vmem:[%s6931_s1 + $0xbd8] ss:$12 sps:$4 sm:$0xff]  }
 0x14c   : >> { %3050 = vmatpush1.bf16.msra.mxu0 %v5193_v7  ;;  %v5263_v7 = vld [vmem:[%s6931_s1 + $0xbe8] ss:$12 sps:$4 sm:$0xff]  }
 0x14d   : >> { %3051 = vmatprep.subr.bf16.mxu0 %v5200_v8 }
 0x14e   : >> { %4706 = vmatpush3.bf16.msra.mxu1 %v5197_v9  ;;  %v5270_v9 = vld [vmem:[%s6931_s1 + $0xbd4] ss:$12 sps:$4 sm:$0xff]  }
 0x14f   : >> { %4707 = vmatprep.subr.bf16.mxu1 %v5201_v10 }
 0x150   : >> { %3052 = vmatpush1.bf16.msra.mxu0 %v5198_v11  ;;  %v5272_v11 = vld [vmem:[%s6931_s1 + $0xb18] ss:$12 sps:$4 sm:$0xff]  }
 0x151   : >> { %3053 = vmatprep.subr.bf16.mxu0 %v5205_v12 }
 0x152   : >> { %4708 = vmatpush3.bf16.msra.mxu1 %v5202_v13  ;;  %v5276_v13 = vld [vmem:[%s6931_s1 + $0xbc0] ss:$12 sps:$4 sm:$0xff]  }
 0x153   : >> { %4709 = vmatprep.subr.bf16.mxu1 %v5206_v14 }
 0x154   : >> { %3054 = vmatpush1.bf16.msra.mxu0 %v5203_v15 }
 0x155   : >> { %3055 = vmatprep.subr.bf16.mxu0 %v5210_v16  ;;  %v5275_v16 = vld [vmem:[%s6931_s1 + $0xbbc] ss:$12 sps:$4 sm:$0xff]  }
 0x156   : >> { %4710 = vmatpush3.bf16.msra.mxu1 %v5207_v56  ;;  %v5277_v56 = vld [vmem:[%s6931_s1 + $0xb00] ss:$12 sps:$4 sm:$0xff]  }
 0x157   : >> { %4711 = vmatprep.subr.bf16.mxu1 %v5211_v18  ;;  %v5273_v18 = vld [vmem:[%s6931_s1 + $0xbb8] ss:$12 sps:$4 sm:$0xff]  }
 0x158   : >> { %3056 = vmatpush1.bf16.msra.mxu0 %v5208_v19  ;;  %v5280_v19 = vld [vmem:[%s6931_s1 + $0xba4] ss:$12 sps:$4 sm:$0xff]  }
 0x159   : >> { %3057 = vmatprep.subr.bf16.mxu0 %v5216_v20  ;;  %v5282_v20 = vld [vmem:[%s6931_s1 + $0xae8] ss:$12 sps:$4 sm:$0xff]  }
 0x15a   : >> { %4712 = vmatpush3.bf16.msra.mxu1 %v5212_v21  ;;  %v5286_v21 = vld [vmem:[%s6931_s1 + $0xb90] ss:$12 sps:$4 sm:$0xff]  }
 0x15b   : >> { %3461 = vmatprep.subr.bf16.mxu1 %v5220_v24  ;;  %v5287_v24 = vld [vmem:[%s6931_s1 + $0xad0] ss:$12 sps:$4 sm:$0xff]  }
 0x15c   : >> { %3058 = vmatpush2.bf16.msra.mxu0 %v5214_v25  ;;  %v4625_v33 = vpop.f32.mrf.mxu1  ;;  %v5291_v25 = vld [vmem:[%s6931_s1 + $0xb78] ss:$12 sps:$4 sm:$0xff]  }
 0x15d   : >> { %3115 = vmatmul.mubr.bf16.vlgmr.msra.gmra.mxu1 %v6540_v27  ;;  %3059 = vmatprep.subr.bf16.mxu0 %v5223_v28  ;;  %v5283_v28 = vld [vmem:[%s6931_s1 + $0xb88] ss:$12 sps:$4 sm:$0xff]  }
 0x15e   : >> { %3462 = vmatpush1.bf16.msra.mxu1 %v5218_v29  ;;  %3493 = vmatprep.mubr.bf16.mxu1 %v6548_v30  ;;  %v4626_v36 = vpop.f32.mrf.mxu1  ;;  %v5290_v29 = vld [vmem:[%s6931_s1 + $0xb74] ss:$12 sps:$4 sm:$0xff]  }
 0x15f   : >> { %3463 = vmatprep.subr.bf16.mxu1 %v5226_v31  ;;  %v4627_v37 = vadd.f32 %v4626_v36, %v4625_v33  ;;  %v5296_v31 = vld [vmem:[%s6931_s1 + $0xb60] ss:$12 sps:$4 sm:$0xff]   ;;  %v5295_v33 = vld [vmem:[%s6931_s1 + $0xb5c] ss:$12 sps:$4 sm:$0xff]  }
 0x160   : >> { %3060 = vmatpush2.bf16.msra.mxu0 %v5221_v32  ;;  %v4628_v41 = vpop.f32.mrf.mxu1  ;;  %v5288_v32 = vld [vmem:[%s6931_s1 + $0xb70] ss:$12 sps:$4 sm:$0xff]   ;;  %v5301_v36 = vld [vmem:[%s6931_s1 + $0xb48] ss:$12 sps:$4 sm:$0xff]  }
 0x161   : >> { %3061 = vmatprep.subr.bf16.mxu0 %v5229_v34  ;;  %v6574_v42 = vadd.f32 %v4627_v37, %v6459_v59  ;;  %v5248_v59 = vld [vmem:[%s6931_s1 + $0xab0] ss:$12 sps:$4 sm:$0xff]   ;;  %v3192_v34 = vshll.u32 %v6540_v27, 16 }
 0x162   : >> { %3464 = vmatpush1.bf16.msra.mxu1 %v5224_v35  ;;  %v4629_v45 = vpop.f32.mrf.mxu1  ;;  %v5297_v35 = vld [vmem:[%s6931_s1 + $0xaa0] ss:$12 sps:$4 sm:$0xff]   ;;  %v5300_v37 = vld [vmem:[%s6931_s1 + $0xb44] ss:$12 sps:$4 sm:$0xff]  }
 0x163   : >> { %3465 = vmatprep.subr.bf16.mxu1 %v5232_v26  ;;  %v5293_v26 = vld [vmem:[%s6931_s1 + $0xb58] ss:$12 sps:$4 sm:$0xff]   ;;  %v6737_v41 = vld [vmem:[%s5566_s7 + $0x10] sm:$0x66]  ;;  %v5298_v45 = vld [vmem:[%s6931_s1 + $0xb40] ss:$12 sps:$4 sm:$0xff]  }
 0x164   : >> { %3062 = vmatpush2.bf16.msra.mxu0 %v5227_v39  ;;  %v3190_v39 = vshrl.u32 %v6540_v27, 16 }
 0x165   : >> { %3063 = vmatprep.subr.bf16.mxu0 %v5235_v40  ;;  %v3194_v40 = vrot.slane %v3192_v34, 1 }
 0x166   : >> { %3466 = vmatpush1.bf16.msra.mxu1 %v5230_v43  ;;  %v5302_v43 = vld [vmem:[%s6931_s1 + $0xa88] ss:$12 sps:$4 sm:$0xff]  }
 0x167   : >> { %3467 = vmatprep.subr.bf16.mxu1 %v5238_v44  ;;  %v5305_v44 = vld [vmem:[%s6931_s1 + $0xcac] ss:$12 sps:$4 sm:$0xff]  }
 0x168   : >> { %3064 = vmatpush2.bf16.msra.mxu0 %v5233_v46  ;;  %v3195_v46 = vor.u32 %v3194_v40, %v3190_v39  ;;  %v5356_v39 = vld [vmem:[%s6931_s1 + $0xd24] ss:$12 sps:$4 sm:$0xff]  }
 0x169   : >> { %3065 = vmatprep.subr.bf16.mxu0 %v5241_v47  ;;  %v5306_v47 = vld [vmem:[%s6931_s1 + $0xd70] ss:$12 sps:$4 sm:$0xff]  }
 0x16a   : >> { %3468 = vmatpush1.bf16.msra.mxu1 %v5236_v48  ;;  %v5303_v48 = vld [vmem:[%s6931_s1 + $0xca8] ss:$12 sps:$4 sm:$0xff]  }
 0x16b   : >> { %3469 = vmatprep.subr.bf16.mxu1 %v5244_v49  ;;  %v5310_v49 = vld [vmem:[%s6931_s1 + $0xc94] ss:$12 sps:$4 sm:$0xff]  }
 0x16c   : >> { %3066 = vmatpush2.bf16.msra.mxu0 %v5239_v50  ;;  %v5307_v50 = vld [vmem:[%s6931_s1 + $0xcb0] ss:$12 sps:$4 sm:$0xff]  }
 0x16d   : >> { %3067 = vmatprep.subr.bf16.mxu0 %v5247_v52 }
 0x16e   : >> { %3470 = vmatpush1.bf16.msra.mxu1 %v5242_v53 }
 0x16f   : >> { %3471 = vmatprep.subr.bf16.mxu1 %v5250_v54  ;;  %v5311_v54 = vld [vmem:[%s6931_s1 + $0xd58] ss:$12 sps:$4 sm:$0xff]  }
 0x170   : >> { %3068 = vmatpush2.bf16.msra.mxu0 %v5245_v55  ;;  %v5308_v55 = vld [vmem:[%s6931_s1 + $0xc90] ss:$12 sps:$4 sm:$0xff]  }
 0x171   : >> { %3069 = vmatprep.subr.bf16.mxu0 %v5253_v57 }
 0x172   : >> { %3472 = vmatpush1.bf16.msra.mxu1 %v5248_v59 }
 0x173   : >> { %3473 = vmatprep.subr.bf16.mxu1 %v5256_v60  ;;  %v5315_v60 = vld [vmem:[%s6931_s1 + $0xc7c] ss:$12 sps:$4 sm:$0xff]  }
 0x174   : >> { %3070 = vmatpush2.bf16.msra.mxu0 %v5251_v61 }
 0x175   : >> { %3071 = vmatprep.subr.bf16.mxu0 %v5259_v62 }
 0x176   : >> { %3474 = vmatpush1.bf16.msra.mxu1 %v5254_v63  ;;  %v5312_v63 = vld [vmem:[%s6931_s1 + $0xc98] ss:$12 sps:$4 sm:$0xff]  }
 0x177   : >> { %3475 = vmatprep.subr.bf16.mxu1 %v5262_v1 }
 0x178   : >> { %3072 = vmatpush2.bf16.msra.mxu0 %v5257_v38 }
 0x179   : >> { %4719 = vmatprep.subr.bf16.mxu0 %v5266_v2  ;;  %v5316_v2 = vld [vmem:[%s6931_s1 + $0xd40] ss:$12 sps:$4 sm:$0xff]  }
 0x17a   : >> { %3476 = vmatpush1.bf16.msra.mxu1 %v5260_v3 }
 0x17b   : >> { %v1409_v8 = vpop.f32.mrf.mxu0  ;;  %3074 = vmatmul.mubr.bf16.vlgmr.msra.gmra.mxu0 %v6540_v27  ;;  %3477 = vmatprep.subr.bf16.mxu1 %v5265_v4  ;;  %v4505_v27 = vcombine.high %v6737_v41, %v6737_v41 }
 0x17c   : >> { %v6656_v10 = vadd.f32 %v1409_v8, %v6446_v51  ;;  %4720 = vmatpush3.bf16.msra.mxu0 %v5267_v5  ;;  %3534 = vmatprep.mubr.bf16.mxu0 %v6548_v30  ;;  %v5268_v51 = vld [vmem:[%s6931_s1 + $0xbd0] ss:$12 sps:$4 sm:$0xff]   ;;  %v5292_v30 = vld [vmem:[%s6931_s1 + $0xab8] ss:$12 sps:$4 sm:$0xff]  }
 0x17d   : >> { %v1411_v12 = vpop.f32.mrf.mxu0  ;;  %4721 = vmatprep.subr.bf16.mxu0 %v5271_v6  ;;  %v3616_v52 = vrot.slane %v4505_v27, 1  ;;  %v5313_v5 = vld [vmem:[%s6931_s1 + $0xc78] ss:$12 sps:$4 sm:$0xff]   ;;  %v5357_v27 = vld [vmem:[%s6931_s1 + $0xd08] ss:$12 sps:$4 sm:$0xff]  }
 0x17e   : >> { %3478 = vmatpush2.bf16.msra.mxu1 %v5263_v7  ;;  %v6666_v14 = vadd.f32 %v1411_v12, %v6456_v58  ;;  %v5281_v58 = vld [vmem:[%s6931_s1 + $0xba8] ss:$12 sps:$4 sm:$0xff]   ;;  %v5320_v7 = vld [vmem:[%s6931_s1 + $0xc64] ss:$12 sps:$4 sm:$0xff]   ;;  %v5325_v12 = vld [vmem:[%s6931_s1 + $0xc4c] ss:$12 sps:$4 sm:$0xff]  }
 0x17f   : >> { %v1413_v15 = vpop.f32.mrf.mxu0  ;;  %3479 = vmatprep.subr.bf16.mxu1 %v5270_v9  ;;  %v5317_v9 = vld [vmem:[%s6931_s1 + $0xc80] ss:$12 sps:$4 sm:$0xff]  }
 0x180   : >> { %4722 = vmatpush3.bf16.msra.mxu0 %v5272_v11  ;;  %v5318_v11 = vld [vmem:[%s6931_s1 + $0xc60] ss:$12 sps:$4 sm:$0xff]  }
 0x181   : >> { %v1414_v17 = vpop.f32.mrf.mxu0  ;;  %4723 = vmatprep.subr.bf16.mxu0 %v5276_v13  ;;  %v5322_v13 = vld [vmem:[%s6931_s1 + $0xc68] ss:$12 sps:$4 sm:$0xff]  }
 0x182   : >> { %3480 = vmatpush2.bf16.msra.mxu1 %v5268_v51  ;;  %v5323_v51 = vld [vmem:[%s6931_s1 + $0xc48] ss:$12 sps:$4 sm:$0xff]   ;;  %v5328_v17 = vld [vmem:[%s6931_s1 + $0xc30] ss:$12 sps:$4 sm:$0xff]  }
 0x183   : >> { %3481 = vmatprep.subr.bf16.mxu1 %v5275_v16  ;;  %v5330_v15 = vld [vmem:[%s6931_s1 + $0xc34] ss:$12 sps:$4 sm:$0xff]   ;;  %v5327_v16 = vld [vmem:[%s6931_s1 + $0xc50] ss:$12 sps:$4 sm:$0xff]  }
 0x184   : >> { %4724 = vmatpush3.bf16.msra.mxu0 %v5277_v56  ;;  %v5331_v56 = vld [vmem:[%s6931_s1 + $0xcf8] ss:$12 sps:$4 sm:$0xff]  }
 0x185   : >> { %4725 = vmatprep.subr.bf16.mxu0 %v5281_v58  ;;  %v5335_v58 = vld [vmem:[%s6931_s1 + $0xc1c] ss:$12 sps:$4 sm:$0xff]  }
 0x186   : >> { %3482 = vmatpush2.bf16.msra.mxu1 %v5273_v18  ;;  %v5332_v18 = vld [vmem:[%s6931_s1 + $0xc38] ss:$12 sps:$4 sm:$0xff]  }
 0x187   : >> { %3483 = vmatprep.subr.bf16.mxu1 %v5280_v19  ;;  %v5336_v19 = vld [vmem:[%s6931_s1 + $0xce0] ss:$12 sps:$4 sm:$0xff]  }
 0x188   : >> { %4726 = vmatpush3.bf16.msra.mxu0 %v5282_v20  ;;  %v5333_v20 = vld [vmem:[%s6931_s1 + $0xc18] ss:$12 sps:$4 sm:$0xff]  }
 0x189   : >> { %4727 = vmatprep.subr.bf16.mxu0 %v5286_v21  ;;  %v5340_v21 = vld [vmem:[%s6931_s1 + $0xc04] ss:$12 sps:$4 sm:$0xff]  }
 0x18a   : >> { %3484 = vmatpush2.bf16.msra.mxu1 %v5278_v22  ;;  %v5337_v22 = vld [vmem:[%s6931_s1 + $0xc20] ss:$12 sps:$4 sm:$0xff]  }
 0x18b   : >> { %3485 = vmatprep.subr.bf16.mxu1 %v5285_v23  ;;  %v5341_v23 = vld [vmem:[%s6931_s1 + $0xcc8] ss:$12 sps:$4 sm:$0xff]  }
 0x18c   : >> { %4728 = vmatpush3.bf16.msra.mxu0 %v5287_v24  ;;  %v5338_v24 = vld [vmem:[%s6931_s1 + $0xc00] ss:$12 sps:$4 sm:$0xff]  }
 0x18d   : >> { %4729 = vmatprep.subr.bf16.mxu0 %v5291_v25  ;;  %v4504_v25 = vcombine.low %v6737_v41, %v6737_v41 }
 0x18e   : >> { %3486 = vmatpush2.bf16.msra.mxu1 %v5283_v28  ;;  %v5347_v28 = vld [vmem:[%s6931_s1 + $0xd6c] ss:$12 sps:$4 sm:$0xff]  }
 0x18f   : >> { %3487 = vmatprep.subr.bf16.mxu1 %v5290_v29  ;;  %v5342_v29 = vld [vmem:[%s6931_s1 + $0xc08] ss:$12 sps:$4 sm:$0xff]  }
 0x190   : >> { %4730 = vmatpush3.bf16.msra.mxu0 %v5292_v30  ;;  %v5345_v30 = vld [vmem:[%s6931_s1 + $0xd68] ss:$12 sps:$4 sm:$0xff]  }
 0x191   : >> { %4731 = vmatprep.subr.bf16.mxu0 %v5296_v31  ;;  %v3615_v31 = vrot.slane %v4504_v25, 1  ;;  %v3960_v25 = vlaneseq }
 0x192   : >> { %3488 = vmatpush2.bf16.msra.mxu1 %v5288_v32  ;;  %v5350_v32 = vld [vmem:[%s6931_s1 + $0xd54] ss:$12 sps:$4 sm:$0xff]  }
 0x193   : >> { %3489 = vmatprep.subr.bf16.mxu1 %v5295_v33  ;;  %v5348_v33 = vld [vmem:[%s6931_s1 + $0xd50] ss:$12 sps:$4 sm:$0xff]  }
 0x194   : >> { %4732 = vmatpush3.bf16.msra.mxu0 %v5297_v35  ;;  %v5353_v35 = vld [vmem:[%s6931_s1 + $0xd3c] ss:$12 sps:$4 sm:$0xff]  }
 0x195   : >> { %4733 = vmatprep.subr.bf16.mxu0 %v5301_v36 }
 0x196   : >> { %3490 = vmatpush2.bf16.msra.mxu1 %v5293_v26 }
 0x197   : >> { %3491 = vmatprep.subr.bf16.mxu1 %v5300_v37  ;;  %v5351_v37 = vld [vmem:[%s6931_s1 + $0xd38] ss:$12 sps:$4 sm:$0xff]  }
 0x198   : >> { %4734 = vmatpush3.bf16.msra.mxu0 %v5302_v43 }
 0x199   : >> { %3875 = vmatprep.subr.bf16.mxu0 %v5305_v44  ;;  %v5354_v44 = vld [vmem:[%s6931_s1 + $0xd20] ss:$12 sps:$4 sm:$0xff]  }
 0x19a   : >> { %3492 = vmatpush2.bf16.msra.mxu1 %v5298_v45  ;;  %v5359_v45 = vld [vmem:[%s6931_s1 + $0xd0c] ss:$12 sps:$4 sm:$0xff]  }
 0x19b   : >> { %v4647_v53 = vpop.f32.mrf.mxu0  ;;  %3535 = vmatmul.mubr.bf16.vlgmr.msra.gmra.mxu0 %v3195_v46  ;;  %4741 = vmatprep.subr.bf16.mxu1 %v5306_v47  ;;  %v5360_v47 = vld [vmem:[%s6931_s1 + $0xcf0] ss:$12 sps:$4 sm:$0xff]  }
 0x19c   : >> { %3876 = vmatpush1.bf16.msra.mxu0 %v5303_v48  ;;  %3907 = vmatprep.mubr.bf16.mxu0 %v3616_v52  ;;  %v5365_v48 = vld [vmem:[%s6931_s1 + $0xcdc] ss:$12 sps:$4 sm:$0xff]  }
 0x19d   : >> { %v1825_v57 = vpop.f32.mrf.mxu1  ;;  %3494 = vmatmul.mubr.bf16.vlgmr.msra.gmra.mxu1 %v3195_v46  ;;  %v4648_v59 = vpop.f32.mrf.mxu0  ;;  %3877 = vmatprep.subr.bf16.mxu0 %v5310_v49  ;;  %v5362_v46 = vld [vmem:[%s6931_s1 + $0xcf4] ss:$12 sps:$4 sm:$0xff]   ;;  %v5363_v49 = vld [vmem:[%s6931_s1 + $0xcd8] ss:$12 sps:$4 sm:$0xff]  }
 0x19e   : >> { %v6772_v61 = vadd.f32 %v1825_v57, %v6656_v10  ;;  %4742 = vmatpush3.bf16.msra.mxu1 %v5307_v50  ;;  %v4649_v62 = vadd.f32 %v4648_v59, %v4647_v53  ;;  %3948 = vmatprep.mubr.bf16.mxu1 %v3616_v52  ;;  %v5368_v50 = vld [vmem:[%s6931_s1 + $0xcc4] ss:$12 sps:$4 sm:$0xff]   ;;  %v5366_v52 = vld [vmem:[%s6931_s1 + $0xcc0] ss:$12 sps:$4 sm:$0xff]  }
 0x19f   : >> { %v1827_v1 = vpop.f32.mrf.mxu1  ;;  %v4650_v38 = vpop.f32.mrf.mxu0  ;;  %4743 = vmatprep.subr.bf16.mxu1 %v5311_v54 }
 0x1a0   : >> { %v6781_v3 = vadd.f32 %v1827_v1, %v6666_v14  ;;  %v6784_v4 = vadd.f32 %v4649_v62, %v6574_v42  ;;  %3878 = vmatpush1.bf16.msra.mxu0 %v5308_v55  ;;  %v5321_v42 = vld [vmem:[%s6931_s1 + $0xd28] ss:$12 sps:$4 sm:$0xff]   ;;  %v5326_v14 = vld [vmem:[%s6931_s1 + $0xd10] ss:$12 sps:$4 sm:$0xff]  }
 0x1a1   : >> { %v4651_v6 = vpop.f32.mrf.mxu0  ;;  %3879 = vmatprep.subr.bf16.mxu0 %v5315_v60  ;;  %v1829_v8 = vpop.f32.mrf.mxu1 }
 0x1a2   : >> { %4744 = vmatpush3.bf16.msra.mxu1 %v5312_v63 }
 0x1a3   : >> { %4745 = vmatprep.subr.bf16.mxu1 %v5316_v2  ;;  %v1830_v10 = vpop.f32.mrf.mxu1 }
 0x1a4   : >> { %3880 = vmatpush1.bf16.msra.mxu0 %v5313_v5 }
 0x1a5   : >> { %3881 = vmatprep.subr.bf16.mxu0 %v5320_v7 }
 0x1a6   : >> { %4746 = vmatpush3.bf16.msra.mxu1 %v5317_v9 }
 0x1a7   : >> { %4747 = vmatprep.subr.bf16.mxu1 %v5321_v42 }
 0x1a8   : >> { %3882 = vmatpush1.bf16.msra.mxu0 %v5318_v11 }
 0x1a9   : >> { %3883 = vmatprep.subr.bf16.mxu0 %v5325_v12 }
 0x1aa   : >> { %4748 = vmatpush3.bf16.msra.mxu1 %v5322_v13 }
 0x1ab   : >> { %4749 = vmatprep.subr.bf16.mxu1 %v5326_v14 }
 0x1ac   : >> { %3884 = vmatpush1.bf16.msra.mxu0 %v5323_v51 }
 0x1ad   : >> { %3885 = vmatprep.subr.bf16.mxu0 %v5330_v15 }
 0x1ae   : >> { %4750 = vmatpush3.bf16.msra.mxu1 %v5327_v16 }
 0x1af   : >> { %4751 = vmatprep.subr.bf16.mxu1 %v5331_v56 }
 0x1b0   : >> { %3886 = vmatpush1.bf16.msra.mxu0 %v5328_v17 }
 0x1b1   : >> { %3887 = vmatprep.subr.bf16.mxu0 %v5335_v58 }
 0x1b2   : >> { %4752 = vmatpush3.bf16.msra.mxu1 %v5332_v18 }
 0x1b3   : >> { %4753 = vmatprep.subr.bf16.mxu1 %v5336_v19 }
 0x1b4   : >> { %3888 = vmatpush1.bf16.msra.mxu0 %v5333_v20 }
 0x1b5   : >> { %3889 = vmatprep.subr.bf16.mxu0 %v5340_v21 }
 0x1b6   : >> { %4754 = vmatpush3.bf16.msra.mxu1 %v5337_v22 }
 0x1b7   : >> { %4755 = vmatprep.subr.bf16.mxu1 %v5341_v23 }
 0x1b8   : >> { %3890 = vmatpush1.bf16.msra.mxu0 %v5338_v24 }
 0x1b9   : >> { %3891 = vmatprep.subr.bf16.mxu0 %v5347_v28  ;;  %v3961_v28 = vshrl.u32 %v3960_v25, 7 }
 0x1ba   : >> { %4756 = vmatpush3.bf16.msra.mxu1 %v5342_v29 }
 0x1bc   : >> { %3892 = vmatpush2.bf16.msra.mxu0 %v5345_v30  ;;  %v3970_v30 = vsub.s32 2, %v3961_v28 }
 0x1bd   : >> { %v4669_v34 = vpop.f32.mrf.mxu1  ;;  %3949 = vmatmul.mubr.bf16.vlgmr.msra.gmra.mxu1 %v3615_v31  ;;  %3893 = vmatprep.subr.bf16.mxu0 %v5350_v32 }
 0x1bf   : >> { %v4670_v36 = vpop.f32.mrf.mxu1 }
 0x1c0   : >> { %v4671_v26 = vadd.f32 %v4670_v36, %v4669_v34  ;;  %3894 = vmatpush2.bf16.msra.mxu0 %v5348_v33 }
 0x1c1   : >> { %3895 = vmatprep.subr.bf16.mxu0 %v5353_v35  ;;  %v4672_v40 = vpop.f32.mrf.mxu1  ;;  %v3971_v35 = vrot.slane %v5416_v0, %v3970_v30 }
 0x1c2   : >> { %v2294_v41 = vadd.f32 %v4671_v26, %v6784_v4 }
 0x1c3   : >> { %v4673_v43 = vpop.f32.mrf.mxu1 }
 0x1c4   : >> { %3896 = vmatpush2.bf16.msra.mxu0 %v5351_v37 }
 0x1c5   : >> { %3897 = vmatprep.subr.bf16.mxu0 %v5356_v39 }
 0x1c8   : >> { %3898 = vmatpush2.bf16.msra.mxu0 %v5354_v44 }
 0x1c9   : >> { %3899 = vmatprep.subr.bf16.mxu0 %v5359_v45 }
 0x1cc   : >> { %3900 = vmatpush2.bf16.msra.mxu0 %v5357_v27 }
 0x1cd   : >> { %3901 = vmatprep.subr.bf16.mxu0 %v5362_v46  ;;  %v4558_v46 = vld [vmem:[%s6908_s26 + $0x14] sm:$0x3] }
 0x1d0   : >> { %3902 = vmatpush2.bf16.msra.mxu0 %v5360_v47 }
 0x1d1   : >> { %3903 = vmatprep.subr.bf16.mxu0 %v5365_v48 }
 0x1d4   : >> { %3904 = vmatpush2.bf16.msra.mxu0 %v5363_v49  ;;  %v3962_v49 = vsub.s32 0, %v3961_v28 }
 0x1d5   : >> { %3905 = vmatprep.subr.bf16.mxu0 %v5368_v50  ;;  %v3966_v50 = vsub.s32 1, %v3961_v28 }
 0x1d8   : >> { %3906 = vmatpush2.bf16.msra.mxu0 %v5366_v52 }
 0x1db   : >> { %v2245_v53 = vpop.f32.mrf.mxu0  ;;  %3908 = vmatmul.mubr.bf16.vlgmr.msra.gmra.mxu0 %v3615_v31 }
 0x1dc   : >> { %v2292_v54 = vadd.f32 %v2245_v53, %v6772_v61  ;;  %v3963_v53 = vrot.slane %v5416_v0, %v3962_v49 }
 0x1dd   : >> { %v2247_v55 = vpop.f32.mrf.mxu0 }
 0x1de   : >> { %v2293_v57 = vadd.f32 %v2247_v55, %v6781_v3 }
 0x1df   : >> { %v2249_v59 = vpop.f32.mrf.mxu0 }
 0x1e0   : >> { %v3967_v59 = vrot.slane %v5416_v0, %v3966_v50 }
 0x1e1   : >> { %v2250_v60 = vpop.f32.mrf.mxu0 }
 0x1fb   : >> { %v4691_v62 = vpop.f32.mrf.mxu0 }
 0x1fd   : >> { %v2659_v63 = vpop.f32.mrf.mxu1  ;;  %v4692_v1 = vpop.f32.mrf.mxu0 }
 0x1fe   : >> { %v2706_v38 = vadd.f32 %v2659_v63, %v2292_v54  ;;  %v4693_v2 = vadd.f32 %v4692_v1, %v4691_v62 }
 0x1ff   : >> { %v2661_v4 = vpop.f32.mrf.mxu1  ;;  %v4694_v5 = vpop.f32.mrf.mxu0 }
 0x200   : >> { %v2707_v6 = vadd.f32 %v2661_v4, %v2293_v57  ;;  %v2708_v7 = vadd.f32 %v4693_v2, %v2294_v41 }
 0x201   : >> { %v4695_v8 = vpop.f32.mrf.mxu0  ;;  %v2663_v9 = vpop.f32.mrf.mxu1 }
 0x203   : >> { %v2664_v42 = vpop.f32.mrf.mxu1 }
 0x204   : >> { %v4556_v42 = vld [vmem:[%s6908_s26 + $0xc] sm:$0x33] }
 0x21d   : >> { %v4713_v10 = vpop.f32.mrf.mxu1 }
 0x21f   : >> { %v4714_v11 = vpop.f32.mrf.mxu1 }
 0x220   : >> { %v4715_v61 = vadd.f32 %v4714_v11, %v4713_v10 }
 0x221   : >> { %v4716_v12 = vpop.f32.mrf.mxu1 }
 0x222   : >> { %v3124_v13 = vadd.f32 %v4715_v61, %v2708_v7 }
 0x223   : >> { %v4717_v3 = vpop.f32.mrf.mxu1 }
 0x23b   : >> { %v3075_v14 = vpop.f32.mrf.mxu0 }
 0x23c   : >> { %v3122_v51 = vadd.f32 %v3075_v14, %v2706_v38 }
 0x23d   : >> { %v3077_v15 = vpop.f32.mrf.mxu0 }
 0x23e   : >> { %v3123_v16 = vadd.f32 %v3077_v15, %v2707_v6 }
 0x23f   : >> { %v3079_v56 = vpop.f32.mrf.mxu0 }
 0x241   : >> { %v3080_v17 = vpop.f32.mrf.mxu0 }
 0x25b   : >> { %v4735_v58 = vpop.f32.mrf.mxu0 }
 0x25d   : >> { %v3495_v18 = vpop.f32.mrf.mxu1  ;;  %v4736_v19 = vpop.f32.mrf.mxu0 }
 0x25e   : >> { %v4737_v29 = vadd.f32 %v4736_v19, %v4735_v58  ;;  %v3542_v52 = vadd.f32 %v3495_v18, %v3122_v51 }
 0x25f   : >> { %v3497_v20 = vpop.f32.mrf.mxu1  ;;  %v4738_v21 = vpop.f32.mrf.mxu0 }
 0x260   : >> { %v3544_v33 = vadd.f32 %v4737_v29, %v3124_v13  ;;  %v3543_v55 = vadd.f32 %v3497_v20, %v3123_v16 }
 0x261   : >> { %v4739_v22 = vpop.f32.mrf.mxu0  ;;  %v3499_v23 = vpop.f32.mrf.mxu1 }
 0x263   : >> { %v3500_v24 = vpop.f32.mrf.mxu1 }
 0x27d   : >> { %v4757_v31 = vpop.f32.mrf.mxu1 }
 0x27f   : >> { %v4758_v32 = vpop.f32.mrf.mxu1 }
 0x280   : >> { %v4759_v34 = vadd.f32 %v4758_v32, %v4757_v31 }
 0x281   : >> { %v4760_v36 = vpop.f32.mrf.mxu1 }
 0x282   : >> { %v3958_v26 = vadd.f32 %v4759_v34, %v3544_v33 }
 0x283   : >> { %v4761_v37 = vpop.f32.mrf.mxu1 }
 0x284   : >> { %v3977_v39 = vadd.f32 %v3971_v35, %v3958_v26 }
 0x286   : >> { %v3980_v40 = vmax.f32 %v3977_v39, 0.0 }
 0x288   : >> { %v4564_v41 = vpack.c.bf16 %v3980_v40, %v3980_v40 }
 0x28a   : >> { %v4000_v43 = vshrl.u32 %v4564_v41, 16  ;;  %v4003_v45 = vshll.u32 %v4564_v41, 16 }
 0x28c   : >> { %v4002_v44 = vrot.slane %v4000_v43, 7 }
 0x28e   : >> { %v4005_v47 = vor.u32 %v4003_v45, %v4002_v44 }
 0x290   : >> { %v4022_v48 = vsel %vm6910_vm9, %v4005_v47, %v4558_v46 }
 0x291   : >> { %4559 = vst [vmem:[%s6908_s26 + $0x14] sm:$0x3] %v4022_v48 }
 0x29b   : >> { %v3909_v54 = vpop.f32.mrf.mxu0 }
 0x29c   : >> { %v3956_v57 = vadd.f32 %v3909_v54, %v3542_v52 }
 0x29d   : >> { %v3911_v60 = vpop.f32.mrf.mxu0 }
 0x29e   : >> { %v3975_v62 = vadd.f32 %v3963_v53, %v3956_v57  ;;  %v3957_v63 = vadd.f32 %v3911_v60, %v3543_v55 }
 0x29f   : >> { %v3913_v1 = vpop.f32.mrf.mxu0 }
 0x2a0   : >> { %v3976_v38 = vadd.f32 %v3967_v59, %v3957_v63  ;;  %v3978_v4 = vmax.f32 %v3975_v62, 0.0 }
 0x2a1   : >> { %v3914_v2 = vpop.f32.mrf.mxu0 }
 0x2a2   : >> { %v3979_v5 = vmax.f32 %v3976_v38, 0.0 }
 0x2a4   : >> { %v4563_v6 = vpack.c.bf16 %v3979_v5, %v3978_v4 }
 0x2a6   : >> { %v3993_v7 = vshrl.u32 %v4563_v6, 16  ;;  %v3996_v9 = vshll.u32 %v4563_v6, 16 }
 0x2a8   : >> { %v3995_v8 = vrot.slane %v3993_v7, 7 }
 0x2a9   : > { %214 = sbr.rel (!%p212_p4) target bundleno = 26 (0x1a), region = 73 }
 0x2aa   : >> { %v3998_v10 = vor.u32 %v3996_v9, %v3995_v8 }
 0x2ac   : >> { %v4019_v11 = vsel %vm4017_vm13, %v3998_v10, %v4556_v42 }
 0x2ad   : >> { %4557 = vst [vmem:[%s6908_s26 + $0xc] sm:$0x33] %v4019_v11 }
 0x2ae PF: > { %s13_s12 = sadd.s32 1, %s5379_s12  }
 0x2af   : > { %p10_p5 = scmp.ge.s32.totalorder %s13_s12, 4  }
 0x2b1   :  { %12 = sbr.rel (!%p10_p5) target bundleno = 1 (0x1), region = 84 }

// kernel: features_forward.13
= control target key start
LH: loop header
LB: loop body
LE: loop exit
PB: predicated region body
PF: predicated region fallthrough
CT: control target
= control target key end

     0   :  { %s3343_s12 = smov 0   ;;  %s4319_s0 = inlined_call_operand.vmem [shape: bf16[2,5,5,256], index: 0, kind: input, shape index: {}]   ;;  %s4320_s1 = inlined_call_operand.vmem [shape: bf16[2304,256], index: 1, kind: input, shape index: {}]   ;;  %s4321_s2 = inlined_call_operand.vmem [shape: f32[1,256], index: 2, kind: input, shape index: {}]   ;;  %s4322_s3 = inlined_call_operand.vmem [shape: bf16[2,3,3,256], index: 3, kind: output, shape index: {}]  }
   0x1 LB: > { %s2522_s13 = sadd.s32 4294967295, %s3316_s12   ;;  %p2526_p0 = scmp.ge.s32.totalorder %s3316_s12, 1  ;;  %s3316_s12 = sphi %s3343_s12, %s13_s12  }
   0x2   : > { %p137_p1 = scmp.lt.s32.totalorder %s3316_s12, 3 }
   0x4   : > { %p138_p2 = pnand %p2526_p0, %p137_p1 }
   0x5   : > { %p161_p3 = scmp.lt.s32.totalorder (!%p138_p2), %s2522_s13, 1  ;;  %s3382_s24 = smov (!%p138_p2), 0  }
   0x6   : > { %141 = sbr.rel (%p138_p2) target bundleno = 549 (0x225), region = 32 }
   0xb   : > { %v3354_v0 = vld [vmem:[%s4321_s2] sm:$0x3]  ;;  %vm173_vm0 = vcmask 1041408   ;;  %vm174_vm1 = vsmask.f32 1280  ;;  %vm176_vm2 = vcmask 1043458  }
   0xc   : > { %vm177_vm3 = vsmask.f32 3328  ;;  %s4326_s13 = smov (!%p161_p3, %s2522_s13), 1  ;;  %vm175_vm4 = vmand %vm173_vm0, %vm174_vm1 }
   0xd   : > { %vm178_vm5 = vmand %vm176_vm2, %vm177_vm3  ;;  %s2843_s16 = smul.u32 40, %s4326_s13 }
   0xe   : > { %s2844_s17 = smul.u32 12, %s4326_s13  ;;  %vm3361_vm6 = vmor %vm178_vm5, %vm175_vm4 }
   0xf   : > { %s3359_s20 = scalar_lea.vmem %s4319_s0, %s2843_s16 }
  0x10   : > { %s3368_s23 = scalar_lea.vmem %s4322_s3, %s2844_s17 }
  0x11   : > { %v180_v2 = vld [vmem:[%s3368_s23] sm:$0xf]  ;;  %v183_v3 = vld [vmem:[%s3368_s23 + $0x4] sm:$0xf]  ;;  %v186_v4 = vld [vmem:[%s3368_s23 + $0x8] sm:$0xf] }
  0x12   : > { %v181_v5 = vsel %vm3361_vm6, 0, %v180_v2  ;;  %v184_v6 = vsel %vm3361_vm6, 0, %v183_v3  ;;  %v187_v7 = vsel %vm3361_vm6, 0, %v186_v4 }
  0x13   : > { %182 = vst [vmem:[%s3368_s23] sm:$0xf] %v181_v5  ;;  %185 = vst [vmem:[%s3368_s23 + $0x4] sm:$0xf] %v184_v6 }
  0x14   : > { %188 = vst [vmem:[%s3368_s23 + $0x8] sm:$0xf] %v187_v7 }
  0x15 LB: >> { %v2862_v8 = vld [vmem:[%s4320_s1 + $0x174] ss:$8 sps:$4 sm:$0xff]   ;;  %v2866_v10 = vld [vmem:[%s4320_s1 + $0x170] ss:$8 sps:$4 sm:$0xff]   ;;  %v2868_v12 = vld [vmem:[%s4320_s1 + $0x164] ss:$8 sps:$4 sm:$0xff]   ;;  %s3320_s24 = sphi %s3382_s24, %s194_s24  }
  0x16   : >> { %v2864_v9 = vld [vmem:[%s4320_s1 + $0x74] ss:$8 sps:$4 sm:$0xff]   ;;  %444 = vmatprep.subr.bf16.mxu0 %v2862_v8  ;;  %v2867_v11 = vld [vmem:[%s4320_s1 + $0x70] ss:$8 sps:$4 sm:$0xff]   ;;  %v2870_v13 = vld [vmem:[%s4320_s1 + $0x64] ss:$8 sps:$4 sm:$0xff]  }
  0x17   : >> { %647 = vmatprep.subr.bf16.mxu1 %v2864_v9  ;;  %445 = vmatpush1.bf16.msra.mxu0 %v2866_v10  ;;  %v2872_v14 = vld [vmem:[%s4320_s1 + $0x160] ss:$8 sps:$4 sm:$0xff]   ;;  %v2874_v16 = vld [vmem:[%s4320_s1 + $0x154] ss:$8 sps:$4 sm:$0xff]   ;;  %v2878_v18 = vld [vmem:[%s4320_s1 + $0x150] ss:$8 sps:$4 sm:$0xff]  }
  0x18   : >> { %648 = vmatpush1.bf16.msra.mxu1 %v2867_v11  ;;  %446 = vmatprep.subr.bf16.mxu0 %v2868_v12  ;;  %v2873_v15 = vld [vmem:[%s4320_s1 + $0x60] ss:$8 sps:$4 sm:$0xff]   ;;  %v2876_v17 = vld [vmem:[%s4320_s1 + $0x54] ss:$8 sps:$4 sm:$0xff]   ;;  %v2879_v19 = vld [vmem:[%s4320_s1 + $0x50] ss:$8 sps:$4 sm:$0xff]  }
  0x19   : >> { %649 = vmatprep.subr.bf16.mxu1 %v2870_v13  ;;  %v2880_v20 = vld [vmem:[%s4320_s1 + $0x144] ss:$8 sps:$4 sm:$0xff]   ;;  %v2884_v22 = vld [vmem:[%s4320_s1 + $0x140] ss:$8 sps:$4 sm:$0xff]   ;;  %v2886_v24 = vld [vmem:[%s4320_s1 + $0x134] ss:$8 sps:$4 sm:$0xff]  }
  0x1a   : >> { %v2882_v21 = vld [vmem:[%s4320_s1 + $0x44] ss:$8 sps:$4 sm:$0xff]   ;;  %v2885_v23 = vld [vmem:[%s4320_s1 + $0x40] ss:$8 sps:$4 sm:$0xff]   ;;  %v2888_v25 = vld [vmem:[%s4320_s1 + $0x34] ss:$8 sps:$4 sm:$0xff]  }
  0x1b   : >> { %447 = vmatpush1.bf16.msra.mxu0 %v2872_v14  ;;  %v2890_v26 = vld [vmem:[%s4320_s1 + $0x130] ss:$8 sps:$4 sm:$0xff]   ;;  %v2892_v28 = vld [vmem:[%s4320_s1 + $0x124] ss:$8 sps:$4 sm:$0xff]   ;;  %v2896_v30 = vld [vmem:[%s4320_s1 + $0x120] ss:$8 sps:$4 sm:$0xff]  }
  0x1c   : >> { %650 = vmatpush1.bf16.msra.mxu1 %v2873_v15  ;;  %448 = vmatprep.subr.bf16.mxu0 %v2874_v16  ;;  %v2891_v27 = vld [vmem:[%s4320_s1 + $0x30] ss:$8 sps:$4 sm:$0xff]   ;;  %v2894_v29 = vld [vmem:[%s4320_s1 + $0x24] ss:$8 sps:$4 sm:$0xff]   ;;  %v2897_v31 = vld [vmem:[%s4320_s1 + $0x20] ss:$8 sps:$4 sm:$0xff]  }
  0x1d   : >> { %651 = vmatprep.subr.bf16.mxu1 %v2876_v17  ;;  %v2898_v32 = vld [vmem:[%s4320_s1 + $0x114] ss:$8 sps:$4 sm:$0xff]   ;;  %v2902_v34 = vld [vmem:[%s4320_s1 + $0x110] ss:$8 sps:$4 sm:$0xff]   ;;  %v2904_v36 = vld [vmem:[%s4320_s1 + $0x104] ss:$8 sps:$4 sm:$0xff]  }
  0x1e   : >> { %v2900_v33 = vld [vmem:[%s4320_s1 + $0x14] ss:$8 sps:$4 sm:$0xff]   ;;  %v2903_v35 = vld [vmem:[%s4320_s1 + $0x10] ss:$8 sps:$4 sm:$0xff]   ;;  %v2906_v37 = vld [vmem:[%s4320_s1 + $0x4] ss:$8 sps:$4 sm:$0xff]  }
  0x1f   : >> { %449 = vmatpush1.bf16.msra.mxu0 %v2878_v18  ;;  %v2908_v38 = vld [vmem:[%s4320_s1 + $0x100] ss:$8 sps:$4 sm:$0xff]   ;;  %v2910_v40 = vld [vmem:[%s4320_s1 + $0x1f4] ss:$8 sps:$4 sm:$0xff]   ;;  %v2914_v42 = vld [vmem:[%s4320_s1 + $0x1f0] ss:$8 sps:$4 sm:$0xff]  }
  0x20   : >> { %652 = vmatpush1.bf16.msra.mxu1 %v2879_v19  ;;  %450 = vmatprep.subr.bf16.mxu0 %v2880_v20  ;;  %v2909_v39 = vld [vmem:[%s4320_s1] ss:$8 sps:$4 sm:$0xff]   ;;  %v2912_v41 = vld [vmem:[%s4320_s1 + $0xf4] ss:$8 sps:$4 sm:$0xff]   ;;  %v2915_v43 = vld [vmem:[%s4320_s1 + $0xf0] ss:$8 sps:$4 sm:$0xff]  }
  0x21   : >> { %653 = vmatprep.subr.bf16.mxu1 %v2882_v21  ;;  %v2916_v44 = vld [vmem:[%s4320_s1 + $0x1e4] ss:$8 sps:$4 sm:$0xff]   ;;  %v2920_v46 = vld [vmem:[%s4320_s1 + $0x1e0] ss:$8 sps:$4 sm:$0xff]   ;;  %v2922_v48 = vld [vmem:[%s4320_s1 + $0x1d4] ss:$8 sps:$4 sm:$0xff]  }
  0x22   : >> { %v2918_v45 = vld [vmem:[%s4320_s1 + $0xe4] ss:$8 sps:$4 sm:$0xff]   ;;  %v2921_v47 = vld [vmem:[%s4320_s1 + $0xe0] ss:$8 sps:$4 sm:$0xff]   ;;  %s2841_s11 = sshll.u32 %s3320_s24, 3  ;;  %s2842_s22 = sshll.u32 %s3320_s24, 2 }
  0x23   : >> { %451 = vmatpush1.bf16.msra.mxu0 %v2884_v22  ;;  %v2924_v49 = vld [vmem:[%s4320_s1 + $0xd4] ss:$8 sps:$4 sm:$0xff]   ;;  %v2926_v50 = vld [vmem:[%s4320_s1 + $0x1d0] ss:$8 sps:$4 sm:$0xff]   ;;  %s3521_s19 = scalar_lea.vmem %s3359_s20, %s2841_s11  ;;  %v2928_v52 = vld [vmem:[%s4320_s1 + $0x1c4] ss:$8 sps:$4 sm:$0xff]   ;;  %s2448_s25 = scalar_lea.vmem %s3368_s23, %s2842_s22 }
  0x24   : >> { %654 = vmatpush1.bf16.msra.mxu1 %v2885_v23  ;;  %452 = vmatprep.subr.bf16.mxu0 %v2886_v24  ;;  %v2927_v51 = vld [vmem:[%s4320_s1 + $0xd0] ss:$8 sps:$4 sm:$0xff]   ;;  %v2930_v53 = vld [vmem:[%s4320_s1 + $0xc4] ss:$8 sps:$4 sm:$0xff]   ;;  %v2932_v55 = vld [vmem:[%s4320_s1 + $0x1c0] ss:$8 sps:$4 sm:$0xff]  }
  0x25   : >> { %655 = vmatprep.subr.bf16.mxu1 %v2888_v25  ;;  %v198_v54 = vld [vmem:[%s3521_s19] sm:$0x33]  ;;  %v2934_v58 = vld [vmem:[%s4320_s1 + $0x1b4] ss:$8 sps:$4 sm:$0xff]   ;;  %v2938_v62 = vld [vmem:[%s4320_s1 + $0x1b0] ss:$8 sps:$4 sm:$0xff]  }
  0x26   : >> { %v2532_v56 = vcombine.high %v198_v54, %v198_v54  ;;  %v2933_v57 = vld [vmem:[%s4320_s1 + $0xc0] ss:$8 sps:$4 sm:$0xff]   ;;  %v2936_v59 = vld [vmem:[%s4320_s1 + $0xb4] ss:$8 sps:$4 sm:$0xff]   ;;  %v2939_v63 = vld [vmem:[%s4320_s1 + $0xb0] ss:$8 sps:$4 sm:$0xff]   ;;  %v2531_v8 = vcombine.low %v198_v54, %v198_v54 }
  0x27   : >> { %453 = vmatpush1.bf16.msra.mxu0 %v2890_v26  ;;  %v2940_v3 = vld [vmem:[%s4320_s1 + $0x1a4] ss:$8 sps:$4 sm:$0xff]   ;;  %v2944_v6 = vld [vmem:[%s4320_s1 + $0x1a0] ss:$8 sps:$4 sm:$0xff]   ;;  %v2946_v9 = vld [vmem:[%s4320_s1 + $0x194] ss:$8 sps:$4 sm:$0xff]  }
  0x28   : >> { %656 = vmatpush1.bf16.msra.mxu1 %v2891_v27  ;;  %454 = vmatprep.subr.bf16.mxu0 %v2892_v28  ;;  %v276_v60 = vshrl.u32 %v2532_v56, 16  ;;  %v278_v61 = vshll.u32 %v2532_v56, 16  ;;  %v2942_v4 = vld [vmem:[%s4320_s1 + $0xa4] ss:$8 sps:$4 sm:$0xff]   ;;  %v2945_v7 = vld [vmem:[%s4320_s1 + $0xa0] ss:$8 sps:$4 sm:$0xff]  }
  0x29   : >> { %657 = vmatprep.subr.bf16.mxu1 %v2894_v29  ;;  %679 = vmatprep.mubr.bf16.mxu1 %v2532_v56  ;;  %v2948_v10 = vld [vmem:[%s4320_s1 + $0x94] ss:$8 sps:$4 sm:$0xff]   ;;  %v2950_v11 = vld [vmem:[%s4320_s1 + $0x190] ss:$8 sps:$4 sm:$0xff]   ;;  %v271_v13 = vshll.u32 %v2531_v8, 16  ;;  %v269_v18 = vshrl.u32 %v2531_v8, 16 }
  0x2a   : >> { %v280_v2 = vrot.slane %v278_v61, 1  ;;  %v2951_v12 = vld [vmem:[%s4320_s1 + $0x90] ss:$8 sps:$4 sm:$0xff]   ;;  %v2952_v14 = vld [vmem:[%s4320_s1 + $0x184] ss:$8 sps:$4 sm:$0xff]   ;;  %s194_s24 = sadd.s32 1, %s3320_s24  }
  0x2b   : >> { %455 = vmatpush1.bf16.msra.mxu0 %v2896_v30  ;;  %v2954_v15 = vld [vmem:[%s4320_s1 + $0x84] ss:$8 sps:$4 sm:$0xff]   ;;  %v2956_v16 = vld [vmem:[%s4320_s1 + $0x180] ss:$8 sps:$4 sm:$0xff]   ;;  %v273_v19 = vrot.slane %v271_v13, 1  ;;  %p191_p4 = scmp.ge.s32.totalorder %s194_s24, 3  }
  0x2c   : >> { %658 = vmatpush1.bf16.msra.mxu1 %v2897_v31  ;;  %456 = vmatprep.subr.bf16.mxu0 %v2898_v32  ;;  %v281_v5 = vor.u32 %v280_v2, %v276_v60  ;;  %v2957_v17 = vld [vmem:[%s4320_s1 + $0x80] ss:$8 sps:$4 sm:$0xff]   ;;  %v2962_v20 = vld [vmem:[%s4320_s1 + $0x274] ss:$8 sps:$4 sm:$0xff]   ;;  %v2960_v23 = vld [vmem:[%s4320_s1 + $0x270] ss:$8 sps:$4 sm:$0xff]  }
  0x2d   : >> { %659 = vmatprep.subr.bf16.mxu1 %v2900_v33  ;;  %v2965_v21 = vld [vmem:[%s4320_s1 + $0x374] ss:$8 sps:$4 sm:$0xff]   ;;  %v274_v22 = vor.u32 %v273_v19, %v269_v18  ;;  %v2963_v24 = vld [vmem:[%s4320_s1 + $0x370] ss:$8 sps:$4 sm:$0xff]   ;;  %v2968_v25 = vld [vmem:[%s4320_s1 + $0x264] ss:$8 sps:$4 sm:$0xff]  }
  0x2e   : >> { %476 = vmatprep.mubr.bf16.mxu0 %v281_v5  ;;  %v2971_v26 = vld [vmem:[%s4320_s1 + $0x364] ss:$8 sps:$4 sm:$0xff]   ;;  %v2966_v27 = vld [vmem:[%s4320_s1 + $0x260] ss:$8 sps:$4 sm:$0xff]   ;;  %v2974_v29 = vld [vmem:[%s4320_s1 + $0x254] ss:$8 sps:$4 sm:$0xff]  }
  0x2f   : >> { %457 = vmatpush1.bf16.msra.mxu0 %v2902_v34  ;;  %v2969_v28 = vld [vmem:[%s4320_s1 + $0x360] ss:$8 sps:$4 sm:$0xff]   ;;  %v2977_v30 = vld [vmem:[%s4320_s1 + $0x354] ss:$8 sps:$4 sm:$0xff]   ;;  %v2972_v31 = vld [vmem:[%s4320_s1 + $0x250] ss:$8 sps:$4 sm:$0xff]  }
  0x30   : >> { %660 = vmatpush1.bf16.msra.mxu1 %v2903_v35  ;;  %458 = vmatprep.subr.bf16.mxu0 %v2904_v36  ;;  %v2975_v32 = vld [vmem:[%s4320_s1 + $0x350] ss:$8 sps:$4 sm:$0xff]   ;;  %v2980_v33 = vld [vmem:[%s4320_s1 + $0x244] ss:$8 sps:$4 sm:$0xff]   ;;  %v2978_v35 = vld [vmem:[%s4320_s1 + $0x240] ss:$8 sps:$4 sm:$0xff]  }
  0x31   : >> { %661 = vmatprep.subr.bf16.mxu1 %v2906_v37  ;;  %v2983_v34 = vld [vmem:[%s4320_s1 + $0x344] ss:$8 sps:$4 sm:$0xff]   ;;  %v2981_v36 = vld [vmem:[%s4320_s1 + $0x340] ss:$8 sps:$4 sm:$0xff]   ;;  %v2986_v37 = vld [vmem:[%s4320_s1 + $0x234] ss:$8 sps:$4 sm:$0xff]  }
  0x32   : >> { %v3002_v56 = vld [vmem:[%s4320_s1 + $0x200] ss:$8 sps:$4 sm:$0xff]   ;;  %v3008_v60 = vld [vmem:[%s4320_s1 + $0x2f0] ss:$8 sps:$4 sm:$0xff]   ;;  %v3025_v5 = vld [vmem:[%s4320_s1 + $0x3d4] ss:$8 sps:$4 sm:$0xff]  }
  0x33   : >> { %459 = vmatpush1.bf16.msra.mxu0 %v2908_v38  ;;  %v2989_v38 = vld [vmem:[%s4320_s1 + $0x334] ss:$8 sps:$4 sm:$0xff]   ;;  %v3011_v61 = vld [vmem:[%s4320_s1 + $0x3f0] ss:$8 sps:$4 sm:$0xff]   ;;  %v3014_v2 = vld [vmem:[%s4320_s1 + $0x2e0] ss:$8 sps:$4 sm:$0xff]  }
  0x34   : >> { %662 = vmatpush1.bf16.msra.mxu1 %v2909_v39  ;;  %460 = vmatprep.subr.bf16.mxu0 %v2910_v40  ;;  %v2984_v39 = vld [vmem:[%s4320_s1 + $0x230] ss:$8 sps:$4 sm:$0xff]   ;;  %v3037_v13 = vld [vmem:[%s4320_s1 + $0x3b4] ss:$8 sps:$4 sm:$0xff]   ;;  %v3038_v18 = vld [vmem:[%s4320_s1 + $0x2a0] ss:$8 sps:$4 sm:$0xff]  }
  0x35   : >> { %663 = vmatprep.subr.bf16.mxu1 %v2912_v41  ;;  %v2987_v40 = vld [vmem:[%s4320_s1 + $0x330] ss:$8 sps:$4 sm:$0xff]   ;;  %v2992_v41 = vld [vmem:[%s4320_s1 + $0x224] ss:$8 sps:$4 sm:$0xff]   ;;  %v3041_v19 = vld [vmem:[%s4320_s1 + $0x3a0] ss:$8 sps:$4 sm:$0xff]  }
  0x37   : >> { %461 = vmatpush2.bf16.msra.mxu0 %v2914_v42  ;;  %v2995_v42 = vld [vmem:[%s4320_s1 + $0x324] ss:$8 sps:$4 sm:$0xff]  }
  0x38   : >> { %664 = vmatpush2.bf16.msra.mxu1 %v2915_v43  ;;  %462 = vmatprep.subr.bf16.mxu0 %v2916_v44  ;;  %v2990_v43 = vld [vmem:[%s4320_s1 + $0x220] ss:$8 sps:$4 sm:$0xff]  }
  0x39   : >> { %665 = vmatprep.subr.bf16.mxu1 %v2918_v45  ;;  %v2993_v44 = vld [vmem:[%s4320_s1 + $0x320] ss:$8 sps:$4 sm:$0xff]   ;;  %v2998_v45 = vld [vmem:[%s4320_s1 + $0x214] ss:$8 sps:$4 sm:$0xff]  }
  0x3b   : >> { %463 = vmatpush2.bf16.msra.mxu0 %v2920_v46  ;;  %v3001_v46 = vld [vmem:[%s4320_s1 + $0x314] ss:$8 sps:$4 sm:$0xff]  }
  0x3c   : >> { %666 = vmatpush2.bf16.msra.mxu1 %v2921_v47  ;;  %464 = vmatprep.subr.bf16.mxu0 %v2922_v48  ;;  %v2996_v47 = vld [vmem:[%s4320_s1 + $0x210] ss:$8 sps:$4 sm:$0xff]   ;;  %v3666_v48 = vld [vmem:[%s3521_s19] sm:$0x66] }
  0x3d   : >> { %667 = vmatprep.subr.bf16.mxu1 %v2924_v49  ;;  %v2999_v49 = vld [vmem:[%s4320_s1 + $0x310] ss:$8 sps:$4 sm:$0xff]  }
  0x3f   : >> { %465 = vmatpush2.bf16.msra.mxu0 %v2926_v50  ;;  %v2598_v50 = vcombine.high %v3666_v48, %v3666_v48 }
  0x40   : >> { %668 = vmatpush2.bf16.msra.mxu1 %v2927_v51  ;;  %466 = vmatprep.subr.bf16.mxu0 %v2928_v52  ;;  %v3004_v51 = vld [vmem:[%s4320_s1 + $0x204] ss:$8 sps:$4 sm:$0xff]  }
  0x41   : >> { %669 = vmatprep.subr.bf16.mxu1 %v2930_v53  ;;  %v3677_v52 = vld [vmem:[%s3521_s19 + $0x8] sm:$0x33]  ;;  %v727_v54 = vrot.slane %v2598_v50, 1 }
  0x42   : >> { %v3007_v53 = vld [vmem:[%s4320_s1 + $0x304] ss:$8 sps:$4 sm:$0xff]  }
  0x43   : >> { %467 = vmatpush2.bf16.msra.mxu0 %v2932_v55  ;;  %v3684_v55 = vcombine.high %v3677_v52, %v3677_v52  ;;  %v3080_v50 = vld [vmem:[%s4320_s1 + $0x444] ss:$8 sps:$4 sm:$0xff]  }
  0x44   : >> { %670 = vmatpush2.bf16.msra.mxu1 %v2933_v57  ;;  %468 = vmatprep.subr.bf16.mxu0 %v2934_v58  ;;  %v3005_v57 = vld [vmem:[%s4320_s1 + $0x300] ss:$8 sps:$4 sm:$0xff]   ;;  %v3010_v58 = vld [vmem:[%s4320_s1 + $0x2f4] ss:$8 sps:$4 sm:$0xff]  }
  0x45   : >> { %671 = vmatprep.subr.bf16.mxu1 %v2936_v59  ;;  %v3013_v59 = vld [vmem:[%s4320_s1 + $0x3f4] ss:$8 sps:$4 sm:$0xff]  }
  0x47   : >> { %469 = vmatpush2.bf16.msra.mxu0 %v2938_v62  ;;  %v3016_v62 = vld [vmem:[%s4320_s1 + $0x2e4] ss:$8 sps:$4 sm:$0xff]  }
  0x48   : >> { %672 = vmatpush2.bf16.msra.mxu1 %v2939_v63  ;;  %470 = vmatprep.subr.bf16.mxu0 %v2940_v3  ;;  %v3019_v63 = vld [vmem:[%s4320_s1 + $0x3e4] ss:$8 sps:$4 sm:$0xff]   ;;  %v3017_v3 = vld [vmem:[%s4320_s1 + $0x3e0] ss:$8 sps:$4 sm:$0xff]  }
  0x49   : >> { %673 = vmatprep.subr.bf16.mxu1 %v2942_v4  ;;  %v3022_v4 = vld [vmem:[%s4320_s1 + $0x2d4] ss:$8 sps:$4 sm:$0xff]  }
  0x4b   : >> { %471 = vmatpush2.bf16.msra.mxu0 %v2944_v6  ;;  %v3020_v6 = vld [vmem:[%s4320_s1 + $0x2d0] ss:$8 sps:$4 sm:$0xff]  }
  0x4c   : >> { %674 = vmatpush2.bf16.msra.mxu1 %v2945_v7  ;;  %472 = vmatprep.subr.bf16.mxu0 %v2946_v9  ;;  %v3023_v7 = vld [vmem:[%s4320_s1 + $0x3d0] ss:$8 sps:$4 sm:$0xff]   ;;  %v3031_v9 = vld [vmem:[%s4320_s1 + $0x3c4] ss:$8 sps:$4 sm:$0xff]  }
  0x4d   : >> { %675 = vmatprep.subr.bf16.mxu1 %v2948_v10  ;;  %v3026_v10 = vld [vmem:[%s4320_s1 + $0x2c0] ss:$8 sps:$4 sm:$0xff]  }
  0x4f   : >> { %473 = vmatpush2.bf16.msra.mxu0 %v2950_v11  ;;  %v3029_v11 = vld [vmem:[%s4320_s1 + $0x3c0] ss:$8 sps:$4 sm:$0xff]  }
  0x50   : >> { %676 = vmatpush2.bf16.msra.mxu1 %v2951_v12  ;;  %474 = vmatprep.subr.bf16.mxu0 %v2952_v14  ;;  %v3034_v12 = vld [vmem:[%s4320_s1 + $0x2b4] ss:$8 sps:$4 sm:$0xff]   ;;  %v3032_v14 = vld [vmem:[%s4320_s1 + $0x2b0] ss:$8 sps:$4 sm:$0xff]  }
  0x51   : >> { %677 = vmatprep.subr.bf16.mxu1 %v2954_v15  ;;  %v3035_v15 = vld [vmem:[%s4320_s1 + $0x3b0] ss:$8 sps:$4 sm:$0xff]  }
  0x53   : >> { %475 = vmatpush2.bf16.msra.mxu0 %v2956_v16  ;;  %v3040_v16 = vld [vmem:[%s4320_s1 + $0x2a4] ss:$8 sps:$4 sm:$0xff]  }
  0x54   : >> { %678 = vmatpush2.bf16.msra.mxu1 %v2957_v17  ;;  %890 = vmatprep.subr.bf16.mxu0 %v2962_v20  ;;  %v3043_v17 = vld [vmem:[%s4320_s1 + $0x3a4] ss:$8 sps:$4 sm:$0xff]   ;;  %v3046_v20 = vld [vmem:[%s4320_s1 + $0x294] ss:$8 sps:$4 sm:$0xff]  }
  0x55   : >> { %1137 = vmatprep.subr.bf16.mxu1 %v2965_v21  ;;  %v3049_v21 = vld [vmem:[%s4320_s1 + $0x394] ss:$8 sps:$4 sm:$0xff]  }
  0x56   : >> { %477 = vmatmul.mubr.bf16.vlgmr.msra.gmra.mxu0 %v274_v22  ;;  %v3044_v22 = vld [vmem:[%s4320_s1 + $0x290] ss:$8 sps:$4 sm:$0xff]  }
  0x57   : >> { %680 = vmatmul.mubr.bf16.vlgmr.msra.gmra.mxu1 %v2531_v8  ;;  %891 = vmatpush1.bf16.msra.mxu0 %v2960_v23  ;;  %v3028_v8 = vld [vmem:[%s4320_s1 + $0x2c4] ss:$8 sps:$4 sm:$0xff]   ;;  %v3047_v23 = vld [vmem:[%s4320_s1 + $0x390] ss:$8 sps:$4 sm:$0xff]  }
  0x58   : >> { %1138 = vmatpush1.bf16.msra.mxu1 %v2963_v24  ;;  %892 = vmatprep.subr.bf16.mxu0 %v2968_v25  ;;  %v3052_v24 = vld [vmem:[%s4320_s1 + $0x284] ss:$8 sps:$4 sm:$0xff]  }
  0x59   : >> { %1139 = vmatprep.subr.bf16.mxu1 %v2971_v26  ;;  %922 = vmatprep.mubr.bf16.mxu0 %v727_v54  ;;  %v3055_v25 = vld [vmem:[%s4320_s1 + $0x384] ss:$8 sps:$4 sm:$0xff]   ;;  %v1222_v26 = vshll.u32 %v3684_v55, 16  ;;  %v3086_v54 = vld [vmem:[%s4320_s1 + $0x434] ss:$8 sps:$4 sm:$0xff]  }
  0x5a   : >> { %1169 = vmatprep.mubr.bf16.mxu1 %v3684_v55 }
  0x5b   : >> { %893 = vmatpush1.bf16.msra.mxu0 %v2966_v27  ;;  %v2597_v27 = vcombine.low %v3666_v48, %v3666_v48  ;;  %v3072_v48 = vld [vmem:[%s4320_s1 + $0x450] ss:$8 sps:$4 sm:$0xff]  }
  0x5c   : >> { %1140 = vmatpush1.bf16.msra.mxu1 %v2969_v28  ;;  %894 = vmatprep.subr.bf16.mxu0 %v2974_v29  ;;  %v3050_v28 = vld [vmem:[%s4320_s1 + $0x280] ss:$8 sps:$4 sm:$0xff]  }
  0x5d   : >> { %1141 = vmatprep.subr.bf16.mxu1 %v2977_v30  ;;  %v3053_v29 = vld [vmem:[%s4320_s1 + $0x380] ss:$8 sps:$4 sm:$0xff]   ;;  %v3060_v30 = vld [vmem:[%s4320_s1 + $0x474] ss:$8 sps:$4 sm:$0xff]  }
  0x5f   : >> { %895 = vmatpush1.bf16.msra.mxu0 %v2972_v31  ;;  %v3065_v31 = vld [vmem:[%s4320_s1 + $0x574] ss:$8 sps:$4 sm:$0xff]  }
  0x60   : >> { %1142 = vmatpush1.bf16.msra.mxu1 %v2975_v32  ;;  %896 = vmatprep.subr.bf16.mxu0 %v2980_v33  ;;  %v1220_v32 = vshrl.u32 %v3684_v55, 16  ;;  %v1224_v33 = vrot.slane %v1222_v26, 1  ;;  %v3089_v55 = vld [vmem:[%s4320_s1 + $0x534] ss:$8 sps:$4 sm:$0xff]   ;;  %v3132_v26 = vld [vmem:[%s4320_s1 + $0x4b0] ss:$8 sps:$4 sm:$0xff]  }
  0x61   : >> { %1143 = vmatprep.subr.bf16.mxu1 %v2983_v34  ;;  %v726_v34 = vrot.slane %v2597_v27, 1  ;;  %v3135_v27 = vld [vmem:[%s4320_s1 + $0x5b0] ss:$8 sps:$4 sm:$0xff]  }
  0x63   : >> { %897 = vmatpush1.bf16.msra.mxu0 %v2978_v35  ;;  %v3801_v35 = vcombine.low %v3677_v52, %v3677_v52  ;;  %v3078_v52 = vld [vmem:[%s4320_s1 + $0x440] ss:$8 sps:$4 sm:$0xff]  }
  0x64   : >> { %1144 = vmatpush1.bf16.msra.mxu1 %v2981_v36  ;;  %898 = vmatprep.subr.bf16.mxu0 %v2986_v37  ;;  %v3058_v36 = vld [vmem:[%s4320_s1 + $0x470] ss:$8 sps:$4 sm:$0xff]  }
  0x65   : >> { %1145 = vmatprep.subr.bf16.mxu1 %v2989_v38  ;;  %v3063_v37 = vld [vmem:[%s4320_s1 + $0x570] ss:$8 sps:$4 sm:$0xff]   ;;  %v3068_v38 = vld [vmem:[%s4320_s1 + $0x464] ss:$8 sps:$4 sm:$0xff]  }
  0x67   : >> { %899 = vmatpush1.bf16.msra.mxu0 %v2984_v39  ;;  %v3071_v39 = vld [vmem:[%s4320_s1 + $0x564] ss:$8 sps:$4 sm:$0xff]  }
  0x68   : >> { %1146 = vmatpush1.bf16.msra.mxu1 %v2987_v40  ;;  %900 = vmatprep.subr.bf16.mxu0 %v2992_v41  ;;  %v1225_v40 = vor.u32 %v1224_v33, %v1220_v32  ;;  %v3066_v41 = vld [vmem:[%s4320_s1 + $0x460] ss:$8 sps:$4 sm:$0xff]   ;;  %v3146_v33 = vld [vmem:[%s4320_s1 + $0x494] ss:$8 sps:$4 sm:$0xff]  }
  0x69   : >> { %1147 = vmatprep.subr.bf16.mxu1 %v2995_v42  ;;  %v3820_v42 = vld [vmem:[%s3521_s19 + $0x8] sm:$0x66] }
  0x6a   : >> { %v3141_v32 = vld [vmem:[%s4320_s1 + $0x5a0] ss:$8 sps:$4 sm:$0xff]  }
  0x6b   : >> { %901 = vmatpush1.bf16.msra.mxu0 %v2990_v43  ;;  %v3069_v43 = vld [vmem:[%s4320_s1 + $0x560] ss:$8 sps:$4 sm:$0xff]  }
  0x6c   : >> { %1148 = vmatpush1.bf16.msra.mxu1 %v2993_v44  ;;  %902 = vmatprep.subr.bf16.mxu0 %v2998_v45  ;;  %v3074_v44 = vld [vmem:[%s4320_s1 + $0x454] ss:$8 sps:$4 sm:$0xff]   ;;  %v2701_v45 = vcombine.high %v3820_v42, %v3820_v42 }
  0x6d   : >> { %1149 = vmatprep.subr.bf16.mxu1 %v3001_v46  ;;  %v3077_v46 = vld [vmem:[%s4320_s1 + $0x554] ss:$8 sps:$4 sm:$0xff]  }
  0x6f   : >> { %903 = vmatpush1.bf16.msra.mxu0 %v2996_v47  ;;  %v1470_v47 = vrot.slane %v2701_v45, 1  ;;  %v1213_v45 = vshrl.u32 %v3801_v35, 16 }
  0x70   : >> { %1150 = vmatpush1.bf16.msra.mxu1 %v2999_v49  ;;  %904 = vmatprep.subr.bf16.mxu0 %v3004_v51  ;;  %v3075_v49 = vld [vmem:[%s4320_s1 + $0x550] ss:$8 sps:$4 sm:$0xff]   ;;  %v3083_v51 = vld [vmem:[%s4320_s1 + $0x544] ss:$8 sps:$4 sm:$0xff]  }
  0x71   : >> { %1151 = vmatprep.subr.bf16.mxu1 %v3007_v53  ;;  %v3081_v53 = vld [vmem:[%s4320_s1 + $0x540] ss:$8 sps:$4 sm:$0xff]  }
  0x73   : >> { %905 = vmatpush1.bf16.msra.mxu0 %v3002_v56  ;;  %v3084_v56 = vld [vmem:[%s4320_s1 + $0x430] ss:$8 sps:$4 sm:$0xff]  }
  0x74   : >> { %1152 = vmatpush1.bf16.msra.mxu1 %v3005_v57  ;;  %906 = vmatprep.subr.bf16.mxu0 %v3010_v58  ;;  %v3087_v57 = vld [vmem:[%s4320_s1 + $0x530] ss:$8 sps:$4 sm:$0xff]   ;;  %v3092_v58 = vld [vmem:[%s4320_s1 + $0x424] ss:$8 sps:$4 sm:$0xff]  }
  0x75   : >> { %1153 = vmatprep.subr.bf16.mxu1 %v3013_v59  ;;  %v3095_v59 = vld [vmem:[%s4320_s1 + $0x524] ss:$8 sps:$4 sm:$0xff]  }
  0x77   : >> { %907 = vmatpush2.bf16.msra.mxu0 %v3008_v60  ;;  %v3090_v60 = vld [vmem:[%s4320_s1 + $0x420] ss:$8 sps:$4 sm:$0xff]  }
  0x78   : >> { %1154 = vmatpush2.bf16.msra.mxu1 %v3011_v61  ;;  %908 = vmatprep.subr.bf16.mxu0 %v3016_v62  ;;  %v3093_v61 = vld [vmem:[%s4320_s1 + $0x520] ss:$8 sps:$4 sm:$0xff]   ;;  %v3098_v62 = vld [vmem:[%s4320_s1 + $0x414] ss:$8 sps:$4 sm:$0xff]  }
  0x79   : >> { %1155 = vmatprep.subr.bf16.mxu1 %v3019_v63  ;;  %v3101_v63 = vld [vmem:[%s4320_s1 + $0x514] ss:$8 sps:$4 sm:$0xff]  }
  0x7b   : >> { %909 = vmatpush2.bf16.msra.mxu0 %v3014_v2  ;;  %v3096_v2 = vld [vmem:[%s4320_s1 + $0x410] ss:$8 sps:$4 sm:$0xff]  }
  0x7c   : >> { %1156 = vmatpush2.bf16.msra.mxu1 %v3017_v3  ;;  %910 = vmatprep.subr.bf16.mxu0 %v3022_v4  ;;  %v3099_v3 = vld [vmem:[%s4320_s1 + $0x510] ss:$8 sps:$4 sm:$0xff]   ;;  %v3104_v4 = vld [vmem:[%s4320_s1 + $0x404] ss:$8 sps:$4 sm:$0xff]  }
  0x7d   : >> { %1157 = vmatprep.subr.bf16.mxu1 %v3025_v5  ;;  %v3107_v5 = vld [vmem:[%s4320_s1 + $0x504] ss:$8 sps:$4 sm:$0xff]  }
  0x7f   : >> { %911 = vmatpush2.bf16.msra.mxu0 %v3020_v6  ;;  %v3102_v6 = vld [vmem:[%s4320_s1 + $0x400] ss:$8 sps:$4 sm:$0xff]  }
  0x80   : >> { %1158 = vmatpush2.bf16.msra.mxu1 %v3023_v7  ;;  %912 = vmatprep.subr.bf16.mxu0 %v3028_v8  ;;  %v3105_v7 = vld [vmem:[%s4320_s1 + $0x500] ss:$8 sps:$4 sm:$0xff]   ;;  %v3110_v8 = vld [vmem:[%s4320_s1 + $0x4f4] ss:$8 sps:$4 sm:$0xff]  }
  0x81   : >> { %1159 = vmatprep.subr.bf16.mxu1 %v3031_v9  ;;  %v3113_v9 = vld [vmem:[%s4320_s1 + $0x5f4] ss:$8 sps:$4 sm:$0xff]  }
  0x83   : >> { %913 = vmatpush2.bf16.msra.mxu0 %v3026_v10  ;;  %v3108_v10 = vld [vmem:[%s4320_s1 + $0x4f0] ss:$8 sps:$4 sm:$0xff]  }
  0x84   : >> { %1160 = vmatpush2.bf16.msra.mxu1 %v3029_v11  ;;  %914 = vmatprep.subr.bf16.mxu0 %v3034_v12  ;;  %v3111_v11 = vld [vmem:[%s4320_s1 + $0x5f0] ss:$8 sps:$4 sm:$0xff]   ;;  %v3116_v12 = vld [vmem:[%s4320_s1 + $0x4e4] ss:$8 sps:$4 sm:$0xff]  }
  0x85   : >> { %1161 = vmatprep.subr.bf16.mxu1 %v3037_v13  ;;  %v3119_v13 = vld [vmem:[%s4320_s1 + $0x5e4] ss:$8 sps:$4 sm:$0xff]  }
  0x87   : >> { %915 = vmatpush2.bf16.msra.mxu0 %v3032_v14  ;;  %v3114_v14 = vld [vmem:[%s4320_s1 + $0x4e0] ss:$8 sps:$4 sm:$0xff]  }
  0x88   : >> { %1162 = vmatpush2.bf16.msra.mxu1 %v3035_v15  ;;  %916 = vmatprep.subr.bf16.mxu0 %v3040_v16  ;;  %v3117_v15 = vld [vmem:[%s4320_s1 + $0x5e0] ss:$8 sps:$4 sm:$0xff]   ;;  %v3122_v16 = vld [vmem:[%s4320_s1 + $0x4d4] ss:$8 sps:$4 sm:$0xff]  }
  0x89   : >> { %1163 = vmatprep.subr.bf16.mxu1 %v3043_v17  ;;  %v3125_v17 = vld [vmem:[%s4320_s1 + $0x5d4] ss:$8 sps:$4 sm:$0xff]  }
  0x8b   : >> { %917 = vmatpush2.bf16.msra.mxu0 %v3038_v18  ;;  %v3120_v18 = vld [vmem:[%s4320_s1 + $0x4d0] ss:$8 sps:$4 sm:$0xff]  }
  0x8c   : >> { %1164 = vmatpush2.bf16.msra.mxu1 %v3041_v19  ;;  %918 = vmatprep.subr.bf16.mxu0 %v3046_v20  ;;  %v3123_v19 = vld [vmem:[%s4320_s1 + $0x5d0] ss:$8 sps:$4 sm:$0xff]   ;;  %v3128_v20 = vld [vmem:[%s4320_s1 + $0x4c4] ss:$8 sps:$4 sm:$0xff]  }
  0x8d   : >> { %1165 = vmatprep.subr.bf16.mxu1 %v3049_v21  ;;  %v3131_v21 = vld [vmem:[%s4320_s1 + $0x5c4] ss:$8 sps:$4 sm:$0xff]  }
  0x8f   : >> { %919 = vmatpush2.bf16.msra.mxu0 %v3044_v22  ;;  %v3126_v22 = vld [vmem:[%s4320_s1 + $0x4c0] ss:$8 sps:$4 sm:$0xff]  }
  0x90   : >> { %1166 = vmatpush2.bf16.msra.mxu1 %v3047_v23  ;;  %920 = vmatprep.subr.bf16.mxu0 %v3052_v24  ;;  %v3129_v23 = vld [vmem:[%s4320_s1 + $0x5c0] ss:$8 sps:$4 sm:$0xff]   ;;  %v3134_v24 = vld [vmem:[%s4320_s1 + $0x4b4] ss:$8 sps:$4 sm:$0xff]  }
  0x91   : >> { %1167 = vmatprep.subr.bf16.mxu1 %v3055_v25  ;;  %v3137_v25 = vld [vmem:[%s4320_s1 + $0x5b4] ss:$8 sps:$4 sm:$0xff]  }
  0x93   : >> { %921 = vmatpush2.bf16.msra.mxu0 %v3050_v28  ;;  %v3140_v28 = vld [vmem:[%s4320_s1 + $0x4a4] ss:$8 sps:$4 sm:$0xff]  }
  0x94   : >> { %1168 = vmatpush2.bf16.msra.mxu1 %v3053_v29  ;;  %1388 = vmatprep.subr.bf16.mxu0 %v3060_v30  ;;  %v3143_v29 = vld [vmem:[%s4320_s1 + $0x5a4] ss:$8 sps:$4 sm:$0xff]   ;;  %v3138_v30 = vld [vmem:[%s4320_s1 + $0x4a0] ss:$8 sps:$4 sm:$0xff]  }
  0x95   : >> { %1633 = vmatprep.subr.bf16.mxu1 %v3065_v31  ;;  %v3969_v31 = vld [vmem:[%s3521_s19 + $0x10] sm:$0x33] }
  0x96   : >> { %923 = vmatmul.mubr.bf16.vlgmr.msra.gmra.mxu0 %v726_v34  ;;  %v3149_v34 = vld [vmem:[%s4320_s1 + $0x594] ss:$8 sps:$4 sm:$0xff]  }
  0x97   : >> { %1170 = vmatmul.mubr.bf16.vlgmr.msra.gmra.mxu1 %v3801_v35  ;;  %1389 = vmatpush1.bf16.msra.mxu0 %v3058_v36  ;;  %v2737_v36 = vcombine.high %v3969_v31, %v3969_v31 }
  0x98   : >> { %1634 = vmatpush1.bf16.msra.mxu1 %v3063_v37  ;;  %1390 = vmatprep.subr.bf16.mxu0 %v3068_v38  ;;  %v3144_v37 = vld [vmem:[%s4320_s1 + $0x490] ss:$8 sps:$4 sm:$0xff]   ;;  %v1215_v38 = vshll.u32 %v3801_v35, 16  ;;  %v3163_v35 = vld [vmem:[%s4320_s1 + $0x774] ss:$8 sps:$4 sm:$0xff]  }
  0x99   : >> { %1635 = vmatprep.subr.bf16.mxu1 %v3071_v39  ;;  %1420 = vmatprep.mubr.bf16.mxu0 %v1225_v40  ;;  %v3147_v39 = vld [vmem:[%s4320_s1 + $0x590] ss:$8 sps:$4 sm:$0xff]   ;;  %v3152_v40 = vld [vmem:[%s4320_s1 + $0x484] ss:$8 sps:$4 sm:$0xff]  }
  0x9a   : >> { %1665 = vmatprep.mubr.bf16.mxu1 %v1470_v47  ;;  %v2700_v47 = vcombine.low %v3820_v42, %v3820_v42  ;;  %v3156_v42 = vld [vmem:[%s4320_s1 + $0x670] ss:$8 sps:$4 sm:$0xff]  }
  0x9b   : >> { %1391 = vmatpush1.bf16.msra.mxu0 %v3066_v41  ;;  %v3155_v41 = vld [vmem:[%s4320_s1 + $0x584] ss:$8 sps:$4 sm:$0xff]  }
  0x9c   : >> { %1636 = vmatpush1.bf16.msra.mxu1 %v3069_v43  ;;  %1392 = vmatprep.subr.bf16.mxu0 %v3074_v44  ;;  %v1965_v43 = vshll.u32 %v2737_v36, 16  ;;  %v3150_v44 = vld [vmem:[%s4320_s1 + $0x480] ss:$8 sps:$4 sm:$0xff]  }
  0x9d   : >> { %1637 = vmatprep.subr.bf16.mxu1 %v3077_v46  ;;  %v1217_v46 = vrot.slane %v1215_v38, 1  ;;  %v3224_v38 = vld [vmem:[%s4320_s1 + $0x6c0] ss:$8 sps:$4 sm:$0xff]  }
  0x9f   : >> { %1393 = vmatpush1.bf16.msra.mxu0 %v3072_v48  ;;  %v3153_v48 = vld [vmem:[%s4320_s1 + $0x580] ss:$8 sps:$4 sm:$0xff]  }
  0xa0   : >> { %1638 = vmatpush1.bf16.msra.mxu1 %v3075_v49  ;;  %1394 = vmatprep.subr.bf16.mxu0 %v3080_v50  ;;  %v3158_v49 = vld [vmem:[%s4320_s1 + $0x674] ss:$8 sps:$4 sm:$0xff]   ;;  %v1963_v50 = vshrl.u32 %v2737_v36, 16 }
  0xa1   : >> { %1639 = vmatprep.subr.bf16.mxu1 %v3083_v51  ;;  %v1967_v51 = vrot.slane %v1965_v43, 1  ;;  %v3230_v43 = vld [vmem:[%s4320_s1 + $0x6b0] ss:$8 sps:$4 sm:$0xff]  }
  0xa3   : >> { %1395 = vmatpush1.bf16.msra.mxu0 %v3078_v52  ;;  %v1218_v52 = vor.u32 %v1217_v46, %v1213_v45  ;;  %v3238_v45 = vld [vmem:[%s4320_s1 + $0x6a4] ss:$8 sps:$4 sm:$0xff]  }
  0xa4   : >> { %1640 = vmatpush1.bf16.msra.mxu1 %v3081_v53  ;;  %1396 = vmatprep.subr.bf16.mxu0 %v3086_v54  ;;  %v1469_v53 = vrot.slane %v2700_v47, 1  ;;  %v3161_v54 = vld [vmem:[%s4320_s1 + $0x770] ss:$8 sps:$4 sm:$0xff]   ;;  %v3241_v46 = vld [vmem:[%s4320_s1 + $0x7a4] ss:$8 sps:$4 sm:$0xff]   ;;  %v2736_v47 = vcombine.low %v3969_v31, %v3969_v31 }
  0xa5   : >> { %1641 = vmatprep.subr.bf16.mxu1 %v3089_v55  ;;  %v3166_v55 = vld [vmem:[%s4320_s1 + $0x664] ss:$8 sps:$4 sm:$0xff]   ;;  %v3247_v31 = vld [vmem:[%s4320_s1 + $0x794] ss:$8 sps:$4 sm:$0xff]  }
  0xa7   : >> { %1397 = vmatpush1.bf16.msra.mxu0 %v3084_v56  ;;  %v3169_v56 = vld [vmem:[%s4320_s1 + $0x764] ss:$8 sps:$4 sm:$0xff]  }
  0xa8   : >> { %1642 = vmatpush1.bf16.msra.mxu1 %v3087_v57  ;;  %1398 = vmatprep.subr.bf16.mxu0 %v3092_v58  ;;  %v1968_v57 = vor.u32 %v1967_v51, %v1963_v50  ;;  %v3164_v58 = vld [vmem:[%s4320_s1 + $0x660] ss:$8 sps:$4 sm:$0xff]   ;;  %v1958_v50 = vshll.u32 %v2736_v47, 16  ;;  %v3242_v51 = vld [vmem:[%s4320_s1 + $0x690] ss:$8 sps:$4 sm:$0xff]  }
  0xa9   : >> { %1643 = vmatprep.subr.bf16.mxu1 %v3095_v59  ;;  %v3167_v59 = vld [vmem:[%s4320_s1 + $0x760] ss:$8 sps:$4 sm:$0xff]  }
  0xab   : >> { %1399 = vmatpush1.bf16.msra.mxu0 %v3090_v60  ;;  %v3172_v60 = vld [vmem:[%s4320_s1 + $0x654] ss:$8 sps:$4 sm:$0xff]  }
  0xac   : >> { %1644 = vmatpush1.bf16.msra.mxu1 %v3093_v61  ;;  %1400 = vmatprep.subr.bf16.mxu0 %v3098_v62  ;;  %v3175_v61 = vld [vmem:[%s4320_s1 + $0x754] ss:$8 sps:$4 sm:$0xff]   ;;  %v3170_v62 = vld [vmem:[%s4320_s1 + $0x650] ss:$8 sps:$4 sm:$0xff]  }
  0xad   : >> { %1645 = vmatprep.subr.bf16.mxu1 %v3101_v63  ;;  %v3173_v63 = vld [vmem:[%s4320_s1 + $0x750] ss:$8 sps:$4 sm:$0xff]  }
  0xaf   : >> { %1401 = vmatpush1.bf16.msra.mxu0 %v3096_v2  ;;  %v3178_v2 = vld [vmem:[%s4320_s1 + $0x644] ss:$8 sps:$4 sm:$0xff]  }
  0xb0   : >> { %1646 = vmatpush1.bf16.msra.mxu1 %v3099_v3  ;;  %1402 = vmatprep.subr.bf16.mxu0 %v3104_v4  ;;  %v3181_v3 = vld [vmem:[%s4320_s1 + $0x744] ss:$8 sps:$4 sm:$0xff]   ;;  %v3176_v4 = vld [vmem:[%s4320_s1 + $0x640] ss:$8 sps:$4 sm:$0xff]  }
  0xb1   : >> { %1647 = vmatprep.subr.bf16.mxu1 %v3107_v5  ;;  %v3179_v5 = vld [vmem:[%s4320_s1 + $0x740] ss:$8 sps:$4 sm:$0xff]  }
  0xb3   : >> { %1403 = vmatpush1.bf16.msra.mxu0 %v3102_v6  ;;  %v3184_v6 = vld [vmem:[%s4320_s1 + $0x634] ss:$8 sps:$4 sm:$0xff]  }
  0xb4   : >> { %1648 = vmatpush1.bf16.msra.mxu1 %v3105_v7  ;;  %1404 = vmatprep.subr.bf16.mxu0 %v3110_v8  ;;  %v3187_v7 = vld [vmem:[%s4320_s1 + $0x734] ss:$8 sps:$4 sm:$0xff]   ;;  %v3182_v8 = vld [vmem:[%s4320_s1 + $0x630] ss:$8 sps:$4 sm:$0xff]  }
  0xb5   : >> { %1649 = vmatprep.subr.bf16.mxu1 %v3113_v9  ;;  %v3185_v9 = vld [vmem:[%s4320_s1 + $0x730] ss:$8 sps:$4 sm:$0xff]  }
  0xb7   : >> { %1405 = vmatpush2.bf16.msra.mxu0 %v3108_v10  ;;  %v3190_v10 = vld [vmem:[%s4320_s1 + $0x624] ss:$8 sps:$4 sm:$0xff]  }
  0xb8   : >> { %1650 = vmatpush2.bf16.msra.mxu1 %v3111_v11  ;;  %1406 = vmatprep.subr.bf16.mxu0 %v3116_v12  ;;  %v3193_v11 = vld [vmem:[%s4320_s1 + $0x724] ss:$8 sps:$4 sm:$0xff]   ;;  %v3188_v12 = vld [vmem:[%s4320_s1 + $0x620] ss:$8 sps:$4 sm:$0xff]  }
  0xb9   : >> { %1651 = vmatprep.subr.bf16.mxu1 %v3119_v13  ;;  %v3191_v13 = vld [vmem:[%s4320_s1 + $0x720] ss:$8 sps:$4 sm:$0xff]  }
  0xbb   : >> { %1407 = vmatpush2.bf16.msra.mxu0 %v3114_v14  ;;  %v3196_v14 = vld [vmem:[%s4320_s1 + $0x614] ss:$8 sps:$4 sm:$0xff]  }
  0xbc   : >> { %1652 = vmatpush2.bf16.msra.mxu1 %v3117_v15  ;;  %1408 = vmatprep.subr.bf16.mxu0 %v3122_v16  ;;  %v3199_v15 = vld [vmem:[%s4320_s1 + $0x714] ss:$8 sps:$4 sm:$0xff]   ;;  %v3194_v16 = vld [vmem:[%s4320_s1 + $0x610] ss:$8 sps:$4 sm:$0xff]  }
  0xbd   : >> { %1653 = vmatprep.subr.bf16.mxu1 %v3125_v17  ;;  %v3197_v17 = vld [vmem:[%s4320_s1 + $0x710] ss:$8 sps:$4 sm:$0xff]  }
  0xbf   : >> { %1409 = vmatpush2.bf16.msra.mxu0 %v3120_v18  ;;  %v3202_v18 = vld [vmem:[%s4320_s1 + $0x604] ss:$8 sps:$4 sm:$0xff]  }
  0xc0   : >> { %1654 = vmatpush2.bf16.msra.mxu1 %v3123_v19  ;;  %1410 = vmatprep.subr.bf16.mxu0 %v3128_v20  ;;  %v3205_v19 = vld [vmem:[%s4320_s1 + $0x704] ss:$8 sps:$4 sm:$0xff]   ;;  %v3200_v20 = vld [vmem:[%s4320_s1 + $0x600] ss:$8 sps:$4 sm:$0xff]  }
  0xc1   : >> { %1655 = vmatprep.subr.bf16.mxu1 %v3131_v21  ;;  %v3203_v21 = vld [vmem:[%s4320_s1 + $0x700] ss:$8 sps:$4 sm:$0xff]  }
  0xc3   : >> { %1411 = vmatpush2.bf16.msra.mxu0 %v3126_v22  ;;  %v3208_v22 = vld [vmem:[%s4320_s1 + $0x6f4] ss:$8 sps:$4 sm:$0xff]  }
  0xc4   : >> { %1656 = vmatpush2.bf16.msra.mxu1 %v3129_v23  ;;  %1412 = vmatprep.subr.bf16.mxu0 %v3134_v24  ;;  %v3211_v23 = vld [vmem:[%s4320_s1 + $0x7f4] ss:$8 sps:$4 sm:$0xff]   ;;  %v3206_v24 = vld [vmem:[%s4320_s1 + $0x6f0] ss:$8 sps:$4 sm:$0xff]  }
  0xc5   : >> { %1657 = vmatprep.subr.bf16.mxu1 %v3137_v25  ;;  %v3209_v25 = vld [vmem:[%s4320_s1 + $0x7f0] ss:$8 sps:$4 sm:$0xff]  }
  0xc7   : >> { %1413 = vmatpush2.bf16.msra.mxu0 %v3132_v26  ;;  %v3214_v26 = vld [vmem:[%s4320_s1 + $0x6e4] ss:$8 sps:$4 sm:$0xff]  }
  0xc8   : >> { %1658 = vmatpush2.bf16.msra.mxu1 %v3135_v27  ;;  %1414 = vmatprep.subr.bf16.mxu0 %v3140_v28  ;;  %v3217_v27 = vld [vmem:[%s4320_s1 + $0x7e4] ss:$8 sps:$4 sm:$0xff]   ;;  %v3212_v28 = vld [vmem:[%s4320_s1 + $0x6e0] ss:$8 sps:$4 sm:$0xff]  }
  0xc9   : >> { %1659 = vmatprep.subr.bf16.mxu1 %v3143_v29  ;;  %v3215_v29 = vld [vmem:[%s4320_s1 + $0x7e0] ss:$8 sps:$4 sm:$0xff]  }
  0xcb   : >> { %1415 = vmatpush2.bf16.msra.mxu0 %v3138_v30  ;;  %v3220_v30 = vld [vmem:[%s4320_s1 + $0x6d4] ss:$8 sps:$4 sm:$0xff]  }
  0xcc   : >> { %1660 = vmatpush2.bf16.msra.mxu1 %v3141_v32  ;;  %1416 = vmatprep.subr.bf16.mxu0 %v3146_v33  ;;  %v3223_v32 = vld [vmem:[%s4320_s1 + $0x7d4] ss:$8 sps:$4 sm:$0xff]   ;;  %v3218_v33 = vld [vmem:[%s4320_s1 + $0x6d0] ss:$8 sps:$4 sm:$0xff]  }
  0xcd   : >> { %1661 = vmatprep.subr.bf16.mxu1 %v3149_v34  ;;  %v3221_v34 = vld [vmem:[%s4320_s1 + $0x7d0] ss:$8 sps:$4 sm:$0xff]  }
  0xcf   : >> { %1417 = vmatpush2.bf16.msra.mxu0 %v3144_v37  ;;  %v3229_v37 = vld [vmem:[%s4320_s1 + $0x7c4] ss:$8 sps:$4 sm:$0xff]  }
  0xd0   : >> { %1662 = vmatpush2.bf16.msra.mxu1 %v3147_v39  ;;  %1418 = vmatprep.subr.bf16.mxu0 %v3152_v40  ;;  %v3227_v39 = vld [vmem:[%s4320_s1 + $0x7c0] ss:$8 sps:$4 sm:$0xff]   ;;  %v3232_v40 = vld [vmem:[%s4320_s1 + $0x6b4] ss:$8 sps:$4 sm:$0xff]  }
  0xd1   : >> { %1663 = vmatprep.subr.bf16.mxu1 %v3155_v41  ;;  %v3235_v41 = vld [vmem:[%s4320_s1 + $0x7b4] ss:$8 sps:$4 sm:$0xff]  }
  0xd3   : >> { %1419 = vmatpush2.bf16.msra.mxu0 %v3150_v44  ;;  %v3233_v44 = vld [vmem:[%s4320_s1 + $0x7b0] ss:$8 sps:$4 sm:$0xff]  }
  0xd4   : >> { %1664 = vmatpush2.bf16.msra.mxu1 %v3153_v48  ;;  %1880 = vmatprep.subr.bf16.mxu0 %v3158_v49  ;;  %v3236_v48 = vld [vmem:[%s4320_s1 + $0x6a0] ss:$8 sps:$4 sm:$0xff]  }
  0xd5   : >> { %2131 = vmatprep.subr.bf16.mxu1 %v3163_v35  ;;  %v3239_v49 = vld [vmem:[%s4320_s1 + $0x7a0] ss:$8 sps:$4 sm:$0xff]   ;;  %v3244_v35 = vld [vmem:[%s4320_s1 + $0x694] ss:$8 sps:$4 sm:$0xff]  }
  0xd6   : >> { %1421 = vmatmul.mubr.bf16.vlgmr.msra.gmra.mxu0 %v1218_v52  ;;  %v3245_v52 = vld [vmem:[%s4320_s1 + $0x790] ss:$8 sps:$4 sm:$0xff]  }
  0xd7   : >> { %1666 = vmatmul.mubr.bf16.vlgmr.msra.gmra.mxu1 %v1469_v53  ;;  %1881 = vmatpush1.bf16.msra.mxu0 %v3156_v42  ;;  %v3250_v42 = vld [vmem:[%s4320_s1 + $0x684] ss:$8 sps:$4 sm:$0xff]  }
  0xd8   : >> { %2132 = vmatpush1.bf16.msra.mxu1 %v3161_v54  ;;  %1882 = vmatprep.subr.bf16.mxu0 %v3166_v55  ;;  %v3253_v53 = vld [vmem:[%s4320_s1 + $0x784] ss:$8 sps:$4 sm:$0xff]   ;;  %v4193_v54 = vld [vmem:[%s3521_s19 + $0x10] sm:$0x66]  ;;  %v1956_v55 = vshrl.u32 %v2736_v47, 16 }
  0xd9   : >> { %2133 = vmatprep.subr.bf16.mxu1 %v3169_v56  ;;  %1912 = vmatprep.mubr.bf16.mxu0 %v2737_v36  ;;  %v3226_v36 = vld [vmem:[%s4320_s1 + $0x6c4] ss:$8 sps:$4 sm:$0xff]   ;;  %v1960_v56 = vrot.slane %v1958_v50, 1 }
  0xda   : >> { %2163 = vmatprep.mubr.bf16.mxu1 %v1968_v57  ;;  %v3248_v57 = vld [vmem:[%s4320_s1 + $0x680] ss:$8 sps:$4 sm:$0xff]  }
  0xdb   : >> { %1883 = vmatpush1.bf16.msra.mxu0 %v3164_v58  ;;  %v3251_v58 = vld [vmem:[%s4320_s1 + $0x780] ss:$8 sps:$4 sm:$0xff]  }
  0xdc   : >> { %2134 = vmatpush1.bf16.msra.mxu1 %v3167_v59  ;;  %1884 = vmatprep.subr.bf16.mxu0 %v3172_v60  ;;  %v2804_v59 = vcombine.high %v4193_v54, %v4193_v54  ;;  %v3258_v60 = vld [vmem:[%s4320_s1 + $0x874] ss:$8 sps:$4 sm:$0xff]  }
  0xdd   : >> { %2135 = vmatprep.subr.bf16.mxu1 %v3175_v61  ;;  %v1961_v61 = vor.u32 %v1960_v56, %v1956_v55 }
  0xdf   : >> { %1885 = vmatpush1.bf16.msra.mxu0 %v3170_v62  ;;  %v3256_v62 = vld [vmem:[%s4320_s1 + $0x870] ss:$8 sps:$4 sm:$0xff]  }
  0xe0   : >> { %2136 = vmatpush1.bf16.msra.mxu1 %v3173_v63  ;;  %1886 = vmatprep.subr.bf16.mxu0 %v3178_v2  ;;  %v2213_v63 = vrot.slane %v2804_v59, 1  ;;  %v3261_v2 = vld [vmem:[%s4320_s1 + $0x864] ss:$8 sps:$4 sm:$0xff]  }
  0xe1   : >> { %2137 = vmatprep.subr.bf16.mxu1 %v3181_v3 }
  0xe3   : >> { %1887 = vmatpush1.bf16.msra.mxu0 %v3176_v4 }
  0xe4   : >> { %2138 = vmatpush1.bf16.msra.mxu1 %v3179_v5  ;;  %1888 = vmatprep.subr.bf16.mxu0 %v3184_v6  ;;  %v3259_v6 = vld [vmem:[%s4320_s1 + $0x860] ss:$8 sps:$4 sm:$0xff]  }
  0xe5   : >> { %2139 = vmatprep.subr.bf16.mxu1 %v3187_v7 }
  0xe7   : >> { %1889 = vmatpush1.bf16.msra.mxu0 %v3182_v8 }
  0xe8   : >> { %2140 = vmatpush1.bf16.msra.mxu1 %v3185_v9  ;;  %1890 = vmatprep.subr.bf16.mxu0 %v3190_v10  ;;  %v3264_v9 = vld [vmem:[%s4320_s1 + $0x854] ss:$8 sps:$4 sm:$0xff]  }
  0xe9   : >> { %2141 = vmatprep.subr.bf16.mxu1 %v3193_v11 }
  0xeb   : >> { %1891 = vmatpush1.bf16.msra.mxu0 %v3188_v12 }
  0xec   : >> { %2142 = vmatpush1.bf16.msra.mxu1 %v3191_v13  ;;  %1892 = vmatprep.subr.bf16.mxu0 %v3196_v14  ;;  %v3262_v13 = vld [vmem:[%s4320_s1 + $0x850] ss:$8 sps:$4 sm:$0xff]  }
  0xed   : >> { %2143 = vmatprep.subr.bf16.mxu1 %v3199_v15  ;;  %v3267_v15 = vld [vmem:[%s4320_s1 + $0x844] ss:$8 sps:$4 sm:$0xff]  }
  0xef   : >> { %1893 = vmatpush1.bf16.msra.mxu0 %v3194_v16 }
  0xf0   : >> { %2144 = vmatpush1.bf16.msra.mxu1 %v3197_v17  ;;  %1894 = vmatprep.subr.bf16.mxu0 %v3202_v18  ;;  %v3265_v17 = vld [vmem:[%s4320_s1 + $0x840] ss:$8 sps:$4 sm:$0xff]   ;;  %v3270_v18 = vld [vmem:[%s4320_s1 + $0x834] ss:$8 sps:$4 sm:$0xff]  }
  0xf1   : >> { %2145 = vmatprep.subr.bf16.mxu1 %v3205_v19  ;;  %v3268_v19 = vld [vmem:[%s4320_s1 + $0x830] ss:$8 sps:$4 sm:$0xff]  }
  0xf3   : >> { %1895 = vmatpush1.bf16.msra.mxu0 %v3200_v20  ;;  %v3273_v20 = vld [vmem:[%s4320_s1 + $0x824] ss:$8 sps:$4 sm:$0xff]  }
  0xf4   : >> { %2146 = vmatpush1.bf16.msra.mxu1 %v3203_v21  ;;  %1896 = vmatprep.subr.bf16.mxu0 %v3208_v22  ;;  %v3271_v21 = vld [vmem:[%s4320_s1 + $0x820] ss:$8 sps:$4 sm:$0xff]   ;;  %v3276_v22 = vld [vmem:[%s4320_s1 + $0x814] ss:$8 sps:$4 sm:$0xff]  }
  0xf5   : >> { %2147 = vmatprep.subr.bf16.mxu1 %v3211_v23  ;;  %v3274_v23 = vld [vmem:[%s4320_s1 + $0x810] ss:$8 sps:$4 sm:$0xff]  }
  0xf7   : >> { %1897 = vmatpush2.bf16.msra.mxu0 %v3206_v24  ;;  %v3279_v24 = vld [vmem:[%s4320_s1 + $0x804] ss:$8 sps:$4 sm:$0xff]  }
  0xf8   : >> { %2148 = vmatpush2.bf16.msra.mxu1 %v3209_v25  ;;  %1898 = vmatprep.subr.bf16.mxu0 %v3214_v26  ;;  %v3277_v25 = vld [vmem:[%s4320_s1 + $0x800] ss:$8 sps:$4 sm:$0xff]   ;;  %v3282_v26 = vld [vmem:[%s4320_s1 + $0x8f4] ss:$8 sps:$4 sm:$0xff]  }
  0xf9   : >> { %2149 = vmatprep.subr.bf16.mxu1 %v3217_v27  ;;  %v3280_v27 = vld [vmem:[%s4320_s1 + $0x8f0] ss:$8 sps:$4 sm:$0xff]  }
  0xfb   : >> { %1899 = vmatpush2.bf16.msra.mxu0 %v3212_v28  ;;  %v3285_v28 = vld [vmem:[%s4320_s1 + $0x8e4] ss:$8 sps:$4 sm:$0xff]  }
  0xfc   : >> { %2150 = vmatpush2.bf16.msra.mxu1 %v3215_v29  ;;  %1900 = vmatprep.subr.bf16.mxu0 %v3220_v30  ;;  %v3283_v29 = vld [vmem:[%s4320_s1 + $0x8e0] ss:$8 sps:$4 sm:$0xff]   ;;  %v3288_v30 = vld [vmem:[%s4320_s1 + $0x8d4] ss:$8 sps:$4 sm:$0xff]  }
  0xfd   : >> { %2151 = vmatprep.subr.bf16.mxu1 %v3223_v32  ;;  %v3286_v32 = vld [vmem:[%s4320_s1 + $0x8d0] ss:$8 sps:$4 sm:$0xff]  }
  0xff   : >> { %1901 = vmatpush2.bf16.msra.mxu0 %v3218_v33  ;;  %v3291_v33 = vld [vmem:[%s4320_s1 + $0x8c4] ss:$8 sps:$4 sm:$0xff]  }
 0x100   : >> { %2152 = vmatpush2.bf16.msra.mxu1 %v3221_v34  ;;  %1902 = vmatprep.subr.bf16.mxu0 %v3226_v36  ;;  %v3289_v34 = vld [vmem:[%s4320_s1 + $0x8c0] ss:$8 sps:$4 sm:$0xff]   ;;  %v3294_v36 = vld [vmem:[%s4320_s1 + $0x8b4] ss:$8 sps:$4 sm:$0xff]  }
 0x101   : >> { %2153 = vmatprep.subr.bf16.mxu1 %v3229_v37  ;;  %v3292_v37 = vld [vmem:[%s4320_s1 + $0x8b0] ss:$8 sps:$4 sm:$0xff]  }
 0x103   : >> { %1903 = vmatpush2.bf16.msra.mxu0 %v3224_v38  ;;  %v3297_v38 = vld [vmem:[%s4320_s1 + $0x8a4] ss:$8 sps:$4 sm:$0xff]  }
 0x104   : >> { %2154 = vmatpush2.bf16.msra.mxu1 %v3227_v39  ;;  %1904 = vmatprep.subr.bf16.mxu0 %v3232_v40  ;;  %v3295_v39 = vld [vmem:[%s4320_s1 + $0x8a0] ss:$8 sps:$4 sm:$0xff]   ;;  %v3300_v40 = vld [vmem:[%s4320_s1 + $0x894] ss:$8 sps:$4 sm:$0xff]  }
 0x105   : >> { %2155 = vmatprep.subr.bf16.mxu1 %v3235_v41  ;;  %v3298_v41 = vld [vmem:[%s4320_s1 + $0x890] ss:$8 sps:$4 sm:$0xff]  }
 0x107   : >> { %1905 = vmatpush2.bf16.msra.mxu0 %v3230_v43  ;;  %v3303_v43 = vld [vmem:[%s4320_s1 + $0x884] ss:$8 sps:$4 sm:$0xff]  }
 0x108   : >> { %2156 = vmatpush2.bf16.msra.mxu1 %v3233_v44  ;;  %1906 = vmatprep.subr.bf16.mxu0 %v3238_v45  ;;  %v2803_v44 = vcombine.low %v4193_v54, %v4193_v54  ;;  %v3301_v45 = vld [vmem:[%s4320_s1 + $0x880] ss:$8 sps:$4 sm:$0xff]  }
 0x109   : >> { %2157 = vmatprep.subr.bf16.mxu1 %v3241_v46 }
 0x10a   : >> { %v2212_v46 = vrot.slane %v2803_v44, 1 }
 0x10b   : >> { %1907 = vmatpush2.bf16.msra.mxu0 %v3236_v48 }
 0x10c   : >> { %2158 = vmatpush2.bf16.msra.mxu1 %v3239_v49  ;;  %1908 = vmatprep.subr.bf16.mxu0 %v3244_v35 }
 0x10d   : >> { %2159 = vmatprep.subr.bf16.mxu1 %v3247_v31 }
 0x10f   : >> { %1909 = vmatpush2.bf16.msra.mxu0 %v3242_v51 }
 0x110   : >> { %2160 = vmatpush2.bf16.msra.mxu1 %v3245_v52  ;;  %1910 = vmatprep.subr.bf16.mxu0 %v3250_v42 }
 0x111   : >> { %2161 = vmatprep.subr.bf16.mxu1 %v3253_v53 }
 0x113   : >> { %1911 = vmatpush2.bf16.msra.mxu0 %v3248_v57 }
 0x114   : >> { %2162 = vmatpush2.bf16.msra.mxu1 %v3251_v58  ;;  %2376 = vmatprep.subr.bf16.mxu0 %v3258_v60 }
 0x116   : >> { %v478_v3 = vpop.f32.mrf.mxu0  ;;  %1913 = vmatmul.mubr.bf16.vlgmr.msra.gmra.mxu0 %v2736_v47 }
 0x117   : >> { %v681_v4 = vpop.f32.mrf.mxu1  ;;  %2164 = vmatmul.mubr.bf16.vlgmr.msra.gmra.mxu1 %v1961_v61  ;;  %2377 = vmatpush1.bf16.msra.mxu0 %v3256_v62 }
 0x118   : >> { %v4212_v5 = vadd.f32 %v681_v4, %v478_v3  ;;  %2408 = vmatprep.mubr.bf16.mxu0 %v2213_v63  ;;  %v480_v7 = vpop.f32.mrf.mxu0  ;;  %2378 = vmatprep.subr.bf16.mxu0 %v3261_v2 }
 0x119   : >> { %v683_v8 = vpop.f32.mrf.mxu1 }
 0x11a   : >> { %v4220_v10 = vadd.f32 %v683_v8, %v480_v7  ;;  %v482_v11 = vpop.f32.mrf.mxu0 }
 0x11b   : >> { %v685_v12 = vpop.f32.mrf.mxu1  ;;  %2379 = vmatpush1.bf16.msra.mxu0 %v3259_v6 }
 0x11c   : >> { %v483_v14 = vpop.f32.mrf.mxu0  ;;  %2380 = vmatprep.subr.bf16.mxu0 %v3264_v9 }
 0x11d   : >> { %v686_v16 = vpop.f32.mrf.mxu1 }
 0x11e   : >> { %v2420_v16 = vlaneseq }
 0x11f   : >> { %2381 = vmatpush1.bf16.msra.mxu0 %v3262_v13 }
 0x120   : >> { %2382 = vmatprep.subr.bf16.mxu0 %v3267_v15 }
 0x123   : >> { %2383 = vmatpush1.bf16.msra.mxu0 %v3265_v17  ;;  %v2421_v17 = vshrl.u32 %v2420_v16, 7 }
 0x124   : >> { %2384 = vmatprep.subr.bf16.mxu0 %v3270_v18 }
 0x125   : >> { %v2422_v18 = vsub.s32 0, %v2421_v17 }
 0x127   : >> { %2385 = vmatpush1.bf16.msra.mxu0 %v3268_v19 }
 0x128   : >> { %2386 = vmatprep.subr.bf16.mxu0 %v3273_v20  ;;  %v2426_v20 = vsub.s32 1, %v2421_v17 }
 0x12b   : >> { %2387 = vmatpush1.bf16.msra.mxu0 %v3271_v21  ;;  %v2423_v21 = vrot.slane %v3354_v0, %v2422_v18 }
 0x12c   : >> { %2388 = vmatprep.subr.bf16.mxu0 %v3276_v22  ;;  %v3322_v22 = vmov 1983009808  }
 0x12f   : >> { %2389 = vmatpush1.bf16.msra.mxu0 %v3274_v23  ;;  %v2440_v23 = vunpack.c.l.s4 %v3322_v22 }
 0x130   : >> { %2390 = vmatprep.subr.bf16.mxu0 %v3279_v24 }
 0x133   : >> { %2391 = vmatpush1.bf16.msra.mxu0 %v3277_v25 }
 0x134   : >> { %2392 = vmatprep.subr.bf16.mxu0 %v3282_v26 }
 0x137   : >> { %2393 = vmatpush2.bf16.msra.mxu0 %v3280_v27  ;;  %v2427_v27 = vrot.slane %v3354_v0, %v2426_v20 }
 0x138   : >> { %2394 = vmatprep.subr.bf16.mxu0 %v3285_v28 }
 0x13b   : >> { %2395 = vmatpush2.bf16.msra.mxu0 %v3283_v29 }
 0x13c   : >> { %2396 = vmatprep.subr.bf16.mxu0 %v3288_v30 }
 0x13f   : >> { %2397 = vmatpush2.bf16.msra.mxu0 %v3286_v32  ;;  %v2441_v32 = vunpack.c.0.s8 %v2440_v23 }
 0x140   : >> { %2398 = vmatprep.subr.bf16.mxu0 %v3291_v33 }
 0x143   : >> { %2399 = vmatpush2.bf16.msra.mxu0 %v3289_v34 }
 0x144   : >> { %2400 = vmatprep.subr.bf16.mxu0 %v3294_v36 }
 0x147   : >> { %2401 = vmatpush2.bf16.msra.mxu0 %v3292_v37 }
 0x148   : >> { %2402 = vmatprep.subr.bf16.mxu0 %v3297_v38 }
 0x14b   : >> { %2403 = vmatpush2.bf16.msra.mxu0 %v3295_v39  ;;  %v2444_v39 = vsub.s32 %v2441_v32, %v2421_v17 }
 0x14c   : >> { %2404 = vmatprep.subr.bf16.mxu0 %v3300_v40 }
 0x14f   : >> { %2405 = vmatpush2.bf16.msra.mxu0 %v3298_v41  ;;  %v2449_v41 = vld [vmem:[%s2448_s25] sm:$0xf] }
 0x150   : >> { %2406 = vmatprep.subr.bf16.mxu0 %v3303_v43 }
 0x153   : >> { %2407 = vmatpush2.bf16.msra.mxu0 %v3301_v45 }
 0x156   : >> { %v924_v47 = vpop.f32.mrf.mxu0  ;;  %2409 = vmatmul.mubr.bf16.vlgmr.msra.gmra.mxu0 %v2212_v46 }
 0x157   : >> { %v1171_v48 = vpop.f32.mrf.mxu1  ;;  %v931_v49 = vadd.f32 %v924_v47, %v4212_v5 }
 0x158   : >> { %v926_v35 = vpop.f32.mrf.mxu0 }
 0x159   : >> { %v1173_v31 = vpop.f32.mrf.mxu1  ;;  %v932_v50 = vadd.f32 %v926_v35, %v4220_v10  ;;  %v1178_v51 = vadd.f32 %v1171_v48, %v931_v49 }
 0x15a   : >> { %v928_v52 = vpop.f32.mrf.mxu0 }
 0x15b   : >> { %v1175_v42 = vpop.f32.mrf.mxu1  ;;  %v1179_v53 = vadd.f32 %v1173_v31, %v932_v50 }
 0x15c   : >> { %v929_v54 = vpop.f32.mrf.mxu0 }
 0x15d   : >> { %v1176_v55 = vpop.f32.mrf.mxu1 }
 0x196   : >> { %v1422_v56 = vpop.f32.mrf.mxu0 }
 0x197   : >> { %v1667_v57 = vpop.f32.mrf.mxu1  ;;  %v1429_v58 = vadd.f32 %v1422_v56, %v1178_v51 }
 0x198   : >> { %v1424_v59 = vpop.f32.mrf.mxu0 }
 0x199   : >> { %v1669_v60 = vpop.f32.mrf.mxu1  ;;  %v1430_v61 = vadd.f32 %v1424_v59, %v1179_v53  ;;  %v1674_v62 = vadd.f32 %v1667_v57, %v1429_v58 }
 0x19a   : >> { %v1426_v63 = vpop.f32.mrf.mxu0 }
 0x19b   : >> { %v1671_v2 = vpop.f32.mrf.mxu1  ;;  %v1675_v3 = vadd.f32 %v1669_v60, %v1430_v61 }
 0x19c   : >> { %v1427_v4 = vpop.f32.mrf.mxu0 }
 0x19d   : >> { %v1672_v5 = vpop.f32.mrf.mxu1 }
 0x1d6   : >> { %v1914_v6 = vpop.f32.mrf.mxu0 }
 0x1d7   : >> { %v2165_v7 = vpop.f32.mrf.mxu1  ;;  %v1921_v8 = vadd.f32 %v1914_v6, %v1674_v62 }
 0x1d8   : >> { %v1916_v9 = vpop.f32.mrf.mxu0 }
 0x1d9   : >> { %v2167_v10 = vpop.f32.mrf.mxu1  ;;  %v2172_v11 = vadd.f32 %v2165_v7, %v1921_v8  ;;  %v1922_v19 = vadd.f32 %v1916_v9, %v1675_v3 }
 0x1da   : >> { %v1918_v12 = vpop.f32.mrf.mxu0 }
 0x1db   : >> { %v2169_v13 = vpop.f32.mrf.mxu1  ;;  %v2173_v25 = vadd.f32 %v2167_v10, %v1922_v19 }
 0x1dc   : >> { %v1919_v14 = vpop.f32.mrf.mxu0 }
 0x1dd   : >> { %v2170_v15 = vpop.f32.mrf.mxu1 }
 0x216   : >> { %v2410_v24 = vpop.f32.mrf.mxu0 }
 0x217   : >> { %v2417_v26 = vadd.f32 %v2410_v24, %v2172_v11 }
 0x218   : >> { %v2412_v28 = vpop.f32.mrf.mxu0 }
 0x219   : >> { %v2430_v29 = vadd.f32 %v2423_v21, %v2417_v26  ;;  %v2418_v30 = vadd.f32 %v2412_v28, %v2173_v25 }
 0x21a   : >> { %v2414_v33 = vpop.f32.mrf.mxu0 }
 0x21b   : >> { %v2431_v34 = vadd.f32 %v2427_v27, %v2418_v30  ;;  %v2432_v37 = vmax.f32 %v2430_v29, 0.0 }
 0x21c   : >> { %v2415_v36 = vpop.f32.mrf.mxu0 }
 0x21d   : >> { %v2433_v38 = vmax.f32 %v2431_v34, 0.0 }
 0x21f   : >> { %v2837_v40 = vpack.c.bf16 %v2433_v38, %v2432_v37 }
 0x220   : > { %193 = sbr.rel (!%p191_p4) target bundleno = 21 (0x15), region = 73 }
 0x221   : >> { %v2445_v43 = vrot.slane %v2837_v40, %v2444_v39 }
 0x223   : >> { %v2450_v44 = vsel %vm3361_vm6, %v2445_v43, %v2449_v41 }
 0x224   : >> { %2451 = vst [vmem:[%s2448_s25] sm:$0xf] %v2450_v44 }
 0x225 PF: > { %s13_s12 = sadd.s32 1, %s3316_s12  }
 0x226   : > { %p10_p5 = scmp.ge.s32.totalorder %s13_s12, 4  }
 0x228   :  { %12 = sbr.rel (!%p10_p5) target bundleno = 1 (0x1), region = 84 }

</bundles_post_ra>
